<compile_context>
chip_gen: v7x
topology: tpu7x:2x2x1
jax: 0.10.0
libtpu: 0.0.40
codegen_flags: <defaults>
</compile_context>

<pallas_src>
import numpy as np
import jax
import jax.numpy as jnp
from jax import lax
from jax.experimental import pallas as pl
from jax.experimental.pallas import tpu as pltpu

# ----- small shapes consistent with the module's forward -----
BATCH = 2
RIR_LEN = 2048            # module uses 16000; scaled down, keeps lane divisibility
EARLY_LEN = 128           # module uses 800
REVERB_LEN = 4096         # module uses 80000
NUM_FILTERS = 10
FILTER_ORDER = 1023
NOISE_COND_LEN = 16
Z_SIZE = 128
DEC_IN_LEN = 134
FRAME = 128               # encoder stand-in pooling frame
LANE = 128                # TPU lane width


# --------------------------------------------------------------------------
# deterministic octave band-pass FIR design (replacement for scipy.firwin)
# --------------------------------------------------------------------------
def octave_filters() -> np.ndarray:
    f_bounds = [(22.3, 44.5), (44.5, 88.4), (88.4, 176.8), (176.8, 353.6),
                (353.6, 707.1), (707.1, 1414.2), (1414.2, 2828.4),
                (2828.4, 5656.8), (5656.8, 11313.6), (11313.6, 22627.2)]
    fs = 48000.0
    numtaps = FILTER_ORDER
    n = np.arange(numtaps) - (numtaps - 1) / 2.0
    win = np.hamming(numtaps)
    firs = []
    for low, high in f_bounds:
        def lp(fc):
            c = 2.0 * fc / fs
            return c * np.sinc(c * n)
        h = (lp(high) - lp(low)) * win
        fc_center = 0.5 * (low + high)
        scale = np.sum(h * np.cos(2.0 * np.pi * fc_center / fs * n))
        assert abs(scale) > 1e-3, f"ill-conditioned octave band ({low}, {high})"
        firs.append(h / scale)
    return np.stack(firs, axis=0).astype(np.float32)       # [10, 1023]


# --------------------------------------------------------------------------
# banded-Toeplitz weight blocks for the depthwise FIR (built once at init)
#
# torch Conv1d(groups=C, padding='same', odd K) is the cross-correlation
#   y[c,t] = sum_k x[c, t+k-(K-1)/2] * w[c,k].
# Shifting the taps by one (w'[0]=0, w'[k]=w[k-1]) makes the left pad exactly
# (K+1)/2 = 512 samples = 4 lane blocks, so everything is 128-aligned:
#   y[c, to*128+j] = sum_{d=0..8} sum_i xpad[c, (to+d)*128+i] * WB[c,d,i,j]
# with WB[c,d,i,j] = w'[c, d*128+i-j]  (0 outside the band).
# The 9 blocks are stacked along rows -> one [9*128, 128] MXU weight/channel.
# --------------------------------------------------------------------------
def build_toeplitz_blocks(fir: np.ndarray, lane: int = LANE) -> np.ndarray:
    C, K = fir.shape
    assert (K + 1) % (2 * lane) == 0
    wsh = np.zeros((C, K + 1), np.float64)
    wsh[:, 1:] = fir
    nd = (K + 1) // lane + 1                      # 9 diagonal blocks
    i = np.arange(lane)[:, None]
    j = np.arange(lane)[None, :]
    wb = np.zeros((C, nd, lane, lane), np.float32)
    for d in range(nd):
        k = d * lane + i - j
        valid = (k >= 0) & (k <= K)
        kc = np.clip(k, 0, K)
        for c in range(C):
            wb[c, d] = np.where(valid, wsh[c][kc], 0.0).astype(np.float32)
    return wb                                      # [C, 9, 128, 128]


def build_windowed_weights(fir: np.ndarray, lane: int = LANE) -> np.ndarray:
    wb = build_toeplitz_blocks(fir, lane)          # [C, ND, L, L]
    C, nd, L, _ = wb.shape
    return wb.reshape(C, nd * L, L)                # [C, ND*L, L]


# --------------------------------------------------------------------------
# Pallas kernel 1: fused depthwise FIR (windowed Toeplitz MXU matmul) + tail
#   filtered_noise = octave_FIR(noise)                               (MXU, bf16)
#   late           = filtered_noise * (sigmoid(g)*w_out[c]) * exp(-softplus(d)*t/T)
#   direct_early  *= early mask
#   rir            = w_out[0]*direct_early + sum_c late_c + bias     (1x1 conv)
# --------------------------------------------------------------------------
def fused_fir_tail(x_blocked, w_win, de_blocked, scal):
    B, C, nT, L = x_blocked.shape
    ND = w_win.shape[1] // L            # 9 diagonal blocks
    HALF = (ND - 1) // 2                # zero halo blocks on each side (= 4)
    T = nT * L
    # TODO(synk): at production RIR_LEN=16000 (nT=125) tile the time axis
    # (32-64 block-rows per chunk) to keep live vector state under the vreg file.

    def kernel(scal_ref, x_ref, w_ref, de_ref, o_ref, lhs_ref):
        b = pl.program_id(0)

        # ---- windowed LHS, built directly from the bf16 noise block --------
        # lhs[c, to, d*L + i] = xpad[c, to+d, i]; only the small 'same'-pad
        # halo corners are zeroed (per step -> safe under parallel grid order).
        xv = x_ref[0]                                       # [C, nT, L] bf16
        zdt = lhs_ref.dtype
        for d in range(ND):
            s = d - HALF
            c0, c1 = d * L, (d + 1) * L
            if s < 0:
                z = -s
                lhs_ref[:, :z, c0:c1] = jnp.zeros((C, z, L), zdt)
                lhs_ref[:, z:, c0:c1] = xv[:, :nT - z, :]
            elif s == 0:
                lhs_ref[:, :, c0:c1] = xv
            else:
                lhs_ref[:, :nT - s, c0:c1] = xv[:, s:, :]
                lhs_ref[:, nT - s:, c0:c1] = jnp.zeros((C, s, L), zdt)

        # ---- time indices / masks shared by every channel -------------------
        row = lax.broadcasted_iota(jnp.int32, (nT, L), 0)
        col = lax.broadcasted_iota(jnp.int32, (nT, L), 1)
        t_idx = row * L + col
        early = (t_idx < EARLY_LEN).astype(jnp.float32)
        # separable late-mask exponent: exp(-d*t/T) = exp(-d*row_t)*exp(-d*lane_t)
        row_t = (lax.broadcasted_iota(jnp.int32, (nT, 1), 0).astype(jnp.float32)
                 * (float(L) / float(T)))                    # [nT, 1]
        lane_t = (lax.broadcasted_iota(jnp.int32, (1, L), 1).astype(jnp.float32)
                  * (1.0 / float(T)))                        # [1, L]

        w0 = scal_ref[0]                 # output-conv weight of the d/e channel
        bias = scal_ref[1]               # output-conv bias
        base = 2 + b * (2 * C)

        out = w0 * (de_ref[0] * early) + bias                # [nT, L] f32

        for c in range(C):               # static unroll: 10 channels
            # one K=1152 bf16 matmul per channel, f32 accumulation
            acc = jnp.dot(lhs_ref[c], w_ref[c],
                          preferred_element_type=jnp.float32)   # [nT, L] f32
            coeff = scal_ref[base + c]          # sigmoid(gain) * out_conv_w[c]
            decay = scal_ref[base + C + c]      # softplus(decay)
            rowf = jnp.exp(-decay * row_t)      # [nT, 1]  (EUP: nT exps)
            lanef = jnp.exp(-decay * lane_t)    # [1, L]   (EUP: L exps)
            out = out + (coeff * acc) * rowf * lanef

        o_ref[0] = out

    return pl.pallas_call(
        kernel,
        out_shape=jax.ShapeDtypeStruct((B, nT, L), jnp.float32),
        grid=(B,),
        in_specs=[
            pl.BlockSpec(memory_space=pltpu.MemorySpace.SMEM),      # scalars
            pl.BlockSpec((1, C, nT, L), lambda b: (b, 0, 0, 0)),    # noise (bf16)
            pl.BlockSpec((C, ND * L, L), lambda b: (0, 0, 0)),      # weights (bf16)
            pl.BlockSpec((1, nT, L), lambda b: (b, 0, 0)),          # direct/early
        ],
        out_specs=pl.BlockSpec((1, nT, L), lambda b: (b, 0, 0)),
        scratch_shapes=[pltpu.VMEM((C, nT, ND * L), jnp.bfloat16)], # windowed LHS
        compiler_params=pltpu.CompilerParams(
            dimension_semantics=("parallel",)),
    )(scal, x_blocked, w_win, de_blocked)


# --------------------------------------------------------------------------
# Pallas kernel 2: decoder projection — a single-block MXU matmul producing
#   [direct_early | gain/decay logits] with bias + tanh (direct_early columns
#   only, via a column-iota mask) fused in-kernel.  One grid step (B=2 makes
#   this latency-bound; multi-step tiling was pure overhead).
# --------------------------------------------------------------------------
def decoder_matmul(h, w, b, *, n_tanh):
    B, K = h.shape
    _, N = w.shape
    b2 = b.reshape(1, N)

    def kernel(h_ref, w_ref, b_ref, o_ref):
        y = jnp.dot(h_ref[...], w_ref[...],
                    preferred_element_type=jnp.float32) + b_ref[...]
        col = lax.broadcasted_iota(jnp.int32, y.shape, 1)
        o_ref[...] = jnp.where(col < n_tanh, jnp.tanh(y), y)

    return pl.pallas_call(
        kernel,
        out_shape=jax.ShapeDtypeStruct((B, N), jnp.float32),
        grid=(1,),
        in_specs=[pl.BlockSpec((B, K), lambda i: (0, 0)),     # activations
                  pl.BlockSpec((K, N), lambda i: (0, 0)),     # full weight
                  pl.BlockSpec((1, N), lambda i: (0, 0))],    # bias
        out_specs=pl.BlockSpec((B, N), lambda i: (0, 0)),
    )(h, w, b2)


# --------------------------------------------------------------------------
# parameters (deterministic, synthetic)
# --------------------------------------------------------------------------
def init_params(key):
    ks = jax.random.split(key, 4)
    nf = REVERB_LEN // FRAME                          # encoder stand-in features
    hdim = DEC_IN_LEN + Z_SIZE + NOISE_COND_LEN       # 278
    n_dec_out = RIR_LEN + Z_SIZE                      # [direct_early | params]
    fir = octave_filters()
    return {
        "decoder_input": jax.random.normal(ks[0], (1, 1, DEC_IN_LEN), jnp.float32),
        "enc_w": 0.05 * jax.random.normal(ks[1], (nf, Z_SIZE), jnp.float32),
        "enc_b": jnp.zeros((Z_SIZE,), jnp.float32),
        "dec_w": 0.05 * jax.random.normal(ks[2], (hdim, n_dec_out), jnp.float32),
        "dec_b": jnp.zeros((n_dec_out,), jnp.float32),
        "fir_w": jnp.asarray(fir),                                       # [10, 1023] f32
        "fir_wwin": jnp.asarray(build_windowed_weights(fir),
                                dtype=jnp.bfloat16),                     # [10, 1152, 128] bf16
        "out_w": 0.3 * jax.random.normal(ks[3], (NUM_FILTERS + 1,), jnp.float32),
        "out_b": jnp.asarray(0.0, jnp.float32),
    }


# --------------------------------------------------------------------------
# forward pass (mirrors FinsNetwork.forward)
# --------------------------------------------------------------------------
def fins_forward(params, reverb, stochastic_noise, noise_condition):
    B, C, T = stochastic_noise.shape
    nT = T // LANE

    # z = self.encoder(reverb)
    # TODO(synk): FinsEncoder definition not provided; stand-in = frame-mean
    # pooling + dense + tanh (tiny, launch-bound -> intentionally left in XLA).
    feat = reverb.reshape(B, REVERB_LEN // FRAME, FRAME).mean(axis=-1)
    z = jnp.tanh(jnp.matmul(feat, params["enc_w"],
                            precision=jax.lax.Precision.HIGHEST) + params["enc_b"])

    # condition = cat([z, noise_condition], -1); decoder_input repeated over batch
    condition = jnp.concatenate([z, noise_condition], axis=-1)
    dec_in = jnp.broadcast_to(params["decoder_input"].reshape(1, DEC_IN_LEN),
                              (B, DEC_IN_LEN))
    h = jnp.concatenate([dec_in, condition], axis=-1)            # [B, 278]

    # direct_early, late_mask = self.decoder(decoder_input, condition)
    # TODO(synk): FinsDecoder definition not provided; stand-in = one fused dense
    # projection -> direct_early (tanh) plus per-filter (gain, decay) logits that
    # parameterize an exponentially decaying late mask (applied in the tail).
    dec_out = decoder_matmul(h, params["dec_w"], params["dec_b"], n_tanh=RIR_LEN)
    direct_early = dec_out[:, :RIR_LEN]                          # [B, T]
    p = dec_out[:, RIR_LEN:]
    gains = p[:, :NUM_FILTERS]
    decays = p[:, NUM_FILTERS:2 * NUM_FILTERS]

    # fused-tail scalars: fold the 1x1 output-conv weights into the gains
    coeff = jax.nn.sigmoid(gains) * params["out_w"][1:1 + NUM_FILTERS][None, :]
    decay = jax.nn.softplus(decays)
    scal = jnp.concatenate(
        [jnp.stack([params["out_w"][0], params["out_b"]]),
         jnp.concatenate([coeff, decay], axis=1).reshape(-1)]).astype(jnp.float32)

    # filtered_noise = self.filter(noise); late/early masking; concat; 1x1 conv
    # -- all fused in one Pallas kernel (filtered_noise never touches HBM).
    noise_b = stochastic_noise.astype(jnp.bfloat16).reshape(B, C, nT, LANE)
    rir = fused_fir_tail(noise_b, params["fir_wwin"],
                         direct_early.reshape(B, nT, LANE), scal)
    return rir.reshape(B, 1, T)                                  # [B, 1, RIR_LEN]


# --------------------------------------------------------------------------
# float64 numpy reference of the same stand-in model (for a correctness check)
# --------------------------------------------------------------------------
def _np_sigmoid(x):
    return 1.0 / (1.0 + np.exp(-x))


def _np_softplus(x):
    return np.log1p(np.exp(x))


def reference_forward(params, reverb, stochastic_noise, noise_condition):
    f64 = lambda a: np.asarray(a, np.float64)
    w = f64(params["fir_w"])
    x = f64(stochastic_noise)
    B, C, T = x.shape
    K = w.shape[1]
    pad = (K - 1) // 2
    xp = np.pad(x, ((0, 0), (0, 0), (pad, pad)))
    filt = np.zeros((B, C, T))
    for b in range(B):
        for c in range(C):
            filt[b, c] = np.correlate(xp[b, c], w[c], mode="valid")

    feat = f64(reverb).reshape(B, -1, FRAME).mean(axis=-1)
    z = np.tanh(feat @ f64(params["enc_w"]) + f64(params["enc_b"]))
    condition = np.concatenate([z, f64(noise_condition)], axis=-1)
    dec_in = np.broadcast_to(f64(params["decoder_input"]).reshape(1, DEC_IN_LEN),
                             (B, DEC_IN_LEN))
    h = np.concatenate([dec_in, condition], axis=-1)
    wd = f64(params["dec_w"])
    bd = f64(params["dec_b"])
    de = np.tanh(h @ wd[:, :RIR_LEN] + bd[:RIR_LEN])
    p = h @ wd[:, RIR_LEN:] + bd[RIR_LEN:]
    gains = _np_sigmoid(p[:, :NUM_FILTERS])
    decays = _np_softplus(p[:, NUM_FILTERS:2 * NUM_FILTERS])

    t = np.arange(T, dtype=np.float64) / float(T)
    late = filt * (gains[:, :, None] * np.exp(-decays[:, :, None] * t[None, None, :]))
    early_mask = (np.arange(T) < EARLY_LEN).astype(np.float64)
    de_m = de * early_mask[None, :]
    ow = f64(params["out_w"])
    ob = float(params["out_b"])
    rir = ow[0] * de_m + np.einsum("c,bct->bt", ow[1:1 + NUM_FILTERS], late) + ob
    return rir.reshape(B, 1, T)


if __name__ == "__main__":
    key = jax.random.PRNGKey(0)
    kp, k1, k2, k3 = jax.random.split(key, 4)
    params = init_params(kp)

    reverb = jax.random.normal(k1, (BATCH, 1, REVERB_LEN), jnp.float32)
    stochastic_noise = jax.random.normal(k2, (BATCH, NUM_FILTERS, RIR_LEN), jnp.float32)
    noise_condition = jax.random.normal(k3, (BATCH, NOISE_COND_LEN), jnp.float32)

    rir = jax.jit(fins_forward)(params, reverb, stochastic_noise, noise_condition)
    jax.block_until_ready(rir)
    assert rir.shape == (BATCH, 1, RIR_LEN) and rir.dtype == jnp.float32
    assert bool(jnp.all(jnp.isfinite(rir)))

    # correctness check against the float64 numpy reference of the same model
    # (bf16 FIR path -> validate against the 5e-2 relative tolerance)
    rir_ref = reference_forward(params, reverb, stochastic_noise, noise_condition)
    err = float(np.max(np.abs(np.asarray(rir, np.float64) - rir_ref)))
    scale = float(np.max(np.abs(rir_ref)))
    assert err <= 5e-2 * scale + 5e-3, (err, scale)
    print("KERNEL_OK")
</pallas_src>

<mosaic_0001>
module attributes {stable_mosaic.version = 11 : i64} {
  func.func @kernel(%arg0: i32, %arg1: memref<2x278xf32, #tpu.memory_space<vmem>>, %arg2: memref<278x2176xf32, #tpu.memory_space<vmem>>, %arg3: memref<1x2176xf32, #tpu.memory_space<vmem>>, %arg4: memref<2x2176xf32, #tpu.memory_space<vmem>>) attributes {dimension_semantics = [#tpu.dimension_semantics<arbitrary>], iteration_bounds = array<i64: 1>, scalar_prefetch = 0 : i64, scratch_operands = 0 : i64, tpu.core_type = #tpu.core_type<tc>, window_params = [{pipeline_mode = #tpu.pipeline_mode<synchronous>, transform_indices = @transform_0, window_bounds = array<i64: 2, 278>}, {pipeline_mode = #tpu.pipeline_mode<synchronous>, transform_indices = @transform_1, window_bounds = array<i64: 278, 2176>}, {pipeline_mode = #tpu.pipeline_mode<synchronous>, transform_indices = @transform_2, window_bounds = array<i64: 1, 2176>}, {pipeline_mode = #tpu.pipeline_mode<synchronous>, transform_indices = @transform_3, window_bounds = array<i64: 2, 2176>}]} {
    %c0 = arith.constant 0 : index
    %c0_0 = arith.constant 0 : index
    %0 = vector.load %arg1[%c0, %c0_0] : memref<2x278xf32, #tpu.memory_space<vmem>>, vector<2x278xf32>
    %c0_1 = arith.constant 0 : index
    %c0_2 = arith.constant 0 : index
    %1 = vector.load %arg2[%c0_1, %c0_2] : memref<278x2176xf32, #tpu.memory_space<vmem>>, vector<278x2176xf32>
    %cst = arith.constant dense<0.000000e+00> : vector<2x2176xf32>
    %2 = tpu.matmul %0, %1, %cst {dimension_numbers = #tpu.dot_dimension_numbers<[1], [0], [0], [1], [0, 0, 1, 1], [], []>} : vector<2x278xf32>, vector<278x2176xf32>, vector<2x2176xf32> -> vector<2x2176xf32>
    %c0_3 = arith.constant 0 : index
    %c0_4 = arith.constant 0 : index
    %3 = vector.load %arg3[%c0_3, %c0_4] : memref<1x2176xf32, #tpu.memory_space<vmem>>, vector<1x2176xf32>
    %4 = vector.broadcast %3 : vector<1x2176xf32> to vector<2x2176xf32>
    %5 = arith.addf %2, %4 : vector<2x2176xf32>
    %6 = tpu.iota {dimensions = array<i32: 1>} : vector<2x2176xi32>
    %c2048_i32 = arith.constant 2048 : i32
    %7 = vector.broadcast %c2048_i32 : i32 to vector<2x2176xi32>
    %8 = arith.cmpi slt, %6, %7 : vector<2x2176xi32>
    %9 = math.tanh %5 : vector<2x2176xf32>
    %10 = arith.select %8, %9, %5 : vector<2x2176xi1>, vector<2x2176xf32>
    %c0_5 = arith.constant 0 : index
    %c0_6 = arith.constant 0 : index
    %11 = vector.load %arg4[%c0_5, %c0_6] : memref<2x2176xf32, #tpu.memory_space<vmem>>, vector<2x2176xf32>
    tpu.vector_store %arg4[%c0_5, %c0_6], %10 {strides = array<i32>} : memref<2x2176xf32, #tpu.memory_space<vmem>>, vector<2x2176xf32>,
    return
  }
  func.func @transform_0(%arg0: i32) -> (i32, i32) {
    %c0_i32 = arith.constant 0 : i32
    %c0_i32_0 = arith.constant 0 : i32
    %c0_i32_1 = arith.constant 0 : i32
    return %c0_i32, %c0_i32_0 : i32, i32
  }
  func.func @transform_1(%arg0: i32) -> (i32, i32) {
    %c0_i32 = arith.constant 0 : i32
    %c0_i32_0 = arith.constant 0 : i32
    %c0_i32_1 = arith.constant 0 : i32
    return %c0_i32, %c0_i32_0 : i32, i32
  }
  func.func @transform_2(%arg0: i32) -> (i32, i32) {
    %c0_i32 = arith.constant 0 : i32
    %c0_i32_0 = arith.constant 0 : i32
    %c0_i32_1 = arith.constant 0 : i32
    return %c0_i32, %c0_i32_0 : i32, i32
  }
  func.func @transform_3(%arg0: i32) -> (i32, i32) {
    %c0_i32 = arith.constant 0 : i32
    %c0_i32_0 = arith.constant 0 : i32
    %c0_i32_1 = arith.constant 0 : i32
    return %c0_i32, %c0_i32_0 : i32, i32
  }
}

module attributes {stable_mosaic.version = 11 : i64} {
  func.func @kernel(%arg0: i32, %arg1: memref<42xf32, #tpu.memory_space<smem>>, %arg2: memref<1x10x16x128xbf16, #tpu.memory_space<vmem>>, %arg3: memref<10x1152x128xbf16, #tpu.memory_space<vmem>>, %arg4: memref<1x16x128xf32, #tpu.memory_space<vmem>>, %arg5: memref<1x16x128xf32, #tpu.memory_space<vmem>>, %arg6: memref<10x16x1152xbf16, #tpu.memory_space<vmem>>) attributes {dimension_semantics = [#tpu.dimension_semantics<parallel>], iteration_bounds = array<i64: 2>, scalar_prefetch = 0 : i64, scratch_operands = 1 : i64, tpu.core_type = #tpu.core_type<tc>, window_params = [{transform_indices = @transform_0, window_bounds = array<i64: 42>}, {transform_indices = @transform_1, window_bounds = array<i64: 1, 10, 16, 128>}, {pipeline_mode = #tpu.pipeline_mode<synchronous>, transform_indices = @transform_2, window_bounds = array<i64: 10, 1152, 128>}, {transform_indices = @transform_3, window_bounds = array<i64: 1, 16, 128>}, {transform_indices = @transform_4, window_bounds = array<i64: 1, 16, 128>}]} {
    %c0 = arith.constant 0 : index
    %c0_0 = arith.constant 0 : index
    %c0_1 = arith.constant 0 : index
    %c0_2 = arith.constant 0 : index
    %0 = vector.load %arg2[%c0, %c0_0, %c0_1, %c0_2] : memref<1x10x16x128xbf16, #tpu.memory_space<vmem>>, vector<1x10x16x128xbf16>
    %1 = vector.shape_cast %0 : vector<1x10x16x128xbf16> to vector<10x16x128xbf16>
    %cst = arith.constant 0.000000e+00 : bf16
    %2 = vector.broadcast %cst : bf16 to vector<10x4x128xbf16>
    %c0_3 = arith.constant 0 : index
    %c0_4 = arith.constant 0 : index
    %c0_5 = arith.constant 0 : index
    %3 = vector.load %arg6[%c0_3, %c0_4, %c0_5] : memref<10x16x1152xbf16, #tpu.memory_space<vmem>>, vector<10x4x128xbf16>
    tpu.vector_store %arg6[%c0_3, %c0_4, %c0_5], %2 {strides = array<i32>} : memref<10x16x1152xbf16, #tpu.memory_space<vmem>>, vector<10x4x128xbf16>,
    %4 = vector.extract_strided_slice %1 {offsets = [0, 0, 0], sizes = [10, 12, 128], strides = [1, 1, 1]} : vector<10x16x128xbf16> to vector<10x12x128xbf16>
    %c0_6 = arith.constant 0 : index
    %c4 = arith.constant 4 : index
    %c0_7 = arith.constant 0 : index
    %5 = vector.load %arg6[%c0_6, %c4, %c0_7] : memref<10x16x1152xbf16, #tpu.memory_space<vmem>>, vector<10x12x128xbf16>
    tpu.vector_store %arg6[%c0_6, %c4, %c0_7], %4 {strides = array<i32>} : memref<10x16x1152xbf16, #tpu.memory_space<vmem>>, vector<10x12x128xbf16>,
    %cst_8 = arith.constant 0.000000e+00 : bf16
    %6 = vector.broadcast %cst_8 : bf16 to vector<10x3x128xbf16>
    %c0_9 = arith.constant 0 : index
    %c0_10 = arith.constant 0 : index
    %c128 = arith.constant 128 : index
    %7 = vector.load %arg6[%c0_9, %c0_10, %c128] : memref<10x16x1152xbf16, #tpu.memory_space<vmem>>, vector<10x3x128xbf16>
    tpu.vector_store %arg6[%c0_9, %c0_10, %c128], %6 {strides = array<i32>} : memref<10x16x1152xbf16, #tpu.memory_space<vmem>>, vector<10x3x128xbf16>,
    %8 = vector.extract_strided_slice %1 {offsets = [0, 0, 0], sizes = [10, 13, 128], strides = [1, 1, 1]} : vector<10x16x128xbf16> to vector<10x13x128xbf16>
    %c0_11 = arith.constant 0 : index
    %c3 = arith.constant 3 : index
    %c128_12 = arith.constant 128 : index
    %9 = vector.load %arg6[%c0_11, %c3, %c128_12] : memref<10x16x1152xbf16, #tpu.memory_space<vmem>>, vector<10x13x128xbf16>
    tpu.vector_store %arg6[%c0_11, %c3, %c128_12], %8 {strides = array<i32>} : memref<10x16x1152xbf16, #tpu.memory_space<vmem>>, vector<10x13x128xbf16>,
    %cst_13 = arith.constant 0.000000e+00 : bf16
    %10 = vector.broadcast %cst_13 : bf16 to vector<10x2x128xbf16>
    %c0_14 = arith.constant 0 : index
    %c0_15 = arith.constant 0 : index
    %c256 = arith.constant 256 : index
    %11 = vector.load %arg6[%c0_14, %c0_15, %c256] : memref<10x16x1152xbf16, #tpu.memory_space<vmem>>, vector<10x2x128xbf16>
    tpu.vector_store %arg6[%c0_14, %c0_15, %c256], %10 {strides = array<i32>} : memref<10x16x1152xbf16, #tpu.memory_space<vmem>>, vector<10x2x128xbf16>,
    %12 = vector.extract_strided_slice %1 {offsets = [0, 0, 0], sizes = [10, 14, 128], strides = [1, 1, 1]} : vector<10x16x128xbf16> to vector<10x14x128xbf16>
    %c0_16 = arith.constant 0 : index
    %c2 = arith.constant 2 : index
    %c256_17 = arith.constant 256 : index
    %13 = vector.load %arg6[%c0_16, %c2, %c256_17] : memref<10x16x1152xbf16, #tpu.memory_space<vmem>>, vector<10x14x128xbf16>
    tpu.vector_store %arg6[%c0_16, %c2, %c256_17], %12 {strides = array<i32>} : memref<10x16x1152xbf16, #tpu.memory_space<vmem>>, vector<10x14x128xbf16>,
    %cst_18 = arith.constant 0.000000e+00 : bf16
    %14 = vector.broadcast %cst_18 : bf16 to vector<10x1x128xbf16>
    %c0_19 = arith.constant 0 : index
    %c0_20 = arith.constant 0 : index
    %c384 = arith.constant 384 : index
    %15 = vector.load %arg6[%c0_19, %c0_20, %c384] : memref<10x16x1152xbf16, #tpu.memory_space<vmem>>, vector<10x1x128xbf16>
    tpu.vector_store %arg6[%c0_19, %c0_20, %c384], %14 {strides = array<i32>} : memref<10x16x1152xbf16, #tpu.memory_space<vmem>>, vector<10x1x128xbf16>,
    %16 = vector.extract_strided_slice %1 {offsets = [0, 0, 0], sizes = [10, 15, 128], strides = [1, 1, 1]} : vector<10x16x128xbf16> to vector<10x15x128xbf16>
    %c0_21 = arith.constant 0 : index
    %c1 = arith.constant 1 : index
    %c384_22 = arith.constant 384 : index
    %17 = vector.load %arg6[%c0_21, %c1, %c384_22] : memref<10x16x1152xbf16, #tpu.memory_space<vmem>>, vector<10x15x128xbf16>
    tpu.vector_store %arg6[%c0_21, %c1, %c384_22], %16 {strides = array<i32>} : memref<10x16x1152xbf16, #tpu.memory_space<vmem>>, vector<10x15x128xbf16>,
    %c0_23 = arith.constant 0 : index
    %c0_24 = arith.constant 0 : index
    %c512 = arith.constant 512 : index
    %18 = vector.load %arg6[%c0_23, %c0_24, %c512] : memref<10x16x1152xbf16, #tpu.memory_space<vmem>>, vector<10x16x128xbf16>
    tpu.vector_store %arg6[%c0_23, %c0_24, %c512], %1 {strides = array<i32>} : memref<10x16x1152xbf16, #tpu.memory_space<vmem>>, vector<10x16x128xbf16>,
    %19 = vector.extract_strided_slice %1 {offsets = [0, 1, 0], sizes = [10, 15, 128], strides = [1, 1, 1]} : vector<10x16x128xbf16> to vector<10x15x128xbf16>
    %c0_25 = arith.constant 0 : index
    %c0_26 = arith.constant 0 : index
    %c640 = arith.constant 640 : index
    %20 = vector.load %arg6[%c0_25, %c0_26, %c640] : memref<10x16x1152xbf16, #tpu.memory_space<vmem>>, vector<10x15x128xbf16>
    tpu.vector_store %arg6[%c0_25, %c0_26, %c640], %19 {strides = array<i32>} : memref<10x16x1152xbf16, #tpu.memory_space<vmem>>, vector<10x15x128xbf16>,
    %cst_27 = arith.constant 0.000000e+00 : bf16
    %21 = vector.broadcast %cst_27 : bf16 to vector<10x1x128xbf16>
    %c0_28 = arith.constant 0 : index
    %c15 = arith.constant 15 : index
    %c640_29 = arith.constant 640 : index
    %22 = vector.load %arg6[%c0_28, %c15, %c640_29] : memref<10x16x1152xbf16, #tpu.memory_space<vmem>>, vector<10x1x128xbf16>
    tpu.vector_store %arg6[%c0_28, %c15, %c640_29], %21 {strides = array<i32>} : memref<10x16x1152xbf16, #tpu.memory_space<vmem>>, vector<10x1x128xbf16>,
    %23 = vector.extract_strided_slice %1 {offsets = [0, 2, 0], sizes = [10, 14, 128], strides = [1, 1, 1]} : vector<10x16x128xbf16> to vector<10x14x128xbf16>
    %c0_30 = arith.constant 0 : index
    %c0_31 = arith.constant 0 : index
    %c768 = arith.constant 768 : index
    %24 = vector.load %arg6[%c0_30, %c0_31, %c768] : memref<10x16x1152xbf16, #tpu.memory_space<vmem>>, vector<10x14x128xbf16>
    tpu.vector_store %arg6[%c0_30, %c0_31, %c768], %23 {strides = array<i32>} : memref<10x16x1152xbf16, #tpu.memory_space<vmem>>, vector<10x14x128xbf16>,
    %cst_32 = arith.constant 0.000000e+00 : bf16
    %25 = vector.broadcast %cst_32 : bf16 to vector<10x2x128xbf16>
    %c0_33 = arith.constant 0 : index
    %c14 = arith.constant 14 : index
    %c768_34 = arith.constant 768 : index
    %26 = vector.load %arg6[%c0_33, %c14, %c768_34] : memref<10x16x1152xbf16, #tpu.memory_space<vmem>>, vector<10x2x128xbf16>
    tpu.vector_store %arg6[%c0_33, %c14, %c768_34], %25 {strides = array<i32>} : memref<10x16x1152xbf16, #tpu.memory_space<vmem>>, vector<10x2x128xbf16>,
    %27 = vector.extract_strided_slice %1 {offsets = [0, 3, 0], sizes = [10, 13, 128], strides = [1, 1, 1]} : vector<10x16x128xbf16> to vector<10x13x128xbf16>
    %c0_35 = arith.constant 0 : index
    %c0_36 = arith.constant 0 : index
    %c896 = arith.constant 896 : index
    %28 = vector.load %arg6[%c0_35, %c0_36, %c896] : memref<10x16x1152xbf16, #tpu.memory_space<vmem>>, vector<10x13x128xbf16>
    tpu.vector_store %arg6[%c0_35, %c0_36, %c896], %27 {strides = array<i32>} : memref<10x16x1152xbf16, #tpu.memory_space<vmem>>, vector<10x13x128xbf16>,
    %cst_37 = arith.constant 0.000000e+00 : bf16
    %29 = vector.broadcast %cst_37 : bf16 to vector<10x3x128xbf16>
    %c0_38 = arith.constant 0 : index
    %c13 = arith.constant 13 : index
    %c896_39 = arith.constant 896 : index
    %30 = vector.load %arg6[%c0_38, %c13, %c896_39] : memref<10x16x1152xbf16, #tpu.memory_space<vmem>>, vector<10x3x128xbf16>
    tpu.vector_store %arg6[%c0_38, %c13, %c896_39], %29 {strides = array<i32>} : memref<10x16x1152xbf16, #tpu.memory_space<vmem>>, vector<10x3x128xbf16>,
    %31 = vector.extract_strided_slice %1 {offsets = [0, 4, 0], sizes = [10, 12, 128], strides = [1, 1, 1]} : vector<10x16x128xbf16> to vector<10x12x128xbf16>
    %c0_40 = arith.constant 0 : index
    %c0_41 = arith.constant 0 : index
    %c1024 = arith.constant 1024 : index
    %32 = vector.load %arg6[%c0_40, %c0_41, %c1024] : memref<10x16x1152xbf16, #tpu.memory_space<vmem>>, vector<10x12x128xbf16>
    tpu.vector_store %arg6[%c0_40, %c0_41, %c1024], %31 {strides = array<i32>} : memref<10x16x1152xbf16, #tpu.memory_space<vmem>>, vector<10x12x128xbf16>,
    %cst_42 = arith.constant 0.000000e+00 : bf16
    %33 = vector.broadcast %cst_42 : bf16 to vector<10x4x128xbf16>
    %c0_43 = arith.constant 0 : index
    %c12 = arith.constant 12 : index
    %c1024_44 = arith.constant 1024 : index
    %34 = vector.load %arg6[%c0_43, %c12, %c1024_44] : memref<10x16x1152xbf16, #tpu.memory_space<vmem>>, vector<10x4x128xbf16>
    tpu.vector_store %arg6[%c0_43, %c12, %c1024_44], %33 {strides = array<i32>} : memref<10x16x1152xbf16, #tpu.memory_space<vmem>>, vector<10x4x128xbf16>,
    %35 = tpu.iota {dimensions = array<i32: 0>} : vector<16x128xi32>
    %36 = tpu.iota {dimensions = array<i32: 1>} : vector<16x128xi32>
    %c128_i32 = arith.constant 128 : i32
    %37 = vector.broadcast %c128_i32 : i32 to vector<16x128xi32>
    %38 = arith.muli %35, %37 : vector<16x128xi32>
    %39 = arith.addi %38, %36 : vector<16x128xi32>
    %c128_i32_45 = arith.constant 128 : i32
    %40 = vector.broadcast %c128_i32_45 : i32 to vector<16x128xi32>
    %41 = arith.cmpi slt, %39, %40 : vector<16x128xi32>
    %42 = arith.extui %41 : vector<16x128xi1> to vector<16x128xi32>
    %43 = arith.sitofp %42 : vector<16x128xi32> to vector<16x128xf32>
    %44 = tpu.iota {dimensions = array<i32: 0>} : vector<16x1xi32>
    %45 = arith.sitofp %44 : vector<16x1xi32> to vector<16x1xf32>
    %cst_46 = arith.constant 6.250000e-02 : f32
    %46 = vector.broadcast %cst_46 : f32 to vector<16x1xf32>
    %47 = arith.mulf %45, %46 : vector<16x1xf32>
    %48 = tpu.iota {dimensions = array<i32: 1>} : vector<1x128xi32>
    %49 = arith.sitofp %48 : vector<1x128xi32> to vector<1x128xf32>
    %cst_47 = arith.constant 4.8828125E-4 : f32
    %50 = vector.broadcast %cst_47 : f32 to vector<1x128xf32>
    %51 = arith.mulf %49, %50 : vector<1x128xf32>
    %c0_48 = arith.constant 0 : index
    %52 = memref.load %arg1[%c0_48] : memref<42xf32, #tpu.memory_space<smem>>
    %c1_49 = arith.constant 1 : index
    %53 = memref.load %arg1[%c1_49] : memref<42xf32, #tpu.memory_space<smem>>
    %c20_i32 = arith.constant 20 : i32
    %54 = arith.muli %arg0, %c20_i32 : i32
    %c2_i32 = arith.constant 2 : i32
    %55 = arith.addi %c2_i32, %54 : i32
    %c0_50 = arith.constant 0 : index
    %c0_51 = arith.constant 0 : index
    %c0_52 = arith.constant 0 : index
    %56 = vector.load %arg4[%c0_50, %c0_51, %c0_52] : memref<1x16x128xf32, #tpu.memory_space<vmem>>, vector<1x16x128xf32>
    %57 = vector.shape_cast %56 : vector<1x16x128xf32> to vector<16x128xf32>
    %58 = arith.mulf %57, %43 : vector<16x128xf32>
    %59 = vector.broadcast %52 : f32 to vector<16x128xf32>
    %60 = arith.mulf %59, %58 : vector<16x128xf32>
    %61 = vector.broadcast %53 : f32 to vector<16x128xf32>
    %62 = arith.addf %60, %61 : vector<16x128xf32>
    %c0_53 = arith.constant 0 : index
    %c0_54 = arith.constant 0 : index
    %c0_55 = arith.constant 0 : index
    %63 = vector.load %arg6[%c0_53, %c0_54, %c0_55] : memref<10x16x1152xbf16, #tpu.memory_space<vmem>>, vector<1x16x1152xbf16>
    %64 = vector.shape_cast %63 : vector<1x16x1152xbf16> to vector<16x1152xbf16>
    %c0_56 = arith.constant 0 : index
    %c0_57 = arith.constant 0 : index
    %c0_58 = arith.constant 0 : index
    %65 = vector.load %arg3[%c0_56, %c0_57, %c0_58] : memref<10x1152x128xbf16, #tpu.memory_space<vmem>>, vector<1x1152x128xbf16>
    %66 = vector.shape_cast %65 : vector<1x1152x128xbf16> to vector<1152x128xbf16>
    %cst_59 = arith.constant dense<0.000000e+00> : vector<16x128xf32>
    %67 = tpu.matmul %64, %66, %cst_59 {dimension_numbers = #tpu.dot_dimension_numbers<[1], [0], [0], [1], [0, 0, 1, 1], [], []>} : vector<16x1152xbf16>, vector<1152x128xbf16>, vector<16x128xf32> -> vector<16x128xf32>
    %c0_i32 = arith.constant 0 : i32
    %68 = arith.addi %55, %c0_i32 : i32
    %69 = arith.index_cast %68 : i32 to index
    %70 = memref.load %arg1[%69] : memref<42xf32, #tpu.memory_space<smem>>
    %c10_i32 = arith.constant 10 : i32
    %71 = arith.addi %55, %c10_i32 : i32
    %c0_i32_60 = arith.constant 0 : i32
    %72 = arith.addi %71, %c0_i32_60 : i32
    %73 = arith.index_cast %72 : i32 to index
    %74 = memref.load %arg1[%73] : memref<42xf32, #tpu.memory_space<smem>>
    %cst_61 = arith.constant 0.000000e+00 : f32
    %75 = arith.subf %cst_61, %74 : f32
    %76 = vector.broadcast %75 : f32 to vector<16x1xf32>
    %77 = arith.mulf %76, %47 : vector<16x1xf32>
    %78 = math.exp %77 : vector<16x1xf32>
    %cst_62 = arith.constant 0.000000e+00 : f32
    %79 = arith.subf %cst_62, %74 : f32
    %80 = vector.broadcast %79 : f32 to vector<1x128xf32>
    %81 = arith.mulf %80, %51 : vector<1x128xf32>
    %82 = math.exp %81 : vector<1x128xf32>
    %83 = vector.broadcast %70 : f32 to vector<16x128xf32>
    %84 = arith.mulf %83, %67 : vector<16x128xf32>
    %85 = vector.broadcast %78 : vector<16x1xf32> to vector<16x128xf32>
    %86 = arith.mulf %84, %85 : vector<16x128xf32>
    %87 = vector.broadcast %82 : vector<1x128xf32> to vector<16x128xf32>
    %88 = arith.mulf %86, %87 : vector<16x128xf32>
    %89 = arith.addf %62, %88 : vector<16x128xf32>
    %c1_63 = arith.constant 1 : index
    %c0_64 = arith.constant 0 : index
    %c0_65 = arith.constant 0 : index
    %90 = vector.load %arg6[%c1_63, %c0_64, %c0_65] : memref<10x16x1152xbf16, #tpu.memory_space<vmem>>, vector<1x16x1152xbf16>
    %91 = vector.shape_cast %90 : vector<1x16x1152xbf16> to vector<16x1152xbf16>
    %c1_66 = arith.constant 1 : index
    %c0_67 = arith.constant 0 : index
    %c0_68 = arith.constant 0 : index
    %92 = vector.load %arg3[%c1_66, %c0_67, %c0_68] : memref<10x1152x128xbf16, #tpu.memory_space<vmem>>, vector<1x1152x128xbf16>
    %93 = vector.shape_cast %92 : vector<1x1152x128xbf16> to vector<1152x128xbf16>
    %cst_69 = arith.constant dense<0.000000e+00> : vector<16x128xf32>
    %94 = tpu.matmul %91, %93, %cst_69 {dimension_numbers = #tpu.dot_dimension_numbers<[1], [0], [0], [1], [0, 0, 1, 1], [], []>} : vector<16x1152xbf16>, vector<1152x128xbf16>, vector<16x128xf32> -> vector<16x128xf32>
    %c1_i32 = arith.constant 1 : i32
    %95 = arith.addi %55, %c1_i32 : i32
    %96 = arith.index_cast %95 : i32 to index
    %97 = memref.load %arg1[%96] : memref<42xf32, #tpu.memory_space<smem>>
    %c10_i32_70 = arith.constant 10 : i32
    %98 = arith.addi %55, %c10_i32_70 : i32
    %c1_i32_71 = arith.constant 1 : i32
    %99 = arith.addi %98, %c1_i32_71 : i32
    %100 = arith.index_cast %99 : i32 to index
    %101 = memref.load %arg1[%100] : memref<42xf32, #tpu.memory_space<smem>>
    %cst_72 = arith.constant 0.000000e+00 : f32
    %102 = arith.subf %cst_72, %101 : f32
    %103 = vector.broadcast %102 : f32 to vector<16x1xf32>
    %104 = arith.mulf %103, %47 : vector<16x1xf32>
    %105 = math.exp %104 : vector<16x1xf32>
    %cst_73 = arith.constant 0.000000e+00 : f32
    %106 = arith.subf %cst_73, %101 : f32
    %107 = vector.broadcast %106 : f32 to vector<1x128xf32>
    %108 = arith.mulf %107, %51 : vector<1x128xf32>
    %109 = math.exp %108 : vector<1x128xf32>
    %110 = vector.broadcast %97 : f32 to vector<16x128xf32>
    %111 = arith.mulf %110, %94 : vector<16x128xf32>
    %112 = vector.broadcast %105 : vector<16x1xf32> to vector<16x128xf32>
    %113 = arith.mulf %111, %112 : vector<16x128xf32>
    %114 = vector.broadcast %109 : vector<1x128xf32> to vector<16x128xf32>
    %115 = arith.mulf %113, %114 : vector<16x128xf32>
    %116 = arith.addf %89, %115 : vector<16x128xf32>
    %c2_74 = arith.constant 2 : index
    %c0_75 = arith.constant 0 : index
    %c0_76 = arith.constant 0 : index
    %117 = vector.load %arg6[%c2_74, %c0_75, %c0_76] : memref<10x16x1152xbf16, #tpu.memory_space<vmem>>, vector<1x16x1152xbf16>
    %118 = vector.shape_cast %117 : vector<1x16x1152xbf16> to vector<16x1152xbf16>
    %c2_77 = arith.constant 2 : index
    %c0_78 = arith.constant 0 : index
    %c0_79 = arith.constant 0 : index
    %119 = vector.load %arg3[%c2_77, %c0_78, %c0_79] : memref<10x1152x128xbf16, #tpu.memory_space<vmem>>, vector<1x1152x128xbf16>
    %120 = vector.shape_cast %119 : vector<1x1152x128xbf16> to vector<1152x128xbf16>
    %cst_80 = arith.constant dense<0.000000e+00> : vector<16x128xf32>
    %121 = tpu.matmul %118, %120, %cst_80 {dimension_numbers = #tpu.dot_dimension_numbers<[1], [0], [0], [1], [0, 0, 1, 1], [], []>} : vector<16x1152xbf16>, vector<1152x128xbf16>, vector<16x128xf32> -> vector<16x128xf32>
    %c2_i32_81 = arith.constant 2 : i32
    %122 = arith.addi %55, %c2_i32_81 : i32
    %123 = arith.index_cast %122 : i32 to index
    %124 = memref.load %arg1[%123] : memref<42xf32, #tpu.memory_space<smem>>
    %c10_i32_82 = arith.constant 10 : i32
    %125 = arith.addi %55, %c10_i32_82 : i32
    %c2_i32_83 = arith.constant 2 : i32
    %126 = arith.addi %125, %c2_i32_83 : i32
    %127 = arith.index_cast %126 : i32 to index
    %128 = memref.load %arg1[%127] : memref<42xf32, #tpu.memory_space<smem>>
    %cst_84 = arith.constant 0.000000e+00 : f32
    %129 = arith.subf %cst_84, %128 : f32
    %130 = vector.broadcast %129 : f32 to vector<16x1xf32>
    %131 = arith.mulf %130, %47 : vector<16x1xf32>
    %132 = math.exp %131 : vector<16x1xf32>
    %cst_85 = arith.constant 0.000000e+00 : f32
    %133 = arith.subf %cst_85, %128 : f32
    %134 = vector.broadcast %133 : f32 to vector<1x128xf32>
    %135 = arith.mulf %134, %51 : vector<1x128xf32>
    %136 = math.exp %135 : vector<1x128xf32>
    %137 = vector.broadcast %124 : f32 to vector<16x128xf32>
    %138 = arith.mulf %137, %121 : vector<16x128xf32>
    %139 = vector.broadcast %132 : vector<16x1xf32> to vector<16x128xf32>
    %140 = arith.mulf %138, %139 : vector<16x128xf32>
    %141 = vector.broadcast %136 : vector<1x128xf32> to vector<16x128xf32>
    %142 = arith.mulf %140, %141 : vector<16x128xf32>
    %143 = arith.addf %116, %142 : vector<16x128xf32>
    %c3_86 = arith.constant 3 : index
    %c0_87 = arith.constant 0 : index
    %c0_88 = arith.constant 0 : index
    %144 = vector.load %arg6[%c3_86, %c0_87, %c0_88] : memref<10x16x1152xbf16, #tpu.memory_space<vmem>>, vector<1x16x1152xbf16>
    %145 = vector.shape_cast %144 : vector<1x16x1152xbf16> to vector<16x1152xbf16>
    %c3_89 = arith.constant 3 : index
    %c0_90 = arith.constant 0 : index
    %c0_91 = arith.constant 0 : index
    %146 = vector.load %arg3[%c3_89, %c0_90, %c0_91] : memref<10x1152x128xbf16, #tpu.memory_space<vmem>>, vector<1x1152x128xbf16>
    %147 = vector.shape_cast %146 : vector<1x1152x128xbf16> to vector<1152x128xbf16>
    %cst_92 = arith.constant dense<0.000000e+00> : vector<16x128xf32>
    %148 = tpu.matmul %145, %147, %cst_92 {dimension_numbers = #tpu.dot_dimension_numbers<[1], [0], [0], [1], [0, 0, 1, 1], [], []>} : vector<16x1152xbf16>, vector<1152x128xbf16>, vector<16x128xf32> -> vector<16x128xf32>
    %c3_i32 = arith.constant 3 : i32
    %149 = arith.addi %55, %c3_i32 : i32
    %150 = arith.index_cast %149 : i32 to index
    %151 = memref.load %arg1[%150] : memref<42xf32, #tpu.memory_space<smem>>
    %c10_i32_93 = arith.constant 10 : i32
    %152 = arith.addi %55, %c10_i32_93 : i32
    %c3_i32_94 = arith.constant 3 : i32
    %153 = arith.addi %152, %c3_i32_94 : i32
    %154 = arith.index_cast %153 : i32 to index
    %155 = memref.load %arg1[%154] : memref<42xf32, #tpu.memory_space<smem>>
    %cst_95 = arith.constant 0.000000e+00 : f32
    %156 = arith.subf %cst_95, %155 : f32
    %157 = vector.broadcast %156 : f32 to vector<16x1xf32>
    %158 = arith.mulf %157, %47 : vector<16x1xf32>
    %159 = math.exp %158 : vector<16x1xf32>
    %cst_96 = arith.constant 0.000000e+00 : f32
    %160 = arith.subf %cst_96, %155 : f32
    %161 = vector.broadcast %160 : f32 to vector<1x128xf32>
    %162 = arith.mulf %161, %51 : vector<1x128xf32>
    %163 = math.exp %162 : vector<1x128xf32>
    %164 = vector.broadcast %151 : f32 to vector<16x128xf32>
    %165 = arith.mulf %164, %148 : vector<16x128xf32>
    %166 = vector.broadcast %159 : vector<16x1xf32> to vector<16x128xf32>
    %167 = arith.mulf %165, %166 : vector<16x128xf32>
    %168 = vector.broadcast %163 : vector<1x128xf32> to vector<16x128xf32>
    %169 = arith.mulf %167, %168 : vector<16x128xf32>
    %170 = arith.addf %143, %169 : vector<16x128xf32>
    %c4_97 = arith.constant 4 : index
    %c0_98 = arith.constant 0 : index
    %c0_99 = arith.constant 0 : index
    %171 = vector.load %arg6[%c4_97, %c0_98, %c0_99] : memref<10x16x1152xbf16, #tpu.memory_space<vmem>>, vector<1x16x1152xbf16>
    %172 = vector.shape_cast %171 : vector<1x16x1152xbf16> to vector<16x1152xbf16>
    %c4_100 = arith.constant 4 : index
    %c0_101 = arith.constant 0 : index
    %c0_102 = arith.constant 0 : index
    %173 = vector.load %arg3[%c4_100, %c0_101, %c0_102] : memref<10x1152x128xbf16, #tpu.memory_space<vmem>>, vector<1x1152x128xbf16>
    %174 = vector.shape_cast %173 : vector<1x1152x128xbf16> to vector<1152x128xbf16>
    %cst_103 = arith.constant dense<0.000000e+00> : vector<16x128xf32>
    %175 = tpu.matmul %172, %174, %cst_103 {dimension_numbers = #tpu.dot_dimension_numbers<[1], [0], [0], [1], [0, 0, 1, 1], [], []>} : vector<16x1152xbf16>, vector<1152x128xbf16>, vector<16x128xf32> -> vector<16x128xf32>
    %c4_i32 = arith.constant 4 : i32
    %176 = arith.addi %55, %c4_i32 : i32
    %177 = arith.index_cast %176 : i32 to index
    %178 = memref.load %arg1[%177] : memref<42xf32, #tpu.memory_space<smem>>
    %c10_i32_104 = arith.constant 10 : i32
    %179 = arith.addi %55, %c10_i32_104 : i32
    %c4_i32_105 = arith.constant 4 : i32
    %180 = arith.addi %179, %c4_i32_105 : i32
    %181 = arith.index_cast %180 : i32 to index
    %182 = memref.load %arg1[%181] : memref<42xf32, #tpu.memory_space<smem>>
    %cst_106 = arith.constant 0.000000e+00 : f32
    %183 = arith.subf %cst_106, %182 : f32
    %184 = vector.broadcast %183 : f32 to vector<16x1xf32>
    %185 = arith.mulf %184, %47 : vector<16x1xf32>
    %186 = math.exp %185 : vector<16x1xf32>
    %cst_107 = arith.constant 0.000000e+00 : f32
    %187 = arith.subf %cst_107, %182 : f32
    %188 = vector.broadcast %187 : f32 to vector<1x128xf32>
    %189 = arith.mulf %188, %51 : vector<1x128xf32>
    %190 = math.exp %189 : vector<1x128xf32>
    %191 = vector.broadcast %178 : f32 to vector<16x128xf32>
    %192 = arith.mulf %191, %175 : vector<16x128xf32>
    %193 = vector.broadcast %186 : vector<16x1xf32> to vector<16x128xf32>
    %194 = arith.mulf %192, %193 : vector<16x128xf32>
    %195 = vector.broadcast %190 : vector<1x128xf32> to vector<16x128xf32>
    %196 = arith.mulf %194, %195 : vector<16x128xf32>
    %197 = arith.addf %170, %196 : vector<16x128xf32>
    %c5 = arith.constant 5 : index
    %c0_108 = arith.constant 0 : index
    %c0_109 = arith.constant 0 : index
    %198 = vector.load %arg6[%c5, %c0_108, %c0_109] : memref<10x16x1152xbf16, #tpu.memory_space<vmem>>, vector<1x16x1152xbf16>
    %199 = vector.shape_cast %198 : vector<1x16x1152xbf16> to vector<16x1152xbf16>
    %c5_110 = arith.constant 5 : index
    %c0_111 = arith.constant 0 : index
    %c0_112 = arith.constant 0 : index
    %200 = vector.load %arg3[%c5_110, %c0_111, %c0_112] : memref<10x1152x128xbf16, #tpu.memory_space<vmem>>, vector<1x1152x128xbf16>
    %201 = vector.shape_cast %200 : vector<1x1152x128xbf16> to vector<1152x128xbf16>
    %cst_113 = arith.constant dense<0.000000e+00> : vector<16x128xf32>
    %202 = tpu.matmul %199, %201, %cst_113 {dimension_numbers = #tpu.dot_dimension_numbers<[1], [0], [0], [1], [0, 0, 1, 1], [], []>} : vector<16x1152xbf16>, vector<1152x128xbf16>, vector<16x128xf32> -> vector<16x128xf32>
    %c5_i32 = arith.constant 5 : i32
    %203 = arith.addi %55, %c5_i32 : i32
    %204 = arith.index_cast %203 : i32 to index
    %205 = memref.load %arg1[%204] : memref<42xf32, #tpu.memory_space<smem>>
    %c10_i32_114 = arith.constant 10 : i32
    %206 = arith.addi %55, %c10_i32_114 : i32
    %c5_i32_115 = arith.constant 5 : i32
    %207 = arith.addi %206, %c5_i32_115 : i32
    %208 = arith.index_cast %207 : i32 to index
    %209 = memref.load %arg1[%208] : memref<42xf32, #tpu.memory_space<smem>>
    %cst_116 = arith.constant 0.000000e+00 : f32
    %210 = arith.subf %cst_116, %209 : f32
    %211 = vector.broadcast %210 : f32 to vector<16x1xf32>
    %212 = arith.mulf %211, %47 : vector<16x1xf32>
    %213 = math.exp %212 : vector<16x1xf32>
    %cst_117 = arith.constant 0.000000e+00 : f32
    %214 = arith.subf %cst_117, %209 : f32
    %215 = vector.broadcast %214 : f32 to vector<1x128xf32>
    %216 = arith.mulf %215, %51 : vector<1x128xf32>
    %217 = math.exp %216 : vector<1x128xf32>
    %218 = vector.broadcast %205 : f32 to vector<16x128xf32>
    %219 = arith.mulf %218, %202 : vector<16x128xf32>
    %220 = vector.broadcast %213 : vector<16x1xf32> to vector<16x128xf32>
    %221 = arith.mulf %219, %220 : vector<16x128xf32>
    %222 = vector.broadcast %217 : vector<1x128xf32> to vector<16x128xf32>
    %223 = arith.mulf %221, %222 : vector<16x128xf32>
    %224 = arith.addf %197, %223 : vector<16x128xf32>
    %c6 = arith.constant 6 : index
    %c0_118 = arith.constant 0 : index
    %c0_119 = arith.constant 0 : index
    %225 = vector.load %arg6[%c6, %c0_118, %c0_119] : memref<10x16x1152xbf16, #tpu.memory_space<vmem>>, vector<1x16x1152xbf16>
    %226 = vector.shape_cast %225 : vector<1x16x1152xbf16> to vector<16x1152xbf16>
    %c6_120 = arith.constant 6 : index
    %c0_121 = arith.constant 0 : index
    %c0_122 = arith.constant 0 : index
    %227 = vector.load %arg3[%c6_120, %c0_121, %c0_122] : memref<10x1152x128xbf16, #tpu.memory_space<vmem>>, vector<1x1152x128xbf16>
    %228 = vector.shape_cast %227 : vector<1x1152x128xbf16> to vector<1152x128xbf16>
    %cst_123 = arith.constant dense<0.000000e+00> : vector<16x128xf32>
    %229 = tpu.matmul %226, %228, %cst_123 {dimension_numbers = #tpu.dot_dimension_numbers<[1], [0], [0], [1], [0, 0, 1, 1], [], []>} : vector<16x1152xbf16>, vector<1152x128xbf16>, vector<16x128xf32> -> vector<16x128xf32>
    %c6_i32 = arith.constant 6 : i32
    %230 = arith.addi %55, %c6_i32 : i32
    %231 = arith.index_cast %230 : i32 to index
    %232 = memref.load %arg1[%231] : memref<42xf32, #tpu.memory_space<smem>>
    %c10_i32_124 = arith.constant 10 : i32
    %233 = arith.addi %55, %c10_i32_124 : i32
    %c6_i32_125 = arith.constant 6 : i32
    %234 = arith.addi %233, %c6_i32_125 : i32
    %235 = arith.index_cast %234 : i32 to index
    %236 = memref.load %arg1[%235] : memref<42xf32, #tpu.memory_space<smem>>
    %cst_126 = arith.constant 0.000000e+00 : f32
    %237 = arith.subf %cst_126, %236 : f32
    %238 = vector.broadcast %237 : f32 to vector<16x1xf32>
    %239 = arith.mulf %238, %47 : vector<16x1xf32>
    %240 = math.exp %239 : vector<16x1xf32>
    %cst_127 = arith.constant 0.000000e+00 : f32
    %241 = arith.subf %cst_127, %236 : f32
    %242 = vector.broadcast %241 : f32 to vector<1x128xf32>
    %243 = arith.mulf %242, %51 : vector<1x128xf32>
    %244 = math.exp %243 : vector<1x128xf32>
    %245 = vector.broadcast %232 : f32 to vector<16x128xf32>
    %246 = arith.mulf %245, %229 : vector<16x128xf32>
    %247 = vector.broadcast %240 : vector<16x1xf32> to vector<16x128xf32>
    %248 = arith.mulf %246, %247 : vector<16x128xf32>
    %249 = vector.broadcast %244 : vector<1x128xf32> to vector<16x128xf32>
    %250 = arith.mulf %248, %249 : vector<16x128xf32>
    %251 = arith.addf %224, %250 : vector<16x128xf32>
    %c7 = arith.constant 7 : index
    %c0_128 = arith.constant 0 : index
    %c0_129 = arith.constant 0 : index
    %252 = vector.load %arg6[%c7, %c0_128, %c0_129] : memref<10x16x1152xbf16, #tpu.memory_space<vmem>>, vector<1x16x1152xbf16>
    %253 = vector.shape_cast %252 : vector<1x16x1152xbf16> to vector<16x1152xbf16>
    %c7_130 = arith.constant 7 : index
    %c0_131 = arith.constant 0 : index
    %c0_132 = arith.constant 0 : index
    %254 = vector.load %arg3[%c7_130, %c0_131, %c0_132] : memref<10x1152x128xbf16, #tpu.memory_space<vmem>>, vector<1x1152x128xbf16>
    %255 = vector.shape_cast %254 : vector<1x1152x128xbf16> to vector<1152x128xbf16>
    %cst_133 = arith.constant dense<0.000000e+00> : vector<16x128xf32>
    %256 = tpu.matmul %253, %255, %cst_133 {dimension_numbers = #tpu.dot_dimension_numbers<[1], [0], [0], [1], [0, 0, 1, 1], [], []>} : vector<16x1152xbf16>, vector<1152x128xbf16>, vector<16x128xf32> -> vector<16x128xf32>
    %c7_i32 = arith.constant 7 : i32
    %257 = arith.addi %55, %c7_i32 : i32
    %258 = arith.index_cast %257 : i32 to index
    %259 = memref.load %arg1[%258] : memref<42xf32, #tpu.memory_space<smem>>
    %c10_i32_134 = arith.constant 10 : i32
    %260 = arith.addi %55, %c10_i32_134 : i32
    %c7_i32_135 = arith.constant 7 : i32
    %261 = arith.addi %260, %c7_i32_135 : i32
    %262 = arith.index_cast %261 : i32 to index
    %263 = memref.load %arg1[%262] : memref<42xf32, #tpu.memory_space<smem>>
    %cst_136 = arith.constant 0.000000e+00 : f32
    %264 = arith.subf %cst_136, %263 : f32
    %265 = vector.broadcast %264 : f32 to vector<16x1xf32>
    %266 = arith.mulf %265, %47 : vector<16x1xf32>
    %267 = math.exp %266 : vector<16x1xf32>
    %cst_137 = arith.constant 0.000000e+00 : f32
    %268 = arith.subf %cst_137, %263 : f32
    %269 = vector.broadcast %268 : f32 to vector<1x128xf32>
    %270 = arith.mulf %269, %51 : vector<1x128xf32>
    %271 = math.exp %270 : vector<1x128xf32>
    %272 = vector.broadcast %259 : f32 to vector<16x128xf32>
    %273 = arith.mulf %272, %256 : vector<16x128xf32>
    %274 = vector.broadcast %267 : vector<16x1xf32> to vector<16x128xf32>
    %275 = arith.mulf %273, %274 : vector<16x128xf32>
    %276 = vector.broadcast %271 : vector<1x128xf32> to vector<16x128xf32>
    %277 = arith.mulf %275, %276 : vector<16x128xf32>
    %278 = arith.addf %251, %277 : vector<16x128xf32>
    %c8 = arith.constant 8 : index
    %c0_138 = arith.constant 0 : index
    %c0_139 = arith.constant 0 : index
    %279 = vector.load %arg6[%c8, %c0_138, %c0_139] : memref<10x16x1152xbf16, #tpu.memory_space<vmem>>, vector<1x16x1152xbf16>
    %280 = vector.shape_cast %279 : vector<1x16x1152xbf16> to vector<16x1152xbf16>
    %c8_140 = arith.constant 8 : index
    %c0_141 = arith.constant 0 : index
    %c0_142 = arith.constant 0 : index
    %281 = vector.load %arg3[%c8_140, %c0_141, %c0_142] : memref<10x1152x128xbf16, #tpu.memory_space<vmem>>, vector<1x1152x128xbf16>
    %282 = vector.shape_cast %281 : vector<1x1152x128xbf16> to vector<1152x128xbf16>
    %cst_143 = arith.constant dense<0.000000e+00> : vector<16x128xf32>
    %283 = tpu.matmul %280, %282, %cst_143 {dimension_numbers = #tpu.dot_dimension_numbers<[1], [0], [0], [1], [0, 0, 1, 1], [], []>} : vector<16x1152xbf16>, vector<1152x128xbf16>, vector<16x128xf32> -> vector<16x128xf32>
    %c8_i32 = arith.constant 8 : i32
    %284 = arith.addi %55, %c8_i32 : i32
    %285 = arith.index_cast %284 : i32 to index
    %286 = memref.load %arg1[%285] : memref<42xf32, #tpu.memory_space<smem>>
    %c10_i32_144 = arith.constant 10 : i32
    %287 = arith.addi %55, %c10_i32_144 : i32
    %c8_i32_145 = arith.constant 8 : i32
    %288 = arith.addi %287, %c8_i32_145 : i32
    %289 = arith.index_cast %288 : i32 to index
    %290 = memref.load %arg1[%289] : memref<42xf32, #tpu.memory_space<smem>>
    %cst_146 = arith.constant 0.000000e+00 : f32
    %291 = arith.subf %cst_146, %290 : f32
    %292 = vector.broadcast %291 : f32 to vector<16x1xf32>
    %293 = arith.mulf %292, %47 : vector<16x1xf32>
    %294 = math.exp %293 : vector<16x1xf32>
    %cst_147 = arith.constant 0.000000e+00 : f32
    %295 = arith.subf %cst_147, %290 : f32
    %296 = vector.broadcast %295 : f32 to vector<1x128xf32>
    %297 = arith.mulf %296, %51 : vector<1x128xf32>
    %298 = math.exp %297 : vector<1x128xf32>
    %299 = vector.broadcast %286 : f32 to vector<16x128xf32>
    %300 = arith.mulf %299, %283 : vector<16x128xf32>
    %301 = vector.broadcast %294 : vector<16x1xf32> to vector<16x128xf32>
    %302 = arith.mulf %300, %301 : vector<16x128xf32>
    %303 = vector.broadcast %298 : vector<1x128xf32> to vector<16x128xf32>
    %304 = arith.mulf %302, %303 : vector<16x128xf32>
    %305 = arith.addf %278, %304 : vector<16x128xf32>
    %c9 = arith.constant 9 : index
    %c0_148 = arith.constant 0 : index
    %c0_149 = arith.constant 0 : index
    %306 = vector.load %arg6[%c9, %c0_148, %c0_149] : memref<10x16x1152xbf16, #tpu.memory_space<vmem>>, vector<1x16x1152xbf16>
    %307 = vector.shape_cast %306 : vector<1x16x1152xbf16> to vector<16x1152xbf16>
    %c9_150 = arith.constant 9 : index
    %c0_151 = arith.constant 0 : index
    %c0_152 = arith.constant 0 : index
    %308 = vector.load %arg3[%c9_150, %c0_151, %c0_152] : memref<10x1152x128xbf16, #tpu.memory_space<vmem>>, vector<1x1152x128xbf16>
    %309 = vector.shape_cast %308 : vector<1x1152x128xbf16> to vector<1152x128xbf16>
    %cst_153 = arith.constant dense<0.000000e+00> : vector<16x128xf32>
    %310 = tpu.matmul %307, %309, %cst_153 {dimension_numbers = #tpu.dot_dimension_numbers<[1], [0], [0], [1], [0, 0, 1, 1], [], []>} : vector<16x1152xbf16>, vector<1152x128xbf16>, vector<16x128xf32> -> vector<16x128xf32>
    %c9_i32 = arith.constant 9 : i32
    %311 = arith.addi %55, %c9_i32 : i32
    %312 = arith.index_cast %311 : i32 to index
    %313 = memref.load %arg1[%312] : memref<42xf32, #tpu.memory_space<smem>>
    %c10_i32_154 = arith.constant 10 : i32
    %314 = arith.addi %55, %c10_i32_154 : i32
    %c9_i32_155 = arith.constant 9 : i32
    %315 = arith.addi %314, %c9_i32_155 : i32
    %316 = arith.index_cast %315 : i32 to index
    %317 = memref.load %arg1[%316] : memref<42xf32, #tpu.memory_space<smem>>
    %cst_156 = arith.constant 0.000000e+00 : f32
    %318 = arith.subf %cst_156, %317 : f32
    %319 = vector.broadcast %318 : f32 to vector<16x1xf32>
    %320 = arith.mulf %319, %47 : vector<16x1xf32>
    %321 = math.exp %320 : vector<16x1xf32>
    %cst_157 = arith.constant 0.000000e+00 : f32
    %322 = arith.subf %cst_157, %317 : f32
    %323 = vector.broadcast %322 : f32 to vector<1x128xf32>
    %324 = arith.mulf %323, %51 : vector<1x128xf32>
    %325 = math.exp %324 : vector<1x128xf32>
    %326 = vector.broadcast %313 : f32 to vector<16x128xf32>
    %327 = arith.mulf %326, %310 : vector<16x128xf32>
    %328 = vector.broadcast %321 : vector<16x1xf32> to vector<16x128xf32>
    %329 = arith.mulf %327, %328 : vector<16x128xf32>
    %330 = vector.broadcast %325 : vector<1x128xf32> to vector<16x128xf32>
    %331 = arith.mulf %329, %330 : vector<16x128xf32>
    %332 = arith.addf %305, %331 : vector<16x128xf32>
    %c0_158 = arith.constant 0 : index
    %c0_159 = arith.constant 0 : index
    %c0_160 = arith.constant 0 : index
    %333 = vector.load %arg5[%c0_158, %c0_159, %c0_160] : memref<1x16x128xf32, #tpu.memory_space<vmem>>, vector<1x16x128xf32>
    %334 = vector.shape_cast %333 : vector<1x16x128xf32> to vector<16x128xf32>
    %335 = vector.shape_cast %332 : vector<16x128xf32> to vector<1x16x128xf32>
    tpu.vector_store %arg5[%c0_158, %c0_159, %c0_160], %335 {strides = array<i32>} : memref<1x16x128xf32, #tpu.memory_space<vmem>>, vector<1x16x128xf32>,
    return
  }
  func.func @transform_0(%arg0: i32) -> i32 {
    %c0_i32 = arith.constant 0 : i32
    %c0_i32_0 = arith.constant 0 : i32
    return %c0_i32 : i32
  }
  func.func @transform_1(%arg0: i32) -> (i32, i32, i32, i32) {
    %c0_i32 = arith.constant 0 : i32
    %c0_i32_0 = arith.constant 0 : i32
    %c0_i32_1 = arith.constant 0 : i32
    %c0_i32_2 = arith.constant 0 : i32
    return %arg0, %c0_i32, %c0_i32_0, %c0_i32_1 : i32, i32, i32, i32
  }
  func.func @transform_2(%arg0: i32) -> (i32, i32, i32) {
    %c0_i32 = arith.constant 0 : i32
    %c0_i32_0 = arith.constant 0 : i32
    %c0_i32_1 = arith.constant 0 : i32
    %c0_i32_2 = arith.constant 0 : i32
    return %c0_i32, %c0_i32_0, %c0_i32_1 : i32, i32, i32
  }
  func.func @transform_3(%arg0: i32) -> (i32, i32, i32) {
    %c0_i32 = arith.constant 0 : i32
    %c0_i32_0 = arith.constant 0 : i32
    %c0_i32_1 = arith.constant 0 : i32
    return %arg0, %c0_i32, %c0_i32_0 : i32, i32, i32
  }
  func.func @transform_4(%arg0: i32) -> (i32, i32, i32) {
    %c0_i32 = arith.constant 0 : i32
    %c0_i32_0 = arith.constant 0 : i32
    %c0_i32_1 = arith.constant 0 : i32
    return %arg0, %c0_i32, %c0_i32_0 : i32, i32, i32
  }
}

</mosaic_0001>

<bundles_post_ra>
// kernel: fins_forward.2
= control target key start
LH: loop header
LB: loop body
LE: loop exit
PB: predicated region body
PF: predicated region fallthrough
CT: control target
= control target key end

     0   :  { %8 = vsyncpa [#allocation3], 0  ;;  %s2992_s12 = smov [#allocation2]   ;;  %s3184_s0 = inlined_call_operand.vmem [shape: f32[2,278], index: 0, kind: input, shape index: {}]   ;;  %s3185_s1 = inlined_call_operand.hbm [shape: f32[278,2176], index: 1, kind: input, shape index: {}]   ;;  %s3186_s2 = inlined_call_operand.vmem [shape: f32[1,2176], index: 2, kind: input, shape index: {}]   ;;  %s3187_s3 = inlined_call_operand.vmem [shape: f32[2,2176], index: 3, kind: output, shape index: {}]  }
   0x1   :  { %s16_s13 = sshll.u32 %s2992_s12, 4  ;;  %s2968_s16 = scalar_lea.hbm %s3185_s1, 76160  ;;  %s17_s13 = int_to_ptr.vmem [resolvable:$true] %s16_s13 }
   0x2   :  { %p2969_p0 = scmp.ne.s32.totalorder %s3185_s1, %s2968_s16  ;;  %p2972_p1 = scmp.lt.u32.totalorder %s2968_s16, %s3185_s1 }
   0x4   :  { %p2974_p2 = pnand %p2972_p1, %p2969_p0 }
   0x6   :  { %2977 = shalt.err (!%p2974_p2)
}
   0x7   :  { %s2978_s21 = scalar_lea.vmem %s17_s13, 76160  ;;  %p2983_p4 = scmp.lt.s32.totalorder %s17_s13, %s17_s13 }
   0x8   :  { %p2979_p3 = scmp.ne.s32.totalorder %s17_s13, %s2978_s21  ;;  %p2984_p5 = scmp.lt.s32.totalorder %s2978_s21, %s2978_s21 }
   0xa   :  { %p2985_p6 = por %p2984_p5, %p2983_p4 }
   0xc   :  { %p2986_p7 = pnand %p2985_p6, %p2979_p3 }
   0xe   :  { %2989 = shalt.err (!%p2986_p7)
}
   0xf   :  { %s2993_s22 = smov 2176   ;;  %s2994_s23 = smov 136  }
  0x10   :  { %22 = dma.hbm_to_vmem [thread:$0]  %s3185_s1, 76160, %s17_s13, [#allocation3], %s2993_s22, %s2993_s22, %s2994_s23  }
  0x11   :  { %2990 = dma.done.wait [#allocation3], 76160  }
  0x12   :  { %2991 = vsyncadd [#allocation3], 4294891136  ;;  %v2995_v0 = vmov 0.0   ;;  %v630_v1 = vlaneseq  ;;  %v2996_v2 = vmov 1983009808   ;;  %v30_v6 = vld [vmem:[#allocation2 + $0x8] sm:$0xff] }
  0x13   :  { %924 = vmatprep.mubr.f32.mxu1 %v2995_v0  ;;  %v718_v3 = vunpack.c.l.s4 %v2996_v2  ;;  %v47_v7 = vld [vmem:[#allocation2 + $0x90] sm:$0xff]  ;;  %v574_v8 = vld [vmem:[#allocation2 + $0x1108] sm:$0xff]  ;;  %v29_v11 = vld [vmem:[#allocation2] sm:$0xff]  ;;  %vm737_vm0 = vcmask 1045504   ;;  %vm734_vm1 = vcmask 179200   ;;  %vm2998_vm2 = vmmov 0  }
  0x14   :  { %v3032_v4 = vshrl.u32 %v630_v1, 7  ;;  %v2317_v9 = vpack.c.bf16 %v47_v7, %v30_v6  ;;  %v591_v10 = vld [vmem:[#allocation2 + $0x1190] sm:$0xff]  ;;  %v46_v12 = vld [vmem:[#allocation2 + $0x88] sm:$0xff]  ;;  %v573_v15 = vld [vmem:[#allocation2 + $0x1100] sm:$0xff] }
  0x15   :  { %v719_v5 = vunpack.c.0.s8 %v718_v3  ;;  %v2381_v13 = vpack.c.bf16 %v591_v10, %v574_v8  ;;  %v2319_v14 = vpack.c.bf16 %v46_v12, %v29_v11  ;;  %v590_v16 = vld [vmem:[#allocation2 + $0x1188] sm:$0xff]  ;;  %v64_v17 = vld [vmem:[#allocation2 + $0x118] sm:$0xff]  ;;  %v81_v19 = vld [vmem:[#allocation2 + $0x1a0] sm:$0xff] }
  0x16   :  { %2318 = vmatprep.subr.bf16.mxu0 %v2317_v9  ;;  %v2383_v18 = vpack.c.bf16 %v590_v16, %v573_v15  ;;  %v608_v20 = vld [vmem:[#allocation2 + $0x1218] sm:$0x3f]  ;;  %v63_v21 = vld [vmem:[#allocation2 + $0x110] sm:$0xff]  ;;  %v2321_v23 = vpack.c.bf16 %v81_v19, %v64_v17  ;;  %v28_v26 = vld [vmem:[%s3184_s0] sm:$0x3f] }
  0x17   :  { %v3035_v22 = vsub.s32 %v719_v5, %v3032_v4  ;;  %2382 = vmatprep.subr.bf16.mxu1 %v2381_v13  ;;  %2320 = vmatpush1.bf16.msra.mxu0 %v2319_v14  ;;  %v80_v24 = vld [vmem:[#allocation2 + $0x198] sm:$0xff]  ;;  %v607_v25 = vld [vmem:[#allocation2 + $0x1210] sm:$0x3f]  ;;  %v716_v28 = vcombine.high %v28_v26, %v28_v26  ;;  %v49_v31 = vld [vmem:[#allocation2 + $0xa0] sm:$0xff] }
  0x18   :  { %2384 = vmatpush1.bf16.msra.mxu1 %v2383_v18  ;;  %v2323_v27 = vpack.c.bf16 %v80_v24, %v63_v21  ;;  %v32_v30 = vld [vmem:[#allocation2 + $0x18] sm:$0xff]  ;;  %v31_v32 = vld [vmem:[#allocation2 + $0x10] sm:$0xff]  ;;  %2322 = vmatprep.subr.bf16.mxu0 %v2321_v23  ;;  %v98_v35 = vld [vmem:[#allocation2 + $0x228] sm:$0xff] }
  0x19   :  { %v3041_v29 = vrot.slane %v28_v26, %v3035_v22  ;;  %2242 = vmatprep.subr.msk.mxu1 %vm737_vm0, %v608_v20  ;;  %v2385_v33 = vpack.c.bf16 %v49_v31, %v32_v30  ;;  %v48_v34 = vld [vmem:[#allocation2 + $0x98] sm:$0xff]  ;;  %v115_v36 = vld [vmem:[#allocation2 + $0x2b0] sm:$0xff]  ;;  %v3045_v37 = vrot.slane %v716_v28, %v3035_v22  ;;  %v97_v40 = vld [vmem:[#allocation2 + $0x220] sm:$0xff] }
  0x1a   :  { %v2387_v38 = vpack.c.bf16 %v48_v34, %v31_v32  ;;  %v2325_v39 = vpack.c.bf16 %v115_v36, %v98_v35  ;;  %v114_v41 = vld [vmem:[#allocation2 + $0x2a8] sm:$0xff]  ;;  %v83_v45 = vld [vmem:[#allocation2 + $0x1b0] sm:$0xff]  ;;  %v65_v46 = vld [vmem:[#allocation2 + $0x120] sm:$0xff] }
  0x1b   :  { %v66_v42 = vld [vmem:[#allocation2 + $0x128] sm:$0xff]  ;;  %v3049_v43 = vcombine.high %v3041_v29, %v3041_v29  ;;  %2324 = vmatpush1.bf16.msra.mxu0 %v2323_v27  ;;  %v2327_v44 = vpack.c.bf16 %v114_v41, %v97_v40  ;;  %v132_v49 = vld [vmem:[#allocation2 + $0x338] sm:$0xff]  ;;  %v149_v50 = vld [vmem:[#allocation2 + $0x3c0] sm:$0xff] }
  0x1c   :  { %v82_v47 = vld [vmem:[#allocation2 + $0x1a8] sm:$0xff]  ;;  %2243 = vmatpush1.msk.msra.mxu1 %vm737_vm0, %v607_v25  ;;  %2326 = vmatprep.subr.bf16.mxu0 %v2325_v39  ;;  %v2389_v48 = vpack.c.bf16 %v83_v45, %v66_v42  ;;  %v131_v51 = vld [vmem:[#allocation2 + $0x330] sm:$0xff]  ;;  %v2329_v52 = vpack.c.bf16 %v149_v50, %v132_v49  ;;  %v148_v53 = vld [vmem:[#allocation2 + $0x3b8] sm:$0xff] }
  0x1d   :  { %2244 = vmatmul.mubr.msk.f32.vlgmr.msra.gmra.mrb[0].mxu1 %vm734_vm1, %v3045_v37  ;;  %2386 = vmatprep.subr.bf16.mxu1 %v2385_v33  ;;  %v100_v54 = vld [vmem:[#allocation2 + $0x238] sm:$0xff]  ;;  %v117_v55 = vld [vmem:[#allocation2 + $0x2c0] sm:$0xff]  ;;  %v2391_v56 = vpack.c.bf16 %v82_v47, %v65_v46  ;;  %v99_v57 = vld [vmem:[#allocation2 + $0x230] sm:$0xff]  ;;  %v2331_v59 = vpack.c.bf16 %v148_v53, %v131_v51 }
  0x1e   :  { %2388 = vmatpush1.bf16.msra.mxu1 %v2387_v38  ;;  %v166_v58 = vld [vmem:[#allocation2 + $0x448] sm:$0xff]  ;;  %853 = vmatprep.mubr.f32.mxu0 %v3049_v43  ;;  %v2393_v60 = vpack.c.bf16 %v117_v55, %v100_v54  ;;  %v116_v61 = vld [vmem:[#allocation2 + $0x2b8] sm:$0xff]  ;;  %v183_v62 = vld [vmem:[#allocation2 + $0x4d0] sm:$0xff] }
  0x1f   :  { %2328 = vmatpush1.bf16.msra.mxu0 %v2327_v44  ;;  %2390 = vmatprep.subr.bf16.mxu1 %v2389_v48  ;;  %v165_v63 = vld [vmem:[#allocation2 + $0x440] sm:$0xff]  ;;  %v2333_v1 = vpack.c.bf16 %v183_v62, %v166_v58  ;;  %v182_v2 = vld [vmem:[#allocation2 + $0x4c8] sm:$0xff]  ;;  %v151_v5 = vld [vmem:[#allocation2 + $0x3d0] sm:$0xff]  ;;  %v2395_v8 = vpack.c.bf16 %v116_v61, %v99_v57 }
  0x20   :  { %2330 = vmatprep.subr.bf16.mxu0 %v2329_v52  ;;  %v134_v3 = vld [vmem:[#allocation2 + $0x348] sm:$0xff]  ;;  %995 = vmatprep.mubr.f32.mxu1 %v3049_v43  ;;  %v200_v6 = vld [vmem:[#allocation2 + $0x558] sm:$0xff]  ;;  %v217_v7 = vld [vmem:[#allocation2 + $0x5e0] sm:$0xff]  ;;  %v2335_v9 = vpack.c.bf16 %v182_v2, %v165_v63 }
  0x21   :  { %v2397_v10 = vpack.c.bf16 %v151_v5, %v134_v3  ;;  %v133_v11 = vld [vmem:[#allocation2 + $0x340] sm:$0xff]  ;;  %v150_v12 = vld [vmem:[#allocation2 + $0x3c8] sm:$0xff]  ;;  %v199_v13 = vld [vmem:[#allocation2 + $0x550] sm:$0xff]  ;;  %v2337_v14 = vpack.c.bf16 %v217_v7, %v200_v6 }
  0x22   :  { %2392 = vmatpush1.bf16.msra.mxu1 %v2391_v56  ;;  %v216_v15 = vld [vmem:[#allocation2 + $0x5d8] sm:$0xff]  ;;  %v185_v17 = vld [vmem:[#allocation2 + $0x4e0] sm:$0xff]  ;;  %v234_v18 = vld [vmem:[#allocation2 + $0x668] sm:$0xff]  ;;  %v2399_v20 = vpack.c.bf16 %v150_v12, %v133_v11 }
  0x23   :  { %2332 = vmatpush1.bf16.msra.mxu0 %v2331_v59  ;;  %2394 = vmatprep.subr.bf16.mxu1 %v2393_v60  ;;  %v168_v16 = vld [vmem:[#allocation2 + $0x458] sm:$0xff]  ;;  %v251_v19 = vld [vmem:[#allocation2 + $0x6f0] sm:$0xff]  ;;  %v2339_v21 = vpack.c.bf16 %v216_v15, %v199_v13  ;;  %v233_v26 = vld [vmem:[#allocation2 + $0x660] sm:$0xff] }
  0x24   :  { %2334 = vmatprep.subr.bf16.mxu0 %v2333_v1  ;;  %v2401_v23 = vpack.c.bf16 %v185_v17, %v168_v16  ;;  %v167_v24 = vld [vmem:[#allocation2 + $0x450] sm:$0xff]  ;;  %v184_v25 = vld [vmem:[#allocation2 + $0x4d8] sm:$0xff]  ;;  %v2341_v27 = vpack.c.bf16 %v251_v19, %v234_v18  ;;  %v250_v28 = vld [vmem:[#allocation2 + $0x6e8] sm:$0xff] }
  0x25   :  { %v202_v30 = vld [vmem:[#allocation2 + $0x568] sm:$0xff]  ;;  %v219_v31 = vld [vmem:[#allocation2 + $0x5f0] sm:$0xff]  ;;  %v268_v32 = vld [vmem:[#allocation2 + $0x778] sm:$0xff]  ;;  %v2403_v34 = vpack.c.bf16 %v184_v25, %v167_v24  ;;  %v2343_v35 = vpack.c.bf16 %v250_v28, %v233_v26 }
  0x26   :  { %2396 = vmatpush1.bf16.msra.mxu1 %v2395_v8  ;;  %v285_v33 = vld [vmem:[#allocation2 + $0x800] sm:$0xff]  ;;  %v2405_v36 = vpack.c.bf16 %v219_v31, %v202_v30  ;;  %v218_v39 = vld [vmem:[#allocation2 + $0x5e8] sm:$0xff]  ;;  %v267_v40 = vld [vmem:[#allocation2 + $0x770] sm:$0xff] }
  0x27   :  { %2336 = vmatpush1.bf16.msra.mxu0 %v2335_v9  ;;  %2398 = vmatprep.subr.bf16.mxu1 %v2397_v10  ;;  %v201_v38 = vld [vmem:[#allocation2 + $0x560] sm:$0xff]  ;;  %v2345_v41 = vpack.c.bf16 %v285_v33, %v268_v32  ;;  %v284_v42 = vld [vmem:[#allocation2 + $0x7f8] sm:$0xff]  ;;  %v302_v46 = vld [vmem:[#allocation2 + $0x888] sm:$0xff] }
  0x28   :  { %2338 = vmatprep.subr.bf16.mxu0 %v2337_v14  ;;  %v236_v44 = vld [vmem:[#allocation2 + $0x678] sm:$0xff]  ;;  %v253_v45 = vld [vmem:[#allocation2 + $0x700] sm:$0xff]  ;;  %v319_v47 = vld [vmem:[#allocation2 + $0x910] sm:$0xff]  ;;  %v2407_v48 = vpack.c.bf16 %v218_v39, %v201_v38  ;;  %v2347_v49 = vpack.c.bf16 %v284_v42, %v267_v40 }
  0x29   :  { %v2409_v50 = vpack.c.bf16 %v253_v45, %v236_v44  ;;  %v235_v51 = vld [vmem:[#allocation2 + $0x670] sm:$0xff]  ;;  %v252_v52 = vld [vmem:[#allocation2 + $0x6f8] sm:$0xff]  ;;  %v301_v53 = vld [vmem:[#allocation2 + $0x880] sm:$0xff]  ;;  %v2349_v54 = vpack.c.bf16 %v319_v47, %v302_v46 }
  0x2a   :  { %2400 = vmatpush1.bf16.msra.mxu1 %v2399_v20  ;;  %v318_v55 = vld [vmem:[#allocation2 + $0x908] sm:$0xff]  ;;  %v287_v57 = vld [vmem:[#allocation2 + $0x810] sm:$0xff]  ;;  %v336_v58 = vld [vmem:[#allocation2 + $0x998] sm:$0xff]  ;;  %v2411_v60 = vpack.c.bf16 %v252_v52, %v235_v51 }
  0x2b   :  { %2340 = vmatpush1.bf16.msra.mxu0 %v2339_v21  ;;  %2402 = vmatprep.subr.bf16.mxu1 %v2401_v23  ;;  %v270_v56 = vld [vmem:[#allocation2 + $0x788] sm:$0xff]  ;;  %v353_v59 = vld [vmem:[#allocation2 + $0xa20] sm:$0xff]  ;;  %v2351_v61 = vpack.c.bf16 %v318_v55, %v301_v53  ;;  %v335_v2 = vld [vmem:[#allocation2 + $0x990] sm:$0xff] }
  0x2c   :  { %2342 = vmatprep.subr.bf16.mxu0 %v2341_v27  ;;  %v2413_v62 = vpack.c.bf16 %v287_v57, %v270_v56  ;;  %v269_v63 = vld [vmem:[#allocation2 + $0x780] sm:$0xff]  ;;  %v286_v1 = vld [vmem:[#allocation2 + $0x808] sm:$0xff]  ;;  %v2353_v3 = vpack.c.bf16 %v353_v59, %v336_v58  ;;  %v352_v5 = vld [vmem:[#allocation2 + $0xa18] sm:$0xff] }
  0x2d   :  { %v304_v6 = vld [vmem:[#allocation2 + $0x898] sm:$0xff]  ;;  %v321_v7 = vld [vmem:[#allocation2 + $0x920] sm:$0xff]  ;;  %v370_v8 = vld [vmem:[#allocation2 + $0xaa8] sm:$0xff]  ;;  %v2415_v10 = vpack.c.bf16 %v286_v1, %v269_v63  ;;  %v2355_v11 = vpack.c.bf16 %v352_v5, %v335_v2 }
  0x2e   :  { %2404 = vmatpush1.bf16.msra.mxu1 %v2403_v34  ;;  %v387_v9 = vld [vmem:[#allocation2 + $0xb30] sm:$0xff]  ;;  %v2417_v12 = vpack.c.bf16 %v321_v7, %v304_v6  ;;  %v320_v14 = vld [vmem:[#allocation2 + $0x918] sm:$0xff]  ;;  %v369_v15 = vld [vmem:[#allocation2 + $0xaa0] sm:$0xff] }
  0x2f   :  { %2344 = vmatpush1.bf16.msra.mxu0 %v2343_v35  ;;  %2406 = vmatprep.subr.bf16.mxu1 %v2405_v36  ;;  %v303_v13 = vld [vmem:[#allocation2 + $0x890] sm:$0xff]  ;;  %v2357_v16 = vpack.c.bf16 %v387_v9, %v370_v8  ;;  %v386_v17 = vld [vmem:[#allocation2 + $0xb28] sm:$0xff]  ;;  %v404_v20 = vld [vmem:[#allocation2 + $0xbb8] sm:$0xff] }
  0x30   :  { %2346 = vmatprep.subr.bf16.mxu0 %v2345_v41  ;;  %v338_v18 = vld [vmem:[#allocation2 + $0x9a8] sm:$0xff]  ;;  %v355_v19 = vld [vmem:[#allocation2 + $0xa30] sm:$0xff]  ;;  %v421_v21 = vld [vmem:[#allocation2 + $0xc40] sm:$0xff]  ;;  %v2419_v23 = vpack.c.bf16 %v320_v14, %v303_v13  ;;  %v2359_v24 = vpack.c.bf16 %v386_v17, %v369_v15 }
  0x31   :  { %v2421_v25 = vpack.c.bf16 %v355_v19, %v338_v18  ;;  %v337_v26 = vld [vmem:[#allocation2 + $0x9a0] sm:$0xff]  ;;  %v354_v27 = vld [vmem:[#allocation2 + $0xa28] sm:$0xff]  ;;  %v403_v28 = vld [vmem:[#allocation2 + $0xbb0] sm:$0xff]  ;;  %v2361_v30 = vpack.c.bf16 %v421_v21, %v404_v20 }
  0x32   :  { %2408 = vmatpush1.bf16.msra.mxu1 %v2407_v48  ;;  %v420_v31 = vld [vmem:[#allocation2 + $0xc38] sm:$0xff]  ;;  %v389_v33 = vld [vmem:[#allocation2 + $0xb40] sm:$0xff]  ;;  %v438_v34 = vld [vmem:[#allocation2 + $0xcc8] sm:$0xff]  ;;  %v2423_v36 = vpack.c.bf16 %v354_v27, %v337_v26 }
  0x33   :  { %2348 = vmatpush1.bf16.msra.mxu0 %v2347_v49  ;;  %2410 = vmatprep.subr.bf16.mxu1 %v2409_v50  ;;  %v372_v32 = vld [vmem:[#allocation2 + $0xab8] sm:$0xff]  ;;  %v455_v35 = vld [vmem:[#allocation2 + $0xd50] sm:$0xff]  ;;  %v2363_v38 = vpack.c.bf16 %v420_v31, %v403_v28  ;;  %v437_v42 = vld [vmem:[#allocation2 + $0xcc0] sm:$0xff] }
  0x34   :  { %2350 = vmatprep.subr.bf16.mxu0 %v2349_v54  ;;  %v2425_v39 = vpack.c.bf16 %v389_v33, %v372_v32  ;;  %v371_v40 = vld [vmem:[#allocation2 + $0xab0] sm:$0xff]  ;;  %v388_v41 = vld [vmem:[#allocation2 + $0xb38] sm:$0xff]  ;;  %v2365_v44 = vpack.c.bf16 %v455_v35, %v438_v34  ;;  %v454_v45 = vld [vmem:[#allocation2 + $0xd48] sm:$0xff] }
  0x35   :  { %v406_v46 = vld [vmem:[#allocation2 + $0xbc8] sm:$0xff]  ;;  %v423_v47 = vld [vmem:[#allocation2 + $0xc50] sm:$0xff]  ;;  %v472_v48 = vld [vmem:[#allocation2 + $0xdd8] sm:$0xff]  ;;  %v2427_v50 = vpack.c.bf16 %v388_v41, %v371_v40  ;;  %v2367_v51 = vpack.c.bf16 %v454_v45, %v437_v42 }
  0x36   :  { %2412 = vmatpush1.bf16.msra.mxu1 %v2411_v60  ;;  %v489_v49 = vld [vmem:[#allocation2 + $0xe60] sm:$0xff]  ;;  %v2429_v52 = vpack.c.bf16 %v423_v47, %v406_v46  ;;  %v422_v54 = vld [vmem:[#allocation2 + $0xc48] sm:$0xff]  ;;  %v471_v55 = vld [vmem:[#allocation2 + $0xdd0] sm:$0xff] }
  0x37   :  { %2352 = vmatpush1.bf16.msra.mxu0 %v2351_v61  ;;  %2414 = vmatprep.subr.bf16.mxu1 %v2413_v62  ;;  %v405_v53 = vld [vmem:[#allocation2 + $0xbc0] sm:$0xff]  ;;  %v2369_v56 = vpack.c.bf16 %v489_v49, %v472_v48  ;;  %v488_v57 = vld [vmem:[#allocation2 + $0xe58] sm:$0xff]  ;;  %v506_v60 = vld [vmem:[#allocation2 + $0xee8] sm:$0xff] }
  0x38   :  { %2354 = vmatprep.subr.bf16.mxu0 %v2353_v3  ;;  %v440_v58 = vld [vmem:[#allocation2 + $0xcd8] sm:$0xff]  ;;  %v457_v59 = vld [vmem:[#allocation2 + $0xd60] sm:$0xff]  ;;  %v523_v61 = vld [vmem:[#allocation2 + $0xf70] sm:$0xff]  ;;  %v2431_v62 = vpack.c.bf16 %v422_v54, %v405_v53  ;;  %v2371_v63 = vpack.c.bf16 %v488_v57, %v471_v55 }
  0x39   :  { %v2433_v1 = vpack.c.bf16 %v457_v59, %v440_v58  ;;  %v439_v2 = vld [vmem:[#allocation2 + $0xcd0] sm:$0xff]  ;;  %v456_v3 = vld [vmem:[#allocation2 + $0xd58] sm:$0xff]  ;;  %v505_v5 = vld [vmem:[#allocation2 + $0xee0] sm:$0xff]  ;;  %v2373_v6 = vpack.c.bf16 %v523_v61, %v506_v60 }
  0x3a   :  { %2416 = vmatpush1.bf16.msra.mxu1 %v2415_v10  ;;  %v522_v7 = vld [vmem:[#allocation2 + $0xf68] sm:$0xff]  ;;  %v491_v9 = vld [vmem:[#allocation2 + $0xe70] sm:$0xff]  ;;  %v540_v10 = vld [vmem:[#allocation2 + $0xff8] sm:$0xff] }
  0x3b   :  { %2356 = vmatpush1.bf16.msra.mxu0 %v2355_v11  ;;  %2418 = vmatprep.subr.bf16.mxu1 %v2417_v12  ;;  %v474_v8 = vld [vmem:[#allocation2 + $0xde8] sm:$0xff]  ;;  %v557_v11 = vld [vmem:[#allocation2 + $0x1080] sm:$0xff]  ;;  %v2435_v12 = vpack.c.bf16 %v456_v3, %v439_v2  ;;  %v2375_v13 = vpack.c.bf16 %v522_v7, %v505_v5  ;;  %v539_v17 = vld [vmem:[#allocation2 + $0xff0] sm:$0xff] }
  0x3c   :  { %2358 = vmatprep.subr.bf16.mxu0 %v2357_v16  ;;  %v2437_v14 = vpack.c.bf16 %v491_v9, %v474_v8  ;;  %v473_v15 = vld [vmem:[#allocation2 + $0xde0] sm:$0xff]  ;;  %v490_v16 = vld [vmem:[#allocation2 + $0xe68] sm:$0xff]  ;;  %v2377_v18 = vpack.c.bf16 %v557_v11, %v540_v10  ;;  %v556_v19 = vld [vmem:[#allocation2 + $0x1078] sm:$0xff] }
  0x3d   :  { %v508_v20 = vld [vmem:[#allocation2 + $0xef8] sm:$0xff]  ;;  %v525_v21 = vld [vmem:[#allocation2 + $0xf80] sm:$0xff]  ;;  %v2379_v26 = vpack.c.bf16 %v556_v19, %v539_v17  ;;  %v507_v28 = vld [vmem:[#allocation2 + $0xef0] sm:$0xff] }
  0x3e   :  { %2420 = vmatpush1.bf16.msra.mxu1 %v2419_v23  ;;  %v34_v23 = vld [vmem:[#allocation2 + $0x28] sm:$0xff]  ;;  %v2441_v27 = vpack.c.bf16 %v525_v21, %v508_v20  ;;  %v33_v31 = vld [vmem:[#allocation2 + $0x20] sm:$0xff]  ;;  %v559_v35 = vld [vmem:[#allocation2 + $0x1090] sm:$0xff] }
  0x3f   :  { %2360 = vmatpush1.bf16.msra.mxu0 %v2359_v24  ;;  %2422 = vmatprep.subr.bf16.mxu1 %v2421_v25  ;;  %v51_v24 = vld [vmem:[#allocation2 + $0xb0] sm:$0xff]  ;;  %v2439_v25 = vpack.c.bf16 %v490_v16, %v473_v15  ;;  %v50_v33 = vld [vmem:[#allocation2 + $0xa8] sm:$0xff]  ;;  %v541_v42 = vld [vmem:[#allocation2 + $0x1000] sm:$0xff] }
  0x40   :  { %2362 = vmatprep.subr.bf16.mxu0 %v2361_v30  ;;  %v524_v30 = vld [vmem:[#allocation2 + $0xf78] sm:$0xff]  ;;  %v2453_v32 = vpack.c.bf16 %v51_v24, %v34_v23  ;;  %v542_v34 = vld [vmem:[#allocation2 + $0x1008] sm:$0xff]  ;;  %v2455_v40 = vpack.c.bf16 %v50_v33, %v33_v31  ;;  %v67_v45 = vld [vmem:[#allocation2 + $0x130] sm:$0xff] }
  0x41   :  { %v2445_v41 = vpack.c.bf16 %v559_v35, %v542_v34  ;;  %v84_v47 = vld [vmem:[#allocation2 + $0x1b8] sm:$0xff]  ;;  %v593_v49 = vld [vmem:[#allocation2 + $0x11a0] sm:$0xff]  ;;  %v575_v55 = vld [vmem:[#allocation2 + $0x1110] sm:$0xff] }
  0x42   :  { %2424 = vmatpush1.bf16.msra.mxu1 %v2423_v36  ;;  %v68_v36 = vld [vmem:[#allocation2 + $0x138] sm:$0xff]  ;;  %v2459_v53 = vpack.c.bf16 %v84_v47, %v67_v45  ;;  %v101_v58 = vld [vmem:[#allocation2 + $0x240] sm:$0xff]  ;;  %v118_v59 = vld [vmem:[#allocation2 + $0x2c8] sm:$0xff] }
  0x43   :  { %2364 = vmatpush1.bf16.msra.mxu0 %v2363_v38  ;;  %2426 = vmatprep.subr.bf16.mxu1 %v2425_v39  ;;  %v85_v38 = vld [vmem:[#allocation2 + $0x1c0] sm:$0xff]  ;;  %v2443_v39 = vpack.c.bf16 %v524_v30, %v507_v28  ;;  %v576_v48 = vld [vmem:[#allocation2 + $0x1118] sm:$0xff]  ;;  %v135_v2 = vld [vmem:[#allocation2 + $0x350] sm:$0xff] }
  0x44   :  { %2366 = vmatprep.subr.bf16.mxu0 %v2365_v44  ;;  %v558_v44 = vld [vmem:[#allocation2 + $0x1088] sm:$0xff]  ;;  %v2457_v46 = vpack.c.bf16 %v85_v38, %v68_v36  ;;  %v2449_v54 = vpack.c.bf16 %v593_v49, %v576_v48  ;;  %v136_v60 = vld [vmem:[#allocation2 + $0x358] sm:$0xff]  ;;  %v153_v61 = vld [vmem:[#allocation2 + $0x3e0] sm:$0xff] }
  0x45   :  { %v2465_v3 = vpack.c.bf16 %v153_v61, %v136_v60  ;;  %v152_v5 = vld [vmem:[#allocation2 + $0x3d8] sm:$0xff]  ;;  %v595_v7 = vld [vmem:[#allocation2 + $0x11b0] sm:$0xff]  ;;  %v170_v8 = vld [vmem:[#allocation2 + $0x468] sm:$0xff] }
  0x46   :  { %2428 = vmatpush1.bf16.msra.mxu1 %v2427_v50  ;;  %v102_v50 = vld [vmem:[#allocation2 + $0x248] sm:$0xff]  ;;  %v187_v9 = vld [vmem:[#allocation2 + $0x4f0] sm:$0xff]  ;;  %v609_v10 = vld [vmem:[#allocation2 + $0x1220] sm:$0x3f]  ;;  %v2467_v11 = vpack.c.bf16 %v152_v5, %v135_v2 }
  0x47   :  { %2368 = vmatpush1.bf16.msra.mxu0 %v2367_v51  ;;  %2430 = vmatprep.subr.bf16.mxu1 %v2429_v52  ;;  %v119_v51 = vld [vmem:[#allocation2 + $0x2d0] sm:$0xff]  ;;  %v2447_v52 = vpack.c.bf16 %v558_v44, %v541_v42  ;;  %v2469_v15 = vpack.c.bf16 %v187_v9, %v170_v8  ;;  %v169_v16 = vld [vmem:[#allocation2 + $0x460] sm:$0xff]  ;;  %v186_v17 = vld [vmem:[#allocation2 + $0x4e8] sm:$0xff] }
  0x48   :  { %2370 = vmatprep.subr.bf16.mxu0 %v2369_v56  ;;  %v592_v56 = vld [vmem:[#allocation2 + $0x1198] sm:$0xff]  ;;  %v2461_v57 = vpack.c.bf16 %v119_v51, %v102_v50  ;;  %v221_v19 = vld [vmem:[#allocation2 + $0x600] sm:$0xff]  ;;  %v2471_v21 = vpack.c.bf16 %v186_v17, %v169_v16  ;;  %v203_v30 = vld [vmem:[#allocation2 + $0x570] sm:$0xff] }
  0x49   :  { %v612_v23 = vld [vmem:[#allocation2 + $0x1238] sm:$0x3f]  ;;  %v87_v33 = vld [vmem:[#allocation2 + $0x1d0] sm:$0xff]  ;;  %v238_v34 = vld [vmem:[#allocation2 + $0x688] sm:$0xff] }
  0x4a   :  { %2432 = vmatpush1.bf16.msra.mxu1 %v2431_v62  ;;  %v2451_v62 = vpack.c.bf16 %v592_v56, %v575_v55  ;;  %v36_v24 = vld [vmem:[#allocation2 + $0x38] sm:$0xff]  ;;  %v255_v35 = vld [vmem:[#allocation2 + $0x710] sm:$0xff]  ;;  %v86_v42 = vld [vmem:[#allocation2 + $0x1c8] sm:$0xff] }
  0x4b   :  { %2372 = vmatpush1.bf16.msra.mxu0 %v2371_v63  ;;  %2434 = vmatprep.subr.bf16.mxu1 %v2433_v1  ;;  %v2463_v63 = vpack.c.bf16 %v118_v59, %v101_v58  ;;  %v610_v1 = vld [vmem:[#allocation2 + $0x1228] sm:$0x3f]  ;;  %v52_v28 = vld [vmem:[#allocation2 + $0xb8] sm:$0xff]  ;;  %v611_v36 = vld [vmem:[#allocation2 + $0x1230] sm:$0x3f]  ;;  %v2477_v45 = vpack.c.bf16 %v255_v35, %v238_v34 }
  0x4c   :  { %2374 = vmatprep.subr.bf16.mxu0 %v2373_v6  ;;  %v578_v6 = vld [vmem:[#allocation2 + $0x1128] sm:$0xff]  ;;  %v220_v31 = vld [vmem:[#allocation2 + $0x5f8] sm:$0xff]  ;;  %v121_v49 = vld [vmem:[#allocation2 + $0x2e0] sm:$0xff] }
  0x4d   :  { %v254_v47 = vld [vmem:[#allocation2 + $0x708] sm:$0xff]  ;;  %v104_v48 = vld [vmem:[#allocation2 + $0x258] sm:$0xff]  ;;  %v289_v51 = vld [vmem:[#allocation2 + $0x820] sm:$0xff] }
  0x4e   :  { %2436 = vmatpush1.bf16.msra.mxu1 %v2435_v12  ;;  %v2517_v12 = vpack.c.bf16 %v595_v7, %v578_v6  ;;  %v272_v50 = vld [vmem:[#allocation2 + $0x798] sm:$0xff]  ;;  %v2529_v56 = vpack.c.bf16 %v121_v49, %v104_v48  ;;  %v271_v58 = vld [vmem:[#allocation2 + $0x790] sm:$0xff]  ;;  %v138_v60 = vld [vmem:[#allocation2 + $0x368] sm:$0xff] }
  0x4f   :  { %2376 = vmatpush1.bf16.msra.mxu0 %v2375_v13  ;;  %2438 = vmatprep.subr.bf16.mxu1 %v2437_v14  ;;  %v577_v13 = vld [vmem:[#allocation2 + $0x1120] sm:$0xff]  ;;  %v594_v14 = vld [vmem:[#allocation2 + $0x11a8] sm:$0xff]  ;;  %v120_v55 = vld [vmem:[#allocation2 + $0x2d8] sm:$0xff] }
  0x50   :  { %2378 = vmatprep.subr.bf16.mxu0 %v2377_v18  ;;  %v204_v18 = vld [vmem:[#allocation2 + $0x578] sm:$0xff]  ;;  %v2519_v20 = vpack.c.bf16 %v594_v14, %v577_v13  ;;  %v155_v61 = vld [vmem:[#allocation2 + $0x3f0] sm:$0xff]  ;;  %v154_v5 = vld [vmem:[#allocation2 + $0x3e8] sm:$0xff] }
  0x51   :  { %v288_v59 = vld [vmem:[#allocation2 + $0x818] sm:$0xff]  ;;  %v2533_v6 = vpack.c.bf16 %v155_v61, %v138_v60  ;;  %v305_v8 = vld [vmem:[#allocation2 + $0x8a0] sm:$0xff]  ;;  %v322_v9 = vld [vmem:[#allocation2 + $0x928] sm:$0xff] }
  0x52   :  { %2440 = vmatpush1.bf16.msra.mxu1 %v2439_v25  ;;  %v53_v25 = vld [vmem:[#allocation2 + $0xc0] sm:$0xff]  ;;  %v2483_v2 = vpack.c.bf16 %v288_v59, %v271_v58  ;;  %v171_v16 = vld [vmem:[#allocation2 + $0x470] sm:$0xff]  ;;  %v188_v17 = vld [vmem:[#allocation2 + $0x4f8] sm:$0xff] }
  0x53   :  { %2380 = vmatpush1.bf16.msra.mxu0 %v2379_v26  ;;  %2442 = vmatprep.subr.bf16.mxu1 %v2441_v27  ;;  %v2473_v26 = vpack.c.bf16 %v221_v19, %v204_v18  ;;  %v35_v27 = vld [vmem:[#allocation2 + $0x30] sm:$0xff]  ;;  %v2521_v38 = vpack.c.bf16 %v53_v25, %v36_v24  ;;  %v357_v13 = vld [vmem:[#allocation2 + $0xa40] sm:$0xff]  ;;  %v374_v25 = vld [vmem:[#allocation2 + $0xac8] sm:$0xff] }
  0x54   :  { %2454 = vmatprep.subr.bf16.mxu0 %v2453_v32  ;;  %v70_v32 = vld [vmem:[#allocation2 + $0x148] sm:$0xff]  ;;  %v223_v24 = vld [vmem:[#allocation2 + $0x610] sm:$0xff]  ;;  %v373_v34 = vld [vmem:[#allocation2 + $0xac0] sm:$0xff] }
  0x55   :  { %v2525_v44 = vpack.c.bf16 %v87_v33, %v70_v32  ;;  %v390_v35 = vld [vmem:[#allocation2 + $0xb48] sm:$0xff]  ;;  %v407_v48 = vld [vmem:[#allocation2 + $0xbd0] sm:$0xff]  ;;  %v424_v49 = vld [vmem:[#allocation2 + $0xc58] sm:$0xff] }
  0x56   :  { %2444 = vmatpush1.bf16.msra.mxu1 %v2443_v39  ;;  %854 = vmatmul.mubr.f32.vlgmr.msra.gmra.mrb[0].mxu0 %v3041_v29  ;;  %v2523_v39 = vpack.c.bf16 %v52_v28, %v35_v27  ;;  %v2539_v27 = vpack.c.bf16 %v188_v17, %v171_v16  ;;  %v441_v60 = vld [vmem:[#allocation2 + $0xce0] sm:$0xff]  ;;  %v458_v61 = vld [vmem:[#allocation2 + $0xd68] sm:$0xff] }
  0x57   :  { %2456 = vmatpush1.bf16.msra.mxu0 %v2455_v40  ;;  %2446 = vmatprep.subr.bf16.mxu1 %v2445_v41  ;;  %v2475_v40 = vpack.c.bf16 %v220_v31, %v203_v30  ;;  %v69_v41 = vld [vmem:[#allocation2 + $0x140] sm:$0xff]  ;;  %v222_v31 = vld [vmem:[#allocation2 + $0x608] sm:$0xff] }
  0x58   :  { %2458 = vmatprep.subr.bf16.mxu0 %v2457_v46  ;;  %1137 = vmatprep.mubr.f32.mxu0 %v3049_v43  ;;  %v237_v46 = vld [vmem:[#allocation2 + $0x680] sm:$0xff] }
  0x59   :  { %v205_v30 = vld [vmem:[#allocation2 + $0x580] sm:$0xff] }
  0x5a   :  { %2448 = vmatpush1.bf16.msra.mxu1 %v2447_v52  ;;  %v2527_v52 = vpack.c.bf16 %v86_v42, %v69_v41  ;;  %v2543_v41 = vpack.c.bf16 %v222_v31, %v205_v30  ;;  %v2495_v42 = vpack.c.bf16 %v390_v35, %v373_v34 }
  0x5b   :  { %2460 = vmatpush1.bf16.msra.mxu0 %v2459_v53  ;;  %2450 = vmatprep.subr.bf16.mxu1 %v2449_v54  ;;  %v2479_v53 = vpack.c.bf16 %v254_v47, %v237_v46  ;;  %v103_v54 = vld [vmem:[#allocation2 + $0x250] sm:$0xff] }
  0x5c   :  { %2462 = vmatprep.subr.bf16.mxu0 %v2461_v57  ;;  %v2481_v57 = vpack.c.bf16 %v289_v51, %v272_v50  ;;  %v274_v50 = vld [vmem:[#allocation2 + $0x7a8] sm:$0xff]  ;;  %v291_v51 = vld [vmem:[#allocation2 + $0x830] sm:$0xff] }
  0x5d   :  { %996 = vmatmul.mubr.f32.vlgmr.msra.gmra.mrb[2].mxu1 %v3041_v29  ;;  %v2549_v58 = vpack.c.bf16 %v291_v51, %v274_v50  ;;  %v37_v50 = vld [vmem:[#allocation2 + $0x40] sm:$0xff]  ;;  %v54_v51 = vld [vmem:[#allocation2 + $0xc8] sm:$0xff] }
  0x5e   :  { %2452 = vmatpush1.bf16.msra.mxu1 %v2451_v62  ;;  %1066 = vmatprep.mubr.f32.mxu1 %v2995_v0  ;;  %v306_v62 = vld [vmem:[#allocation2 + $0x8a8] sm:$0xff] }
  0x5f   :  { %2464 = vmatpush1.bf16.msra.mxu0 %v2463_v63  ;;  %2245 = vmatprep.subr.msk.mxu1 %vm737_vm0, %v610_v1  ;;  %v323_v63 = vld [vmem:[#allocation2 + $0x930] sm:$0xff]  ;;  %v2531_v1 = vpack.c.bf16 %v120_v55, %v103_v54  ;;  %v2499_v55 = vpack.c.bf16 %v424_v49, %v407_v48 }
  0x60   :  { %2466 = vmatprep.subr.bf16.mxu0 %v2465_v3  ;;  %v137_v3 = vld [vmem:[#allocation2 + $0x360] sm:$0xff]  ;;  %v2485_v7 = vpack.c.bf16 %v323_v63, %v306_v62  ;;  %v308_v62 = vld [vmem:[#allocation2 + $0x8b8] sm:$0xff] }
  0x61   :  { %v2535_v14 = vpack.c.bf16 %v154_v5, %v137_v3  ;;  %v325_v63 = vld [vmem:[#allocation2 + $0x940] sm:$0xff]  ;;  %v2503_v5 = vpack.c.bf16 %v458_v61, %v441_v60 }
  0x62   :  { %2246 = vmatpush1.msk.msra.mxu1 %vm737_vm0, %v609_v10  ;;  %v172_v10 = vld [vmem:[#allocation2 + $0x478] sm:$0xff] }
  0x63   :  { %2468 = vmatpush1.bf16.msra.mxu0 %v2467_v11  ;;  %2518 = vmatprep.subr.bf16.mxu1 %v2517_v12  ;;  %v189_v11 = vld [vmem:[#allocation2 + $0x500] sm:$0xff]  ;;  %v340_v12 = vld [vmem:[#allocation2 + $0x9b8] sm:$0xff] }
  0x64   :  { %2470 = vmatprep.subr.bf16.mxu0 %v2469_v15  ;;  %v2487_v15 = vpack.c.bf16 %v322_v9, %v305_v8  ;;  %v2537_v18 = vpack.c.bf16 %v189_v11, %v172_v10  ;;  %v2489_v19 = vpack.c.bf16 %v357_v13, %v340_v12  ;;  %v2553_v8 = vpack.c.bf16 %v325_v63, %v308_v62  ;;  %v475_v10 = vld [vmem:[#allocation2 + $0xdf0] sm:$0xff]  ;;  %v492_v11 = vld [vmem:[#allocation2 + $0xe78] sm:$0xff]  ;;  %v342_v12 = vld [vmem:[#allocation2 + $0x9c8] sm:$0xff] }
  0x65   :  { %2247 = vmatmul.mubr.msk.f32.vlgmr.msra.gmra.mrb[2].mxu1 %vm734_vm1, %v3045_v37  ;;  %v359_v13 = vld [vmem:[#allocation2 + $0xa50] sm:$0xff]  ;;  %v2507_v17 = vpack.c.bf16 %v492_v11, %v475_v10  ;;  %v88_v63 = vld [vmem:[#allocation2 + $0x1d8] sm:$0xff] }
  0x66   :  { %2520 = vmatpush1.bf16.msra.mxu1 %v2519_v20  ;;  %1208 = vmatprep.mubr.f32.mxu1 %v2995_v0  ;;  %v339_v20 = vld [vmem:[#allocation2 + $0x9b0] sm:$0xff] }
  0x67   :  { %2472 = vmatpush1.bf16.msra.mxu0 %v2471_v21  ;;  %2248 = vmatprep.subr.msk.mxu1 %vm737_vm0, %v612_v23  ;;  %v356_v21 = vld [vmem:[#allocation2 + $0xa38] sm:$0xff]  ;;  %v206_v23 = vld [vmem:[#allocation2 + $0x588] sm:$0xff]  ;;  %v71_v62 = vld [vmem:[#allocation2 + $0x150] sm:$0xff] }
  0x68   :  { %2474 = vmatprep.subr.bf16.mxu0 %v2473_v26  ;;  %v391_v26 = vld [vmem:[#allocation2 + $0xb50] sm:$0xff]  ;;  %v2491_v28 = vpack.c.bf16 %v356_v21, %v339_v20  ;;  %v2541_v32 = vpack.c.bf16 %v223_v24, %v206_v23  ;;  %v2557_v20 = vpack.c.bf16 %v359_v13, %v342_v12  ;;  %v509_v23 = vld [vmem:[#allocation2 + $0xf00] sm:$0xff]  ;;  %v526_v24 = vld [vmem:[#allocation2 + $0xf88] sm:$0xff] }
  0x69   :  { %v2493_v33 = vpack.c.bf16 %v391_v26, %v374_v25  ;;  %v376_v25 = vld [vmem:[#allocation2 + $0xad8] sm:$0xff]  ;;  %v393_v26 = vld [vmem:[#allocation2 + $0xb60] sm:$0xff]  ;;  %v2511_v31 = vpack.c.bf16 %v526_v24, %v509_v23  ;;  %v122_v13 = vld [vmem:[#allocation2 + $0x2e8] sm:$0xff] }
  0x6a   :  { %2249 = vmatpush1.msk.msra.mxu1 %vm737_vm0, %v611_v36  ;;  %v240_v36 = vld [vmem:[#allocation2 + $0x698] sm:$0xff]  ;;  %v2561_v34 = vpack.c.bf16 %v393_v26, %v376_v25  ;;  %v105_v12 = vld [vmem:[#allocation2 + $0x260] sm:$0xff]  ;;  %v139_v25 = vld [vmem:[#allocation2 + $0x370] sm:$0xff] }
  0x6b   :  { %2250 = vmatmul.mubr.msk.f32.vlgmr.msra.gmra.mrb[4].mxu1 %vm734_vm1, %v3045_v37  ;;  %2522 = vmatprep.subr.bf16.mxu1 %v2521_v38  ;;  %v257_v38 = vld [vmem:[#allocation2 + $0x720] sm:$0xff]  ;;  %v156_v26 = vld [vmem:[#allocation2 + $0x3f8] sm:$0xff] }
  0x6c   :  { %2524 = vmatpush1.bf16.msra.mxu1 %v2523_v39  ;;  %2476 = vmatpush1.bf16.msra.mxu0 %v2475_v40  ;;  %v408_v39 = vld [vmem:[#allocation2 + $0xbd8] sm:$0xff]  ;;  %v425_v40 = vld [vmem:[#allocation2 + $0xc60] sm:$0xff]  ;;  %v2545_v46 = vpack.c.bf16 %v257_v38, %v240_v36  ;;  %v543_v36 = vld [vmem:[#allocation2 + $0x1010] sm:$0xff] }
  0x6d   :  { %2526 = vmatprep.subr.bf16.mxu1 %v2525_v44  ;;  %2478 = vmatprep.subr.bf16.mxu0 %v2477_v45  ;;  %v239_v44 = vld [vmem:[#allocation2 + $0x690] sm:$0xff]  ;;  %v256_v45 = vld [vmem:[#allocation2 + $0x718] sm:$0xff]  ;;  %v2497_v47 = vpack.c.bf16 %v425_v40, %v408_v39  ;;  %v410_v39 = vld [vmem:[#allocation2 + $0xbe8] sm:$0xff] }
  0x6e   :  { %1279 = vmatprep.mubr.f32.mxu1 %v3049_v43  ;;  %v2547_v54 = vpack.c.bf16 %v256_v45, %v239_v44  ;;  %v560_v38 = vld [vmem:[#allocation2 + $0x1098] sm:$0xff]  ;;  %v427_v40 = vld [vmem:[#allocation2 + $0xc70] sm:$0xff] }
  0x6f   :  { %v2515_v45 = vpack.c.bf16 %v560_v38, %v543_v36  ;;  %v2565_v48 = vpack.c.bf16 %v427_v40, %v410_v39  ;;  %v173_v39 = vld [vmem:[#allocation2 + $0x480] sm:$0xff]  ;;  %v190_v40 = vld [vmem:[#allocation2 + $0x508] sm:$0xff] }
  0x70   :  { %2528 = vmatpush1.bf16.msra.mxu1 %v2527_v52  ;;  %2480 = vmatpush1.bf16.msra.mxu0 %v2479_v53  ;;  %v442_v52 = vld [vmem:[#allocation2 + $0xce8] sm:$0xff]  ;;  %v459_v53 = vld [vmem:[#allocation2 + $0xd70] sm:$0xff] }
  0x71   :  { %2530 = vmatprep.subr.bf16.mxu1 %v2529_v56  ;;  %2482 = vmatprep.subr.bf16.mxu0 %v2481_v57  ;;  %v273_v56 = vld [vmem:[#allocation2 + $0x7a0] sm:$0xff]  ;;  %v290_v57 = vld [vmem:[#allocation2 + $0x828] sm:$0xff]  ;;  %v2501_v59 = vpack.c.bf16 %v459_v53, %v442_v52  ;;  %v444_v52 = vld [vmem:[#allocation2 + $0xcf8] sm:$0xff] }
  0x72   :  { %v2551_v3 = vpack.c.bf16 %v290_v57, %v273_v56  ;;  %v461_v53 = vld [vmem:[#allocation2 + $0xd80] sm:$0xff]  ;;  %v2591_v57 = vpack.c.bf16 %v54_v51, %v37_v50  ;;  %v596_v50 = vld [vmem:[#allocation2 + $0x11b8] sm:$0xff] }
  0x73   :  { %v2569_v60 = vpack.c.bf16 %v461_v53, %v444_v52  ;;  %v207_v52 = vld [vmem:[#allocation2 + $0x590] sm:$0xff]  ;;  %v224_v53 = vld [vmem:[#allocation2 + $0x618] sm:$0xff] }
  0x74   :  { %2532 = vmatpush1.bf16.msra.mxu1 %v2531_v1  ;;  %2484 = vmatpush1.bf16.msra.mxu0 %v2483_v2  ;;  %v476_v1 = vld [vmem:[#allocation2 + $0xdf8] sm:$0xff]  ;;  %v493_v2 = vld [vmem:[#allocation2 + $0xe80] sm:$0xff] }
  0x75   :  { %2534 = vmatprep.subr.bf16.mxu1 %v2533_v6  ;;  %2486 = vmatprep.subr.bf16.mxu0 %v2485_v7  ;;  %v307_v6 = vld [vmem:[#allocation2 + $0x8b0] sm:$0xff]  ;;  %v324_v7 = vld [vmem:[#allocation2 + $0x938] sm:$0xff]  ;;  %v2505_v9 = vpack.c.bf16 %v493_v2, %v476_v1  ;;  %v478_v1 = vld [vmem:[#allocation2 + $0xe08] sm:$0xff] }
  0x76   :  { %v2555_v16 = vpack.c.bf16 %v324_v7, %v307_v6  ;;  %v495_v2 = vld [vmem:[#allocation2 + $0xe90] sm:$0xff]  ;;  %v2595_v7 = vpack.c.bf16 %v88_v63, %v71_v62  ;;  %v40_v62 = vld [vmem:[#allocation2 + $0x58] sm:$0xff]  ;;  %v57_v63 = vld [vmem:[#allocation2 + $0xe0] sm:$0xff] }
  0x77   :  { %v2573_v10 = vpack.c.bf16 %v495_v2, %v478_v1  ;;  %v276_v1 = vld [vmem:[#allocation2 + $0x7b8] sm:$0xff]  ;;  %v293_v2 = vld [vmem:[#allocation2 + $0x840] sm:$0xff] }
  0x78   :  { %2536 = vmatpush1.bf16.msra.mxu1 %v2535_v14  ;;  %2488 = vmatpush1.bf16.msra.mxu0 %v2487_v15  ;;  %v510_v14 = vld [vmem:[#allocation2 + $0xf08] sm:$0xff]  ;;  %v527_v15 = vld [vmem:[#allocation2 + $0xf90] sm:$0xff] }
  0x79   :  { %2538 = vmatprep.subr.bf16.mxu1 %v2537_v18  ;;  %2490 = vmatprep.subr.bf16.mxu0 %v2489_v19  ;;  %v341_v18 = vld [vmem:[#allocation2 + $0x9c0] sm:$0xff]  ;;  %v358_v19 = vld [vmem:[#allocation2 + $0xa48] sm:$0xff]  ;;  %v2509_v21 = vpack.c.bf16 %v527_v15, %v510_v14  ;;  %v512_v14 = vld [vmem:[#allocation2 + $0xf18] sm:$0xff] }
  0x7a   :  { %v2559_v30 = vpack.c.bf16 %v358_v19, %v341_v18  ;;  %v529_v15 = vld [vmem:[#allocation2 + $0xfa0] sm:$0xff]  ;;  %v2599_v19 = vpack.c.bf16 %v122_v13, %v105_v12  ;;  %v74_v12 = vld [vmem:[#allocation2 + $0x168] sm:$0xff]  ;;  %v91_v13 = vld [vmem:[#allocation2 + $0x1f0] sm:$0xff] }
  0x7b   :  { %v2577_v23 = vpack.c.bf16 %v529_v15, %v512_v14  ;;  %v310_v14 = vld [vmem:[#allocation2 + $0x8c8] sm:$0xff]  ;;  %v327_v15 = vld [vmem:[#allocation2 + $0x950] sm:$0xff] }
  0x7c   :  { %2540 = vmatpush1.bf16.msra.mxu1 %v2539_v27  ;;  %2492 = vmatpush1.bf16.msra.mxu0 %v2491_v28  ;;  %v544_v27 = vld [vmem:[#allocation2 + $0x1018] sm:$0xff]  ;;  %v561_v28 = vld [vmem:[#allocation2 + $0x10a0] sm:$0xff] }
  0x7d   :  { %2542 = vmatprep.subr.bf16.mxu1 %v2541_v32  ;;  %2494 = vmatprep.subr.bf16.mxu0 %v2493_v33  ;;  %v375_v32 = vld [vmem:[#allocation2 + $0xad0] sm:$0xff]  ;;  %v392_v33 = vld [vmem:[#allocation2 + $0xb58] sm:$0xff]  ;;  %v2513_v35 = vpack.c.bf16 %v561_v28, %v544_v27  ;;  %v546_v27 = vld [vmem:[#allocation2 + $0x1028] sm:$0xff] }
  0x7e   :  { %v2563_v44 = vpack.c.bf16 %v392_v33, %v375_v32  ;;  %v563_v28 = vld [vmem:[#allocation2 + $0x10b0] sm:$0xff]  ;;  %v2603_v33 = vpack.c.bf16 %v156_v26, %v139_v25  ;;  %v108_v25 = vld [vmem:[#allocation2 + $0x278] sm:$0xff]  ;;  %v125_v26 = vld [vmem:[#allocation2 + $0x300] sm:$0xff] }
  0x7f   :  { %v2581_v36 = vpack.c.bf16 %v563_v28, %v546_v27  ;;  %v344_v27 = vld [vmem:[#allocation2 + $0x9d8] sm:$0xff]  ;;  %v361_v28 = vld [vmem:[#allocation2 + $0xa60] sm:$0xff] }
  0x80   :  { %2544 = vmatpush1.bf16.msra.mxu1 %v2543_v41  ;;  %2496 = vmatpush1.bf16.msra.mxu0 %v2495_v42  ;;  %v38_v41 = vld [vmem:[#allocation2 + $0x48] sm:$0xff]  ;;  %v55_v42 = vld [vmem:[#allocation2 + $0xd0] sm:$0xff] }
  0x81   :  { %2546 = vmatprep.subr.bf16.mxu1 %v2545_v46  ;;  %2498 = vmatprep.subr.bf16.mxu0 %v2497_v47  ;;  %v409_v46 = vld [vmem:[#allocation2 + $0xbe0] sm:$0xff]  ;;  %v426_v47 = vld [vmem:[#allocation2 + $0xc68] sm:$0xff]  ;;  %v2589_v49 = vpack.c.bf16 %v55_v42, %v38_v41  ;;  %v580_v41 = vld [vmem:[#allocation2 + $0x1138] sm:$0xff] }
  0x82   :  { %v2567_v56 = vpack.c.bf16 %v426_v47, %v409_v46  ;;  %v597_v42 = vld [vmem:[#allocation2 + $0x11c0] sm:$0xff]  ;;  %v2607_v47 = vpack.c.bf16 %v190_v40, %v173_v39  ;;  %v142_v39 = vld [vmem:[#allocation2 + $0x388] sm:$0xff]  ;;  %v159_v40 = vld [vmem:[#allocation2 + $0x410] sm:$0xff] }
  0x84   :  { %2548 = vmatpush1.bf16.msra.mxu1 %v2547_v54  ;;  %2500 = vmatpush1.bf16.msra.mxu0 %v2499_v55  ;;  %v72_v54 = vld [vmem:[#allocation2 + $0x158] sm:$0xff]  ;;  %v89_v55 = vld [vmem:[#allocation2 + $0x1e0] sm:$0xff] }
  0x85   :  { %2550 = vmatprep.subr.bf16.mxu1 %v2549_v58  ;;  %2502 = vmatprep.subr.bf16.mxu0 %v2501_v59  ;;  %v443_v58 = vld [vmem:[#allocation2 + $0xcf0] sm:$0xff]  ;;  %v460_v59 = vld [vmem:[#allocation2 + $0xd78] sm:$0xff]  ;;  %v2593_v61 = vpack.c.bf16 %v89_v55, %v72_v54  ;;  %v242_v54 = vld [vmem:[#allocation2 + $0x6a8] sm:$0xff] }
  0x86   :  { %v2571_v6 = vpack.c.bf16 %v460_v59, %v443_v58  ;;  %v259_v55 = vld [vmem:[#allocation2 + $0x730] sm:$0xff]  ;;  %v614_v58 = vld [vmem:[#allocation2 + $0x1248] sm:$0x3f] }
  0x87   :  { %v2613_v59 = vpack.c.bf16 %v259_v55, %v242_v54  ;;  %v412_v54 = vld [vmem:[#allocation2 + $0xbf8] sm:$0xff]  ;;  %v429_v55 = vld [vmem:[#allocation2 + $0xc80] sm:$0xff] }
  0x88   :  { %2552 = vmatpush1.bf16.msra.mxu1 %v2551_v3  ;;  %2504 = vmatpush1.bf16.msra.mxu0 %v2503_v5  ;;  %v106_v3 = vld [vmem:[#allocation2 + $0x268] sm:$0xff]  ;;  %v123_v5 = vld [vmem:[#allocation2 + $0x2f0] sm:$0xff] }
  0x89   :  { %2554 = vmatprep.subr.bf16.mxu1 %v2553_v8  ;;  %2506 = vmatprep.subr.bf16.mxu0 %v2505_v9  ;;  %v477_v8 = vld [vmem:[#allocation2 + $0xe00] sm:$0xff]  ;;  %v494_v9 = vld [vmem:[#allocation2 + $0xe88] sm:$0xff]  ;;  %v2597_v11 = vpack.c.bf16 %v123_v5, %v106_v3 }
  0x8a   :  { %v2575_v18 = vpack.c.bf16 %v494_v9, %v477_v8  ;;  %v613_v3 = vld [vmem:[#allocation2 + $0x1240] sm:$0x3f]  ;;  %v2657_v8 = vpack.c.bf16 %v57_v63, %v40_v62  ;;  %v2617_v9 = vpack.c.bf16 %v293_v2, %v276_v1  ;;  %v411_v62 = vld [vmem:[#allocation2 + $0xbf0] sm:$0xff]  ;;  %v428_v63 = vld [vmem:[#allocation2 + $0xc78] sm:$0xff] }
  0x8b   :  { %v210_v1 = vld [vmem:[#allocation2 + $0x5a8] sm:$0xff]  ;;  %v227_v2 = vld [vmem:[#allocation2 + $0x630] sm:$0xff] }
  0x8c   :  { %2556 = vmatpush1.bf16.msra.mxu1 %v2555_v16  ;;  %2508 = vmatpush1.bf16.msra.mxu0 %v2507_v17  ;;  %v140_v16 = vld [vmem:[#allocation2 + $0x378] sm:$0xff]  ;;  %v157_v17 = vld [vmem:[#allocation2 + $0x400] sm:$0xff] }
  0x8d   :  { %2558 = vmatprep.subr.bf16.mxu1 %v2557_v20  ;;  %2510 = vmatprep.subr.bf16.mxu0 %v2509_v21  ;;  %v511_v20 = vld [vmem:[#allocation2 + $0xf10] sm:$0xff]  ;;  %v528_v21 = vld [vmem:[#allocation2 + $0xf98] sm:$0xff]  ;;  %v2601_v24 = vpack.c.bf16 %v157_v17, %v140_v16 }
  0x8e   :  { %v2579_v32 = vpack.c.bf16 %v528_v21, %v511_v20  ;;  %v2661_v20 = vpack.c.bf16 %v91_v13, %v74_v12  ;;  %v2621_v21 = vpack.c.bf16 %v327_v15, %v310_v14  ;;  %v445_v12 = vld [vmem:[#allocation2 + $0xd00] sm:$0xff]  ;;  %v462_v13 = vld [vmem:[#allocation2 + $0xd88] sm:$0xff]  ;;  %v244_v14 = vld [vmem:[#allocation2 + $0x6b8] sm:$0xff] }
  0x8f   :  { %v261_v15 = vld [vmem:[#allocation2 + $0x740] sm:$0xff] }
  0x90   :  { %2560 = vmatpush1.bf16.msra.mxu1 %v2559_v30  ;;  %2512 = vmatpush1.bf16.msra.mxu0 %v2511_v31  ;;  %v174_v30 = vld [vmem:[#allocation2 + $0x488] sm:$0xff]  ;;  %v191_v31 = vld [vmem:[#allocation2 + $0x510] sm:$0xff] }
  0x91   :  { %2562 = vmatprep.subr.bf16.mxu1 %v2561_v34  ;;  %2514 = vmatprep.subr.bf16.mxu0 %v2513_v35  ;;  %v545_v34 = vld [vmem:[#allocation2 + $0x1020] sm:$0xff]  ;;  %v562_v35 = vld [vmem:[#allocation2 + $0x10a8] sm:$0xff]  ;;  %v2605_v38 = vpack.c.bf16 %v191_v31, %v174_v30 }
  0x92   :  { %v2583_v46 = vpack.c.bf16 %v562_v35, %v545_v34  ;;  %v2665_v34 = vpack.c.bf16 %v125_v26, %v108_v25  ;;  %v2625_v35 = vpack.c.bf16 %v361_v28, %v344_v27  ;;  %v479_v25 = vld [vmem:[#allocation2 + $0xe10] sm:$0xff]  ;;  %v496_v26 = vld [vmem:[#allocation2 + $0xe98] sm:$0xff]  ;;  %v278_v27 = vld [vmem:[#allocation2 + $0x7c8] sm:$0xff] }
  0x93   :  { %v295_v28 = vld [vmem:[#allocation2 + $0x850] sm:$0xff] }
  0x94   :  { %2564 = vmatpush1.bf16.msra.mxu1 %v2563_v44  ;;  %2516 = vmatpush1.bf16.msra.mxu0 %v2515_v45  ;;  %v208_v44 = vld [vmem:[#allocation2 + $0x598] sm:$0xff]  ;;  %v225_v45 = vld [vmem:[#allocation2 + $0x620] sm:$0xff] }
  0x95   :  { %2566 = vmatprep.subr.bf16.mxu1 %v2565_v48  ;;  %2590 = vmatprep.subr.bf16.mxu0 %v2589_v49  ;;  %v579_v48 = vld [vmem:[#allocation2 + $0x1130] sm:$0xff]  ;;  %v2585_v49 = vpack.c.bf16 %v597_v42, %v580_v41  ;;  %v2609_v51 = vpack.c.bf16 %v225_v45, %v208_v44  ;;  %v378_v41 = vld [vmem:[#allocation2 + $0xae8] sm:$0xff] }
  0x96   :  { %v395_v42 = vld [vmem:[#allocation2 + $0xb70] sm:$0xff] }
  0x97   :  { %1138 = vmatmul.mubr.f32.vlgmr.msra.gmra.mrb[2].mxu0 %v3041_v29 }
  0x98   :  { %2568 = vmatpush1.bf16.msra.mxu1 %v2567_v56  ;;  %2592 = vmatpush1.bf16.msra.mxu0 %v2591_v57  ;;  %v2587_v56 = vpack.c.bf16 %v596_v50, %v579_v48  ;;  %v2611_v57 = vpack.c.bf16 %v224_v53, %v207_v52  ;;  %v2669_v48 = vpack.c.bf16 %v159_v40, %v142_v39  ;;  %v377_v50 = vld [vmem:[#allocation2 + $0xae0] sm:$0xff]  ;;  %v176_v52 = vld [vmem:[#allocation2 + $0x498] sm:$0xff]  ;;  %v530_v40 = vld [vmem:[#allocation2 + $0xfa8] sm:$0xff] }
  0x99   :  { %2570 = vmatprep.subr.bf16.mxu1 %v2569_v60  ;;  %2594 = vmatprep.subr.bf16.mxu0 %v2593_v61  ;;  %v241_v60 = vld [vmem:[#allocation2 + $0x6a0] sm:$0xff]  ;;  %v258_v61 = vld [vmem:[#allocation2 + $0x728] sm:$0xff] }
  0x9a   :  { %1421 = vmatprep.mubr.f32.mxu0 %v3049_v43  ;;  %v2615_v5 = vpack.c.bf16 %v258_v61, %v241_v60  ;;  %v193_v53 = vld [vmem:[#allocation2 + $0x520] sm:$0xff]  ;;  %v2633_v61 = vpack.c.bf16 %v429_v55, %v412_v54  ;;  %v346_v54 = vld [vmem:[#allocation2 + $0x9e8] sm:$0xff]  ;;  %v363_v55 = vld [vmem:[#allocation2 + $0xa70] sm:$0xff] }
  0x9b   :  { %v2673_v60 = vpack.c.bf16 %v193_v53, %v176_v52  ;;  %v513_v39 = vld [vmem:[#allocation2 + $0xf20] sm:$0xff]  ;;  %v547_v52 = vld [vmem:[#allocation2 + $0x1030] sm:$0xff]  ;;  %v564_v53 = vld [vmem:[#allocation2 + $0x10b8] sm:$0xff] }
  0x9c   :  { %2572 = vmatpush1.bf16.msra.mxu1 %v2571_v6  ;;  %2596 = vmatpush1.bf16.msra.mxu0 %v2595_v7  ;;  %v39_v6 = vld [vmem:[#allocation2 + $0x50] sm:$0xff]  ;;  %v56_v7 = vld [vmem:[#allocation2 + $0xd8] sm:$0xff] }
  0x9d   :  { %2574 = vmatprep.subr.bf16.mxu1 %v2573_v10  ;;  %2598 = vmatprep.subr.bf16.mxu0 %v2597_v11  ;;  %v275_v10 = vld [vmem:[#allocation2 + $0x7b0] sm:$0xff]  ;;  %v292_v11 = vld [vmem:[#allocation2 + $0x838] sm:$0xff]  ;;  %v2659_v16 = vpack.c.bf16 %v56_v7, %v39_v6  ;;  %v2635_v7 = vpack.c.bf16 %v428_v63, %v411_v62  ;;  %v362_v62 = vld [vmem:[#allocation2 + $0xa68] sm:$0xff] }
  0x9e   :  { %v2619_v17 = vpack.c.bf16 %v292_v11, %v275_v10  ;;  %v2677_v10 = vpack.c.bf16 %v227_v2, %v210_v1  ;;  %v581_v1 = vld [vmem:[#allocation2 + $0x1140] sm:$0xff]  ;;  %v598_v2 = vld [vmem:[#allocation2 + $0x11c8] sm:$0xff] }
  0xa0   :  { %2576 = vmatpush1.bf16.msra.mxu1 %v2575_v18  ;;  %2600 = vmatpush1.bf16.msra.mxu0 %v2599_v19  ;;  %v73_v18 = vld [vmem:[#allocation2 + $0x160] sm:$0xff]  ;;  %v90_v19 = vld [vmem:[#allocation2 + $0x1e8] sm:$0xff] }
  0xa1   :  { %2578 = vmatprep.subr.bf16.mxu1 %v2577_v23  ;;  %2602 = vmatprep.subr.bf16.mxu0 %v2601_v24  ;;  %v309_v23 = vld [vmem:[#allocation2 + $0x8c0] sm:$0xff]  ;;  %v326_v24 = vld [vmem:[#allocation2 + $0x948] sm:$0xff]  ;;  %v2663_v30 = vpack.c.bf16 %v90_v19, %v73_v18  ;;  %v2639_v19 = vpack.c.bf16 %v462_v13, %v445_v12  ;;  %v431_v13 = vld [vmem:[#allocation2 + $0xc90] sm:$0xff] }
  0xa2   :  { %v2623_v31 = vpack.c.bf16 %v326_v24, %v309_v23  ;;  %v2681_v23 = vpack.c.bf16 %v261_v15, %v244_v14  ;;  %v414_v12 = vld [vmem:[#allocation2 + $0xc08] sm:$0xff]  ;;  %v59_v15 = vld [vmem:[#allocation2 + $0xf0] sm:$0xff] }
  0xa3   :  { %v42_v14 = vld [vmem:[#allocation2 + $0x68] sm:$0xff] }
  0xa4   :  { %2580 = vmatpush1.bf16.msra.mxu1 %v2579_v32  ;;  %2604 = vmatpush1.bf16.msra.mxu0 %v2603_v33  ;;  %v107_v32 = vld [vmem:[#allocation2 + $0x270] sm:$0xff]  ;;  %v124_v33 = vld [vmem:[#allocation2 + $0x2f8] sm:$0xff] }
  0xa5   :  { %2582 = vmatprep.subr.bf16.mxu1 %v2581_v36  ;;  %2606 = vmatprep.subr.bf16.mxu0 %v2605_v38  ;;  %v343_v36 = vld [vmem:[#allocation2 + $0x9d0] sm:$0xff]  ;;  %v360_v38 = vld [vmem:[#allocation2 + $0xa58] sm:$0xff]  ;;  %v2667_v44 = vpack.c.bf16 %v124_v33, %v107_v32  ;;  %v2643_v33 = vpack.c.bf16 %v496_v26, %v479_v25  ;;  %v465_v26 = vld [vmem:[#allocation2 + $0xda0] sm:$0xff] }
  0xa6   :  { %v2627_v45 = vpack.c.bf16 %v360_v38, %v343_v36  ;;  %v2685_v36 = vpack.c.bf16 %v295_v28, %v278_v27  ;;  %v448_v25 = vld [vmem:[#allocation2 + $0xd18] sm:$0xff]  ;;  %v93_v28 = vld [vmem:[#allocation2 + $0x200] sm:$0xff] }
  0xa7   :  { %v76_v27 = vld [vmem:[#allocation2 + $0x178] sm:$0xff] }
  0xa8   :  { %2584 = vmatpush1.bf16.msra.mxu1 %v2583_v46  ;;  %2608 = vmatpush1.bf16.msra.mxu0 %v2607_v47  ;;  %v141_v46 = vld [vmem:[#allocation2 + $0x380] sm:$0xff]  ;;  %v158_v47 = vld [vmem:[#allocation2 + $0x408] sm:$0xff] }
  0xa9   :  { %2586 = vmatprep.subr.bf16.mxu1 %v2585_v49  ;;  %2610 = vmatprep.subr.bf16.mxu0 %v2609_v51  ;;  %v2629_v49 = vpack.c.bf16 %v395_v42, %v378_v41  ;;  %v394_v51 = vld [vmem:[#allocation2 + $0xb68] sm:$0xff]  ;;  %v312_v41 = vld [vmem:[#allocation2 + $0x8d8] sm:$0xff]  ;;  %v329_v42 = vld [vmem:[#allocation2 + $0x960] sm:$0xff] }
  0xab   :  { %1280 = vmatmul.mubr.f32.vlgmr.msra.gmra.mrb[6].mxu1 %v3041_v29 }
  0xac   :  { %2588 = vmatpush1.bf16.msra.mxu1 %v2587_v56  ;;  %2612 = vmatpush1.bf16.msra.mxu0 %v2611_v57  ;;  %v2671_v56 = vpack.c.bf16 %v158_v47, %v141_v46  ;;  %v2631_v57 = vpack.c.bf16 %v394_v51, %v377_v50  ;;  %v2647_v47 = vpack.c.bf16 %v530_v40, %v513_v39  ;;  %v482_v39 = vld [vmem:[#allocation2 + $0xe28] sm:$0xff]  ;;  %v499_v40 = vld [vmem:[#allocation2 + $0xeb0] sm:$0xff] }
  0xad   :  { %2251 = vmatprep.subr.msk.mxu1 %vm737_vm0, %v614_v58  ;;  %2614 = vmatprep.subr.bf16.mxu0 %v2613_v59  ;;  %v175_v58 = vld [vmem:[#allocation2 + $0x490] sm:$0xff]  ;;  %v192_v59 = vld [vmem:[#allocation2 + $0x518] sm:$0xff]  ;;  %v2689_v50 = vpack.c.bf16 %v329_v42, %v312_v41  ;;  %v110_v41 = vld [vmem:[#allocation2 + $0x288] sm:$0xff] }
  0xae   :  { %1350 = vmatprep.mubr.f32.mxu1 %v2995_v0  ;;  %v2675_v6 = vpack.c.bf16 %v192_v59, %v175_v58  ;;  %v2651_v59 = vpack.c.bf16 %v564_v53, %v547_v52  ;;  %v127_v42 = vld [vmem:[#allocation2 + $0x310] sm:$0xff]  ;;  %v516_v52 = vld [vmem:[#allocation2 + $0xf38] sm:$0xff]  ;;  %v533_v53 = vld [vmem:[#allocation2 + $0xfc0] sm:$0xff] }
  0xb0   :  { %2252 = vmatpush1.msk.msra.mxu1 %vm737_vm0, %v613_v3  ;;  %2616 = vmatpush1.bf16.msra.mxu0 %v2615_v5  ;;  %v446_v3 = vld [vmem:[#allocation2 + $0xd08] sm:$0xff]  ;;  %v463_v5 = vld [vmem:[#allocation2 + $0xd90] sm:$0xff] }
  0xb1   :  { %2658 = vmatprep.subr.bf16.mxu1 %v2657_v8  ;;  %2618 = vmatprep.subr.bf16.mxu0 %v2617_v9  ;;  %v209_v8 = vld [vmem:[#allocation2 + $0x5a0] sm:$0xff]  ;;  %v226_v9 = vld [vmem:[#allocation2 + $0x628] sm:$0xff]  ;;  %v2637_v11 = vpack.c.bf16 %v463_v5, %v446_v3  ;;  %v380_v3 = vld [vmem:[#allocation2 + $0xaf8] sm:$0xff] }
  0xb2   :  { %v2679_v18 = vpack.c.bf16 %v226_v9, %v209_v8  ;;  %v397_v5 = vld [vmem:[#allocation2 + $0xb80] sm:$0xff]  ;;  %v379_v8 = vld [vmem:[#allocation2 + $0xaf0] sm:$0xff] }
  0xb3   :  { %2253 = vmatmul.mubr.msk.f32.vlgmr.msra.gmra.mrb[6].mxu1 %vm734_vm1, %v3045_v37  ;;  %v2697_v9 = vpack.c.bf16 %v397_v5, %v380_v3  ;;  %v178_v3 = vld [vmem:[#allocation2 + $0x4a8] sm:$0xff]  ;;  %v195_v5 = vld [vmem:[#allocation2 + $0x530] sm:$0xff] }
  0xb4   :  { %2660 = vmatpush1.bf16.msra.mxu1 %v2659_v16  ;;  %2620 = vmatpush1.bf16.msra.mxu0 %v2619_v17  ;;  %v480_v16 = vld [vmem:[#allocation2 + $0xe18] sm:$0xff]  ;;  %v497_v17 = vld [vmem:[#allocation2 + $0xea0] sm:$0xff] }
  0xb5   :  { %2662 = vmatprep.subr.bf16.mxu1 %v2661_v20  ;;  %2622 = vmatprep.subr.bf16.mxu0 %v2621_v21  ;;  %v243_v20 = vld [vmem:[#allocation2 + $0x6b0] sm:$0xff]  ;;  %v260_v21 = vld [vmem:[#allocation2 + $0x738] sm:$0xff]  ;;  %v2641_v24 = vpack.c.bf16 %v497_v17, %v480_v16 }
  0xb6   :  { %1563 = vmatprep.mubr.f32.mxu1 %v3049_v43  ;;  %v2683_v32 = vpack.c.bf16 %v260_v21, %v243_v20  ;;  %v615_v17 = vld [vmem:[#allocation2 + $0x1250] sm:$0x3f]  ;;  %v2701_v20 = vpack.c.bf16 %v431_v13, %v414_v12  ;;  %v2725_v21 = vpack.c.bf16 %v59_v15, %v42_v14  ;;  %v177_v12 = vld [vmem:[#allocation2 + $0x4a0] sm:$0xff]  ;;  %v194_v13 = vld [vmem:[#allocation2 + $0x528] sm:$0xff] }
  0xb7   :  { %v584_v14 = vld [vmem:[#allocation2 + $0x1158] sm:$0xff]  ;;  %v601_v15 = vld [vmem:[#allocation2 + $0x11e0] sm:$0xff] }
  0xb8   :  { %2664 = vmatpush1.bf16.msra.mxu1 %v2663_v30  ;;  %2624 = vmatpush1.bf16.msra.mxu0 %v2623_v31  ;;  %v514_v30 = vld [vmem:[#allocation2 + $0xf28] sm:$0xff]  ;;  %v531_v31 = vld [vmem:[#allocation2 + $0xfb0] sm:$0xff] }
  0xb9   :  { %2666 = vmatprep.subr.bf16.mxu1 %v2665_v34  ;;  %2626 = vmatprep.subr.bf16.mxu0 %v2625_v35  ;;  %v277_v34 = vld [vmem:[#allocation2 + $0x7c0] sm:$0xff]  ;;  %v294_v35 = vld [vmem:[#allocation2 + $0x848] sm:$0xff]  ;;  %v2645_v38 = vpack.c.bf16 %v531_v31, %v514_v30 }
  0xba   :  { %v2687_v46 = vpack.c.bf16 %v294_v35, %v277_v34  ;;  %v2705_v34 = vpack.c.bf16 %v465_v26, %v448_v25  ;;  %v2729_v35 = vpack.c.bf16 %v93_v28, %v76_v27  ;;  %v211_v25 = vld [vmem:[#allocation2 + $0x5b0] sm:$0xff]  ;;  %v228_v26 = vld [vmem:[#allocation2 + $0x638] sm:$0xff]  ;;  %v246_v27 = vld [vmem:[#allocation2 + $0x6c8] sm:$0xff] }
  0xbb   :  { %v263_v28 = vld [vmem:[#allocation2 + $0x750] sm:$0xff] }
  0xbc   :  { %2668 = vmatpush1.bf16.msra.mxu1 %v2667_v44  ;;  %2628 = vmatpush1.bf16.msra.mxu0 %v2627_v45  ;;  %v548_v44 = vld [vmem:[#allocation2 + $0x1038] sm:$0xff]  ;;  %v565_v45 = vld [vmem:[#allocation2 + $0x10c0] sm:$0xff] }
  0xbd   :  { %2670 = vmatprep.subr.bf16.mxu1 %v2669_v48  ;;  %2630 = vmatprep.subr.bf16.mxu0 %v2629_v49  ;;  %v311_v48 = vld [vmem:[#allocation2 + $0x8d0] sm:$0xff]  ;;  %v328_v49 = vld [vmem:[#allocation2 + $0x958] sm:$0xff]  ;;  %v2649_v51 = vpack.c.bf16 %v565_v45, %v548_v44 }
  0xbe   :  { %v2691_v58 = vpack.c.bf16 %v328_v49, %v311_v48  ;;  %v2709_v48 = vpack.c.bf16 %v499_v40, %v482_v39  ;;  %v2733_v49 = vpack.c.bf16 %v127_v42, %v110_v41  ;;  %v44_v39 = vld [vmem:[#allocation2 + $0x78] sm:$0xff]  ;;  %v61_v40 = vld [vmem:[#allocation2 + $0x100] sm:$0xff] }
  0xbf   :  { %v280_v41 = vld [vmem:[#allocation2 + $0x7d8] sm:$0xff]  ;;  %v297_v42 = vld [vmem:[#allocation2 + $0x860] sm:$0xff] }
  0xc0   :  { %2672 = vmatpush1.bf16.msra.mxu1 %v2671_v56  ;;  %2632 = vmatpush1.bf16.msra.mxu0 %v2631_v57  ;;  %v582_v56 = vld [vmem:[#allocation2 + $0x1148] sm:$0xff]  ;;  %v599_v57 = vld [vmem:[#allocation2 + $0x11d0] sm:$0xff] }
  0xc1   :  { %2674 = vmatprep.subr.bf16.mxu1 %v2673_v60  ;;  %2634 = vmatprep.subr.bf16.mxu0 %v2633_v61  ;;  %v345_v60 = vld [vmem:[#allocation2 + $0x9e0] sm:$0xff]  ;;  %v2693_v61 = vpack.c.bf16 %v363_v55, %v346_v54  ;;  %v2653_v63 = vpack.c.bf16 %v599_v57, %v582_v56  ;;  %v144_v54 = vld [vmem:[#allocation2 + $0x398] sm:$0xff] }
  0xc2   :  { %v161_v55 = vld [vmem:[#allocation2 + $0x420] sm:$0xff] }
  0xc4   :  { %2676 = vmatpush1.bf16.msra.mxu1 %v2675_v6  ;;  %2636 = vmatpush1.bf16.msra.mxu0 %v2635_v7  ;;  %v2695_v6 = vpack.c.bf16 %v362_v62, %v345_v60  ;;  %v2655_v7 = vpack.c.bf16 %v598_v2, %v581_v1  ;;  %v2713_v60 = vpack.c.bf16 %v533_v53, %v516_v52  ;;  %v143_v62 = vld [vmem:[#allocation2 + $0x390] sm:$0xff]  ;;  %v550_v1 = vld [vmem:[#allocation2 + $0x1048] sm:$0xff] }
  0xc5   :  { %2678 = vmatprep.subr.bf16.mxu1 %v2677_v10  ;;  %2638 = vmatprep.subr.bf16.mxu0 %v2637_v11  ;;  %v396_v10 = vld [vmem:[#allocation2 + $0xb78] sm:$0xff]  ;;  %v567_v2 = vld [vmem:[#allocation2 + $0x10d0] sm:$0xff]  ;;  %v78_v52 = vld [vmem:[#allocation2 + $0x188] sm:$0xff] }
  0xc6   :  { %v616_v11 = vld [vmem:[#allocation2 + $0x1258] sm:$0x3f]  ;;  %v2699_v16 = vpack.c.bf16 %v396_v10, %v379_v8  ;;  %v549_v8 = vld [vmem:[#allocation2 + $0x1040] sm:$0xff]  ;;  %v2717_v10 = vpack.c.bf16 %v567_v2, %v550_v1  ;;  %v95_v53 = vld [vmem:[#allocation2 + $0x210] sm:$0xff] }
  0xc7   :  { %v112_v1 = vld [vmem:[#allocation2 + $0x298] sm:$0xff]  ;;  %v129_v2 = vld [vmem:[#allocation2 + $0x320] sm:$0xff] }
  0xc8   :  { %2680 = vmatpush1.bf16.msra.mxu1 %v2679_v18  ;;  %2640 = vmatpush1.bf16.msra.mxu0 %v2639_v19  ;;  %v413_v18 = vld [vmem:[#allocation2 + $0xc00] sm:$0xff]  ;;  %v430_v19 = vld [vmem:[#allocation2 + $0xc88] sm:$0xff] }
  0xc9   :  { %2682 = vmatprep.subr.bf16.mxu1 %v2681_v23  ;;  %2642 = vmatprep.subr.bf16.mxu0 %v2641_v24  ;;  %v41_v23 = vld [vmem:[#allocation2 + $0x60] sm:$0xff]  ;;  %v58_v24 = vld [vmem:[#allocation2 + $0xe8] sm:$0xff]  ;;  %v2703_v30 = vpack.c.bf16 %v430_v19, %v413_v18  ;;  %v2743_v19 = vpack.c.bf16 %v194_v13, %v177_v12  ;;  %v347_v12 = vld [vmem:[#allocation2 + $0x9f0] sm:$0xff] }
  0xca   :  { %v2727_v31 = vpack.c.bf16 %v58_v24, %v41_v23  ;;  %v600_v23 = vld [vmem:[#allocation2 + $0x11d8] sm:$0xff] }
  0xcb   :  { %v364_v13 = vld [vmem:[#allocation2 + $0xa78] sm:$0xff] }
  0xcc   :  { %2684 = vmatpush1.bf16.msra.mxu1 %v2683_v32  ;;  %2644 = vmatpush1.bf16.msra.mxu0 %v2643_v33  ;;  %v447_v32 = vld [vmem:[#allocation2 + $0xd10] sm:$0xff]  ;;  %v464_v33 = vld [vmem:[#allocation2 + $0xd98] sm:$0xff] }
  0xcd   :  { %2686 = vmatprep.subr.bf16.mxu1 %v2685_v36  ;;  %2646 = vmatprep.subr.bf16.mxu0 %v2645_v38  ;;  %v75_v36 = vld [vmem:[#allocation2 + $0x170] sm:$0xff]  ;;  %v92_v38 = vld [vmem:[#allocation2 + $0x1f8] sm:$0xff]  ;;  %v2707_v44 = vpack.c.bf16 %v464_v33, %v447_v32  ;;  %v2747_v32 = vpack.c.bf16 %v228_v26, %v211_v25  ;;  %v618_v33 = vld [vmem:[#allocation2 + $0x1268] sm:$0x3f] }
  0xce   :  { %v2731_v45 = vpack.c.bf16 %v92_v38, %v75_v36  ;;  %v245_v36 = vld [vmem:[#allocation2 + $0x6c0] sm:$0xff]  ;;  %v262_v38 = vld [vmem:[#allocation2 + $0x748] sm:$0xff] }
  0xcf   :  { %v381_v25 = vld [vmem:[#allocation2 + $0xb00] sm:$0xff]  ;;  %v398_v26 = vld [vmem:[#allocation2 + $0xb88] sm:$0xff] }
  0xd0   :  { %2688 = vmatpush1.bf16.msra.mxu1 %v2687_v46  ;;  %2648 = vmatpush1.bf16.msra.mxu0 %v2647_v47  ;;  %v481_v46 = vld [vmem:[#allocation2 + $0xe20] sm:$0xff]  ;;  %v498_v47 = vld [vmem:[#allocation2 + $0xea8] sm:$0xff] }
  0xd1   :  { %2690 = vmatprep.subr.bf16.mxu1 %v2689_v50  ;;  %2650 = vmatprep.subr.bf16.mxu0 %v2649_v51  ;;  %v109_v50 = vld [vmem:[#allocation2 + $0x280] sm:$0xff]  ;;  %v126_v51 = vld [vmem:[#allocation2 + $0x308] sm:$0xff]  ;;  %v2711_v56 = vpack.c.bf16 %v498_v47, %v481_v46  ;;  %v43_v46 = vld [vmem:[#allocation2 + $0x70] sm:$0xff] }
  0xd2   :  { %v2735_v57 = vpack.c.bf16 %v126_v51, %v109_v50  ;;  %v60_v47 = vld [vmem:[#allocation2 + $0xf8] sm:$0xff]  ;;  %v279_v50 = vld [vmem:[#allocation2 + $0x7d0] sm:$0xff] }
  0xd3   :  { %v296_v51 = vld [vmem:[#allocation2 + $0x858] sm:$0xff] }
  0xd4   :  { %2692 = vmatpush1.bf16.msra.mxu1 %v2691_v58  ;;  %2652 = vmatpush1.bf16.msra.mxu0 %v2651_v59  ;;  %v515_v58 = vld [vmem:[#allocation2 + $0xf30] sm:$0xff]  ;;  %v532_v59 = vld [vmem:[#allocation2 + $0xfb8] sm:$0xff] }
  0xd5   :  { %2694 = vmatprep.subr.bf16.mxu1 %v2693_v61  ;;  %2654 = vmatprep.subr.bf16.mxu0 %v2653_v63  ;;  %v2737_v61 = vpack.c.bf16 %v161_v55, %v144_v54  ;;  %v160_v63 = vld [vmem:[#allocation2 + $0x418] sm:$0xff]  ;;  %v314_v54 = vld [vmem:[#allocation2 + $0x8e8] sm:$0xff]  ;;  %v331_v55 = vld [vmem:[#allocation2 + $0x970] sm:$0xff] }
  0xd7   :  { %1422 = vmatmul.mubr.f32.vlgmr.msra.gmra.mrb[4].mxu0 %v3041_v29 }
  0xd8   :  { %2696 = vmatpush1.bf16.msra.mxu1 %v2695_v6  ;;  %2656 = vmatpush1.bf16.msra.mxu0 %v2655_v7  ;;  %v2715_v6 = vpack.c.bf16 %v532_v59, %v515_v58  ;;  %v2739_v7 = vpack.c.bf16 %v160_v63, %v143_v62  ;;  %v77_v58 = vld [vmem:[#allocation2 + $0x180] sm:$0xff]  ;;  %v94_v59 = vld [vmem:[#allocation2 + $0x208] sm:$0xff] }
  0xd9   :  { %2698 = vmatprep.subr.bf16.mxu1 %v2697_v9  ;;  %2254 = vmatprep.subr.msk.mxu0 %vm737_vm0, %v616_v11  ;;  %v566_v9 = vld [vmem:[#allocation2 + $0x10c8] sm:$0xff]  ;;  %v2741_v11 = vpack.c.bf16 %v195_v5, %v178_v3  ;;  %v313_v62 = vld [vmem:[#allocation2 + $0x8e0] sm:$0xff]  ;;  %v348_v3 = vld [vmem:[#allocation2 + $0x9f8] sm:$0xff] }
  0xda   :  { %1492 = vmatprep.mubr.f32.mxu0 %v2995_v0  ;;  %v2719_v18 = vpack.c.bf16 %v566_v9, %v549_v8  ;;  %v330_v63 = vld [vmem:[#allocation2 + $0x968] sm:$0xff]  ;;  %v365_v5 = vld [vmem:[#allocation2 + $0xa80] sm:$0xff]  ;;  %v111_v8 = vld [vmem:[#allocation2 + $0x290] sm:$0xff] }
  0xdb   :  { %v128_v9 = vld [vmem:[#allocation2 + $0x318] sm:$0xff] }
  0xdc   :  { %2700 = vmatpush1.bf16.msra.mxu1 %v2699_v16  ;;  %2255 = vmatpush1.msk.msra.mxu0 %vm737_vm0, %v615_v17  ;;  %v212_v16 = vld [vmem:[#allocation2 + $0x5b8] sm:$0xff]  ;;  %v229_v17 = vld [vmem:[#allocation2 + $0x640] sm:$0xff] }
  0xdd   :  { %2702 = vmatprep.subr.bf16.mxu1 %v2701_v20  ;;  %2726 = vmatprep.subr.bf16.mxu0 %v2725_v21  ;;  %v583_v20 = vld [vmem:[#allocation2 + $0x1150] sm:$0xff]  ;;  %v2721_v21 = vpack.c.bf16 %v601_v15, %v584_v14  ;;  %v2745_v24 = vpack.c.bf16 %v229_v17, %v212_v16  ;;  %v146_v14 = vld [vmem:[#allocation2 + $0x3a8] sm:$0xff] }
  0xde   :  { %v163_v15 = vld [vmem:[#allocation2 + $0x430] sm:$0xff]  ;;  %v382_v16 = vld [vmem:[#allocation2 + $0xb08] sm:$0xff] }
  0xdf   :  { %2256 = vmatmul.mubr.msk.f32.vlgmr.msra.gmra.mrb[4].mxu0 %vm734_vm1, %v3045_v37  ;;  %v399_v17 = vld [vmem:[#allocation2 + $0xb90] sm:$0xff] }
  0xe0   :  { %2704 = vmatpush1.bf16.msra.mxu1 %v2703_v30  ;;  %2728 = vmatpush1.bf16.msra.mxu0 %v2727_v31  ;;  %v2723_v31 = vpack.c.bf16 %v600_v23, %v583_v20  ;;  %v145_v20 = vld [vmem:[#allocation2 + $0x3a0] sm:$0xff]  ;;  %v2805_v23 = vpack.c.bf16 %v163_v15, %v146_v14 }
  0xe1   :  { %2706 = vmatprep.subr.bf16.mxu1 %v2705_v34  ;;  %2730 = vmatprep.subr.bf16.mxu0 %v2729_v35  ;;  %v2749_v35 = vpack.c.bf16 %v263_v28, %v246_v27  ;;  %v180_v27 = vld [vmem:[#allocation2 + $0x4b8] sm:$0xff]  ;;  %v197_v28 = vld [vmem:[#allocation2 + $0x540] sm:$0xff] }
  0xe2   :  { %1705 = vmatprep.mubr.f32.mxu0 %v3049_v43 }
  0xe4   :  { %2708 = vmatpush1.bf16.msra.mxu1 %v2707_v44  ;;  %2732 = vmatpush1.bf16.msra.mxu0 %v2731_v45  ;;  %v617_v44 = vld [vmem:[#allocation2 + $0x1260] sm:$0x3f]  ;;  %v2751_v45 = vpack.c.bf16 %v262_v38, %v245_v36  ;;  %v179_v36 = vld [vmem:[#allocation2 + $0x4b0] sm:$0xff]  ;;  %v196_v38 = vld [vmem:[#allocation2 + $0x538] sm:$0xff] }
  0xe5   :  { %2710 = vmatprep.subr.bf16.mxu1 %v2709_v48  ;;  %2734 = vmatprep.subr.bf16.mxu0 %v2733_v49  ;;  %v2793_v48 = vpack.c.bf16 %v61_v40, %v44_v39  ;;  %v2753_v49 = vpack.c.bf16 %v297_v42, %v280_v41  ;;  %v2809_v39 = vpack.c.bf16 %v197_v28, %v180_v27  ;;  %v415_v41 = vld [vmem:[#allocation2 + $0xc10] sm:$0xff]  ;;  %v432_v42 = vld [vmem:[#allocation2 + $0xc98] sm:$0xff] }
  0xe8   :  { %2712 = vmatpush1.bf16.msra.mxu1 %v2711_v56  ;;  %2736 = vmatpush1.bf16.msra.mxu0 %v2735_v57  ;;  %v2795_v56 = vpack.c.bf16 %v60_v47, %v43_v46  ;;  %v2755_v57 = vpack.c.bf16 %v296_v51, %v279_v50  ;;  %v450_v46 = vld [vmem:[#allocation2 + $0xd28] sm:$0xff]  ;;  %v467_v47 = vld [vmem:[#allocation2 + $0xdb0] sm:$0xff]  ;;  %v213_v50 = vld [vmem:[#allocation2 + $0x5c0] sm:$0xff] }
  0xe9   :  { %2714 = vmatprep.subr.bf16.mxu1 %v2713_v60  ;;  %2738 = vmatprep.subr.bf16.mxu0 %v2737_v61  ;;  %v2797_v60 = vpack.c.bf16 %v95_v53, %v78_v52  ;;  %v2757_v61 = vpack.c.bf16 %v331_v55, %v314_v54  ;;  %v230_v51 = vld [vmem:[#allocation2 + $0x648] sm:$0xff]  ;;  %v2773_v53 = vpack.c.bf16 %v467_v47, %v450_v46  ;;  %v449_v54 = vld [vmem:[#allocation2 + $0xd20] sm:$0xff] }
  0xea   :  { %v466_v55 = vld [vmem:[#allocation2 + $0xda8] sm:$0xff]  ;;  %v585_v46 = vld [vmem:[#allocation2 + $0x1160] sm:$0xff] }
  0xeb   :  { %v602_v47 = vld [vmem:[#allocation2 + $0x11e8] sm:$0xff] }
  0xec   :  { %2716 = vmatpush1.bf16.msra.mxu1 %v2715_v6  ;;  %2740 = vmatpush1.bf16.msra.mxu0 %v2739_v7  ;;  %v2799_v6 = vpack.c.bf16 %v94_v59, %v77_v58  ;;  %v2759_v7 = vpack.c.bf16 %v330_v63, %v313_v62  ;;  %v484_v58 = vld [vmem:[#allocation2 + $0xe38] sm:$0xff]  ;;  %v501_v59 = vld [vmem:[#allocation2 + $0xec0] sm:$0xff]  ;;  %v247_v62 = vld [vmem:[#allocation2 + $0x6d0] sm:$0xff] }
  0xed   :  { %2718 = vmatprep.subr.bf16.mxu1 %v2717_v10  ;;  %2742 = vmatprep.subr.bf16.mxu0 %v2741_v11  ;;  %v2801_v10 = vpack.c.bf16 %v129_v2, %v112_v1  ;;  %v2761_v11 = vpack.c.bf16 %v365_v5, %v348_v3  ;;  %v264_v63 = vld [vmem:[#allocation2 + $0x758] sm:$0xff]  ;;  %v2777_v2 = vpack.c.bf16 %v501_v59, %v484_v58  ;;  %v483_v3 = vld [vmem:[#allocation2 + $0xe30] sm:$0xff]  ;;  %v317_v58 = vld [vmem:[#allocation2 + $0x900] sm:$0xff] }
  0xee   :  { %v500_v5 = vld [vmem:[#allocation2 + $0xeb8] sm:$0xff]  ;;  %v334_v59 = vld [vmem:[#allocation2 + $0x988] sm:$0xff] }
  0xf0   :  { %2720 = vmatpush1.bf16.msra.mxu1 %v2719_v18  ;;  %2744 = vmatpush1.bf16.msra.mxu0 %v2743_v19  ;;  %v3086_v30 = vpop.f32.mrb[0].mxu1  ;;  %v2803_v18 = vpack.c.bf16 %v128_v9, %v111_v8  ;;  %v2763_v19 = vpack.c.bf16 %v364_v13, %v347_v12  ;;  %v518_v8 = vld [vmem:[#allocation2 + $0xf48] sm:$0xff]  ;;  %v535_v9 = vld [vmem:[#allocation2 + $0xfd0] sm:$0xff]  ;;  %v281_v12 = vld [vmem:[#allocation2 + $0x7e0] sm:$0xff] }
  0xf1   :  { %v3088_v34 = vpop.f32.mrb[1].mxu1  ;;  %2722 = vmatprep.subr.bf16.mxu1 %v2721_v21  ;;  %2746 = vmatprep.subr.bf16.mxu0 %v2745_v24  ;;  %v162_v21 = vld [vmem:[#allocation2 + $0x428] sm:$0xff]  ;;  %v2765_v24 = vpack.c.bf16 %v399_v17, %v382_v16  ;;  %v2781_v15 = vpack.c.bf16 %v535_v9, %v518_v8  ;;  %v517_v16 = vld [vmem:[#allocation2 + $0xf40] sm:$0xff]  ;;  %v632_v8 = vsub.s32 0, %v3032_v4  ;;  %v351_v9 = vld [vmem:[#allocation2 + $0xa10] sm:$0xff] }
  0xf2   :  { %v298_v13 = vld [vmem:[#allocation2 + $0x868] sm:$0xff] }
  0xf3   :  { %1564 = vmatmul.mubr.f32.vlgmr.msra.gmra.mrb[8].mxu1 %v3041_v29  ;;  %v534_v17 = vld [vmem:[#allocation2 + $0xfc8] sm:$0xff] }
  0xf4   :  { %2724 = vmatpush1.bf16.msra.mxu1 %v2723_v31  ;;  %2748 = vmatpush1.bf16.msra.mxu0 %v2747_v32  ;;  %v416_v31 = vld [vmem:[#allocation2 + $0xc18] sm:$0xff]  ;;  %v433_v32 = vld [vmem:[#allocation2 + $0xca0] sm:$0xff] }
  0xf5   :  { %2257 = vmatprep.subr.msk.mxu1 %vm737_vm0, %v618_v33  ;;  %2750 = vmatprep.subr.bf16.mxu0 %v2749_v35  ;;  %v2807_v33 = vpack.c.bf16 %v162_v21, %v145_v20  ;;  %v2767_v35 = vpack.c.bf16 %v398_v26, %v381_v25  ;;  %v2769_v40 = vpack.c.bf16 %v433_v32, %v416_v31  ;;  %v552_v20 = vld [vmem:[#allocation2 + $0x1058] sm:$0xff]  ;;  %v569_v21 = vld [vmem:[#allocation2 + $0x10e0] sm:$0xff]  ;;  %v315_v25 = vld [vmem:[#allocation2 + $0x8f0] sm:$0xff] }
  0xf6   :  { %1634 = vmatprep.mubr.f32.mxu1 %v2995_v0  ;;  %v332_v26 = vld [vmem:[#allocation2 + $0x978] sm:$0xff]  ;;  %v2785_v28 = vpack.c.bf16 %v569_v21, %v552_v20  ;;  %v551_v31 = vld [vmem:[#allocation2 + $0x1050] sm:$0xff] }
  0xf7   :  { %v568_v32 = vld [vmem:[#allocation2 + $0x10d8] sm:$0xff]  ;;  %v79_v20 = vld [vmem:[#allocation2 + $0x190] sm:$0xff] }
  0xf8   :  { %2258 = vmatpush1.msk.msra.mxu1 %vm737_vm0, %v617_v44  ;;  %2752 = vmatpush1.bf16.msra.mxu0 %v2751_v45  ;;  %v214_v44 = vld [vmem:[#allocation2 + $0x5c8] sm:$0xff]  ;;  %v231_v45 = vld [vmem:[#allocation2 + $0x650] sm:$0xff]  ;;  %v96_v21 = vld [vmem:[#allocation2 + $0x218] sm:$0xff] }
  0xf9   :  { %2794 = vmatprep.subr.bf16.mxu1 %v2793_v48  ;;  %2754 = vmatprep.subr.bf16.mxu0 %v2753_v49  ;;  %v2811_v48 = vpack.c.bf16 %v196_v38, %v179_v36  ;;  %v2771_v49 = vpack.c.bf16 %v432_v42, %v415_v41  ;;  %v2813_v52 = vpack.c.bf16 %v231_v45, %v214_v44  ;;  %v586_v36 = vld [vmem:[#allocation2 + $0x1168] sm:$0xff]  ;;  %v603_v38 = vld [vmem:[#allocation2 + $0x11f0] sm:$0xff]  ;;  %v349_v41 = vld [vmem:[#allocation2 + $0xa00] sm:$0xff] }
  0xfa   :  { %v366_v44 = vld [vmem:[#allocation2 + $0xa88] sm:$0xff]  ;;  %v2789_v45 = vpack.c.bf16 %v603_v38, %v586_v36  ;;  %v520_v38 = vld [vmem:[#allocation2 + $0xf58] sm:$0xff] }
  0xfb   :  { %2259 = vmatmul.mubr.msk.f32.vlgmr.msra.gmra.mrb[8].mxu1 %vm734_vm1, %v3045_v37 }
  0xfc   :  { %2796 = vmatpush1.bf16.msra.mxu1 %v2795_v56  ;;  %2756 = vmatpush1.bf16.msra.mxu0 %v2755_v57  ;;  %v248_v56 = vld [vmem:[#allocation2 + $0x6d8] sm:$0xff]  ;;  %v265_v57 = vld [vmem:[#allocation2 + $0x760] sm:$0xff] }
  0xfd   :  { %2798 = vmatprep.subr.bf16.mxu1 %v2797_v60  ;;  %2758 = vmatprep.subr.bf16.mxu0 %v2757_v61  ;;  %v2815_v60 = vpack.c.bf16 %v230_v51, %v213_v50  ;;  %v2775_v61 = vpack.c.bf16 %v466_v55, %v449_v54  ;;  %v2817_v1 = vpack.c.bf16 %v265_v57, %v248_v56  ;;  %v400_v54 = vld [vmem:[#allocation2 + $0xb98] sm:$0xff]  ;;  %v418_v56 = vld [vmem:[#allocation2 + $0xc28] sm:$0xff]  ;;  %v435_v57 = vld [vmem:[#allocation2 + $0xcb0] sm:$0xff] }
  0xfe   :  { %1847 = vmatprep.mubr.f32.mxu1 %v3049_v43  ;;  %v2831_v50 = vpack.c.bf16 %v366_v44, %v349_v41  ;;  %v2791_v51 = vpack.c.bf16 %v602_v47, %v585_v46  ;;  %v620_v55 = vld [vmem:[#allocation2 + $0x1278] sm:$0x3f]  ;;  %v130_v41 = vld [vmem:[#allocation2 + $0x328] sm:$0xff]  ;;  %v419_v46 = vld [vmem:[#allocation2 + $0xc30] sm:$0xff] }
  0xff   :  { %v436_v47 = vld [vmem:[#allocation2 + $0xcb8] sm:$0xff] }
 0x100   :  { %2800 = vmatpush1.bf16.msra.mxu1 %v2799_v6  ;;  %2760 = vmatpush1.bf16.msra.mxu0 %v2759_v7  ;;  %v282_v6 = vld [vmem:[#allocation2 + $0x7e8] sm:$0xff]  ;;  %v299_v7 = vld [vmem:[#allocation2 + $0x870] sm:$0xff] }
 0x101   :  { %2802 = vmatprep.subr.bf16.mxu1 %v2801_v10  ;;  %2762 = vmatprep.subr.bf16.mxu0 %v2761_v11  ;;  %v2819_v10 = vpack.c.bf16 %v264_v63, %v247_v62  ;;  %v2779_v11 = vpack.c.bf16 %v500_v5, %v483_v3  ;;  %v2821_v14 = vpack.c.bf16 %v299_v7, %v282_v6  ;;  %v417_v62 = vld [vmem:[#allocation2 + $0xc20] sm:$0xff]  ;;  %v434_v63 = vld [vmem:[#allocation2 + $0xca8] sm:$0xff] }
 0x102   :  { %v2861_v3 = vpack.c.bf16 %v334_v59, %v317_v58  ;;  %v45_v5 = vld [vmem:[#allocation2 + $0x80] sm:$0xff]  ;;  %v62_v6 = vld [vmem:[#allocation2 + $0x108] sm:$0xff]  ;;  %v147_v58 = vld [vmem:[#allocation2 + $0x3b0] sm:$0xff] }
 0x103   :  { %v469_v7 = vld [vmem:[#allocation2 + $0xdc0] sm:$0xff]  ;;  %v164_v59 = vld [vmem:[#allocation2 + $0x438] sm:$0xff] }
 0x104   :  { %2804 = vmatpush1.bf16.msra.mxu1 %v2803_v18  ;;  %2764 = vmatpush1.bf16.msra.mxu0 %v2763_v19  ;;  %v316_v18 = vld [vmem:[#allocation2 + $0x8f8] sm:$0xff]  ;;  %v333_v19 = vld [vmem:[#allocation2 + $0x980] sm:$0xff] }
 0x105   :  { %2806 = vmatprep.subr.bf16.mxu1 %v2805_v23  ;;  %2766 = vmatprep.subr.bf16.mxu0 %v2765_v24  ;;  %v2823_v23 = vpack.c.bf16 %v298_v13, %v281_v12  ;;  %v2783_v24 = vpack.c.bf16 %v534_v17, %v517_v16  ;;  %v2825_v27 = vpack.c.bf16 %v333_v19, %v316_v18  ;;  %v636_v12 = vsub.s32 1, %v3032_v4  ;;  %v486_v18 = vld [vmem:[#allocation2 + $0xe48] sm:$0xff] }
 0x106   :  { %v2839_v13 = vpack.c.bf16 %v434_v63, %v417_v62  ;;  %v2863_v16 = vpack.c.bf16 %v62_v6, %v45_v5  ;;  %v553_v62 = vld [vmem:[#allocation2 + $0x1060] sm:$0xff]  ;;  %v570_v63 = vld [vmem:[#allocation2 + $0x10e8] sm:$0xff] }
 0x107   :  { %v181_v6 = vld [vmem:[#allocation2 + $0x4c0] sm:$0xff] }
 0x108   :  { %2808 = vmatpush1.bf16.msra.mxu1 %v2807_v33  ;;  %2768 = vmatpush1.bf16.msra.mxu0 %v2767_v35  ;;  %v350_v33 = vld [vmem:[#allocation2 + $0xa08] sm:$0xff]  ;;  %v367_v35 = vld [vmem:[#allocation2 + $0xa90] sm:$0xff] }
 0x109   :  { %2810 = vmatprep.subr.bf16.mxu1 %v2809_v39  ;;  %2770 = vmatprep.subr.bf16.mxu0 %v2769_v40  ;;  %v2827_v39 = vpack.c.bf16 %v332_v26, %v315_v25  ;;  %v2787_v40 = vpack.c.bf16 %v568_v32, %v551_v31  ;;  %v2829_v42 = vpack.c.bf16 %v367_v35, %v350_v33  ;;  %v385_v25 = vld [vmem:[#allocation2 + $0xb20] sm:$0xff]  ;;  %v402_v26 = vld [vmem:[#allocation2 + $0xba8] sm:$0xff] }
 0x10a   :  { %v485_v31 = vld [vmem:[#allocation2 + $0xe40] sm:$0xff]  ;;  %v502_v32 = vld [vmem:[#allocation2 + $0xec8] sm:$0xff]  ;;  %v2867_v33 = vpack.c.bf16 %v96_v21, %v79_v20  ;;  %v604_v20 = vld [vmem:[#allocation2 + $0x11f8] sm:$0xff] }
 0x10c   :  { %2812 = vmatpush1.bf16.msra.mxu1 %v2811_v48  ;;  %2772 = vmatpush1.bf16.msra.mxu0 %v2771_v49  ;;  %v384_v48 = vld [vmem:[#allocation2 + $0xb18] sm:$0xff]  ;;  %v401_v49 = vld [vmem:[#allocation2 + $0xba0] sm:$0xff] }
 0x10d   :  { %2814 = vmatprep.subr.bf16.mxu1 %v2813_v52  ;;  %2774 = vmatprep.subr.bf16.mxu0 %v2773_v53  ;;  %v383_v52 = vld [vmem:[#allocation2 + $0xb10] sm:$0xff]  ;;  %v2833_v53 = vpack.c.bf16 %v401_v49, %v384_v48 }
 0x110   :  { %2816 = vmatpush1.bf16.msra.mxu1 %v2815_v60  ;;  %2776 = vmatpush1.bf16.msra.mxu0 %v2775_v61  ;;  %v2835_v60 = vpack.c.bf16 %v400_v54, %v383_v52  ;;  %v619_v61 = vld [vmem:[#allocation2 + $0x1270] sm:$0x3f]  ;;  %v536_v52 = vld [vmem:[#allocation2 + $0xfd8] sm:$0xff] }
 0x111   :  { %2818 = vmatprep.subr.bf16.mxu1 %v2817_v1  ;;  %2778 = vmatprep.subr.bf16.mxu0 %v2777_v2  ;;  %v2837_v1 = vpack.c.bf16 %v435_v57, %v418_v56  ;;  %v452_v2 = vld [vmem:[#allocation2 + $0xd38] sm:$0xff]  ;;  %v554_v56 = vld [vmem:[#allocation2 + $0x1068] sm:$0xff]  ;;  %v2873_v57 = vpack.c.bf16 %v436_v47, %v419_v46  ;;  %v555_v46 = vld [vmem:[#allocation2 + $0x1070] sm:$0xff] }
 0x112   :  { %v2841_v17 = vpack.c.bf16 %v469_v7, %v452_v2  ;;  %v640_v2 = vsub.s32 2, %v3032_v4  ;;  %v198_v7 = vld [vmem:[#allocation2 + $0x548] sm:$0xff]  ;;  %v572_v47 = vld [vmem:[#allocation2 + $0x10f8] sm:$0xff] }
 0x114   :  { %2820 = vmatpush1.bf16.msra.mxu1 %v2819_v10  ;;  %2780 = vmatpush1.bf16.msra.mxu0 %v2779_v11  ;;  %v368_v10 = vld [vmem:[#allocation2 + $0xa98] sm:$0xff]  ;;  %v3104_v11 = vld [vmem:[%s3186_s2] sm:$0xff] }
 0x115   :  { %2822 = vmatprep.subr.bf16.mxu1 %v2821_v14  ;;  %2782 = vmatprep.subr.bf16.mxu0 %v2781_v15  ;;  %v451_v14 = vld [vmem:[#allocation2 + $0xd30] sm:$0xff]  ;;  %v468_v15 = vld [vmem:[#allocation2 + $0xdb8] sm:$0xff]  ;;  %v2865_v19 = vpack.c.bf16 %v368_v10, %v351_v9  ;;  %v605_v9 = vld [vmem:[#allocation2 + $0x1200] sm:$0xff]  ;;  %v644_v10 = vsub.s32 3, %v3032_v4 }
 0x118   :  { %2824 = vmatpush1.bf16.msra.mxu1 %v2823_v23  ;;  %2784 = vmatpush1.bf16.msra.mxu0 %v2783_v24  ;;  %v633_v23 = vrot.slane %v3104_v11, %v632_v8  ;;  %v503_v24 = vld [vmem:[#allocation2 + $0xed0] sm:$0xff] }
 0x119   :  { %2826 = vmatprep.subr.bf16.mxu1 %v2825_v27  ;;  %2786 = vmatprep.subr.bf16.mxu0 %v2785_v28  ;;  %v637_v27 = vrot.slane %v3104_v11, %v636_v12  ;;  %v2843_v28 = vpack.c.bf16 %v468_v15, %v451_v14  ;;  %v2845_v36 = vpack.c.bf16 %v503_v24, %v486_v18  ;;  %v504_v14 = vld [vmem:[#allocation2 + $0xed8] sm:$0xff]  ;;  %v215_v24 = vld [vmem:[#allocation2 + $0x5d0] sm:$0xff] }
 0x11a   :  { %v2855_v15 = vpack.c.bf16 %v570_v63, %v553_v62 }
 0x11c   :  { %2828 = vmatpush1.bf16.msra.mxu1 %v2827_v39  ;;  %2788 = vmatpush1.bf16.msra.mxu0 %v2787_v40  ;;  %v2869_v39 = vpack.c.bf16 %v402_v26, %v385_v25  ;;  %v113_v40 = vld [vmem:[#allocation2 + $0x2a0] sm:$0xff]  ;;  %v232_v25 = vld [vmem:[#allocation2 + $0x658] sm:$0xff] }
 0x11d   :  { %2830 = vmatprep.subr.bf16.mxu1 %v2829_v42  ;;  %2790 = vmatprep.subr.bf16.mxu0 %v2789_v45  ;;  %v537_v45 = vld [vmem:[#allocation2 + $0xfe0] sm:$0xff] }
 0x11e   :  { %v521_v26 = vld [vmem:[#allocation2 + $0xf60] sm:$0xff] }
 0x11f   :  { %1706 = vmatmul.mubr.f32.vlgmr.msra.gmra.mrb[6].mxu0 %v3041_v29 }
 0x120   :  { %2832 = vmatpush1.bf16.msra.mxu1 %v2831_v50  ;;  %2792 = vmatpush1.bf16.msra.mxu0 %v2791_v51  ;;  %v2847_v50 = vpack.c.bf16 %v502_v32, %v485_v31  ;;  %v519_v51 = vld [vmem:[#allocation2 + $0xf50] sm:$0xff] }
 0x121   :  { %2834 = vmatprep.subr.bf16.mxu1 %v2833_v53  ;;  %2260 = vmatprep.subr.msk.mxu0 %vm737_vm0, %v620_v55  ;;  %v2871_v53 = vpack.c.bf16 %v130_v41, %v113_v40  ;;  %v2849_v55 = vpack.c.bf16 %v537_v45, %v520_v38  ;;  %v2883_v38 = vpack.c.bf16 %v232_v25, %v215_v24  ;;  %v622_v41 = vld [vmem:[#allocation2 + $0x1288] sm:$0x3f] }
 0x122   :  { %1776 = vmatprep.mubr.f32.mxu0 %v2995_v0  ;;  %v266_v45 = vld [vmem:[#allocation2 + $0x768] sm:$0xff] }
 0x124   :  { %2836 = vmatpush1.bf16.msra.mxu1 %v2835_v60  ;;  %2261 = vmatpush1.msk.msra.mxu0 %vm737_vm0, %v619_v61  ;;  %v453_v60 = vld [vmem:[#allocation2 + $0xd40] sm:$0xff]  ;;  %v470_v61 = vld [vmem:[#allocation2 + $0xdc8] sm:$0xff] }
 0x125   :  { %2838 = vmatprep.subr.bf16.mxu1 %v2837_v1  ;;  %2862 = vmatprep.subr.bf16.mxu0 %v2861_v3  ;;  %v2875_v1 = vpack.c.bf16 %v164_v59, %v147_v58  ;;  %v588_v3 = vld [vmem:[#allocation2 + $0x1178] sm:$0xff]  ;;  %v2877_v5 = vpack.c.bf16 %v470_v61, %v453_v60  ;;  %v2997_v59 = vmov 0.0|0.0   ;;  %v623_v60 = vld [vmem:[#allocation2 + $0x1290] sm:$0x3f] }
 0x126   :  { %v2857_v18 = vpack.c.bf16 %v605_v9, %v588_v3 }
 0x127   :  { %2262 = vmatmul.mubr.msk.f32.vlgmr.msra.gmra.mrb[6].mxu0 %vm734_vm1, %v3045_v37 }
 0x128   :  { %2840 = vmatpush1.bf16.msra.mxu1 %v2839_v13  ;;  %2864 = vmatpush3.bf16.msra.mxu0 %v2863_v16  ;;  %v487_v13 = vld [vmem:[#allocation2 + $0xe50] sm:$0xff]  ;;  %v2879_v16 = vpack.c.bf16 %v198_v7, %v181_v6 }
 0x129   :  { %2842 = vmatprep.subr.bf16.mxu1 %v2841_v17  ;;  %v855_v35 = vpop.f32.mrb[0].mxu0  ;;  %2866 = vmatprep.subr.bf16.mxu0 %v2865_v19  ;;  %v641_v17 = vrot.slane %v3104_v11, %v640_v2  ;;  %v587_v19 = vld [vmem:[#allocation2 + $0x1170] sm:$0xff]  ;;  %v2881_v21 = vpack.c.bf16 %v504_v14, %v487_v13 }
 0x12a   :  { %v856_v42 = vadd.f32 %v855_v35, %v633_v23  ;;  %v857_v44 = vpop.f32.mrb[1].mxu0  ;;  %1989 = vmatprep.mubr.f32.mxu0 %v3049_v43  ;;  %v571_v43 = vld [vmem:[#allocation2 + $0x10f0] sm:$0xff]  ;;  %v645_v23 = vrot.slane %v3104_v11, %v644_v10  ;;  %v2859_v32 = vpack.c.bf16 %v604_v20, %v587_v19 }
 0x12b   :  { %v858_v48 = vadd.f32 %v857_v44, %v637_v27  ;;  %v538_v27 = vld [vmem:[#allocation2 + $0xfe8] sm:$0xff]  ;;  %v249_v44 = vld [vmem:[#allocation2 + $0x6e0] sm:$0xff] }
 0x12c   :  { %2844 = vmatpush1.bf16.msra.mxu1 %v2843_v28  ;;  %v927_v49 = vadd.f32 %v3086_v30, %v856_v42  ;;  %2868 = vmatpush3.bf16.msra.mxu0 %v2867_v33  ;;  %v2851_v30 = vpack.c.bf16 %v536_v52, %v519_v51  ;;  %v2885_v42 = vpack.c.bf16 %v538_v27, %v521_v26  ;;  %v606_v51 = vld [vmem:[#allocation2 + $0x1208] sm:$0xff] }
 0x12d   :  { %v929_v54 = vadd.f32 %v3088_v34, %v858_v48  ;;  %2846 = vmatprep.subr.bf16.mxu1 %v2845_v36  ;;  %2870 = vmatprep.subr.bf16.mxu0 %v2869_v39  ;;  %v2853_v34 = vpack.c.bf16 %v571_v43, %v554_v56  ;;  %v621_v48 = vld [vmem:[#allocation2 + $0x1280] sm:$0x3f] }
 0x12e   :  { %2936 = vtanh.f32 %v927_v49  ;;  %v2887_v49 = vpack.c.bf16 %v266_v45, %v249_v44 }
 0x12f   :  { %2938 = vtanh.f32 %v929_v54  ;;  %v283_v54 = vld [vmem:[#allocation2 + $0x7f0] sm:$0xff] }
 0x130   :  { %2848 = vmatpush1.bf16.msra.mxu1 %v2847_v50  ;;  %2872 = vmatpush3.bf16.msra.mxu0 %v2871_v53  ;;  %v589_v50 = vld [vmem:[#allocation2 + $0x1180] sm:$0xff]  ;;  %v2889_v53 = vpack.c.bf16 %v572_v47, %v555_v46 }
 0x131   :  { %2850 = vmatprep.subr.bf16.mxu1 %v2849_v55  ;;  %2874 = vmatprep.subr.bf16.mxu0 %v2873_v57  ;;  %v300_v55 = vld [vmem:[#allocation2 + $0x878] sm:$0xff]  ;;  %v2894_v57 = vpack.c.bf16 %v606_v51, %v589_v50 }
 0x132   :  { %v2891_v58 = vpack.c.bf16 %v300_v55, %v283_v54 }
 0x134   :  { %2852 = vmatpush1.bf16.msra.mxu1 %v2851_v30  ;;  %2876 = vmatpush3.bf16.msra.mxu0 %v2875_v1 }
 0x135   :  { %2854 = vmatprep.subr.bf16.mxu1 %v2853_v34  ;;  %2878 = vmatprep.subr.bf16.mxu0 %v2877_v5  ;;  %v652_v34 = vsub.s32 5, %v3032_v4 }
 0x137   :  { %v653_v3 = vrot.slane %v3104_v11, %v652_v34 }
 0x138   :  { %v2937_v28 = vpop.eup %2936  ;;  %2856 = vmatpush1.bf16.msra.mxu1 %v2855_v15  ;;  %v1068_v31 = vpop.f32.mrb[2].mxu1  ;;  %2880 = vmatpush3.bf16.msra.mxu0 %v2879_v16 }
 0x139   :  { %v2939_v33 = vpop.eup %2938  ;;  %v2900_v35 = vadd.f32 %v1068_v31, %v641_v17  ;;  %2858 = vmatprep.subr.bf16.mxu1 %v2857_v18  ;;  %v1070_v36 = vpop.f32.mrb[3].mxu1  ;;  %2882 = vmatprep.subr.bf16.mxu0 %v2881_v21  ;;  %v656_v17 = vsub.s32 6, %v3032_v4  ;;  %v660_v18 = vsub.s32 7, %v3032_v4 }
 0x13a   :  { %v2151_v39 = vcombine.low %v2937_v28, %v2939_v33  ;;  %v2901_v40 = vadd.f32 %v1070_v36, %v645_v23 }
 0x13b   :  { %2940 = vtanh.f32 %v2900_v35  ;;  %1848 = vmatmul.mubr.f32.vlgmr.msra.gmra.mrb[10].mxu1 %v3041_v29  ;;  %v657_v19 = vrot.slane %v3104_v11, %v656_v17  ;;  %v661_v20 = vrot.slane %v3104_v11, %v660_v18 }
 0x13c   :  { %2942 = vtanh.f32 %v2901_v40  ;;  %2860 = vmatpush1.bf16.msra.mxu1 %v2859_v32  ;;  %1918 = vmatprep.mubr.f32.mxu1 %v2995_v0  ;;  %v2159_v62 = vrot.slane %v2151_v39, %v3035_v22 }
 0x13d   :  { %2263 = vmatprep.subr.msk.mxu1 %vm737_vm0, %v622_v41  ;;  %2884 = vmatpush3.bf16.msra.mxu0 %v2883_v38 }
 0x13e   :  { %v1210_v52 = vpop.f32.mrb[4].mxu1  ;;  %2886 = vmatprep.subr.bf16.mxu0 %v2885_v42 }
 0x13f   :  { %v1212_v56 = vpop.f32.mrb[5].mxu1 }
 0x140   :  { %2264 = vmatpush1.msk.msra.mxu1 %vm737_vm0, %v621_v48 }
 0x141   :  { %2888 = vmatpush3.bf16.msra.mxu0 %v2887_v49  ;;  %2893 = vmatprep.subr.bf16.mxu1 %v2997_v59 }
 0x142   :  { %2890 = vmatprep.subr.bf16.mxu0 %v2889_v53 }
 0x143   :  { %2265 = vmatmul.mubr.msk.f32.vlgmr.msra.gmra.mrb[10].mxu1 %vm734_vm1, %v3045_v37 }
 0x144   :  { %2895 = vmatpush3.bf16.msra.mxu1 %v2894_v57  ;;  %2314 = vmatprep.mubr.msk.f32.mxu1 %vm2998_vm2, %v2995_v0 }
 0x145   :  { %v2941_v43 = vpop.eup %2940  ;;  %2892 = vmatpush3.bf16.msra.mxu0 %v2891_v58  ;;  %2312 = vmatprep.subr.mxu1 %v2995_v0  ;;  %v648_v0 = vsub.s32 4, %v3032_v4 }
 0x146   :  { %v2943_v61 = vpop.eup %2942 }
 0x147   :  { %v2152_v30 = vcombine.low %v2941_v43, %v2943_v61 }
 0x148   :  { %1990 = vmatmul.mubr.f32.vlgmr.msra.gmra.mrb[8].mxu0 %v3041_v29  ;;  %2313 = vmatpush3.msk.msra.mxu1 %vm737_vm0, %v623_v60  ;;  %v649_v29 = vrot.slane %v3104_v11, %v648_v0  ;;  %v625_v11 = vld [vmem:[%s3186_s2 + $0x8] sm:$0xff] }
 0x149   :  { %v2166_v63 = vrot.slane %v2152_v30, %v3035_v22  ;;  %2315 = vmatmul.mubr.msk.f32.vlgmr.msra.gmra.mrb[12].mxu1 %vm734_vm1, %v3045_v37  ;;  %v665_v35 = vrot.slane %v625_v11, %v632_v8  ;;  %v669_v36 = vrot.slane %v625_v11, %v636_v12  ;;  %v673_v46 = vrot.slane %v625_v11, %v640_v2 }
 0x14a   :  { %v677_v47 = vrot.slane %v625_v11, %v644_v10  ;;  %v681_v4 = vrot.slane %v625_v11, %v648_v0  ;;  %v685_v2 = vrot.slane %v625_v11, %v652_v34  ;;  %v689_v61 = vrot.slane %v625_v11, %v656_v17  ;;  %v2241_v34 = vld [vmem:[%s3186_s2 + $0x10] ss:$0 sm:$0xff] }
 0x14b   :  { %v2167_v1 = vcombine.low %v2159_v62, %v2166_v63  ;;  %v693_v30 = vrot.slane %v625_v11, %v660_v18 }
 0x14d   :  { %2231 = vst [vmem:[%s3187_s3] sm:$0xff] %v2167_v1 }
 0x16a   :  { %v1139_v5 = vpop.f32.mrb[2].mxu0 }
 0x16b   :  { %v1140_v6 = vadd.f32 %v1139_v5, %v649_v29  ;;  %v1141_v7 = vpop.f32.mrb[3].mxu0 }
 0x16c   :  { %v1142_v9 = vadd.f32 %v1141_v7, %v653_v3 }
 0x16d   :  { %v1211_v13 = vadd.f32 %v1210_v52, %v1140_v6 }
 0x16e   :  { %v1213_v14 = vadd.f32 %v1212_v56, %v1142_v9 }
 0x16f   :  { %2944 = vtanh.f32 %v1211_v13 }
 0x170   :  { %2946 = vtanh.f32 %v1213_v14 }
 0x179   :  { %v2945_v37 = vpop.eup %2944 }
 0x17a   :  { %v2947_v15 = vpop.eup %2946 }
 0x17b   :  { %v2168_v16 = vcombine.low %v2945_v37, %v2947_v15 }
 0x17d   :  { %v2176_v31 = vrot.slane %v2168_v16, %v3035_v22 }
 0x186   :  { %v1352_v21 = vpop.f32.mrb[6].mxu1 }
 0x187   :  { %v2906_v23 = vadd.f32 %v1352_v21, %v657_v19  ;;  %v1354_v24 = vpop.f32.mrb[7].mxu1 }
 0x188   :  { %v2907_v25 = vadd.f32 %v1354_v24, %v661_v20 }
 0x189   :  { %2948 = vtanh.f32 %v2906_v23 }
 0x18a   :  { %2950 = vtanh.f32 %v2907_v25 }
 0x193   :  { %v2949_v26 = vpop.eup %2948 }
 0x194   :  { %v2951_v27 = vpop.eup %2950 }
 0x195   :  { %v2169_v28 = vcombine.low %v2949_v26, %v2951_v27 }
 0x197   :  { %v2183_v32 = vrot.slane %v2169_v28, %v3035_v22 }
 0x199   :  { %v2184_v33 = vcombine.low %v2176_v31, %v2183_v32 }
 0x19b   :  { %2232 = vst [vmem:[%s3187_s3 + $0x8] sm:$0xff] %v2184_v33 }
 0x1b2   :  { %v1494_v38 = vpop.f32.mrb[4].mxu0 }
 0x1b3   :  { %v2908_v39 = vadd.f32 %v1494_v38, %v665_v35  ;;  %v1496_v40 = vpop.f32.mrb[5].mxu0 }
 0x1b4   :  { %v2909_v41 = vadd.f32 %v1496_v40, %v669_v36 }
 0x1b5   :  { %2952 = vtanh.f32 %v2908_v39 }
 0x1b6   :  { %2954 = vtanh.f32 %v2909_v41 }
 0x1bf   :  { %v2953_v42 = vpop.eup %2952 }
 0x1c0   :  { %v2955_v44 = vpop.eup %2954 }
 0x1c1   :  { %v2185_v45 = vcombine.low %v2953_v42, %v2955_v44 }
 0x1c3   :  { %v2193_v53 = vrot.slane %v2185_v45, %v3035_v22 }
 0x1ce   :  { %v1636_v48 = vpop.f32.mrb[8].mxu1 }
 0x1cf   :  { %v2910_v8 = vadd.f32 %v1636_v48, %v673_v46  ;;  %v1638_v49 = vpop.f32.mrb[9].mxu1 }
 0x1d0   :  { %v2911_v50 = vadd.f32 %v1638_v49, %v677_v47 }
 0x1d1   :  { %2956 = vtanh.f32 %v2910_v8 }
 0x1d2   :  { %2958 = vtanh.f32 %v2911_v50 }
 0x1db   :  { %v2957_v12 = vpop.eup %2956 }
 0x1dc   :  { %v2959_v51 = vpop.eup %2958 }
 0x1dd   :  { %v2186_v52 = vcombine.low %v2957_v12, %v2959_v51 }
 0x1df   :  { %v2200_v54 = vrot.slane %v2186_v52, %v3035_v22 }
 0x1e1   :  { %v2201_v55 = vcombine.low %v2193_v53, %v2200_v54 }
 0x1e3   :  { %2233 = vst [vmem:[%s3187_s3 + $0x10] sm:$0xff] %v2201_v55 }
 0x1fa   :  { %v1778_v10 = vpop.f32.mrb[6].mxu0 }
 0x1fb   :  { %v2912_v56 = vadd.f32 %v1778_v10, %v681_v4  ;;  %v1780_v57 = vpop.f32.mrb[7].mxu0 }
 0x1fc   :  { %v2913_v58 = vadd.f32 %v1780_v57, %v685_v2 }
 0x1fd   :  { %2960 = vtanh.f32 %v2912_v56 }
 0x1fe   :  { %2962 = vtanh.f32 %v2913_v58 }
 0x207   :  { %v2961_v59 = vpop.eup %2960 }
 0x208   :  { %v2963_v43 = vpop.eup %2962 }
 0x209   :  { %v2202_v60 = vcombine.low %v2961_v59, %v2963_v43 }
 0x20b   :  { %v2210_v16 = vrot.slane %v2202_v60, %v3035_v22 }
 0x216   :  { %v1920_v62 = vpop.f32.mrb[10].mxu1 }
 0x217   :  { %v2914_v63 = vadd.f32 %v1920_v62, %v689_v61  ;;  %v1922_v1 = vpop.f32.mrb[11].mxu1 }
 0x218   :  { %v2915_v29 = vadd.f32 %v1922_v1, %v693_v30 }
 0x219   :  { %2964 = vtanh.f32 %v2914_v63 }
 0x21a   :  { %2966 = vtanh.f32 %v2915_v29 }
 0x21b   :  { %v2301_v3 = vpop.f32.mrb[8].mxu0 }
 0x21c   :  { %v2302_v0 = vpop.f32.mrb[9].mxu0  ;;  %v2061_v5 = vpop.f32.mrb[12].mxu1 }
 0x21d   :  { %v2303_v6 = vadd.f32 %v2302_v0, %v2301_v3  ;;  %v2316_v7 = vpop.f32.mrb[13].mxu1 }
 0x21f   :  { %v1992_v9 = vadd.f32 %v2303_v6, %v2241_v34 }
 0x221   :  { %v2062_v13 = vadd.f32 %v2061_v5, %v1992_v9 }
 0x223   :  { %v2965_v14 = vpop.eup %2964  ;;  %2268 = vst.sshfl [vmem:[%s3187_s3 + $0x20] sm:$0x3 pattern:$0x76325410] %v2062_v13 }
 0x224   :  { %v2967_v37 = vpop.eup %2966 }
 0x225   :  { %v2203_v15 = vcombine.low %v2965_v14, %v2967_v37 }
 0x227   :  { %v2217_v17 = vrot.slane %v2203_v15, %v3035_v22 }
 0x229   :  { %v2218_v18 = vcombine.low %v2210_v16, %v2217_v17 }
 0x22b   :  { %2234 = vst [vmem:[%s3187_s3 + $0x18] sm:$0xff] %v2218_v18 }
 0x22c   :  { %2240 = vsyncpa [#allocation3], 1 }

// kernel: fins_forward.3
= control target key start
LH: loop header
LB: loop body
LE: loop exit
PB: predicated region body
PF: predicated region fallthrough
CT: control target
= control target key end

     0   :  { %9 = vsyncpa [#allocation5], 0  ;;  %s16516_s0 = inlined_call_operand.vmem [shape: f32[42], index: 0, kind: input, shape index: {}]   ;;  %s16517_s1 = inlined_call_operand.vmem [shape: bf16[2,10,16,128], index: 1, kind: input, shape index: {}]   ;;  %s16518_s2 = inlined_call_operand.vmem [shape: bf16[10,1152,128], index: 2, kind: input, shape index: {}]   ;;  %s16519_s3 = inlined_call_operand.vmem [shape: f32[2,16,128], index: 3, kind: input, shape index: {}]   ;;  %s16520_s4 = inlined_call_operand.hbm [shape: f32[2,16,128], index: 4, kind: output, shape index: {}]  }
   0x1   :  { %10 = vsyncpa [#allocation4], 0 }
   0x2   :  { %12 = vsyncpa [#allocation4 + $0x1], 0  ;;  %s13405_s15 = smov 0   ;;  %s13407_s16 = smov 0  }
   0x3   :  { %s13409_s17 = smov 0   ;;  %s13411_s18 = smov 0  }
   0x4 LB: > { %s13426_s19 = sadd.s32 4294967295, %s13371_s18   ;;  %s9228_s20 = sadd.s32 4294967294, %s13371_s18   ;;  %s13371_s18 = sphi %s13411_s18, %s16543_s18   ;;  %s13367_s17 = sphi %s13409_s17, %s16542_s17   ;;  %s13363_s16 = sphi %s13407_s16, %s16541_s16   ;;  %s13359_s15 = sphi %s13405_s15, %s16540_s15  }
   0x5   : > { %s13430_s21 = sadd.s32 1, %s13371_s18   ;;  %s119_s22 = sadd.s32 1, %s13367_s17 }
   0x6   : > { %s116_s23 = ssub.s32 %s13371_s18, %s13430_s21  ;;  %p129_p0 = scmp.ne.s32.totalorder %s13367_s17, %s13363_s16 }
   0x7   : > { %p117_p1 = scmp.eq.s32.totalorder %s116_s23, 0  ;;  %p130_p2 = scmp.eq.s32.totalorder %s13426_s19, 1 }
   0x8   : > { %p135_p3 = scmp.ne.s32.totalorder %s13363_s16, %s13359_s15  ;;  %p136_p4 = scmp.eq.s32.totalorder %s9228_s20, 1 }
   0x9   : > { %s13441_s24 = scalar_select %p117_p1, %s13367_s17, %s119_s22  }
   0xa   : > { %p13443_p5 = por %p130_p2, %p129_p0  ;;  %p13447_p6 = por %p136_p4, %p135_p3 }
   0xb   : > { %p9229_p7 = scmp.ge.s32.totalorder %s13371_s18, 1  ;;  %p143_p8 = scmp.lt.s32.totalorder %s13371_s18, 3 }
   0xc   : > { %p12459_p9 = scmp.eq.s32.totalorder %s13426_s19, 0  ;;  %s156_s30 = sshll.u32 %s16516_s0, 4  ;;  %s157_s30 = int_to_ptr.vmem [resolvable:$true] %s156_s30 }
   0xd   : > { %p13454_p10 = pnand %p9229_p7, %p143_p8  ;;  %s13290_s5 = scalar_lea.vmem %s157_s30, 16 }
   0xe   : > { %p13291_p13 = scmp.ne.s32.totalorder %s157_s30, %s13290_s5  ;;  %p13298_p3 = scmp.lt.s32.totalorder %s157_s30, %s157_s30 }
   0xf   : > { %p12451_p11 = pneg %p13454_p10  ;;  %p13299_p4 = scmp.lt.s32.totalorder %s13290_s5, %s13290_s5 }
  0x11   : > { %p12452_p12 = pnand %p12459_p9, %p12451_p11  ;;  %p13300_p7 = por %p13299_p4, %p13298_p3 }
  0x13   : > { %p13292_p0 = pneg %p12452_p12 }
  0x15   : > { %p13293_p1 = pnand %p13292_p0, %p13291_p13 }
  0x17   : > { %p13294_p2 = pneg %p13293_p1 }
  0x19   : > { %p13301_p8 = pnand %p13300_p7, %p13294_p2 }
  0x1b   : > { %13304 = shalt.err (!%p13301_p8)
}
  0x1c   : > { %s13373_s6 = smov [#allocation3]   ;;  %188 = sbr.rel (%p13454_p10) target bundleno = 1091 (0x443), region = 36 }
  0x1d   : > { %12454 = dma.vmem_to_smem (!%p12452_p12), %s157_s30, 16, %s13373_s6, [#allocation5]  }
  0x23   : > { %13350 = dma.done.wait (%p12459_p9), [#allocation5], 16  }
  0x24   : > { %13352 = vsyncadd (%p12459_p9), [#allocation5], 4294967280 }
  0x25   : > { %194 = sfence }
  0x26   : > { %v12500_v0 = vld [vmem:[%s16518_s2 + $0x40] sm:$0xff]   ;;  %v12504_v4 = vld [vmem:[%s16518_s2 + $0x48] sm:$0xff]   ;;  %v12508_v8 = vld [vmem:[%s16518_s2 + $0x50] sm:$0xff]   ;;  %v13374_v9 = vmov 0   ;;  %p220_p9 = scmp.lt.s32.totalorder %s13426_s19, 1  ;;  %vm341_vm0 = vcmask 1041408  }
  0x27   : > { %v12501_v1 = vld [vmem:[%s16518_s2 + $0xc0] sm:$0xff]   ;;  %11274 = vmatprep.subr.bf16.mxu0 %v12500_v0  ;;  %v12505_v5 = vld [vmem:[%s16518_s2 + $0xc8] sm:$0xff]   ;;  %251 = vst [vmem:[#allocation2] sm:$0x3] %v13374_v9  ;;  %252 = vst [vmem:[#allocation2 + $0x48] sm:$0x3] %v13374_v9 }
  0x28   : > { %v12502_v2 = vld [vmem:[%s16518_s2] sm:$0xff]   ;;  %11296 = vmatprep.subr.bf16.mxu1 %v12501_v1  ;;  %v12506_v6 = vld [vmem:[%s16518_s2 + $0x8] sm:$0xff]   ;;  %253 = vst [vmem:[#allocation2 + $0x90] sm:$0x3] %v13374_v9  ;;  %254 = vst [vmem:[#allocation2 + $0xd8] sm:$0x3] %v13374_v9 }
  0x29   : > { %v12503_v3 = vld [vmem:[%s16518_s2 + $0x80] sm:$0xff]   ;;  %11275 = vmatpush3.bf16.msra.mxu0 %v12502_v2  ;;  %v12507_v7 = vld [vmem:[%s16518_s2 + $0x88] sm:$0xff]   ;;  %255 = vst [vmem:[#allocation2 + $0x120] sm:$0x3] %v13374_v9  ;;  %256 = vst [vmem:[#allocation2 + $0x168] sm:$0x3] %v13374_v9 }
  0x2a   : > { %11297 = vmatpush3.bf16.msra.mxu1 %v12503_v3  ;;  %11276 = vmatprep.subr.bf16.mxu0 %v12504_v4  ;;  %257 = vst [vmem:[#allocation2 + $0x1b0] sm:$0x3] %v13374_v9  ;;  %258 = vst [vmem:[#allocation2 + $0x1f8] sm:$0x3] %v13374_v9  ;;  %v12509_v10 = vld [vmem:[%s16518_s2 + $0xd0] sm:$0xff]   ;;  %v12512_v13 = vld [vmem:[%s16518_s2 + $0x58] sm:$0xff]  }
  0x2b   : > { %11298 = vmatprep.subr.bf16.mxu1 %v12505_v5  ;;  %259 = vst [vmem:[#allocation2 + $0x240] sm:$0x3] %v13374_v9  ;;  %260 = vst [vmem:[#allocation2 + $0x288] sm:$0x3] %v13374_v9  ;;  %v12510_v11 = vld [vmem:[%s16518_s2 + $0x10] sm:$0xff]   ;;  %v12513_v14 = vld [vmem:[%s16518_s2 + $0xd8] sm:$0xff]  }
  0x2c   : > { %497 = vst [vmem:[#allocation2 + $0x10] sm:$0x1] %v13374_v9  ;;  %498 = vst [vmem:[#allocation2 + $0x58] sm:$0x1] %v13374_v9  ;;  %v12511_v12 = vld [vmem:[%s16518_s2 + $0x90] sm:$0xff]   ;;  %v12514_v15 = vld [vmem:[%s16518_s2 + $0x18] sm:$0xff]  }
  0x2d   : > { %11277 = vmatpush3.bf16.msra.mxu0 %v12506_v6  ;;  %499 = vst [vmem:[#allocation2 + $0xa0] sm:$0x1] %v13374_v9  ;;  %500 = vst [vmem:[#allocation2 + $0xe8] sm:$0x1] %v13374_v9  ;;  %v12515_v16 = vld [vmem:[%s16518_s2 + $0x98] sm:$0xff]   ;;  %v12516_v17 = vld [vmem:[%s16518_s2 + $0x60] sm:$0xff]  }
  0x2e   : > { %501 = vst [vmem:[#allocation2 + $0x130] sm:$0x1] %v13374_v9  ;;  %502 = vst [vmem:[#allocation2 + $0x178] sm:$0x1] %v13374_v9  ;;  %11299 = vmatpush3.bf16.msra.mxu1 %v12507_v7  ;;  %11278 = vmatprep.subr.bf16.mxu0 %v12508_v8  ;;  %v12517_v18 = vld [vmem:[%s16518_s2 + $0xe0] sm:$0xff]   ;;  %v12520_v21 = vld [vmem:[%s16518_s2 + $0x68] sm:$0xff]  }
  0x2f   : > { %503 = vst [vmem:[#allocation2 + $0x1c0] sm:$0x1] %v13374_v9  ;;  %504 = vst [vmem:[#allocation2 + $0x208] sm:$0x1] %v13374_v9  ;;  %11300 = vmatprep.subr.bf16.mxu1 %v12509_v10  ;;  %v12518_v19 = vld [vmem:[%s16518_s2 + $0x20] sm:$0xff]   ;;  %v12521_v22 = vld [vmem:[%s16518_s2 + $0xe8] sm:$0xff]  }
  0x30   : > { %505 = vst [vmem:[#allocation2 + $0x250] sm:$0x1] %v13374_v9  ;;  %506 = vst [vmem:[#allocation2 + $0x298] sm:$0x1] %v13374_v9  ;;  %v12519_v20 = vld [vmem:[%s16518_s2 + $0xa0] sm:$0xff]   ;;  %s13539_s23 = scalar_select %p220_p9, %s13426_s19, 1 }
  0x31   : > { %778 = vst [vmem:[#allocation2 + $0x30] sm:$0x80] %v13374_v9  ;;  %779 = vst [vmem:[#allocation2 + $0x78] sm:$0x80] %v13374_v9  ;;  %11279 = vmatpush3.bf16.msra.mxu0 %v12510_v11  ;;  %v12522_v23 = vld [vmem:[%s16518_s2 + $0x28] sm:$0xff]   ;;  %v12524_v25 = vld [vmem:[%s16518_s2 + $0x70] sm:$0xff]  }
  0x32   : > { %780 = vst [vmem:[#allocation2 + $0xc0] sm:$0x80] %v13374_v9  ;;  %781 = vst [vmem:[#allocation2 + $0x108] sm:$0x80] %v13374_v9  ;;  %11301 = vmatpush3.bf16.msra.mxu1 %v12511_v12  ;;  %11280 = vmatprep.subr.bf16.mxu0 %v12512_v13  ;;  %v12523_v24 = vld [vmem:[%s16518_s2 + $0xa8] sm:$0xff]   ;;  %v12525_v26 = vld [vmem:[%s16518_s2 + $0xf0] sm:$0xff]  }
  0x33   : > { %782 = vst [vmem:[#allocation2 + $0x150] sm:$0x80] %v13374_v9  ;;  %783 = vst [vmem:[#allocation2 + $0x198] sm:$0x80] %v13374_v9  ;;  %11302 = vmatprep.subr.bf16.mxu1 %v12513_v14  ;;  %s12444_s9 = smul.u32 80, %s13539_s23  ;;  %v12526_v27 = vld [vmem:[%s16518_s2 + $0x30] sm:$0xff]  }
  0x34   : > { %784 = vst [vmem:[#allocation2 + $0x1e0] sm:$0x80] %v13374_v9  ;;  %785 = vst [vmem:[#allocation2 + $0x228] sm:$0x80] %v13374_v9  ;;  %v12527_v28 = vld [vmem:[%s16518_s2 + $0xb0] sm:$0xff]   ;;  %v12528_v29 = vld [vmem:[%s16518_s2 + $0x78] sm:$0xff]  }
  0x35   : > { %786 = vst [vmem:[#allocation2 + $0x270] sm:$0x80] %v13374_v9  ;;  %787 = vst [vmem:[#allocation2 + $0x2b8] sm:$0x80] %v13374_v9  ;;  %11281 = vmatpush3.bf16.msra.mxu0 %v12514_v15  ;;  %v12529_v30 = vld [vmem:[%s16518_s2 + $0xf8] sm:$0xff]   ;;  %s13569_s30 = scalar_lea.vmem %s16517_s1, %s12444_s9  ;;  %vm537_vm2 = vcmask 1040384  }
  0x36   : > { %924 = vst [vmem:[#allocation2 + $0x40] sm:$0xc0] %v13374_v9  ;;  %925 = vst [vmem:[#allocation2 + $0x88] sm:$0xc0] %v13374_v9  ;;  %11303 = vmatpush3.bf16.msra.mxu1 %v12515_v16  ;;  %11282 = vmatprep.subr.bf16.mxu0 %v12516_v17  ;;  %v12530_v31 = vld [vmem:[%s16518_s2 + $0x38] sm:$0xff]   ;;  %v13578_v33 = vld [vmem:[%s13569_s30] sm:$0xff]  }
  0x37   : > { %926 = vst [vmem:[#allocation2 + $0xd0] sm:$0xc0] %v13374_v9  ;;  %927 = vst [vmem:[#allocation2 + $0x118] sm:$0xc0] %v13374_v9  ;;  %11304 = vmatprep.subr.bf16.mxu1 %v12517_v18  ;;  %v12531_v32 = vld [vmem:[%s16518_s2 + $0xb8] sm:$0xff]   ;;  %v13585_v36 = vshrl.u32 %v13578_v33, 16 }
  0x38   : > { %928 = vst [vmem:[#allocation2 + $0x160] sm:$0xc0] %v13374_v9  ;;  %929 = vst [vmem:[#allocation2 + $0x1a8] sm:$0xc0] %v13374_v9  ;;  %vm342_vm1 = vsmask.f32 1280 }
  0x39   : > { %930 = vst [vmem:[#allocation2 + $0x1f0] sm:$0xc0] %v13374_v9  ;;  %931 = vst [vmem:[#allocation2 + $0x238] sm:$0xc0] %v13374_v9  ;;  %11283 = vmatpush3.bf16.msra.mxu0 %v12518_v19  ;;  %v344_v34 = vld [vmem:[#allocation2 + $0x8] sm:$0x3] }
  0x3a   : > { %932 = vst [vmem:[#allocation2 + $0x280] sm:$0xc0] %v13374_v9  ;;  %933 = vst [vmem:[#allocation2 + $0x2c8] sm:$0xc0] %v13374_v9  ;;  %11305 = vmatpush3.bf16.msra.mxu1 %v12519_v20  ;;  %11284 = vmatprep.subr.bf16.mxu0 %v12520_v21  ;;  %v13588_v37 = vshll.u32 %v13578_v33, 16  ;;  %v311_v40 = vrot.slane %v13578_v33, 6 }
  0x3b   : > { %11306 = vmatprep.subr.bf16.mxu1 %v12521_v22  ;;  %vm13580_vm3 = vmand %vm341_vm0, %vm342_vm1  ;;  %vm538_vm4 = vsmask.f32 256  ;;  %v540_v38 = vld [vmem:[#allocation2 + $0x18] sm:$0x1]  ;;  %vm465_vm5 = vsmask.f32 7942 }
  0x3c   : > { %v345_v39 = vsel %vm13580_vm3, 0, %v344_v34  ;;  %v507_v41 = vrot.slane %v13578_v33, 7  ;;  %v12533_v42 = vld [vmem:[%s16518_s2 + $0x140] sm:$0xff]   ;;  %v377_v43 = vrot.slane %v13585_v36, 6  ;;  %v380_v44 = vrot.slane %v13588_v37, 7  ;;  %vm13600_vm7 = vmand %vm537_vm2, %vm538_vm4  ;;  %v12538_v61 = vld [vmem:[%s16518_s2 + $0x1c8] sm:$0xff]  }
  0x3d   : > { %11285 = vmatpush3.bf16.msra.mxu0 %v12522_v23  ;;  %346 = vst [vmem:[#allocation2 + $0x8] sm:$0x3] %v345_v39  ;;  %vm464_vm6 = vcmask 1047553   ;;  %v12534_v46 = vld [vmem:[%s16518_s2 + $0x1c0] sm:$0xff]   ;;  %v541_v47 = vsel %vm13600_vm7, 0, %v540_v38  ;;  %v570_v48 = vrot.slane %v13585_v36, 7 }
  0x3e   : > { %11307 = vmatpush3.bf16.msra.mxu1 %v12523_v24  ;;  %11286 = vmatprep.subr.bf16.mxu0 %v12524_v25  ;;  %331 = vst [vmem:[#allocation2] sm:$0xfc] %v311_v40  ;;  %527 = vst [vmem:[#allocation2 + $0x10] sm:$0xfe] %v507_v41  ;;  %vm600_vm8 = vcmask 1047552   ;;  %v381_v49 = vor.u32 %v380_v44, %v377_v43  ;;  %v748_v51 = vrot.slane %v13578_v33, 1 }
  0x3f   : > { %11308 = vmatprep.subr.bf16.mxu1 %v12525_v26  ;;  %542 = vst [vmem:[#allocation2 + $0x18] sm:$0x1] %v541_v47  ;;  %vm601_vm9 = vsmask.f32 7938  ;;  %vm13611_vm10 = vmand %vm464_vm6, %vm465_vm5  ;;  %v571_v52 = vor.u32 %v570_v48, %v13588_v37  ;;  %v894_v53 = vrot.slane %v13578_v33, 2  ;;  %v12536_v57 = vld [vmem:[%s16518_s2 + $0x180] sm:$0xff]  }
  0x40   : > { %vm13619_vm11 = vmand %vm600_vm8, %vm601_vm9  ;;  %768 = vst [vmem:[#allocation2 + $0x30] sm:$0x7f] %v748_v51  ;;  %v12535_v62 = vld [vmem:[%s16518_s2 + $0x100] sm:$0xff]   ;;  %v12540_v63 = vld [vmem:[%s16518_s2 + $0x188] sm:$0xff]   ;;  %vm683_vm12 = vsmask.f32 7424 }
  0x41   : > { %11287 = vmatpush3.bf16.msra.mxu0 %v12526_v27  ;;  %914 = vst [vmem:[#allocation2 + $0x40] sm:$0x3f] %v894_v53  ;;  %v12542_v0 = vld [vmem:[%s16518_s2 + $0x1d0] sm:$0xff]   ;;  %v12537_v3 = vld [vmem:[%s16518_s2 + $0x148] sm:$0xff]   ;;  %v12546_v5 = vld [vmem:[%s16518_s2 + $0x1d8] sm:$0xff]   ;;  %v653_v15 = vrot.slane %v13588_v37, 1 }
  0x42   : > { %11309 = vmatpush3.bf16.msra.mxu1 %v12527_v28  ;;  %11288 = vmatprep.subr.bf16.mxu0 %v12528_v29  ;;  %v12544_v4 = vld [vmem:[%s16518_s2 + $0x190] sm:$0xff]   ;;  %v12539_v6 = vld [vmem:[%s16518_s2 + $0x108] sm:$0xff]   ;;  %v12548_v8 = vld [vmem:[%s16518_s2 + $0x198] sm:$0xff]   ;;  %vm829_vm13 = vsmask.f32 6400  ;;  %v788_v17 = vrot.slane %v13585_v36, 1 }
  0x43   : > { %11310 = vmatprep.subr.bf16.mxu1 %v12529_v30  ;;  %v12541_v7 = vld [vmem:[%s16518_s2 + $0x150] sm:$0xff]   ;;  %v12550_v9 = vld [vmem:[%s16518_s2 + $0x1e0] sm:$0xff]   ;;  %v12545_v11 = vld [vmem:[%s16518_s2 + $0x158] sm:$0xff]   ;;  %v789_v20 = vrot.slane %v13588_v37, 2  ;;  %v654_v23 = vor.u32 %v653_v15, %v13585_v36  ;;  %vm828_vm14 = vcmask 1046528   ;;  %vm715_vm2 = vcmask 1047559  }
  0x44   : > { %v467_v54 = vld [vmem:[#allocation2 + $0x8] sm:$0xfe]  ;;  %v12543_v10 = vld [vmem:[%s16518_s2 + $0x110] sm:$0xff]   ;;  %v12547_v12 = vld [vmem:[%s16518_s2 + $0x118] sm:$0xff]   ;;  %vm716_vm0 = vsmask.f32 7966 }
  0x45   : > { %11289 = vmatpush3.bf16.msra.mxu0 %v12530_v31  ;;  %v468_v56 = vsel %vm13611_vm10, %v381_v49, %v467_v54  ;;  %v971_v59 = vld [vmem:[#allocation2 + $0x10] sm:$0xff]  ;;  %v969_v1 = vld [vmem:[#allocation2] sm:$0xff]  ;;  %v12554_v14 = vld [vmem:[%s16518_s2 + $0x1e8] sm:$0xff]   ;;  %v790_v26 = vor.u32 %v789_v20, %v788_v17  ;;  %vm861_vm4 = vcmask 1047558   ;;  %vm862_vm5 = vsmask.f32 7962 }
  0x46   : > { %11311 = vmatpush3.bf16.msra.mxu1 %v12531_v32  ;;  %11318 = vmatprep.subr.bf16.mxu0 %v12533_v42  ;;  %469 = vst [vmem:[#allocation2 + $0x8] sm:$0xfe] %v468_v56  ;;  %v603_v58 = vld [vmem:[#allocation2 + $0x18] sm:$0xff]  ;;  %v12552_v13 = vld [vmem:[%s16518_s2 + $0x1a0] sm:$0xff]   ;;  %v12556_v19 = vld [vmem:[%s16518_s2 + $0x1a8] sm:$0xff]   ;;  %v13375_v49 = vmov 0.0  }
  0x47   : > { %11340 = vmatprep.subr.bf16.mxu1 %v12534_v46  ;;  %v604_v60 = vsel %vm13619_vm11, %v571_v52, %v603_v58  ;;  %v12549_v16 = vld [vmem:[%s16518_s2 + $0x160] sm:$0xff]   ;;  %v12558_v21 = vld [vmem:[%s16518_s2 + $0x1f0] sm:$0xff]   ;;  %v12553_v22 = vld [vmem:[%s16518_s2 + $0x168] sm:$0xff]   ;;  %vm13376_vm9 = vmmov 0   ;;  %s14431_s29 = smul.u32 20, %s13426_s19  ;;  %s14536_s11 = sld [smem:[#allocation3]] }
  0x48   : > { %605 = vst [vmem:[#allocation2 + $0x18] sm:$0xff] %v604_v60  ;;  %1627 = vmatprep.mubr.bf16.mxu1 %v604_v60  ;;  %v12551_v18 = vld [vmem:[%s16518_s2 + $0x120] sm:$0xff]   ;;  %v12560_v24 = vld [vmem:[%s16518_s2 + $0x1b0] sm:$0xff]   ;;  %v12562_v25 = vld [vmem:[%s16518_s2 + $0x1f8] sm:$0xff]   ;;  %s11272_s14 = sshll.u32 %s13539_s23, 4 }
  0x49   : > { %1628 = vmatmul.mubr.bf16.vlgmr.msra.gmra.mrb[0].mxu1 %v971_v59  ;;  %vm13705_vm15 = vmand %vm600_vm8, %vm683_vm12  ;;  %v685_v28 = vld [vmem:[#allocation2 + $0x28] sm:$0xff]  ;;  %v831_v29 = vld [vmem:[#allocation2 + $0x38] sm:$0x7f]  ;;  %s1760_s27 = sadd.s32 12, %s14431_s29  ;;  %s2576_s20 = sadd.s32 13, %s14431_s29 }
  0x4a   : > { %11341 = vmatpush3.bf16.msra.mxu1 %v12536_v57  ;;  %v12555_v30 = vld [vmem:[%s16518_s2 + $0x128] sm:$0xff]   ;;  %v686_v31 = vsel %vm13705_vm15, %v654_v23, %v685_v28  ;;  %v12557_v32 = vld [vmem:[%s16518_s2 + $0x170] sm:$0xff]   ;;  %vm13718_vm1 = vmand %vm828_vm14, %vm829_vm13  ;;  %s14469_s10 = sld [smem:[#allocation3 + %s1760_s27]]  ;;  %s958_s6 = sadd.s32 2, %s14431_s29 }
  0x4b   : > { %11342 = vmatprep.subr.bf16.mxu1 %v12538_v61  ;;  %687 = vst [vmem:[#allocation2 + $0x28] sm:$0xff] %v686_v31  ;;  %v12559_v36 = vld [vmem:[%s16518_s2 + $0x130] sm:$0xff]   ;;  %v12564_v37 = vld [vmem:[%s16518_s2 + $0x1b8] sm:$0xff]   ;;  %v832_v38 = vsel %vm13718_vm1, %v790_v26, %v831_v29  ;;  %v12565_v39 = vld [vmem:[%s16518_s2 + $0x280] sm:$0xff]   ;;  %s14522_s5 = sld [smem:[#allocation3 + %s2576_s20]]  ;;  %s229_s13 = scalar_lea.vmem %s16519_s3, %s11272_s14 }
  0x4c   : > { %833 = vst [vmem:[#allocation2 + $0x38] sm:$0x7f] %v832_v38  ;;  %v12561_v40 = vld [vmem:[%s16518_s2 + $0x178] sm:$0xff]   ;;  %vm13737_vm6 = vmand %vm715_vm2, %vm716_vm0  ;;  %v975_v51 = vld [vmem:[#allocation2 + $0x30] sm:$0xff]  ;;  %s14826_s22 = sld [smem:[#allocation3 + %s958_s6]]  ;;  %s2574_s23 = sadd.s32 3, %s14431_s29 }
  0x4d   : > { %v970_v2 = vld [vmem:[#allocation2 + $0x8] sm:$0xff]  ;;  %v12563_v42 = vld [vmem:[%s16518_s2 + $0x138] sm:$0xff]   ;;  %vm13744_vm8 = vmand %vm861_vm4, %vm862_vm5  ;;  %s3392_s14 = sadd.s32 14, %s14431_s29  ;;  %s4206_s9 = sadd.s32 5, %s14431_s29 }
  0x4e   : > { %1586 = vmatprep.mubr.bf16.mxu0 %v970_v2  ;;  %11343 = vmatpush3.bf16.msra.mxu1 %v12540_v63  ;;  %v12566_v52 = vld [vmem:[%s16518_s2 + $0x200] sm:$0xff]   ;;  %v12568_v57 = vld [vmem:[%s16518_s2 + $0x288] sm:$0xff]   ;;  %v12571_v59 = vld [vmem:[%s16518_s2 + $0x290] sm:$0xff]   ;;  %s15075_s6 = sld [smem:[#allocation3 + %s3392_s14]]  ;;  %s5024_s14 = sadd.s32 16, %s14431_s29 }
  0x4f   : > { %1587 = vmatmul.mubr.bf16.vlgmr.msra.gmra.mrb[0].mxu0 %v969_v1  ;;  %11344 = vmatprep.subr.bf16.mxu1 %v12542_v0  ;;  %v12567_v54 = vld [vmem:[%s16518_s2 + $0x240] sm:$0xff]   ;;  %v12569_v58 = vld [vmem:[%s16518_s2 + $0x208] sm:$0xff]   ;;  %v12572_v60 = vld [vmem:[%s16518_s2 + $0x210] sm:$0xff]   ;;  %s15471_s27 = sld [smem:[#allocation3 + %s4206_s9]] }
  0x50   : > { %11319 = vmatpush3.bf16.msra.mxu0 %v12535_v62  ;;  %v12573_v61 = vld [vmem:[%s16518_s2 + $0x250] sm:$0xff]   ;;  %v12574_v62 = vld [vmem:[%s16518_s2 + $0x298] sm:$0xff]   ;;  %v13789_v0 = vld [vmem:[%s13569_s30 + $0x8] sm:$0xff]   ;;  %s1762_s12 = ssub.f32 0.0, %s14469_s10  ;;  %s14554_s10 = sld [smem:[#allocation3 + $0x1]] }
  0x51   : > { %11320 = vmatprep.subr.bf16.mxu0 %v12537_v3  ;;  %v12575_v63 = vld [vmem:[%s16518_s2 + $0x218] sm:$0xff]   ;;  %v347_v1 = vld [vmem:[#allocation2 + $0x50] sm:$0x3]  ;;  %v13795_v3 = vshrl.u32 %v13789_v0, 16  ;;  %v12581_v15 = vld [vmem:[%s16518_s2 + $0x228] sm:$0xff]   ;;  %s2578_s7 = ssub.f32 0.0, %s14522_s5 }
  0x52   : > { %11345 = vmatpush3.bf16.msra.mxu1 %v12544_v4  ;;  %v718_v43 = vld [vmem:[#allocation2 + $0x28] sm:$0x80]  ;;  %v348_v2 = vsel %vm13580_vm3, 0, %v347_v1  ;;  %v13798_v4 = vshll.u32 %v13789_v0, 16  ;;  %v12583_v20 = vld [vmem:[%s16518_s2 + $0x2b0] sm:$0xff]   ;;  %v12588_v26 = vld [vmem:[%s16518_s2 + $0x278] sm:$0xff]  }
  0x53   : > { %11346 = vmatprep.subr.bf16.mxu1 %v12546_v5  ;;  %v719_v46 = vsel %vm13737_vm6, 0, %v718_v43  ;;  %v864_v47 = vld [vmem:[#allocation2 + $0x38] sm:$0xc0]  ;;  %349 = vst [vmem:[#allocation2 + $0x50] sm:$0x3] %v348_v2  ;;  %v12582_v17 = vld [vmem:[%s16518_s2 + $0x268] sm:$0xff]  }
  0x54   : > { %11321 = vmatpush3.bf16.msra.mxu0 %v12539_v6  ;;  %720 = vst [vmem:[#allocation2 + $0x28] sm:$0x80] %v719_v46  ;;  %v865_v48 = vsel %vm13744_vm8, 0, %v864_v47  ;;  %v12576_v5 = vld [vmem:[%s16518_s2 + $0x258] sm:$0xff]   ;;  %v312_v6 = vrot.slane %v13789_v0, 6  ;;  %v12585_v23 = vld [vmem:[%s16518_s2 + $0x270] sm:$0xff]  }
  0x55   : > { %11322 = vmatprep.subr.bf16.mxu0 %v12541_v7  ;;  %866 = vst [vmem:[#allocation2 + $0x38] sm:$0xc0] %v865_v48  ;;  %v12577_v7 = vld [vmem:[%s16518_s2 + $0x2a0] sm:$0xff]   ;;  %v12595_v38 = vld [vmem:[%s16518_s2 + $0x388] sm:$0xff]   ;;  %v12598_v43 = vld [vmem:[%s16518_s2 + $0x310] sm:$0xff]   ;;  %v655_v48 = vrot.slane %v13798_v4, 1 }
  0x56   : > { %11347 = vmatpush3.bf16.msra.mxu1 %v12548_v8  ;;  %v12578_v8 = vld [vmem:[%s16518_s2 + $0x220] sm:$0xff]   ;;  %332 = vst [vmem:[#allocation2 + $0x48] sm:$0xfc] %v312_v6  ;;  %v12599_v46 = vld [vmem:[%s16518_s2 + $0x390] sm:$0xff]   ;;  %v12611_v6 = vld [vmem:[%s16518_s2 + $0x3a8] sm:$0xff]   ;;  %s3394_s20 = ssub.f32 0.0, %s15075_s6 }
  0x57   : > { %11348 = vmatprep.subr.bf16.mxu1 %v12550_v9  ;;  %v385_v9 = vrot.slane %v13795_v3, 6  ;;  %v12590_v28 = vld [vmem:[%s16518_s2 + $0x300] sm:$0xff]   ;;  %v12600_v47 = vld [vmem:[%s16518_s2 + $0x2d0] sm:$0xff]   ;;  %s3390_s5 = sadd.s32 4, %s14431_s29  ;;  %s15671_s9 = sld [smem:[#allocation3 + %s5024_s14]]  ;;  %v13160_v35 = vld [vmem:[%s16518_s2 + $0x1458] sm:$0xff]  }
  0x58   : > { %11323 = vmatpush3.bf16.msra.mxu0 %v12543_v10  ;;  %v388_v10 = vrot.slane %v13798_v4, 7  ;;  %v977_v29 = vld [vmem:[#allocation2 + $0x40] sm:$0xff]  ;;  %v13167_v50 = vld [vmem:[%s16518_s2 + $0x1430] sm:$0xff]   ;;  %v13189_v45 = vld [vmem:[%s16518_s2 + $0x1558] sm:$0xff]   ;;  %s7470_s14 = sadd.s32 9, %s14431_s29 }
  0x59   : > { %11324 = vmatprep.subr.bf16.mxu0 %v12545_v11  ;;  %v12579_v11 = vld [vmem:[%s16518_s2 + $0x260] sm:$0xff]   ;;  %v13199_v41 = vld [vmem:[%s16518_s2 + $0x14f0] sm:$0xff]   ;;  %v13221_v44 = vld [vmem:[%s16518_s2 + $0x1628] sm:$0xff]  }
  0x5a   : > { %11349 = vmatpush3.bf16.msra.mxu1 %v12552_v13  ;;  %v508_v13 = vrot.slane %v13789_v0, 7  ;;  %v12591_v31 = vld [vmem:[%s16518_s2 + $0x380] sm:$0xff]  }
  0x5b   : > { %11350 = vmatprep.subr.bf16.mxu1 %v12554_v14  ;;  %v974_v53 = vld [vmem:[#allocation2 + $0x28] sm:$0xff]  ;;  %v12609_v2 = vld [vmem:[%s16518_s2 + $0x360] sm:$0xff]  }
  0x5c   : > { %11325 = vmatpush3.bf16.msra.mxu0 %v12547_v12  ;;  %1668 = vmatprep.mubr.bf16.mxu0 %v974_v53  ;;  %v976_v56 = vld [vmem:[#allocation2 + $0x38] sm:$0xff]  ;;  %v389_v12 = vor.u32 %v388_v10, %v385_v9  ;;  %v12580_v14 = vld [vmem:[%s16518_s2 + $0x2a8] sm:$0xff]   ;;  %528 = vst [vmem:[#allocation2 + $0x58] sm:$0xfe] %v508_v13  ;;  %v12614_v10 = vld [vmem:[%s16518_s2 + $0x330] sm:$0xff]  }
  0x5d   : > { %11326 = vmatprep.subr.bf16.mxu0 %v12549_v16  ;;  %1709 = vmatprep.mubr.bf16.mxu1 %v976_v56  ;;  %v470_v16 = vld [vmem:[#allocation2 + $0x50] sm:$0xfe]  ;;  %v12603_v53 = vld [vmem:[%s16518_s2 + $0x398] sm:$0xff]   ;;  %v656_v56 = vor.u32 %v655_v48, %v13795_v3  ;;  %v12613_v9 = vld [vmem:[%s16518_s2 + $0x368] sm:$0xff]  }
  0x5e   : > { %11351 = vmatpush3.bf16.msra.mxu1 %v12556_v19  ;;  %v749_v19 = vrot.slane %v13789_v0, 1  ;;  %v12637_v48 = vld [vmem:[%s16518_s2 + $0x428] sm:$0xff]   ;;  %v13193_v27 = vld [vmem:[%s16518_s2 + $0x1560] sm:$0xff]  }
  0x5f   : > { %11352 = vmatprep.subr.bf16.mxu1 %v12558_v21  ;;  %v895_v21 = vrot.slane %v13789_v0, 2 }
  0x60   : > { %11327 = vmatpush3.bf16.msra.mxu0 %v12551_v18  ;;  %v471_v18 = vsel %vm13611_vm10, %v389_v12, %v470_v16  ;;  %769 = vst [vmem:[#allocation2 + $0x78] sm:$0x7f] %v749_v19  ;;  %v12619_v19 = vld [vmem:[%s16518_s2 + $0x3b8] sm:$0xff]  }
  0x61   : > { %11328 = vmatprep.subr.bf16.mxu0 %v12553_v22  ;;  %472 = vst [vmem:[#allocation2 + $0x50] sm:$0xfe] %v471_v18  ;;  %v12584_v22 = vld [vmem:[%s16518_s2 + $0x230] sm:$0xff]   ;;  %915 = vst [vmem:[#allocation2 + $0x88] sm:$0x3f] %v895_v21  ;;  %v12622_v21 = vld [vmem:[%s16518_s2 + $0x400] sm:$0xff]  }
  0x62   : > { %11353 = vmatpush3.bf16.msra.mxu1 %v12560_v24  ;;  %v12586_v24 = vld [vmem:[%s16518_s2 + $0x2b8] sm:$0xff]   ;;  %v12617_v18 = vld [vmem:[%s16518_s2 + $0x370] sm:$0xff]  }
  0x63   : > { %11354 = vmatprep.subr.bf16.mxu1 %v12562_v25  ;;  %v12587_v25 = vld [vmem:[%s16518_s2 + $0x238] sm:$0xff]  }
  0x64   : > { %11329 = vmatpush3.bf16.msra.mxu0 %v12555_v30 }
  0x65   : > { %11330 = vmatprep.subr.bf16.mxu0 %v12557_v32  ;;  %v12592_v32 = vld [vmem:[%s16518_s2 + $0x2c0] sm:$0xff]  }
  0x66   : > { %11355 = vmatpush3.bf16.msra.mxu1 %v12564_v37  ;;  %v12594_v37 = vld [vmem:[%s16518_s2 + $0x308] sm:$0xff]  }
  0x67   : > { %11371 = vmatprep.subr.bf16.mxu1 %v12565_v39  ;;  %v1783_v39 = vld [vmem:[#allocation2 + $0x48] sm:$0xff] }
  0x68   : > { %11331 = vmatpush3.bf16.msra.mxu0 %v12559_v36  ;;  %v1784_v30 = vld [vmem:[#allocation2 + $0x50] sm:$0xff]  ;;  %v12593_v36 = vld [vmem:[%s16518_s2 + $0x340] sm:$0xff]  }
  0x69   : > { %11332 = vmatprep.subr.bf16.mxu0 %v12561_v40  ;;  %1710 = vmatmul.mubr.bf16.vlgmr.msra.gmra.mrb[4].mxu1 %v975_v51  ;;  %v12596_v40 = vld [vmem:[%s16518_s2 + $0x2c8] sm:$0xff]   ;;  %v12601_v51 = vld [vmem:[%s16518_s2 + $0x350] sm:$0xff]  }
  0x6a   : > { %11372 = vmatpush3.bf16.msra.mxu1 %v12567_v54  ;;  %2401 = vmatprep.mubr.bf16.mxu1 %v1784_v30  ;;  %v12604_v54 = vld [vmem:[%s16518_s2 + $0x2d8] sm:$0xff]   ;;  %v12624_v30 = vld [vmem:[%s16518_s2 + $0x440] sm:$0xff]  }
  0x6b   : > { %11373 = vmatprep.subr.bf16.mxu1 %v12568_v57  ;;  %v12605_v57 = vld [vmem:[%s16518_s2 + $0x358] sm:$0xff]  }
  0x6c   : > { %11333 = vmatpush3.bf16.msra.mxu0 %v12563_v42  ;;  %v12597_v42 = vld [vmem:[%s16518_s2 + $0x348] sm:$0xff]  }
  0x6d   : > { %12244 = vmatprep.subr.bf16.mxu0 %v13375_v49 }
  0x6f   : > { %1669 = vmatmul.mubr.bf16.vlgmr.msra.gmra.mrb[4].mxu0 %v13578_v33  ;;  %v12570_v33 = vld [vmem:[%s16518_s2 + $0x248] sm:$0xff]  }
  0x70   : > { %12245 = vmatpush3.bf16.msra.mxu0 %v12566_v52  ;;  %12260 = vmatprep.mubr.msk.bf16.mxu0 %vm13376_vm9, %v13375_v49  ;;  %v12602_v52 = vld [vmem:[%s16518_s2 + $0x318] sm:$0xff]  }
  0x71   : > { %12246 = vmatprep.subr.bf16.mxu0 %v13375_v49  ;;  %11374 = vmatpush3.bf16.msra.mxu1 %v12570_v33  ;;  %v543_v33 = vld [vmem:[#allocation2 + $0x60] sm:$0x1] }
  0x72   : > { %11375 = vmatprep.subr.bf16.mxu1 %v12571_v59  ;;  %v12607_v59 = vld [vmem:[%s16518_s2 + $0x3a0] sm:$0xff]  }
  0x74   : > { %12247 = vmatpush3.bf16.msra.mxu0 %v12569_v58  ;;  %v12606_v58 = vld [vmem:[%s16518_s2 + $0x320] sm:$0xff]  }
  0x75   : > { %12248 = vmatprep.subr.bf16.mxu0 %v13375_v49  ;;  %11376 = vmatpush3.bf16.msra.mxu1 %v12573_v61  ;;  %v688_v61 = vld [vmem:[#allocation2 + $0x70] sm:$0xff] }
  0x76   : > { %11377 = vmatprep.subr.bf16.mxu1 %v12574_v62  ;;  %v12608_v62 = vld [vmem:[%s16518_s2 + $0x2e0] sm:$0xff]   ;;  %v689_v1 = vsel %vm13705_vm15, %v656_v56, %v688_v61  ;;  %v12639_v56 = vld [vmem:[%s16518_s2 + $0x468] sm:$0xff]   ;;  %v12645_v61 = vld [vmem:[%s16518_s2 + $0x478] sm:$0xff]  }
  0x77   : > { %690 = vst [vmem:[#allocation2 + $0x70] sm:$0xff] %v689_v1  ;;  %v12647_v1 = vld [vmem:[%s16518_s2 + $0x540] sm:$0xff]  }
  0x78   : > { %12249 = vmatpush3.bf16.msra.mxu0 %v12572_v60  ;;  %v544_v60 = vsel %vm13600_vm7, 0, %v543_v33 }
  0x79   : > { %12250 = vmatprep.subr.bf16.mxu0 %v13375_v49  ;;  %11378 = vmatpush3.bf16.msra.mxu1 %v12576_v5  ;;  %545 = vst [vmem:[#allocation2 + $0x60] sm:$0x1] %v544_v60  ;;  %v12610_v5 = vld [vmem:[%s16518_s2 + $0x328] sm:$0xff]   ;;  %v12644_v60 = vld [vmem:[%s16518_s2 + $0x3f8] sm:$0xff]  }
  0x7a   : > { %11379 = vmatprep.subr.bf16.mxu1 %v12577_v7  ;;  %v12612_v7 = vld [vmem:[%s16518_s2 + $0x2e8] sm:$0xff]  }
  0x7c   : > { %12251 = vmatpush3.bf16.msra.mxu0 %v12575_v63  ;;  %v572_v63 = vrot.slane %v13795_v3, 7 }
  0x7d   : > { %12252 = vmatprep.subr.bf16.mxu0 %v13375_v49  ;;  %11380 = vmatpush3.bf16.msra.mxu1 %v12579_v11  ;;  %v12615_v11 = vld [vmem:[%s16518_s2 + $0x3b0] sm:$0xff]  }
  0x7e   : > { %11381 = vmatprep.subr.bf16.mxu1 %v12580_v14  ;;  %v721_v14 = vld [vmem:[#allocation2 + $0x70] sm:$0x80] }
  0x7f   : > { %v722_v16 = vsel %vm13737_vm6, 0, %v721_v14  ;;  %v12657_v14 = vld [vmem:[%s16518_s2 + $0x510] sm:$0xff]  }
  0x80   : > { %12253 = vmatpush3.bf16.msra.mxu0 %v12578_v8  ;;  %v573_v8 = vor.u32 %v572_v63, %v13798_v4  ;;  %v606_v12 = vld [vmem:[#allocation2 + $0x60] sm:$0xff]  ;;  %723 = vst [vmem:[#allocation2 + $0x70] sm:$0x80] %v722_v16  ;;  %v1789_v63 = vld [vmem:[#allocation2 + $0x78] sm:$0xff] }
  0x81   : > { %12254 = vmatprep.subr.bf16.mxu0 %v13375_v49  ;;  %11382 = vmatpush3.bf16.msra.mxu1 %v12582_v17  ;;  %v12618_v17 = vld [vmem:[%s16518_s2 + $0x338] sm:$0xff]  }
  0x82   : > { %11383 = vmatprep.subr.bf16.mxu1 %v12583_v20  ;;  %v607_v13 = vsel %vm13619_vm11, %v573_v8, %v606_v12  ;;  %v12620_v20 = vld [vmem:[%s16518_s2 + $0x2f8] sm:$0xff]   ;;  %v12651_v8 = vld [vmem:[%s16518_s2 + $0x548] sm:$0xff]   ;;  %v12655_v12 = vld [vmem:[%s16518_s2 + $0x550] sm:$0xff]  }
  0x83   : > { %608 = vst [vmem:[#allocation2 + $0x60] sm:$0xff] %v607_v13  ;;  %v12659_v16 = vld [vmem:[%s16518_s2 + $0x558] sm:$0xff]  }
  0x84   : > { %12255 = vmatpush3.bf16.msra.mxu0 %v12581_v15  ;;  %v12616_v15 = vld [vmem:[%s16518_s2 + $0x2f0] sm:$0xff]  }
  0x85   : > { %12256 = vmatprep.subr.bf16.mxu0 %v13375_v49  ;;  %11384 = vmatpush3.bf16.msra.mxu1 %v12585_v23  ;;  %v1785_v23 = vld [vmem:[#allocation2 + $0x58] sm:$0xff] }
  0x86   : > { %11385 = vmatprep.subr.bf16.mxu1 %v12586_v24 }
  0x87   : > { %v1788_v24 = vld [vmem:[#allocation2 + $0x70] sm:$0xff] }
  0x88   : > { %12257 = vmatpush3.bf16.msra.mxu0 %v12584_v22  ;;  %v12621_v22 = vld [vmem:[%s16518_s2 + $0x378] sm:$0xff]  }
  0x89   : > { %12258 = vmatprep.subr.bf16.mxu0 %v13375_v49  ;;  %11386 = vmatpush3.bf16.msra.mxu1 %v12588_v26  ;;  %v791_v26 = vrot.slane %v13795_v3, 1  ;;  %v12626_v3 = vld [vmem:[%s16518_s2 + $0x3c8] sm:$0xff]  }
  0x8a   : > { %11415 = vmatprep.subr.bf16.mxu1 %v12591_v31  ;;  %v12628_v31 = vld [vmem:[%s16518_s2 + $0x410] sm:$0xff]  }
  0x8c   : > { %12259 = vmatpush3.bf16.msra.mxu0 %v12587_v25  ;;  %2402 = vmatmul.mubr.bf16.vlgmr.msra.gmra.mrb[8].mxu1 %v1783_v39  ;;  %v12623_v25 = vld [vmem:[%s16518_s2 + $0x3c0] sm:$0xff]   ;;  %v12630_v39 = vld [vmem:[%s16518_s2 + $0x450] sm:$0xff]  }
  0x8d   : > { %11393 = vmatprep.subr.bf16.mxu0 %v12590_v28  ;;  %11416 = vmatpush3.bf16.msra.mxu1 %v12593_v36  ;;  %v792_v28 = vrot.slane %v13798_v4, 2  ;;  %v834_v36 = vld [vmem:[#allocation2 + $0x80] sm:$0x7f] }
  0x8e   : > { %11417 = vmatprep.subr.bf16.mxu1 %v12595_v38  ;;  %2483 = vmatprep.mubr.bf16.mxu1 %v1788_v24  ;;  %v12631_v38 = vld [vmem:[%s16518_s2 + $0x418] sm:$0xff]   ;;  %v12662_v24 = vld [vmem:[%s16518_s2 + $0x4e0] sm:$0xff]  }
  0x8f   : > { %12261 = vmatmul.mubr.bf16.vlgmr.msra.gmra.mrb[8].mxu0 %v977_v29  ;;  %v12625_v29 = vld [vmem:[%s16518_s2 + $0x408] sm:$0xff]   ;;  %v793_v4 = vor.u32 %v792_v28, %v791_v26 }
  0x90   : > { %11394 = vmatpush3.bf16.msra.mxu0 %v12592_v32  ;;  %2442 = vmatprep.mubr.bf16.mxu0 %v607_v13  ;;  %v12627_v32 = vld [vmem:[%s16518_s2 + $0x448] sm:$0xff]   ;;  %v12656_v13 = vld [vmem:[%s16518_s2 + $0x490] sm:$0xff]  }
  0x91   : > { %11395 = vmatprep.subr.bf16.mxu0 %v12594_v37  ;;  %11418 = vmatpush3.bf16.msra.mxu1 %v12597_v42  ;;  %v835_v37 = vsel %vm13718_vm1, %v793_v4, %v834_v36  ;;  %v12634_v42 = vld [vmem:[%s16518_s2 + $0x420] sm:$0xff]  }
  0x92   : > { %11419 = vmatprep.subr.bf16.mxu1 %v12599_v46  ;;  %836 = vst [vmem:[#allocation2 + $0x80] sm:$0x7f] %v835_v37  ;;  %v12635_v46 = vld [vmem:[%s16518_s2 + $0x3e0] sm:$0xff]  }
  0x93   : > { %v12665_v36 = vld [vmem:[%s16518_s2 + $0x520] sm:$0xff]  }
  0x94   : > { %11396 = vmatpush3.bf16.msra.mxu0 %v12596_v40  ;;  %v12632_v40 = vld [vmem:[%s16518_s2 + $0x3d8] sm:$0xff]  }
  0x95   : > { %11397 = vmatprep.subr.bf16.mxu0 %v12598_v43  ;;  %11420 = vmatpush3.bf16.msra.mxu1 %v12601_v51  ;;  %v12633_v43 = vld [vmem:[%s16518_s2 + $0x458] sm:$0xff]  }
  0x96   : > { %11421 = vmatprep.subr.bf16.mxu1 %v12603_v53  ;;  %v12638_v53 = vld [vmem:[%s16518_s2 + $0x3e8] sm:$0xff]  }
  0x98   : > { %11398 = vmatpush3.bf16.msra.mxu0 %v12600_v47 }
  0x99   : > { %11399 = vmatprep.subr.bf16.mxu0 %v12602_v52  ;;  %11422 = vmatpush3.bf16.msra.mxu1 %v12605_v57  ;;  %v867_v47 = vld [vmem:[#allocation2 + $0x80] sm:$0xc0]  ;;  %v12641_v57 = vld [vmem:[%s16518_s2 + $0x3f0] sm:$0xff]  }
  0x9a   : > { %11423 = vmatprep.subr.bf16.mxu1 %v12607_v59  ;;  %v868_v51 = vsel %vm13744_vm8, 0, %v867_v47  ;;  %v12636_v52 = vld [vmem:[%s16518_s2 + $0x460] sm:$0xff]   ;;  %v12642_v59 = vld [vmem:[%s16518_s2 + $0x470] sm:$0xff]   ;;  %v12668_v47 = vld [vmem:[%s16518_s2 + $0x4a8] sm:$0xff]  }
  0x9b   : > { %869 = vst [vmem:[#allocation2 + $0x80] sm:$0xc0] %v868_v51 }
  0x9c   : > { %11400 = vmatpush3.bf16.msra.mxu0 %v12604_v54  ;;  %v12640_v54 = vld [vmem:[%s16518_s2 + $0x430] sm:$0xff]  }
  0x9d   : > { %11401 = vmatprep.subr.bf16.mxu0 %v12606_v58  ;;  %11424 = vmatpush3.bf16.msra.mxu1 %v12609_v2  ;;  %v12643_v58 = vld [vmem:[%s16518_s2 + $0x438] sm:$0xff]   ;;  %v12648_v2 = vld [vmem:[%s16518_s2 + $0x480] sm:$0xff]  }
  0x9e   : > { %11425 = vmatprep.subr.bf16.mxu1 %v12611_v6  ;;  %v12649_v6 = vld [vmem:[%s16518_s2 + $0x500] sm:$0xff]  }
  0xa0   : > { %11402 = vmatpush3.bf16.msra.mxu0 %v12608_v62  ;;  %v12646_v62 = vld [vmem:[%s16518_s2 + $0x4c0] sm:$0xff]  }
  0xa1   : > { %11403 = vmatprep.subr.bf16.mxu0 %v12610_v5  ;;  %11426 = vmatpush3.bf16.msra.mxu1 %v12613_v9  ;;  %v1791_v5 = vld [vmem:[#allocation2 + $0x88] sm:$0xff] }
  0xa2   : > { %11427 = vmatprep.subr.bf16.mxu1 %v12615_v11  ;;  %v1790_v33 = vld [vmem:[#allocation2 + $0x80] sm:$0xff]  ;;  %v12652_v9 = vld [vmem:[%s16518_s2 + $0x488] sm:$0xff]   ;;  %v12654_v11 = vld [vmem:[%s16518_s2 + $0x4d0] sm:$0xff]  }
  0xa4   : > { %11404 = vmatpush3.bf16.msra.mxu0 %v12612_v7  ;;  %v12650_v7 = vld [vmem:[%s16518_s2 + $0x4c8] sm:$0xff]  }
  0xa5   : > { %11405 = vmatprep.subr.bf16.mxu0 %v12614_v10  ;;  %11428 = vmatpush3.bf16.msra.mxu1 %v12617_v18  ;;  %v12653_v10 = vld [vmem:[%s16518_s2 + $0x508] sm:$0xff]   ;;  %v14094_v18 = vld [vmem:[%s13569_s30 + $0x10] sm:$0xff]  }
  0xa6   : > { %11429 = vmatprep.subr.bf16.mxu1 %v12619_v19  ;;  %v350_v19 = vld [vmem:[#allocation2 + $0x98] sm:$0x3]  ;;  %v14110_v26 = vshll.u32 %v14094_v18, 16  ;;  %v313_v28 = vrot.slane %v14094_v18, 6 }
  0xa8   : > { %11406 = vmatpush3.bf16.msra.mxu0 %v12616_v15  ;;  %v12658_v15 = vld [vmem:[%s16518_s2 + $0x4d8] sm:$0xff]   ;;  %v396_v4 = vrot.slane %v14110_v26, 7  ;;  %333 = vst [vmem:[#allocation2 + $0x90] sm:$0xfc] %v313_v28 }
  0xa9   : > { %11407 = vmatprep.subr.bf16.mxu0 %v12618_v17  ;;  %11430 = vmatpush3.bf16.msra.mxu1 %v12621_v22  ;;  %v12660_v17 = vld [vmem:[%s16518_s2 + $0x498] sm:$0xff]  }
  0xaa   : > { %12264 = vmatprep.subr.bf16.mxu1 %v13375_v49  ;;  %v691_v28 = vld [vmem:[#allocation2 + $0xb8] sm:$0xff] }
  0xac   : > { %11408 = vmatpush3.bf16.msra.mxu0 %v12620_v20  ;;  %2484 = vmatmul.mubr.bf16.vlgmr.msra.gmra.mrb[12].mxu1 %v13789_v0  ;;  %v12629_v0 = vld [vmem:[%s16518_s2 + $0x3d0] sm:$0xff]   ;;  %v546_v20 = vld [vmem:[#allocation2 + $0xa8] sm:$0x1] }
  0xad   : > { %11437 = vmatprep.subr.bf16.mxu0 %v12622_v21  ;;  %12265 = vmatpush3.bf16.msra.mxu1 %v12624_v30  ;;  %v351_v21 = vsel %vm13580_vm3, 0, %v350_v19  ;;  %v547_v22 = vsel %vm13600_vm7, 0, %v546_v20  ;;  %v12663_v30 = vld [vmem:[%s16518_s2 + $0x560] sm:$0xff]   ;;  %v12691_v19 = vld [vmem:[%s16518_s2 + $0x5d8] sm:$0xff]  }
  0xae   : > { %12280 = vmatprep.mubr.msk.bf16.mxu1 %vm13376_vm9, %v13375_v49  ;;  %12266 = vmatprep.subr.bf16.mxu1 %v13375_v49  ;;  %352 = vst [vmem:[#allocation2 + $0x98] sm:$0x3] %v351_v21  ;;  %548 = vst [vmem:[#allocation2 + $0xa8] sm:$0x1] %v547_v22  ;;  %v12692_v20 = vld [vmem:[%s16518_s2 + $0x658] sm:$0xff]  }
  0xaf   : > { %2443 = vmatmul.mubr.bf16.vlgmr.msra.gmra.mrb[12].mxu0 %v1785_v23  ;;  %v12661_v23 = vld [vmem:[%s16518_s2 + $0x518] sm:$0xff]  }
  0xb0   : > { %11438 = vmatpush3.bf16.msra.mxu0 %v12623_v25  ;;  %2524 = vmatprep.mubr.bf16.mxu0 %v1790_v33  ;;  %v14107_v25 = vshrl.u32 %v14094_v18, 16  ;;  %v12675_v33 = vld [vmem:[%s16518_s2 + $0x578] sm:$0xff]  }
  0xb1   : > { %11439 = vmatprep.subr.bf16.mxu0 %v12625_v29  ;;  %12267 = vmatpush3.bf16.msra.mxu1 %v12627_v32  ;;  %v509_v29 = vrot.slane %v14094_v18, 7  ;;  %v12664_v32 = vld [vmem:[%s16518_s2 + $0x4a0] sm:$0xff]   ;;  %v12693_v22 = vld [vmem:[%s16518_s2 + $0x598] sm:$0xff]  }
  0xb2   : > { %12268 = vmatprep.subr.bf16.mxu1 %v13375_v49 }
  0xb3   : > { %529 = vst [vmem:[#allocation2 + $0xa0] sm:$0xfe] %v509_v29  ;;  %v837_v29 = vld [vmem:[#allocation2 + $0xc8] sm:$0x7f] }
  0xb4   : > { %11440 = vmatpush3.bf16.msra.mxu0 %v12626_v3  ;;  %v393_v3 = vrot.slane %v14107_v25, 6 }
  0xb5   : > { %11441 = vmatprep.subr.bf16.mxu0 %v12628_v31  ;;  %12269 = vmatpush3.bf16.msra.mxu1 %v12630_v39  ;;  %v574_v31 = vrot.slane %v14107_v25, 7  ;;  %v12667_v39 = vld [vmem:[%s16518_s2 + $0x568] sm:$0xff]  }
  0xb6   : > { %12270 = vmatprep.subr.bf16.mxu1 %v13375_v49 }
  0xb7   : > { %v575_v37 = vor.u32 %v574_v31, %v14110_v26  ;;  %v12698_v31 = vld [vmem:[%s16518_s2 + $0x620] sm:$0xff]  }
  0xb8   : > { %11442 = vmatpush3.bf16.msra.mxu0 %v12629_v0  ;;  %v397_v0 = vor.u32 %v396_v4, %v393_v3  ;;  %v12697_v3 = vld [vmem:[%s16518_s2 + $0x5a0] sm:$0xff]  }
  0xb9   : > { %11443 = vmatprep.subr.bf16.mxu0 %v12631_v38  ;;  %12271 = vmatpush3.bf16.msra.mxu1 %v12633_v43  ;;  %v12666_v38 = vld [vmem:[%s16518_s2 + $0x4e8] sm:$0xff]  }
  0xba   : > { %12272 = vmatprep.subr.bf16.mxu1 %v13375_v49  ;;  %v609_v43 = vld [vmem:[#allocation2 + $0xa8] sm:$0xff] }
  0xbb   : > { %v610_v51 = vsel %vm13619_vm11, %v575_v37, %v609_v43  ;;  %v12702_v37 = vld [vmem:[%s16518_s2 + $0x628] sm:$0xff]  }
  0xbc   : > { %11444 = vmatpush3.bf16.msra.mxu0 %v12632_v40  ;;  %v750_v40 = vrot.slane %v14094_v18, 1  ;;  %611 = vst [vmem:[#allocation2 + $0xa8] sm:$0xff] %v610_v51 }
  0xbd   : > { %11445 = vmatprep.subr.bf16.mxu0 %v12634_v42  ;;  %12273 = vmatpush3.bf16.msra.mxu1 %v12636_v52  ;;  %v473_v42 = vld [vmem:[#allocation2 + $0x98] sm:$0xfe]  ;;  %v12669_v52 = vld [vmem:[%s16518_s2 + $0x528] sm:$0xff]  }
  0xbe   : > { %12274 = vmatprep.subr.bf16.mxu1 %v13375_v49  ;;  %770 = vst [vmem:[#allocation2 + $0xc0] sm:$0x7f] %v750_v40 }
  0xc0   : > { %11446 = vmatpush3.bf16.msra.mxu0 %v12635_v46  ;;  %v896_v46 = vrot.slane %v14094_v18, 2 }
  0xc1   : > { %11447 = vmatprep.subr.bf16.mxu0 %v12637_v48  ;;  %12275 = vmatpush3.bf16.msra.mxu1 %v12639_v56  ;;  %v474_v48 = vsel %vm13611_vm10, %v397_v0, %v473_v42  ;;  %v12672_v56 = vld [vmem:[%s16518_s2 + $0x4b0] sm:$0xff]   ;;  %v12701_v0 = vld [vmem:[%s16518_s2 + $0x5a8] sm:$0xff]  }
  0xc2   : > { %12276 = vmatprep.subr.bf16.mxu1 %v13375_v49  ;;  %475 = vst [vmem:[#allocation2 + $0x98] sm:$0xfe] %v474_v48  ;;  %916 = vst [vmem:[#allocation2 + $0xd0] sm:$0x3f] %v896_v46  ;;  %v12705_v42 = vld [vmem:[%s16518_s2 + $0x5b0] sm:$0xff]  }
  0xc4   : > { %11448 = vmatpush3.bf16.msra.mxu0 %v12638_v53  ;;  %v12670_v53 = vld [vmem:[%s16518_s2 + $0x4f0] sm:$0xff]  }
  0xc5   : > { %11449 = vmatprep.subr.bf16.mxu0 %v12640_v54  ;;  %12277 = vmatpush3.bf16.msra.mxu1 %v12642_v59  ;;  %v12671_v54 = vld [vmem:[%s16518_s2 + $0x570] sm:$0xff]   ;;  %v12676_v59 = vld [vmem:[%s16518_s2 + $0x4b8] sm:$0xff]  }
  0xc6   : > { %12278 = vmatprep.subr.bf16.mxu1 %v13375_v49 }
  0xc8   : > { %11450 = vmatpush3.bf16.msra.mxu0 %v12641_v57  ;;  %v12673_v57 = vld [vmem:[%s16518_s2 + $0x530] sm:$0xff]  }
  0xc9   : > { %11451 = vmatprep.subr.bf16.mxu0 %v12643_v58  ;;  %12279 = vmatpush3.bf16.msra.mxu1 %v12645_v61  ;;  %v12674_v58 = vld [vmem:[%s16518_s2 + $0x4f8] sm:$0xff]  }
  0xca   : > { %11490 = vmatprep.subr.bf16.mxu1 %v12647_v1  ;;  %v2600_v61 = vld [vmem:[#allocation2 + $0x98] sm:$0xff]  ;;  %v12681_v1 = vld [vmem:[%s16518_s2 + $0x580] sm:$0xff]  }
  0xcc   : > { %11452 = vmatpush3.bf16.msra.mxu0 %v12644_v60  ;;  %12281 = vmatmul.mubr.bf16.vlgmr.msra.gmra.mrb[16].mxu1 %v1791_v5  ;;  %v12677_v60 = vld [vmem:[%s16518_s2 + $0x538] sm:$0xff]   ;;  %v2599_v5 = vld [vmem:[#allocation2 + $0x90] sm:$0xff] }
  0xcd   : > { %11468 = vmatprep.subr.bf16.mxu0 %v12646_v62  ;;  %11491 = vmatpush3.bf16.msra.mxu1 %v12649_v6  ;;  %v12679_v62 = vld [vmem:[%s16518_s2 + $0x5c0] sm:$0xff]  }
  0xce   : > { %11492 = vmatprep.subr.bf16.mxu1 %v12651_v8  ;;  %3258 = vmatprep.mubr.bf16.mxu1 %v610_v51  ;;  %v12682_v6 = vld [vmem:[%s16518_s2 + $0x600] sm:$0xff]   ;;  %v12706_v51 = vld [vmem:[%s16518_s2 + $0x630] sm:$0xff]  }
  0xcf   : > { %2525 = vmatmul.mubr.bf16.vlgmr.msra.gmra.mrb[16].mxu0 %v1789_v63  ;;  %v12680_v63 = vld [vmem:[%s16518_s2 + $0x640] sm:$0xff]  }
  0xd0   : > { %11469 = vmatpush3.bf16.msra.mxu0 %v12648_v2  ;;  %3217 = vmatprep.mubr.bf16.mxu0 %v2600_v61  ;;  %v12683_v2 = vld [vmem:[%s16518_s2 + $0x5c8] sm:$0xff]   ;;  %v2601_v8 = vld [vmem:[#allocation2 + $0xa0] sm:$0xff] }
  0xd1   : > { %11470 = vmatprep.subr.bf16.mxu0 %v12650_v7  ;;  %11493 = vmatpush3.bf16.msra.mxu1 %v12653_v10  ;;  %v12684_v7 = vld [vmem:[%s16518_s2 + $0x648] sm:$0xff]  }
  0xd2   : > { %11494 = vmatprep.subr.bf16.mxu1 %v12655_v12  ;;  %v12686_v10 = vld [vmem:[%s16518_s2 + $0x608] sm:$0xff]   ;;  %v657_v12 = vrot.slane %v14110_v26, 1 }
  0xd3   : > { %v12714_v61 = vld [vmem:[%s16518_s2 + $0x708] sm:$0xff]  }
  0xd4   : > { %11471 = vmatpush3.bf16.msra.mxu0 %v12652_v9  ;;  %v12685_v9 = vld [vmem:[%s16518_s2 + $0x588] sm:$0xff]   ;;  %v658_v21 = vor.u32 %v657_v12, %v14107_v25  ;;  %v12721_v12 = vld [vmem:[%s16518_s2 + $0x698] sm:$0xff]  }
  0xd5   : > { %11472 = vmatprep.subr.bf16.mxu0 %v12654_v11  ;;  %11495 = vmatpush3.bf16.msra.mxu1 %v12657_v14  ;;  %v12687_v11 = vld [vmem:[%s16518_s2 + $0x5d0] sm:$0xff]   ;;  %v794_v14 = vrot.slane %v14107_v25, 1 }
  0xd6   : > { %11496 = vmatprep.subr.bf16.mxu1 %v12659_v16  ;;  %v795_v16 = vrot.slane %v14110_v26, 2  ;;  %v12695_v26 = vld [vmem:[%s16518_s2 + $0x5e0] sm:$0xff]   ;;  %v692_v25 = vsel %vm13705_vm15, %v658_v21, %v691_v28 }
  0xd7   : > { %693 = vst [vmem:[#allocation2 + $0xb8] sm:$0xff] %v692_v25  ;;  %v12725_v28 = vld [vmem:[%s16518_s2 + $0x6e0] sm:$0xff]  }
  0xd8   : > { %11473 = vmatpush3.bf16.msra.mxu0 %v12656_v13  ;;  %v12688_v13 = vld [vmem:[%s16518_s2 + $0x650] sm:$0xff]  }
  0xd9   : > { %11474 = vmatprep.subr.bf16.mxu0 %v12658_v15  ;;  %11497 = vmatpush3.bf16.msra.mxu1 %v12661_v23  ;;  %v12689_v15 = vld [vmem:[%s16518_s2 + $0x590] sm:$0xff]   ;;  %v796_v23 = vor.u32 %v795_v16, %v794_v14  ;;  %v12722_v14 = vld [vmem:[%s16518_s2 + $0x6d8] sm:$0xff]  }
  0xda   : > { %11498 = vmatprep.subr.bf16.mxu1 %v12663_v30  ;;  %v12696_v30 = vld [vmem:[%s16518_s2 + $0x660] sm:$0xff]  }
  0xdb   : > { %v838_v4 = vsel %vm13718_vm1, %v796_v23, %v837_v29 }
  0xdc   : > { %11475 = vmatpush3.bf16.msra.mxu0 %v12660_v17  ;;  %v12690_v17 = vld [vmem:[%s16518_s2 + $0x610] sm:$0xff]   ;;  %839 = vst [vmem:[#allocation2 + $0xc8] sm:$0x7f] %v838_v4 }
  0xdd   : > { %11476 = vmatprep.subr.bf16.mxu0 %v12662_v24  ;;  %11499 = vmatpush3.bf16.msra.mxu1 %v12665_v36  ;;  %v12694_v24 = vld [vmem:[%s16518_s2 + $0x618] sm:$0xff]   ;;  %v12700_v36 = vld [vmem:[%s16518_s2 + $0x668] sm:$0xff]  }
  0xde   : > { %11500 = vmatprep.subr.bf16.mxu1 %v12667_v39  ;;  %v12704_v39 = vld [vmem:[%s16518_s2 + $0x670] sm:$0xff]   ;;  %v724_v40 = vld [vmem:[#allocation2 + $0xb8] sm:$0x80] }
  0xdf   : > { %v725_v43 = vsel %vm13737_vm6, 0, %v724_v40 }
  0xe0   : > { %11477 = vmatpush3.bf16.msra.mxu0 %v12664_v32  ;;  %v12699_v32 = vld [vmem:[%s16518_s2 + $0x5e8] sm:$0xff]   ;;  %726 = vst [vmem:[#allocation2 + $0xb8] sm:$0x80] %v725_v43  ;;  %v12730_v43 = vld [vmem:[%s16518_s2 + $0x6b0] sm:$0xff]  }
  0xe1   : > { %11478 = vmatprep.subr.bf16.mxu0 %v12666_v38  ;;  %11501 = vmatpush3.bf16.msra.mxu1 %v12669_v52  ;;  %v12703_v38 = vld [vmem:[%s16518_s2 + $0x5f0] sm:$0xff]   ;;  %v12708_v52 = vld [vmem:[%s16518_s2 + $0x678] sm:$0xff]  }
  0xe2   : > { %11502 = vmatprep.subr.bf16.mxu1 %v12671_v54  ;;  %v12710_v54 = vld [vmem:[%s16518_s2 + $0x638] sm:$0xff]  }
  0xe3   : > { %v870_v46 = vld [vmem:[#allocation2 + $0xc8] sm:$0xc0] }
  0xe4   : > { %11479 = vmatpush3.bf16.msra.mxu0 %v12668_v47  ;;  %v12707_v47 = vld [vmem:[%s16518_s2 + $0x5f8] sm:$0xff]   ;;  %v871_v48 = vsel %vm13744_vm8, 0, %v870_v46 }
  0xe5   : > { %11480 = vmatprep.subr.bf16.mxu0 %v12670_v53  ;;  %11503 = vmatpush3.bf16.msra.mxu1 %v12673_v57  ;;  %872 = vst [vmem:[#allocation2 + $0xc8] sm:$0xc0] %v871_v48  ;;  %v12709_v53 = vld [vmem:[%s16518_s2 + $0x5b8] sm:$0xff]   ;;  %v12711_v57 = vld [vmem:[%s16518_s2 + $0x700] sm:$0xff]  }
  0xe6   : > { %11504 = vmatprep.subr.bf16.mxu1 %v12675_v33  ;;  %v12712_v33 = vld [vmem:[%s16518_s2 + $0x680] sm:$0xff]   ;;  %v12732_v48 = vld [vmem:[%s16518_s2 + $0x738] sm:$0xff]  }
  0xe8   : > { %11481 = vmatpush3.bf16.msra.mxu0 %v12672_v56  ;;  %v2604_v56 = vld [vmem:[#allocation2 + $0xb8] sm:$0xff] }
  0xe9   : > { %11482 = vmatprep.subr.bf16.mxu0 %v12674_v58  ;;  %11505 = vmatpush3.bf16.msra.mxu1 %v12677_v60  ;;  %v12713_v60 = vld [vmem:[%s16518_s2 + $0x6c0] sm:$0xff]  }
  0xea   : > { %11534 = vmatprep.subr.bf16.mxu1 %v12680_v63  ;;  %v12717_v63 = vld [vmem:[%s16518_s2 + $0x710] sm:$0xff]  }
  0xec   : > { %11483 = vmatpush3.bf16.msra.mxu0 %v12676_v59  ;;  %3259 = vmatmul.mubr.bf16.vlgmr.msra.gmra.mrb[20].mxu1 %v2601_v8  ;;  %v2606_v58 = vld [vmem:[#allocation2 + $0xc8] sm:$0xff]  ;;  %v2605_v59 = vld [vmem:[#allocation2 + $0xc0] sm:$0xff]  ;;  %v12720_v8 = vld [vmem:[%s16518_s2 + $0x718] sm:$0xff]  }
  0xed   : > { %11512 = vmatprep.subr.bf16.mxu0 %v12679_v62  ;;  %11535 = vmatpush3.bf16.msra.mxu1 %v12682_v6  ;;  %v12715_v62 = vld [vmem:[%s16518_s2 + $0x688] sm:$0xff]   ;;  %v12719_v6 = vld [vmem:[%s16518_s2 + $0x6d0] sm:$0xff]  }
  0xee   : > { %11536 = vmatprep.subr.bf16.mxu1 %v12684_v7  ;;  %3340 = vmatprep.mubr.bf16.mxu1 %v2606_v58  ;;  %v2607_v58 = vld [vmem:[#allocation2 + $0xd0] sm:$0xff] }
  0xef   : > { %3218 = vmatmul.mubr.bf16.vlgmr.msra.gmra.mrb[20].mxu0 %v2599_v5  ;;  %v353_v5 = vld [vmem:[#allocation2 + $0xe0] sm:$0x3] }
  0xf0   : > { %11513 = vmatpush3.bf16.msra.mxu0 %v12681_v1  ;;  %3299 = vmatprep.mubr.bf16.mxu0 %v2604_v56  ;;  %v12718_v1 = vld [vmem:[%s16518_s2 + $0x690] sm:$0xff]   ;;  %v354_v7 = vsel %vm13580_vm3, 0, %v353_v5  ;;  %v12734_v56 = vld [vmem:[%s16518_s2 + $0x6f8] sm:$0xff]  }
  0xf1   : > { %11514 = vmatprep.subr.bf16.mxu0 %v12683_v2  ;;  %11537 = vmatpush3.bf16.msra.mxu1 %v12686_v10  ;;  %v14308_v2 = vld [vmem:[%s13569_s30 + $0x18] sm:$0xff]   ;;  %355 = vst [vmem:[#allocation2 + $0xe0] sm:$0x3] %v354_v7  ;;  %v12745_v7 = vld [vmem:[%s16518_s2 + $0x810] sm:$0xff]  }
  0xf2   : > { %11538 = vmatprep.subr.bf16.mxu1 %v12688_v13  ;;  %v14322_v10 = vshll.u32 %v14308_v2, 16 }
  0xf4   : > { %11515 = vmatpush3.bf16.msra.mxu0 %v12685_v9  ;;  %v14319_v9 = vshrl.u32 %v14308_v2, 16  ;;  %v659_v5 = vrot.slane %v14322_v10, 1 }
  0xf5   : > { %11516 = vmatprep.subr.bf16.mxu0 %v12687_v11  ;;  %11539 = vmatpush3.bf16.msra.mxu1 %v12690_v17  ;;  %v314_v11 = vrot.slane %v14308_v2, 6  ;;  %v404_v17 = vrot.slane %v14322_v10, 7 }
  0xf6   : > { %11540 = vmatprep.subr.bf16.mxu1 %v12692_v20  ;;  %v401_v16 = vrot.slane %v14319_v9, 6 }
  0xf7   : > { %334 = vst [vmem:[#allocation2 + $0xd8] sm:$0xfc] %v314_v11  ;;  %v12748_v11 = vld [vmem:[%s16518_s2 + $0x798] sm:$0xff]  }
  0xf8   : > { %11517 = vmatpush3.bf16.msra.mxu0 %v12689_v15  ;;  %v476_v29 = vld [vmem:[#allocation2 + $0xe0] sm:$0xfe] }
  0xf9   : > { %11518 = vmatprep.subr.bf16.mxu0 %v12691_v19  ;;  %11541 = vmatpush3.bf16.msra.mxu1 %v12694_v24  ;;  %v12723_v19 = vld [vmem:[%s16518_s2 + $0x720] sm:$0xff]   ;;  %v405_v24 = vor.u32 %v404_v17, %v401_v16  ;;  %v549_v16 = vld [vmem:[#allocation2 + $0xf0] sm:$0x1]  ;;  %v12751_v17 = vld [vmem:[%s16518_s2 + $0x7d8] sm:$0xff]  }
  0xfa   : > { %11542 = vmatprep.subr.bf16.mxu1 %v12696_v30 }
  0xfb   : > { %v477_v4 = vsel %vm13611_vm10, %v405_v24, %v476_v29  ;;  %v12753_v24 = vld [vmem:[%s16518_s2 + $0x820] sm:$0xff]   ;;  %v12756_v29 = vld [vmem:[%s16518_s2 + $0x7a8] sm:$0xff]  }
  0xfc   : > { %11519 = vmatpush3.bf16.msra.mxu0 %v12693_v22  ;;  %v12724_v22 = vld [vmem:[%s16518_s2 + $0x6a0] sm:$0xff]   ;;  %478 = vst [vmem:[#allocation2 + $0xe0] sm:$0xfe] %v477_v4  ;;  %v12758_v4 = vld [vmem:[%s16518_s2 + $0x768] sm:$0xff]  }
  0xfd   : > { %11520 = vmatprep.subr.bf16.mxu0 %v12695_v26  ;;  %11543 = vmatpush3.bf16.msra.mxu1 %v12698_v31 }
  0xfe   : > { %11544 = vmatprep.subr.bf16.mxu1 %v12700_v36  ;;  %v12727_v36 = vld [vmem:[%s16518_s2 + $0x6a8] sm:$0xff]  }
 0x100   : > { %11521 = vmatpush3.bf16.msra.mxu0 %v12697_v3  ;;  %v12726_v3 = vld [vmem:[%s16518_s2 + $0x728] sm:$0xff]  }
 0x101   : > { %11522 = vmatprep.subr.bf16.mxu0 %v12699_v32  ;;  %11545 = vmatpush3.bf16.msra.mxu1 %v12702_v37  ;;  %v12728_v37 = vld [vmem:[%s16518_s2 + $0x6e8] sm:$0xff]  }
 0x102   : > { %11546 = vmatprep.subr.bf16.mxu1 %v12704_v39 }
 0x104   : > { %11523 = vmatpush3.bf16.msra.mxu0 %v12701_v0  ;;  %v510_v0 = vrot.slane %v14308_v2, 7 }
 0x105   : > { %11524 = vmatprep.subr.bf16.mxu0 %v12703_v38  ;;  %11547 = vmatpush3.bf16.msra.mxu1 %v12706_v51  ;;  %v751_v51 = vrot.slane %v14308_v2, 1 }
 0x106   : > { %11548 = vmatprep.subr.bf16.mxu1 %v12708_v52  ;;  %530 = vst [vmem:[#allocation2 + $0xe8] sm:$0xfe] %v510_v0  ;;  %v12733_v52 = vld [vmem:[%s16518_s2 + $0x6b8] sm:$0xff]   ;;  %v12760_v0 = vld [vmem:[%s16518_s2 + $0x7b0] sm:$0xff]  }
 0x107   : > { %771 = vst [vmem:[#allocation2 + $0x108] sm:$0x7f] %v751_v51 }
 0x108   : > { %11525 = vmatpush3.bf16.msra.mxu0 %v12705_v42  ;;  %v12729_v42 = vld [vmem:[%s16518_s2 + $0x730] sm:$0xff]  }
 0x109   : > { %11526 = vmatprep.subr.bf16.mxu0 %v12707_v47  ;;  %11549 = vmatpush3.bf16.msra.mxu1 %v12710_v54  ;;  %v12731_v47 = vld [vmem:[%s16518_s2 + $0x6f0] sm:$0xff]   ;;  %v3416_v54 = vld [vmem:[#allocation2 + $0xe0] sm:$0xff] }
 0x10a   : > { %11565 = vmatprep.subr.bf16.mxu1 %v12711_v57  ;;  %v12736_v57 = vld [vmem:[%s16518_s2 + $0x780] sm:$0xff]  }
 0x10c   : > { %11527 = vmatpush3.bf16.msra.mxu0 %v12709_v53  ;;  %3341 = vmatmul.mubr.bf16.vlgmr.msra.gmra.mrb[24].mxu1 %v2605_v59  ;;  %v897_v53 = vrot.slane %v14308_v2, 2  ;;  %v12738_v59 = vld [vmem:[%s16518_s2 + $0x740] sm:$0xff]  }
 0x10d   : > { %12284 = vmatprep.subr.bf16.mxu0 %v13375_v49  ;;  %11566 = vmatpush3.bf16.msra.mxu1 %v12713_v60  ;;  %v12739_v60 = vld [vmem:[%s16518_s2 + $0x7c0] sm:$0xff]  }
 0x10e   : > { %11567 = vmatprep.subr.bf16.mxu1 %v12714_v61  ;;  %4033 = vmatprep.mubr.bf16.mxu1 %v3416_v54  ;;  %917 = vst [vmem:[#allocation2 + $0x118] sm:$0x3f] %v897_v53  ;;  %v12740_v61 = vld [vmem:[%s16518_s2 + $0x788] sm:$0xff]   ;;  %v12762_v54 = vld [vmem:[%s16518_s2 + $0x770] sm:$0xff]  }
 0x10f   : > { %3300 = vmatmul.mubr.bf16.vlgmr.msra.gmra.mrb[24].mxu0 %v14094_v18  ;;  %v12716_v18 = vld [vmem:[%s16518_s2 + $0x6c8] sm:$0xff]  }
 0x110   : > { %12285 = vmatpush3.bf16.msra.mxu0 %v12712_v33  ;;  %12300 = vmatprep.mubr.msk.bf16.mxu0 %vm13376_vm9, %v13375_v49  ;;  %v12737_v33 = vld [vmem:[%s16518_s2 + $0x800] sm:$0xff]  }
 0x111   : > { %12286 = vmatprep.subr.bf16.mxu0 %v13375_v49  ;;  %11568 = vmatpush3.bf16.msra.mxu1 %v12716_v18  ;;  %v12741_v18 = vld [vmem:[%s16518_s2 + $0x808] sm:$0xff]  }
 0x112   : > { %11569 = vmatprep.subr.bf16.mxu1 %v12717_v63  ;;  %v12742_v63 = vld [vmem:[%s16518_s2 + $0x748] sm:$0xff]  }
 0x114   : > { %12287 = vmatpush3.bf16.msra.mxu0 %v12715_v62  ;;  %v3415_v62 = vld [vmem:[#allocation2 + $0xd8] sm:$0xff] }
 0x115   : > { %12288 = vmatprep.subr.bf16.mxu0 %v13375_v49  ;;  %11570 = vmatpush3.bf16.msra.mxu1 %v12719_v6  ;;  %v12743_v6 = vld [vmem:[%s16518_s2 + $0x7c8] sm:$0xff]  }
 0x116   : > { %11571 = vmatprep.subr.bf16.mxu1 %v12720_v8  ;;  %v12746_v8 = vld [vmem:[%s16518_s2 + $0x750] sm:$0xff]  }
 0x118   : > { %12289 = vmatpush3.bf16.msra.mxu0 %v12718_v1  ;;  %v12744_v1 = vld [vmem:[%s16518_s2 + $0x790] sm:$0xff]  }
 0x119   : > { %12290 = vmatprep.subr.bf16.mxu0 %v13375_v49  ;;  %11572 = vmatpush3.bf16.msra.mxu1 %v12722_v14  ;;  %v12749_v14 = vld [vmem:[%s16518_s2 + $0x818] sm:$0xff]  }
 0x11a   : > { %11573 = vmatprep.subr.bf16.mxu1 %v12723_v19  ;;  %v550_v19 = vsel %vm13600_vm7, 0, %v549_v16  ;;  %v3417_v16 = vld [vmem:[#allocation2 + $0xe8] sm:$0xff] }
 0x11b   : > { %551 = vst [vmem:[#allocation2 + $0xf0] sm:$0x1] %v550_v19  ;;  %v12769_v19 = vld [vmem:[%s16518_s2 + $0x840] sm:$0xff]  }
 0x11c   : > { %v11312_v13 = vpop.f32.mrb[0].mxu1  ;;  %12291 = vmatpush3.bf16.msra.mxu0 %v12721_v12  ;;  %v660_v12 = vor.u32 %v659_v5, %v14319_v9 }
 0x11d   : > { %v11313_v15 = vpop.f32.mrb[1].mxu1  ;;  %12292 = vmatprep.subr.bf16.mxu0 %v13375_v49  ;;  %11574 = vmatpush3.bf16.msra.mxu1 %v12725_v28  ;;  %v12755_v28 = vld [vmem:[%s16518_s2 + $0x7e0] sm:$0xff]  }
 0x11e   : > { %v11314_v20 = vadd.f32 %v11313_v15, %v11312_v13  ;;  %v11315_v21 = vpop.f32.mrb[2].mxu1  ;;  %11575 = vmatprep.subr.bf16.mxu1 %v12726_v3  ;;  %v12747_v13 = vld [vmem:[%s16518_s2 + $0x7d0] sm:$0xff]   ;;  %v12750_v15 = vld [vmem:[%s16518_s2 + $0x758] sm:$0xff]   ;;  %v12757_v3 = vld [vmem:[%s16518_s2 + $0x828] sm:$0xff]  }
 0x11f   : > { %v11316_v23 = vpop.f32.mrb[3].mxu1 }
 0x120   : > { %v11317_v26 = vadd.f32 %v11316_v23, %v11315_v21  ;;  %12293 = vmatpush3.bf16.msra.mxu0 %v12724_v22  ;;  %v12752_v21 = vld [vmem:[%s16518_s2 + $0x7a0] sm:$0xff]   ;;  %v576_v22 = vrot.slane %v14319_v9, 7 }
 0x121   : > { %12294 = vmatprep.subr.bf16.mxu0 %v13375_v49  ;;  %11576 = vmatpush3.bf16.msra.mxu1 %v12728_v37 }
 0x122   : > { %v11290_v25 = vpop.f32.mrb[0].mxu0  ;;  %11577 = vmatprep.subr.bf16.mxu1 %v12729_v42 }
 0x123   : > { %v11291_v30 = vpop.f32.mrb[1].mxu0 }
 0x124   : > { %v11292_v31 = vadd.f32 %v11291_v30, %v11290_v25  ;;  %v11293_v32 = vpop.f32.mrb[2].mxu0  ;;  %12295 = vmatpush3.bf16.msra.mxu0 %v12727_v36  ;;  %v934_v25 = vlaneseq  ;;  %v577_v30 = vor.u32 %v576_v22, %v14322_v10  ;;  %v1763_v22 = vstv %s1762_s12  ;;  %s14869_s12 = sld [smem:[#allocation3 + %s2574_s23]]  ;;  %s5022_s23 = sadd.s32 6, %s14431_s29 }
 0x125   : > { %v11294_v38 = vpop.f32.mrb[3].mxu0  ;;  %12296 = vmatprep.subr.bf16.mxu0 %v13375_v49  ;;  %11578 = vmatpush3.bf16.msra.mxu1 %v12731_v47 }
 0x126   : > { %v14357_v39 = vadd.f32 %v11314_v20, %v11292_v31  ;;  %v11295_v40 = vadd.f32 %v11294_v38, %v11293_v32  ;;  %11579 = vmatprep.subr.bf16.mxu1 %v12732_v48  ;;  %v694_v20 = vld [vmem:[#allocation2 + $0x100] sm:$0xff]  ;;  %v12759_v31 = vld [vmem:[%s16518_s2 + $0x7e8] sm:$0xff]   ;;  %v612_v32 = vld [vmem:[#allocation2 + $0xf0] sm:$0xff]  ;;  %v14467_v36 = vshrl.u32 %v934_v25, 7 }
 0x127   : > { %v695_v23 = vsel %vm13705_vm15, %v660_v12, %v694_v20  ;;  %v613_v37 = vsel %vm13619_vm11, %v577_v30, %v612_v32  ;;  %v12761_v48 = vld [vmem:[%s16518_s2 + $0x830] sm:$0xff]   ;;  %v12771_v20 = vld [vmem:[%s16518_s2 + $0x888] sm:$0xff]   ;;  %v12777_v32 = vld [vmem:[%s16518_s2 + $0x898] sm:$0xff]  }
 0x128   : > { %v14365_v46 = vadd.f32 %v11317_v26, %v11295_v40  ;;  %12297 = vmatpush3.bf16.msra.mxu0 %v12730_v43  ;;  %696 = vst [vmem:[#allocation2 + $0x100] sm:$0xff] %v695_v23  ;;  %v12754_v26 = vld [vmem:[%s16518_s2 + $0x760] sm:$0xff]   ;;  %v14476_v40 = vand.u32 127, %v934_v25  ;;  %614 = vst [vmem:[#allocation2 + $0xf0] sm:$0xff] %v613_v37 }
 0x129   : > { %12298 = vmatprep.subr.bf16.mxu0 %v13375_v49  ;;  %11580 = vmatpush3.bf16.msra.mxu1 %v12734_v56  ;;  %v12764_v56 = vld [vmem:[%s16518_s2 + $0x7b8] sm:$0xff]  }
 0x12a   : > { %11609 = vmatprep.subr.bf16.mxu1 %v12737_v33  ;;  %v953_v12 = vcvt.s32.f32 %v14476_v40 }
 0x12c   : > { %12299 = vmatpush3.bf16.msra.mxu0 %v12733_v52  ;;  %4034 = vmatmul.mubr.bf16.vlgmr.msra.gmra.mrb[28].mxu1 %v3415_v62  ;;  %v12763_v62 = vld [vmem:[%s16518_s2 + $0x7f0] sm:$0xff]  }
 0x12d   : > { %11587 = vmatprep.subr.bf16.mxu0 %v12736_v57  ;;  %11610 = vmatpush3.bf16.msra.mxu1 %v12739_v60 }
 0x12e   : > { %11611 = vmatprep.subr.bf16.mxu1 %v12741_v18 }
 0x12f   : > { %12301 = vmatmul.mubr.bf16.vlgmr.msra.gmra.mrb[28].mxu0 %v2607_v58  ;;  %v727_v38 = vld [vmem:[#allocation2 + $0x100] sm:$0x80] }
 0x130   : > { %11588 = vmatpush3.bf16.msra.mxu0 %v12738_v59  ;;  %4074 = vmatprep.mubr.bf16.mxu0 %v613_v37  ;;  %v728_v43 = vsel %vm13737_vm6, 0, %v727_v38  ;;  %v12776_v37 = vld [vmem:[%s16518_s2 + $0x8d0] sm:$0xff]  }
 0x131   : > { %11589 = vmatprep.subr.bf16.mxu0 %v12740_v61  ;;  %11612 = vmatpush3.bf16.msra.mxu1 %v12743_v6  ;;  %729 = vst [vmem:[#allocation2 + $0x100] sm:$0x80] %v728_v43  ;;  %v12778_v43 = vld [vmem:[%s16518_s2 + $0x858] sm:$0xff]  }
 0x132   : > { %11613 = vmatprep.subr.bf16.mxu1 %v12745_v7  ;;  %v12768_v7 = vld [vmem:[%s16518_s2 + $0x880] sm:$0xff]  }
 0x134   : > { %11590 = vmatpush3.bf16.msra.mxu0 %v12742_v63  ;;  %v12765_v63 = vld [vmem:[%s16518_s2 + $0x838] sm:$0xff]  }
 0x135   : > { %11591 = vmatprep.subr.bf16.mxu0 %v12744_v1  ;;  %11614 = vmatpush3.bf16.msra.mxu1 %v12747_v13  ;;  %v14513_v13 = vadd.s32 8, %v14467_v36 }
 0x136   : > { %11615 = vmatprep.subr.bf16.mxu1 %v12749_v14 }
 0x137   : > { %v950_v23 = vcvt.s32.f32 %v14513_v13 }
 0x138   : > { %11592 = vmatpush3.bf16.msra.mxu0 %v12746_v8  ;;  %v949_v8 = vcvt.s32.f32 %v14467_v36 }
 0x139   : > { %11593 = vmatprep.subr.bf16.mxu0 %v12748_v11  ;;  %11616 = vmatpush3.bf16.msra.mxu1 %v12751_v17  ;;  %v3420_v11 = vld [vmem:[#allocation2 + $0x100] sm:$0xff]  ;;  %v798_v17 = vrot.slane %v14322_v10, 2  ;;  %v14532_v10 = vmul.f32 0.00048828125, %v953_v12  ;;  %v14549_v30 = vmul.f32 0.0625, %v950_v23  ;;  %v3421_v23 = vld [vmem:[#allocation2 + $0x108] sm:$0xff] }
 0x13a   : > { %11617 = vmatprep.subr.bf16.mxu1 %v12753_v24  ;;  %4115 = vmatprep.mubr.bf16.mxu1 %v3420_v11 }
 0x13c   : > { %11594 = vmatpush3.bf16.msra.mxu0 %v12750_v15  ;;  %v11356_v53 = vpop.f32.mrb[4].mxu1  ;;  %v797_v15 = vrot.slane %v14319_v9, 1  ;;  %v12770_v9 = vld [vmem:[%s16518_s2 + $0x8c0] sm:$0xff]  }
 0x13d   : > { %11595 = vmatprep.subr.bf16.mxu0 %v12752_v21  ;;  %11618 = vmatpush3.bf16.msra.mxu1 %v12755_v28  ;;  %v11357_v58 = vpop.f32.mrb[5].mxu1  ;;  %v14527_v21 = vmul.f32 0.0625, %v949_v8  ;;  %v12774_v28 = vld [vmem:[%s16518_s2 + $0x890] sm:$0xff]   ;;  %v12789_v8 = vld [vmem:[%s16518_s2 + $0x8b8] sm:$0xff]  }
 0x13e   : > { %11619 = vmatprep.subr.bf16.mxu1 %v12757_v3  ;;  %v11358_v60 = vadd.f32 %v11357_v58, %v11356_v53  ;;  %v11359_v61 = vpop.f32.mrb[6].mxu1  ;;  %v799_v24 = vor.u32 %v798_v17, %v797_v15  ;;  %v840_v3 = vld [vmem:[#allocation2 + $0x110] sm:$0x7f]  ;;  %v12783_v58 = vld [vmem:[%s16518_s2 + $0x8a8] sm:$0xff]  }
 0x13f   : > { %v11360_v18 = vpop.f32.mrb[7].mxu1  ;;  %v1764_v25 = vmul.f32 %v1763_v22, %v14527_v21  ;;  %v12788_v17 = vld [vmem:[%s16518_s2 + $0x8f0] sm:$0xff]  }
 0x140   : > { %11596 = vmatpush3.bf16.msra.mxu0 %v12754_v26  ;;  %v11361_v5 = vadd.f32 %v11360_v18, %v11359_v61  ;;  %v12772_v26 = vld [vmem:[%s16518_s2 + $0x848] sm:$0xff]   ;;  %v12786_v61 = vld [vmem:[%s16518_s2 + $0x8b0] sm:$0xff]  }
 0x141   : > { %11597 = vmatprep.subr.bf16.mxu0 %v12756_v29  ;;  %11620 = vmatpush3.bf16.msra.mxu1 %v12759_v31  ;;  %v12773_v29 = vld [vmem:[%s16518_s2 + $0x8c8] sm:$0xff]   ;;  %v12775_v31 = vld [vmem:[%s16518_s2 + $0x850] sm:$0xff]  }
 0x142   : > { %v11334_v42 = vpop.f32.mrb[4].mxu0  ;;  %11621 = vmatprep.subr.bf16.mxu1 %v12761_v48  ;;  %v12780_v48 = vld [vmem:[%s16518_s2 + $0x8a0] sm:$0xff]   ;;  %v12785_v18 = vld [vmem:[%s16518_s2 + $0x8e8] sm:$0xff]  }
 0x143   : > { %v11335_v47 = vpop.f32.mrb[5].mxu0 }
 0x144   : > { %v11336_v51 = vadd.f32 %v11335_v47, %v11334_v42  ;;  %v11337_v52 = vpop.f32.mrb[6].mxu0  ;;  %11598 = vmatpush3.bf16.msra.mxu0 %v12758_v4  ;;  %v841_v4 = vsel %vm13718_vm1, %v799_v24, %v840_v3  ;;  %v1765_v42 = vmul.f32 %v1763_v22, %v14549_v30  ;;  %v14578_v47 = vstv %s2578_s7  ;;  %v12793_v24 = vld [vmem:[%s16518_s2 + $0x9c0] sm:$0xff]   ;;  %v12797_v3 = vld [vmem:[%s16518_s2 + $0x9c8] sm:$0xff]  }
 0x145   : > { %v11338_v57 = vpop.f32.mrb[7].mxu0  ;;  %11599 = vmatprep.subr.bf16.mxu0 %v12760_v0  ;;  %11622 = vmatpush3.bf16.msra.mxu1 %v12763_v62  ;;  %842 = vst [vmem:[#allocation2 + $0x110] sm:$0x7f] %v841_v4  ;;  %v14566_v0 = vmul.f32 1.442695, %v1764_v25  ;;  %v12795_v25 = vld [vmem:[%s16518_s2 + $0x980] sm:$0xff]  }
 0x146   : > { %v1671_v33 = vadd.f32 %v11336_v51, %v14357_v39  ;;  %v11339_v59 = vadd.f32 %v11338_v57, %v11337_v52  ;;  %v12766_v39 = vld [vmem:[%s16518_s2 + $0x778] sm:$0xff]   ;;  %11623 = vmatprep.subr.bf16.mxu1 %v12765_v63  ;;  %v14587_v52 = vmul.f32 1.442695, %v1765_v42  ;;  %v12799_v4 = vld [vmem:[%s16518_s2 + $0x988] sm:$0xff]   ;;  %v12803_v42 = vld [vmem:[%s16518_s2 + $0x990] sm:$0xff]  }
 0x147   : > { %v12779_v51 = vld [vmem:[%s16518_s2 + $0x8d8] sm:$0xff]   ;;  %13230 = vpow2.f32 %v14566_v0  ;;  %v12842_v0 = vld [vmem:[%s16518_s2 + $0xae0] sm:$0xff]  }
 0x148   : > { %v1674_v1 = vadd.f32 %v11339_v59, %v14365_v46  ;;  %11600 = vmatpush3.bf16.msra.mxu0 %v12762_v54  ;;  %v14500_v6 = vadd.f32 %v11358_v60, %v1671_v33  ;;  %v12767_v46 = vld [vmem:[%s16518_s2 + $0x7f8] sm:$0xff]   ;;  %v2580_v54 = vmul.f32 %v14578_v47, %v14527_v21  ;;  %v12782_v33 = vld [vmem:[%s16518_s2 + $0x8e0] sm:$0xff]   ;;  %v12784_v60 = vld [vmem:[%s16518_s2 + $0x868] sm:$0xff]   ;;  %13232 = vpow2.f32 %v14587_v52 }
 0x149   : > { %11601 = vmatprep.subr.bf16.mxu0 %v12764_v56  ;;  %11624 = vmatpush3.bf16.msra.mxu1 %v12767_v46  ;;  %v12781_v56 = vld [vmem:[%s16518_s2 + $0x860] sm:$0xff]   ;;  %v12845_v52 = vld [vmem:[%s16518_s2 + $0xa68] sm:$0xff]  }
 0x14a   : > { %v14515_v14 = vadd.f32 %v11361_v5, %v1674_v1  ;;  %12304 = vmatprep.subr.bf16.mxu1 %v13375_v49  ;;  %v14603_v59 = vmul.f32 1.442695, %v2580_v54  ;;  %v12787_v5 = vld [vmem:[%s16518_s2 + $0x870] sm:$0xff]   ;;  %v12806_v54 = vld [vmem:[%s16518_s2 + $0x918] sm:$0xff]  }
 0x14c   : > { %11602 = vmatpush3.bf16.msra.mxu0 %v12766_v39  ;;  %4116 = vmatmul.mubr.bf16.vlgmr.msra.gmra.mrb[32].mxu1 %v14308_v2  ;;  %v1770_v2 = vmul.f32 %v1763_v22, %v14532_v10  ;;  %v873_v53 = vld [vmem:[#allocation2 + $0x110] sm:$0xc0]  ;;  %v12792_v22 = vld [vmem:[%s16518_s2 + $0x940] sm:$0xff]  }
 0x14d   : > { %11631 = vmatprep.subr.bf16.mxu0 %v12768_v7  ;;  %12305 = vmatpush3.bf16.msra.mxu1 %v12770_v9  ;;  %v874_v57 = vsel %vm13744_vm8, 0, %v873_v53  ;;  %v12791_v9 = vld [vmem:[%s16518_s2 + $0x8f8] sm:$0xff]   ;;  %v356_v53 = vld [vmem:[#allocation2 + $0x128] sm:$0x3] }
 0x14e   : > { %12320 = vmatprep.mubr.msk.bf16.mxu1 %vm13376_vm9, %v13375_v49  ;;  %12306 = vmatprep.subr.bf16.mxu1 %v13375_v49  ;;  %v14572_v38 = vmul.f32 1.442695, %v1770_v2  ;;  %875 = vst [vmem:[#allocation2 + $0x110] sm:$0xc0] %v874_v57  ;;  %v12798_v2 = vld [vmem:[%s16518_s2 + $0x908] sm:$0xff]  }
 0x14f   : > { %4075 = vmatmul.mubr.bf16.vlgmr.msra.gmra.mrb[32].mxu0 %v3417_v16  ;;  %v552_v57 = vld [vmem:[#allocation2 + $0x138] sm:$0x1] }
 0x150   : > { %11632 = vmatpush3.bf16.msra.mxu0 %v12769_v19  ;;  %13234 = vpow2.f32 %v14572_v38  ;;  %v12847_v38 = vld [vmem:[%s16518_s2 + $0xa28] sm:$0xff]  }
 0x151   : > { %11633 = vmatprep.subr.bf16.mxu0 %v12771_v20  ;;  %12307 = vmatpush3.bf16.msra.mxu1 %v12773_v29  ;;  %v12796_v29 = vld [vmem:[%s16518_s2 + $0x948] sm:$0xff]   ;;  %13236 = vpow2.f32 %v14603_v59 }
 0x152   : > { %12308 = vmatprep.subr.bf16.mxu1 %v13375_v49 }
 0x154   : > { %11634 = vmatpush3.bf16.msra.mxu0 %v12772_v26  ;;  %v12794_v26 = vld [vmem:[%s16518_s2 + $0x900] sm:$0xff]  }
 0x155   : > { %11635 = vmatprep.subr.bf16.mxu0 %v12774_v28  ;;  %12309 = vmatpush3.bf16.msra.mxu1 %v12776_v37  ;;  %v3422_v46 = vld [vmem:[#allocation2 + $0x110] sm:$0xff]  ;;  %v3423_v28 = vld [vmem:[#allocation2 + $0x118] sm:$0xff] }
 0x156   : > { %12310 = vmatprep.subr.bf16.mxu1 %v13375_v49  ;;  %4156 = vmatprep.mubr.bf16.mxu0 %v3422_v46  ;;  %v12802_v37 = vld [vmem:[%s16518_s2 + $0x910] sm:$0xff]  }
 0x158   : > { %11636 = vmatpush3.bf16.msra.mxu0 %v12775_v31  ;;  %v12800_v31 = vld [vmem:[%s16518_s2 + $0x950] sm:$0xff]  }
 0x159   : > { %11637 = vmatprep.subr.bf16.mxu0 %v12777_v32  ;;  %12311 = vmatpush3.bf16.msra.mxu1 %v12779_v51  ;;  %v12801_v32 = vld [vmem:[%s16518_s2 + $0x9d0] sm:$0xff]   ;;  %v14685_v51 = vld [vmem:[%s13569_s30 + $0x20] sm:$0xff]  }
 0x15a   : > { %12312 = vmatprep.subr.bf16.mxu1 %v13375_v49 }
 0x15c   : > { %11638 = vmatpush3.bf16.msra.mxu0 %v12778_v43  ;;  %v12804_v43 = vld [vmem:[%s16518_s2 + $0x958] sm:$0xff]  }
 0x15d   : > { %11639 = vmatprep.subr.bf16.mxu0 %v12780_v48  ;;  %12313 = vmatpush3.bf16.msra.mxu1 %v12782_v33  ;;  %v12805_v48 = vld [vmem:[%s16518_s2 + $0x9d8] sm:$0xff]   ;;  %v14696_v33 = vshll.u32 %v14685_v51, 16 }
 0x15e   : > { %12314 = vmatprep.subr.bf16.mxu1 %v13375_v49 }
 0x15f   : > { %v11387_v7 = vpop.f32.mrb[8].mxu1 }
 0x160   : > { %11640 = vmatpush3.bf16.msra.mxu0 %v12781_v56  ;;  %v11388_v12 = vpop.f32.mrb[9].mxu1  ;;  %v357_v56 = vsel %vm13580_vm3, 0, %v356_v53  ;;  %v12819_v53 = vld [vmem:[%s16518_s2 + $0x9b0] sm:$0xff]  }
 0x161   : > { %11641 = vmatprep.subr.bf16.mxu0 %v12783_v58  ;;  %12315 = vmatpush3.bf16.msra.mxu1 %v12785_v18  ;;  %v14627_v15 = vadd.f32 %v11388_v12, %v11387_v7  ;;  %v11390_v16 = vpop.f32.mrb[10].mxu1  ;;  %358 = vst [vmem:[#allocation2 + $0x128] sm:$0x3] %v357_v56  ;;  %v14693_v58 = vshrl.u32 %v14685_v51, 16  ;;  %v511_v18 = vrot.slane %v14685_v51, 7 }
 0x162   : > { %v1752_v62 = vpop.f32.mrb[8].mxu0  ;;  %12316 = vmatprep.subr.bf16.mxu1 %v13375_v49  ;;  %v11391_v19 = vpop.f32.mrb[11].mxu1 }
 0x163   : > { %v14615_v63 = vadd.f32 %v1752_v62, %v14500_v6  ;;  %v12262_v1 = vpop.f32.mrb[9].mxu0  ;;  %v14636_v20 = vadd.f32 %v11391_v19, %v11390_v16  ;;  %v12807_v62 = vld [vmem:[%s16518_s2 + $0x998] sm:$0xff]   ;;  %v578_v7 = vrot.slane %v14693_v58, 7  ;;  %531 = vst [vmem:[#allocation2 + $0x130] sm:$0xfe] %v511_v18  ;;  %v12812_v16 = vld [vmem:[%s16518_s2 + $0x968] sm:$0xff]  }
 0x164   : > { %v1755_v39 = vpop.f32.mrb[10].mxu0  ;;  %11642 = vmatpush3.bf16.msra.mxu0 %v12784_v60  ;;  %v553_v60 = vsel %vm13600_vm7, 0, %v552_v57  ;;  %v12808_v1 = vld [vmem:[%s16518_s2 + $0x960] sm:$0xff]  }
 0x165   : > { %v14625_v11 = vadd.f32 %v1755_v39, %v14515_v14  ;;  %v12263_v6 = vpop.f32.mrb[11].mxu0  ;;  %11643 = vmatprep.subr.bf16.mxu0 %v12786_v61  ;;  %v12790_v14 = vld [vmem:[%s16518_s2 + $0x878] sm:$0xff]   ;;  %12317 = vmatpush3.bf16.msra.mxu1 %v12788_v17  ;;  %v315_v61 = vrot.slane %v14685_v51, 6  ;;  %554 = vst [vmem:[#allocation2 + $0x138] sm:$0x1] %v553_v60  ;;  %v412_v39 = vrot.slane %v14696_v33, 7  ;;  %v579_v12 = vor.u32 %v578_v7, %v14696_v33 }
 0x166   : > { %12318 = vmatprep.subr.bf16.mxu1 %v13375_v49  ;;  %v12810_v6 = vld [vmem:[%s16518_s2 + $0x920] sm:$0xff]   ;;  %v2586_v17 = vmul.f32 %v14578_v47, %v14532_v10  ;;  %v12821_v60 = vld [vmem:[%s16518_s2 + $0x9f8] sm:$0xff]  }
 0x167   : > { %335 = vst [vmem:[#allocation2 + $0x120] sm:$0xfc] %v315_v61  ;;  %v12811_v19 = vld [vmem:[%s16518_s2 + $0x9a0] sm:$0xff]  }
 0x168   : > { %11644 = vmatpush3.bf16.msra.mxu0 %v12787_v5  ;;  %v409_v5 = vrot.slane %v14693_v58, 6 }
 0x169   : > { %11645 = vmatprep.subr.bf16.mxu0 %v12789_v8  ;;  %12319 = vmatpush3.bf16.msra.mxu1 %v12791_v9  ;;  %v12809_v8 = vld [vmem:[%s16518_s2 + $0x9e0] sm:$0xff]   ;;  %v752_v9 = vrot.slane %v14685_v51, 1 }
 0x16a   : > { %11684 = vmatprep.subr.bf16.mxu1 %v12793_v24  ;;  %v413_v46 = vor.u32 %v412_v39, %v409_v5  ;;  %v12822_v5 = vld [vmem:[%s16518_s2 + $0x938] sm:$0xff]  }
 0x16b   : > { %772 = vst [vmem:[#allocation2 + $0x150] sm:$0x7f] %v752_v9  ;;  %v12828_v9 = vld [vmem:[%s16518_s2 + $0xa80] sm:$0xff]  }
 0x16c   : > { %11646 = vmatpush3.bf16.msra.mxu0 %v12790_v14  ;;  %12321 = vmatmul.mubr.bf16.vlgmr.msra.gmra.mrb[36].mxu1 %v3423_v28  ;;  %v479_v14 = vld [vmem:[#allocation2 + $0x128] sm:$0xfe]  ;;  %v615_v24 = vld [vmem:[#allocation2 + $0x138] sm:$0xff] }
 0x16d   : > { %11662 = vmatprep.subr.bf16.mxu0 %v12792_v22  ;;  %11685 = vmatpush3.bf16.msra.mxu1 %v12795_v25  ;;  %v12813_v22 = vld [vmem:[%s16518_s2 + $0x9e8] sm:$0xff]   ;;  %v616_v25 = vsel %vm13619_vm11, %v579_v12, %v615_v24  ;;  %v12825_v12 = vld [vmem:[%s16518_s2 + $0xa40] sm:$0xff]  }
 0x16e   : > { %11686 = vmatprep.subr.bf16.mxu1 %v12797_v3  ;;  %v12814_v28 = vld [vmem:[%s16518_s2 + $0x928] sm:$0xff]   ;;  %v12816_v3 = vld [vmem:[%s16518_s2 + $0x970] sm:$0xff]   ;;  %617 = vst [vmem:[#allocation2 + $0x138] sm:$0xff] %v616_v25  ;;  %4890 = vmatprep.mubr.bf16.mxu1 %v616_v25 }
 0x16f   : > { %4157 = vmatmul.mubr.bf16.vlgmr.msra.gmra.mrb[36].mxu0 %v3421_v23  ;;  %v480_v23 = vsel %vm13611_vm10, %v413_v46, %v479_v14  ;;  %v4231_v14 = vld [vmem:[#allocation2 + $0x120] sm:$0xff]  ;;  %v12831_v24 = vld [vmem:[%s16518_s2 + $0xa08] sm:$0xff]   ;;  %v12833_v25 = vld [vmem:[%s16518_s2 + $0xa50] sm:$0xff]  }
 0x170   : > { %11663 = vmatpush3.bf16.msra.mxu0 %v12794_v26  ;;  %v898_v26 = vrot.slane %v14685_v51, 2  ;;  %481 = vst [vmem:[#allocation2 + $0x128] sm:$0xfe] %v480_v23  ;;  %v4233_v23 = vld [vmem:[#allocation2 + $0x130] sm:$0xff] }
 0x171   : > { %11664 = vmatprep.subr.bf16.mxu0 %v12796_v29  ;;  %11687 = vmatpush3.bf16.msra.mxu1 %v12799_v4  ;;  %v12815_v29 = vld [vmem:[%s16518_s2 + $0x9a8] sm:$0xff]  }
 0x172   : > { %11688 = vmatprep.subr.bf16.mxu1 %v12801_v32  ;;  %918 = vst [vmem:[#allocation2 + $0x160] sm:$0x3f] %v898_v26  ;;  %v12832_v26 = vld [vmem:[%s16518_s2 + $0xa88] sm:$0xff]  }
 0x174   : > { %11665 = vmatpush3.bf16.msra.mxu0 %v12798_v2  ;;  %v14744_v2 = vmul.f32 1.442695, %v2586_v17 }
 0x175   : > { %11666 = vmatprep.subr.bf16.mxu0 %v12800_v31  ;;  %11689 = vmatpush3.bf16.msra.mxu1 %v12803_v42  ;;  %v12817_v31 = vld [vmem:[%s16518_s2 + $0x9f0] sm:$0xff]  }
 0x176   : > { %11690 = vmatprep.subr.bf16.mxu1 %v12805_v48  ;;  %13238 = vpow2.f32 %v14744_v2  ;;  %v963_v2 = vstv %s14536_s11  ;;  %s5838_s11 = sadd.s32 7, %s14431_s29 }
 0x177   : > { %v4232_v7 = vld [vmem:[#allocation2 + $0x128] sm:$0xff] }
 0x178   : > { %11667 = vmatpush3.bf16.msra.mxu0 %v12802_v37  ;;  %v12818_v37 = vld [vmem:[%s16518_s2 + $0x930] sm:$0xff]   ;;  %4849 = vmatprep.mubr.bf16.mxu0 %v4232_v7  ;;  %v960_v7 = vld [vmem:[%s229_s13 + $0x8] sm:$0xff] }
 0x179   : > { %11668 = vmatprep.subr.bf16.mxu0 %v12804_v43  ;;  %11691 = vmatpush3.bf16.msra.mxu1 %v12807_v62 }
 0x17a   : > { %11692 = vmatprep.subr.bf16.mxu1 %v12809_v8 }
 0x17c   : > { %11669 = vmatpush3.bf16.msra.mxu0 %v12806_v54  ;;  %v12820_v54 = vld [vmem:[%s16518_s2 + $0x978] sm:$0xff]  }
 0x17d   : > { %11670 = vmatprep.subr.bf16.mxu0 %v12808_v1  ;;  %11693 = vmatpush3.bf16.msra.mxu1 %v12811_v19  ;;  %v12829_v19 = vld [vmem:[%s16518_s2 + $0xa48] sm:$0xff]  }
 0x17e   : > { %11694 = vmatprep.subr.bf16.mxu1 %v12813_v22  ;;  %v12830_v22 = vld [vmem:[%s16518_s2 + $0xac8] sm:$0xff]  }
 0x17f   : > { %v11431_v48 = vpop.f32.mrb[12].mxu1 }
 0x180   : > { %11671 = vmatpush3.bf16.msra.mxu0 %v12810_v6  ;;  %v11432_v57 = vpop.f32.mrb[13].mxu1 }
 0x181   : > { %11672 = vmatprep.subr.bf16.mxu0 %v12812_v16  ;;  %11695 = vmatpush3.bf16.msra.mxu1 %v12815_v29  ;;  %v11433_v18 = vadd.f32 %v11432_v57, %v11431_v48  ;;  %v11434_v1 = vpop.f32.mrb[14].mxu1  ;;  %v12826_v16 = vld [vmem:[%s16518_s2 + $0xac0] sm:$0xff]   ;;  %v800_v29 = vrot.slane %v14693_v58, 1 }
 0x182   : > { %v11409_v4 = vpop.f32.mrb[12].mxu0  ;;  %v11435_v39 = vpop.f32.mrb[15].mxu1  ;;  %11696 = vmatprep.subr.bf16.mxu1 %v12817_v31  ;;  %v939_v31 = vmul.u32 128, %v14467_v36  ;;  %v2581_v36 = vmul.f32 %v14578_v47, %v14549_v30  ;;  %v12840_v47 = vld [vmem:[%s16518_s2 + $0xa98] sm:$0xff]  }
 0x183   : > { %v11410_v32 = vpop.f32.mrb[13].mxu0  ;;  %v11436_v6 = vadd.f32 %v11435_v39, %v11434_v1  ;;  %v12844_v1 = vld [vmem:[%s16518_s2 + $0xaa0] sm:$0xff]  }
 0x184   : > { %v11411_v42 = vadd.f32 %v11410_v32, %v11409_v4  ;;  %v11412_v43 = vpop.f32.mrb[14].mxu0  ;;  %11673 = vmatpush3.bf16.msra.mxu0 %v12814_v28  ;;  %v661_v28 = vrot.slane %v14696_v33, 1  ;;  %v801_v4 = vrot.slane %v14696_v33, 2  ;;  %v12835_v32 = vld [vmem:[%s16518_s2 + $0xa10] sm:$0xff]   ;;  %v12837_v33 = vld [vmem:[%s16518_s2 + $0xa58] sm:$0xff]  }
 0x185   : > { %v11413_v56 = vpop.f32.mrb[15].mxu0  ;;  %11674 = vmatprep.subr.bf16.mxu0 %v12816_v3  ;;  %11697 = vmatpush3.bf16.msra.mxu1 %v12819_v53  ;;  %v12834_v3 = vld [vmem:[%s16518_s2 + $0xad0] sm:$0xff]   ;;  %v2584_v57 = vmul.f32 1.442695, %v2581_v36 }
 0x186   : > { %v2445_v61 = vadd.f32 %v11411_v42, %v14627_v15  ;;  %v11414_v62 = vadd.f32 %v11413_v56, %v11412_v43  ;;  %v12823_v15 = vld [vmem:[%s16518_s2 + $0x9b8] sm:$0xff]   ;;  %11698 = vmatprep.subr.bf16.mxu1 %v12821_v60  ;;  %v940_v42 = vmul.u32 128, %v14513_v13  ;;  %v662_v48 = vor.u32 %v661_v28, %v14693_v58  ;;  %v12841_v58 = vld [vmem:[%s16518_s2 + $0xa60] sm:$0xff]   ;;  %v697_v60 = vld [vmem:[#allocation2 + $0x148] sm:$0xff] }
 0x187   : > { %v12838_v43 = vld [vmem:[%s16518_s2 + $0xad8] sm:$0xff]   ;;  %v802_v53 = vor.u32 %v801_v4, %v800_v29  ;;  %13240 = vpow2.f32 %v2584_v57  ;;  %v12851_v28 = vld [vmem:[%s16518_s2 + $0xa30] sm:$0xff]   ;;  %v2589_v57 = vstv %s14869_s12  ;;  %s7471_s12 = sld [smem:[#allocation3 + %s7470_s14]] }
 0x188   : > { %v2448_v8 = vadd.f32 %v11414_v62, %v14636_v20  ;;  %v14766_v46 = vadd.f32 %v11433_v18, %v2445_v61  ;;  %11675 = vmatpush3.bf16.msra.mxu0 %v12818_v37  ;;  %v12827_v20 = vld [vmem:[%s16518_s2 + $0xa00] sm:$0xff]   ;;  %v12836_v37 = vld [vmem:[%s16518_s2 + $0xa90] sm:$0xff]   ;;  %v12839_v13 = vld [vmem:[%s16518_s2 + $0xa18] sm:$0xff]   ;;  %v942_v56 = vadd.s32 %v940_v42, %v14476_v40 }
 0x189   : > { %11676 = vmatprep.subr.bf16.mxu0 %v12820_v54  ;;  %11699 = vmatpush3.bf16.msra.mxu1 %v12823_v15  ;;  %v941_v54 = vadd.s32 %v939_v31, %v14476_v40  ;;  %v843_v61 = vld [vmem:[#allocation2 + $0x158] sm:$0x7f]  ;;  %v698_v40 = vsel %vm13705_vm15, %v662_v48, %v697_v60  ;;  %v12843_v18 = vld [vmem:[%s16518_s2 + $0xa20] sm:$0xff]   ;;  %v12852_v36 = vld [vmem:[%s16518_s2 + $0xab0] sm:$0xff]  }
 0x18a   : > { %v14777_v17 = vadd.f32 %v11436_v6, %v2448_v8  ;;  %11728 = vmatprep.subr.bf16.mxu1 %v12826_v16  ;;  %v844_v62 = vsel %vm13718_vm1, %v802_v53, %v843_v61  ;;  %699 = vst [vmem:[#allocation2 + $0x148] sm:$0xff] %v698_v40  ;;  %vm944_vm13 = vcmp.lt.s32.totalorder %v942_v56, 128  ;;  %v12846_v8 = vld [vmem:[%s16518_s2 + $0xae8] sm:$0xff]   ;;  %v1773_v6 = vstv %s14826_s22  ;;  %v12849_v16 = vld [vmem:[%s16518_s2 + $0xa70] sm:$0xff]   ;;  %v12855_v61 = vld [vmem:[%s16518_s2 + $0xa38] sm:$0xff]   ;;  %s4208_s22 = sadd.s32 15, %s14431_s29 }
 0x18b   : > { %vm943_vm12 = vcmp.lt.s32.totalorder %v941_v54, 128  ;;  %845 = vst [vmem:[#allocation2 + $0x158] sm:$0x7f] %v844_v62  ;;  %v9249_v15 = vsel %vm944_vm13, 1.0, %v13375_v49  ;;  %v1775_v29 = vmul.f32 %v1773_v6, %v14625_v11  ;;  %v12853_v11 = vld [vmem:[%s16518_s2 + $0xa78] sm:$0xff]   ;;  %s15151_s7 = sld [smem:[#allocation3 + %s4208_s22]] }
 0x18c   : > { %11677 = vmatpush3.bf16.msra.mxu0 %v12822_v5  ;;  %4891 = vmatmul.mubr.bf16.vlgmr.msra.gmra.mrb[40].mxu1 %v4233_v23  ;;  %v959_v5 = vld [vmem:[%s229_s13] sm:$0xff]  ;;  %v9248_v39 = vsel %vm943_vm12, 1.0, %v13375_v49  ;;  %v13231_v23 = vpop.eup %13230  ;;  %s15201_s22 = sld [smem:[#allocation3 + %s3390_s5]] }
 0x18d   : > { %11706 = vmatprep.subr.bf16.mxu0 %v12825_v12  ;;  %11729 = vmatpush3.bf16.msra.mxu1 %v12828_v9  ;;  %v12848_v12 = vld [vmem:[%s16518_s2 + $0xaa8] sm:$0xff]   ;;  %s15794_s13 = sld [smem:[#allocation3 + %s5022_s23]]  ;;  %s5840_s23 = sadd.s32 17, %s14431_s29 }
 0x18e   : > { %11730 = vmatprep.subr.bf16.mxu1 %v12830_v22 }
 0x18f   : > { %4850 = vmatmul.mubr.bf16.vlgmr.msra.gmra.mrb[40].mxu0 %v4231_v14  ;;  %v12850_v14 = vld [vmem:[%s16518_s2 + $0xaf0] sm:$0xff]  }
 0x190   : > { %11707 = vmatpush3.bf16.msra.mxu0 %v12827_v20  ;;  %v961_v20 = vmul.f32 %v9248_v39, %v959_v5 }
 0x191   : > { %11708 = vmatprep.subr.bf16.mxu0 %v12829_v19  ;;  %11731 = vmatpush3.bf16.msra.mxu1 %v12832_v26  ;;  %v1774_v19 = vmul.f32 %v1773_v6, %v14615_v63  ;;  %v730_v9 = vld [vmem:[#allocation2 + $0x148] sm:$0x80]  ;;  %s4210_s28 = ssub.f32 0.0, %s15151_s7 }
 0x192   : > { %11732 = vmatprep.subr.bf16.mxu1 %v12834_v3  ;;  %v876_v22 = vld [vmem:[#allocation2 + $0x158] sm:$0xc0]  ;;  %v731_v63 = vsel %vm13737_vm6, 0, %v730_v9 }
 0x193   : > { %732 = vst [vmem:[#allocation2 + $0x148] sm:$0x80] %v731_v63  ;;  %v1776_v48 = vmul.f32 %v13231_v23, %v1774_v19  ;;  %v12858_v19 = vld [vmem:[%s16518_s2 + $0xb00] sm:$0xff]   ;;  %v12861_v63 = vld [vmem:[%s16518_s2 + $0xb08] sm:$0xff]  }
 0x194   : > { %11709 = vmatpush3.bf16.msra.mxu0 %v12831_v24  ;;  %v962_v24 = vmul.f32 %v9249_v15, %v960_v7  ;;  %v12859_v23 = vld [vmem:[%s16518_s2 + $0xb40] sm:$0xff]  }
 0x195   : > { %11710 = vmatprep.subr.bf16.mxu0 %v12833_v25  ;;  %11733 = vmatpush3.bf16.msra.mxu1 %v12836_v37  ;;  %v877_v25 = vsel %vm13744_vm8, 0, %v876_v22  ;;  %v966_v37 = vstv %s14554_s10  ;;  %s6654_s10 = sadd.s32 8, %s14431_s29 }
 0x196   : > { %11734 = vmatprep.subr.bf16.mxu1 %v12838_v43  ;;  %878 = vst [vmem:[#allocation2 + $0x158] sm:$0xc0] %v877_v25  ;;  %v964_v43 = vmul.f32 %v963_v2, %v961_v20  ;;  %v12862_v25 = vld [vmem:[%s16518_s2 + $0xb48] sm:$0xff]  }
 0x198   : > { %11711 = vmatpush3.bf16.msra.mxu0 %v12835_v32  ;;  %v13233_v32 = vpop.eup %13232  ;;  %v967_v5 = vadd.f32 %v966_v37, %v964_v43 }
 0x199   : > { %11712 = vmatprep.subr.bf16.mxu0 %v12837_v33  ;;  %11735 = vmatpush3.bf16.msra.mxu1 %v12840_v47  ;;  %v12854_v47 = vld [vmem:[%s16518_s2 + $0xaf8] sm:$0xff]   ;;  %v13235_v56 = vpop.eup %13234 }
 0x19a   : > { %11736 = vmatprep.subr.bf16.mxu1 %v12842_v0  ;;  %v1777_v0 = vmul.f32 %v13233_v32, %v1775_v29  ;;  %v12863_v29 = vld [vmem:[%s16518_s2 + $0xb90] sm:$0xff]  }
 0x19b   : > { %v359_v32 = vld [vmem:[#allocation2 + $0x170] sm:$0x3] }
 0x19c   : > { %11713 = vmatpush3.bf16.msra.mxu0 %v12839_v13 }
 0x19d   : > { %11714 = vmatprep.subr.bf16.mxu0 %v12841_v58  ;;  %11737 = vmatpush3.bf16.msra.mxu1 %v12844_v1  ;;  %v965_v58 = vmul.f32 %v963_v2, %v962_v24  ;;  %v4238_v15 = vld [vmem:[#allocation2 + $0x158] sm:$0xff]  ;;  %v12860_v2 = vld [vmem:[%s16518_s2 + $0xb88] sm:$0xff]  }
 0x19e   : > { %11738 = vmatprep.subr.bf16.mxu1 %v12846_v8  ;;  %v12857_v8 = vld [vmem:[%s16518_s2 + $0xb80] sm:$0xff]   ;;  %4972 = vmatprep.mubr.bf16.mxu1 %v4238_v15  ;;  %v12877_v15 = vld [vmem:[%s16518_s2 + $0xb70] sm:$0xff]  }
 0x19f   : > { %v2567_v31 = vpop.f32.mrb[16].mxu1 }
 0x1a0   : > { %11715 = vmatpush3.bf16.msra.mxu0 %v12843_v18  ;;  %v12282_v33 = vpop.f32.mrb[17].mxu1  ;;  %v12856_v18 = vld [vmem:[%s16518_s2 + $0xab8] sm:$0xff]  }
 0x1a1   : > { %11716 = vmatprep.subr.bf16.mxu0 %v12845_v52  ;;  %11739 = vmatpush3.bf16.msra.mxu1 %v12848_v12  ;;  %v2570_v13 = vpop.f32.mrb[18].mxu1  ;;  %v1778_v52 = vmul.f32 %v13235_v56, %v1776_v48  ;;  %v1779_v12 = vmul.f32 %v13235_v56, %v1777_v0  ;;  %v12868_v48 = vld [vmem:[%s16518_s2 + $0xb58] sm:$0xff]   ;;  %v12870_v56 = vld [vmem:[%s16518_s2 + $0xb20] sm:$0xff]  }
 0x1a2   : > { %v11453_v59 = vpop.f32.mrb[16].mxu0  ;;  %11740 = vmatprep.subr.bf16.mxu1 %v12850_v14  ;;  %v12283_v60 = vpop.f32.mrb[19].mxu1 }
 0x1a3   : > { %v11454_v26 = vpop.f32.mrb[17].mxu0  ;;  %v1780_v14 = vadd.f32 %v1778_v52, %v967_v5  ;;  %v12875_v5 = vld [vmem:[%s16518_s2 + $0xbb0] sm:$0xff]  }
 0x1a4   : > { %v11455_v3 = vadd.f32 %v11454_v26, %v11453_v59  ;;  %v11456_v4 = vpop.f32.mrb[18].mxu0  ;;  %11717 = vmatpush3.bf16.msra.mxu0 %v12847_v38  ;;  %v968_v38 = vadd.f32 %v966_v37, %v965_v58  ;;  %v4237_v59 = vld [vmem:[#allocation2 + $0x150] sm:$0xff]  ;;  %v12866_v37 = vld [vmem:[%s16518_s2 + $0xb98] sm:$0xff]  }
 0x1a5   : > { %v11457_v42 = vpop.f32.mrb[19].mxu0  ;;  %11718 = vmatprep.subr.bf16.mxu0 %v12849_v16  ;;  %11741 = vmatpush3.bf16.msra.mxu1 %v12852_v36 }
 0x1a6   : > { %v11458_v53 = vadd.f32 %v11457_v42, %v11456_v4  ;;  %v2527_v54 = vadd.f32 %v11455_v3, %v14766_v46  ;;  %v13237_v46 = vpop.eup %13236  ;;  %11742 = vmatprep.subr.bf16.mxu1 %v12854_v47  ;;  %v1781_v24 = vadd.f32 %v1779_v12, %v968_v38  ;;  %v12864_v3 = vld [vmem:[%s16518_s2 + $0xb10] sm:$0xff]   ;;  %v360_v42 = vsel %vm13580_vm3, 0, %v359_v32  ;;  %v12878_v12 = vld [vmem:[%s16518_s2 + $0xbb8] sm:$0xff]   ;;  %v12887_v32 = vld [vmem:[%s16518_s2 + $0xc88] sm:$0xff]  }
 0x1a7   : > { %v13239_v1 = vpop.eup %13238  ;;  %v12865_v4 = vld [vmem:[%s16518_s2 + $0xb50] sm:$0xff]   ;;  %361 = vst [vmem:[#allocation2 + $0x170] sm:$0x3] %v360_v42  ;;  %v12888_v42 = vld [vmem:[%s16518_s2 + $0xbc8] sm:$0xff]  }
 0x1a8   : > { %v2568_v40 = vadd.f32 %v2567_v31, %v2527_v54  ;;  %v2530_v62 = vadd.f32 %v11458_v53, %v14777_v17  ;;  %11719 = vmatpush3.bf16.msra.mxu0 %v12851_v28  ;;  %v13241_v6 = vpop.eup %13240  ;;  %v4236_v17 = vld [vmem:[#allocation2 + $0x148] sm:$0xff] }
 0x1a9   : > { %11720 = vmatprep.subr.bf16.mxu0 %v12853_v11  ;;  %4931 = vmatprep.mubr.bf16.mxu0 %v4236_v17  ;;  %v14950_v31 = vld [vmem:[%s13569_s30 + $0x28] sm:$0xff]   ;;  %v12867_v11 = vld [vmem:[%s16518_s2 + $0xb18] sm:$0xff]  }
 0x1aa   : > { %v2590_v39 = vmul.f32 %v2589_v57, %v2568_v40  ;;  %v2571_v7 = vadd.f32 %v2570_v13, %v2530_v62  ;;  %11743 = vmatpush3.bf16.msra.mxu1 %v12856_v18  ;;  %v14958_v33 = vshrl.u32 %v14950_v31, 16  ;;  %v14961_v36 = vshll.u32 %v14950_v31, 16  ;;  %v12869_v13 = vld [vmem:[%s16518_s2 + $0xba0] sm:$0xff]   ;;  %v12873_v40 = vld [vmem:[%s16518_s2 + $0xb28] sm:$0xff]  }
 0x1ab   : > { %11759 = vmatprep.subr.bf16.mxu1 %v12857_v8  ;;  %v316_v43 = vrot.slane %v14950_v31, 6  ;;  %v512_v58 = vrot.slane %v14950_v31, 7  ;;  %v753_v62 = vrot.slane %v14950_v31, 1  ;;  %v899_v18 = vrot.slane %v14950_v31, 2 }
 0x1ac   : > { %v2592_v16 = vmul.f32 %v13237_v46, %v2590_v39  ;;  %v2591_v20 = vmul.f32 %v2589_v57, %v2571_v7  ;;  %11721 = vmatpush3.bf16.msra.mxu0 %v12855_v61  ;;  %v417_v53 = vrot.slane %v14958_v33, 6  ;;  %v420_v54 = vrot.slane %v14961_v36, 7  ;;  %v12871_v57 = vld [vmem:[%s16518_s2 + $0xb60] sm:$0xff]   ;;  %v12872_v61 = vld [vmem:[%s16518_s2 + $0xba8] sm:$0xff]   ;;  %v12876_v39 = vld [vmem:[%s16518_s2 + $0xb30] sm:$0xff]  }
 0x1ad   : > { %12324 = vmatprep.subr.bf16.mxu0 %v13375_v49  ;;  %4973 = vmatmul.mubr.bf16.vlgmr.msra.gmra.mrb[44].mxu1 %v4237_v59  ;;  %336 = vst [vmem:[#allocation2 + $0x168] sm:$0xfc] %v316_v43  ;;  %532 = vst [vmem:[#allocation2 + $0x178] sm:$0xfe] %v512_v58  ;;  %v12874_v46 = vld [vmem:[%s16518_s2 + $0xb68] sm:$0xff]   ;;  %v12879_v59 = vld [vmem:[%s16518_s2 + $0xb38] sm:$0xff]  }
 0x1ae   : > { %v2594_v9 = vmul.f32 %v13239_v1, %v2592_v16  ;;  %v2593_v22 = vmul.f32 %v13241_v6, %v2591_v20  ;;  %11760 = vmatpush3.bf16.msra.mxu1 %v12859_v23  ;;  %v421_v47 = vor.u32 %v420_v54, %v417_v53  ;;  %v482_v60 = vld [vmem:[#allocation2 + $0x170] sm:$0xfe]  ;;  %773 = vst [vmem:[#allocation2 + $0x198] sm:$0x7f] %v753_v62  ;;  %919 = vst [vmem:[#allocation2 + $0x1a8] sm:$0x3f] %v899_v18 }
 0x1af   : > { %4932 = vmatmul.mubr.bf16.vlgmr.msra.gmra.mrb[44].mxu0 %v14685_v51  ;;  %11761 = vmatprep.subr.bf16.mxu1 %v12860_v2  ;;  %v12880_v2 = vld [vmem:[%s16518_s2 + $0xb78] sm:$0xff]   ;;  %v12890_v43 = vld [vmem:[%s16518_s2 + $0xc10] sm:$0xff]   ;;  %v12898_v62 = vld [vmem:[%s16518_s2 + $0xc20] sm:$0xff]  }
 0x1b0   : > { %v14926_v26 = vadd.f32 %v2594_v9, %v1780_v14  ;;  %v2595_v28 = vmul.f32 %v13239_v1, %v2593_v22  ;;  %12325 = vmatpush3.bf16.msra.mxu0 %v12858_v19  ;;  %12340 = vmatprep.mubr.msk.bf16.mxu0 %vm13376_vm9, %v13375_v49  ;;  %v483_v0 = vsel %vm13611_vm10, %v421_v47, %v482_v60  ;;  %v12891_v53 = vld [vmem:[%s16518_s2 + $0xc90] sm:$0xff]   ;;  %v12894_v47 = vld [vmem:[%s16518_s2 + $0xc18] sm:$0xff]   ;;  %v555_v60 = vld [vmem:[#allocation2 + $0x180] sm:$0x1] }
 0x1b1   : > { %12326 = vmatprep.subr.bf16.mxu0 %v13375_v49  ;;  %484 = vst [vmem:[#allocation2 + $0x170] sm:$0xfe] %v483_v0  ;;  %v12892_v54 = vld [vmem:[%s16518_s2 + $0xbd0] sm:$0xff]   ;;  %v12895_v58 = vld [vmem:[%s16518_s2 + $0xc98] sm:$0xff]   ;;  %v556_v0 = vsel %vm13600_vm7, 0, %v555_v60  ;;  %v804_v60 = vrot.slane %v14961_v36, 2 }
 0x1b2   : > { %v14934_v51 = vadd.f32 %v2595_v28, %v1781_v24  ;;  %11762 = vmatpush3.bf16.msra.mxu1 %v12862_v25  ;;  %v12882_v24 = vld [vmem:[%s16518_s2 + $0xc00] sm:$0xff]   ;;  %557 = vst [vmem:[#allocation2 + $0x180] sm:$0x1] %v556_v0  ;;  %v3395_v0 = vstv %s3394_s20  ;;  %s5026_s20 = ssub.f32 0.0, %s15671_s9 }
 0x1b3   : > { %11763 = vmatprep.subr.bf16.mxu1 %v12863_v29  ;;  %v12883_v25 = vld [vmem:[%s16518_s2 + $0xc80] sm:$0xff]  }
 0x1b4   : > { %12327 = vmatpush3.bf16.msra.mxu0 %v12861_v63  ;;  %v4239_v63 = vld [vmem:[#allocation2 + $0x160] sm:$0xff] }
 0x1b5   : > { %12328 = vmatprep.subr.bf16.mxu0 %v13375_v49  ;;  %v12884_v29 = vld [vmem:[%s16518_s2 + $0xbc0] sm:$0xff]  }
 0x1b6   : > { %11764 = vmatpush3.bf16.msra.mxu1 %v12865_v4  ;;  %v12886_v4 = vld [vmem:[%s16518_s2 + $0xc08] sm:$0xff]  }
 0x1b7   : > { %11765 = vmatprep.subr.bf16.mxu1 %v12866_v37  ;;  %v5047_v37 = vld [vmem:[#allocation2 + $0x168] sm:$0xff] }
 0x1b8   : > { %12329 = vmatpush3.bf16.msra.mxu0 %v12864_v3  ;;  %v5048_v9 = vld [vmem:[#allocation2 + $0x170] sm:$0xff]  ;;  %v12885_v3 = vld [vmem:[%s16518_s2 + $0xc40] sm:$0xff]  }
 0x1b9   : > { %12330 = vmatprep.subr.bf16.mxu0 %v13375_v49  ;;  %5665 = vmatprep.mubr.bf16.mxu1 %v5048_v9  ;;  %v12908_v9 = vld [vmem:[%s16518_s2 + $0xbf0] sm:$0xff]  }
 0x1ba   : > { %11766 = vmatpush3.bf16.msra.mxu1 %v12868_v48  ;;  %v663_v48 = vrot.slane %v14961_v36, 1 }
 0x1bb   : > { %11767 = vmatprep.subr.bf16.mxu1 %v12869_v13  ;;  %v12893_v13 = vld [vmem:[%s16518_s2 + $0xc50] sm:$0xff]  }
 0x1bc   : > { %12331 = vmatpush3.bf16.msra.mxu0 %v12867_v11  ;;  %v12889_v11 = vld [vmem:[%s16518_s2 + $0xc48] sm:$0xff]  }
 0x1bd   : > { %12332 = vmatprep.subr.bf16.mxu0 %v13375_v49 }
 0x1be   : > { %11768 = vmatpush3.bf16.msra.mxu1 %v12871_v57  ;;  %v12896_v57 = vld [vmem:[%s16518_s2 + $0xbd8] sm:$0xff]  }
 0x1bf   : > { %11769 = vmatprep.subr.bf16.mxu1 %v12872_v61  ;;  %v11506_v7 = vpop.f32.mrb[20].mxu1  ;;  %v12897_v61 = vld [vmem:[%s16518_s2 + $0xc58] sm:$0xff]  }
 0x1c0   : > { %12333 = vmatpush3.bf16.msra.mxu0 %v12870_v56  ;;  %v11507_v38 = vpop.f32.mrb[21].mxu1  ;;  %v664_v56 = vor.u32 %v663_v48, %v14958_v33  ;;  %v12912_v48 = vld [vmem:[%s16518_s2 + $0xbf8] sm:$0xff]  }
 0x1c1   : > { %12334 = vmatprep.subr.bf16.mxu0 %v13375_v49  ;;  %v11508_v16 = vadd.f32 %v11507_v38, %v11506_v7  ;;  %v11509_v20 = vpop.f32.mrb[22].mxu1  ;;  %v12906_v38 = vld [vmem:[%s16518_s2 + $0xc30] sm:$0xff]  }
 0x1c2   : > { %v11484_v1 = vpop.f32.mrb[20].mxu0  ;;  %11770 = vmatpush3.bf16.msra.mxu1 %v12874_v46  ;;  %v11510_v14 = vpop.f32.mrb[23].mxu1  ;;  %v580_v46 = vrot.slane %v14958_v33, 7 }
 0x1c3   : > { %v11485_v52 = vpop.f32.mrb[21].mxu0  ;;  %11771 = vmatprep.subr.bf16.mxu1 %v12875_v5  ;;  %v11511_v23 = vadd.f32 %v11510_v14, %v11509_v20  ;;  %v12900_v5 = vld [vmem:[%s16518_s2 + $0xbe0] sm:$0xff]   ;;  %v12905_v20 = vld [vmem:[%s16518_s2 + $0xc68] sm:$0xff]  }
 0x1c4   : > { %v11486_v8 = vadd.f32 %v11485_v52, %v11484_v1  ;;  %v11487_v6 = vpop.f32.mrb[22].mxu0  ;;  %12335 = vmatpush3.bf16.msra.mxu0 %v12873_v40  ;;  %v700_v40 = vld [vmem:[#allocation2 + $0x190] sm:$0xff]  ;;  %v12899_v1 = vld [vmem:[%s16518_s2 + $0xca0] sm:$0xff]   ;;  %v581_v7 = vor.u32 %v580_v46, %v14961_v36  ;;  %v3396_v36 = vmul.f32 %v3395_v0, %v14527_v21  ;;  %v12918_v46 = vld [vmem:[%s16518_s2 + $0xcc8] sm:$0xff]  }
 0x1c5   : > { %v11488_v17 = vpop.f32.mrb[23].mxu0  ;;  %12336 = vmatprep.subr.bf16.mxu0 %v13375_v49  ;;  %v701_v18 = vsel %vm13705_vm15, %v664_v56, %v700_v40  ;;  %v12901_v52 = vld [vmem:[%s16518_s2 + $0xc60] sm:$0xff]   ;;  %v12917_v40 = vld [vmem:[%s16518_s2 + $0xd08] sm:$0xff]  }
 0x1c6   : > { %v11489_v19 = vadd.f32 %v11488_v17, %v11487_v6  ;;  %v15014_v22 = vadd.f32 %v11508_v16, %v11486_v8  ;;  %11772 = vmatpush3.bf16.msra.mxu1 %v12877_v15  ;;  %702 = vst [vmem:[#allocation2 + $0x190] sm:$0xff] %v701_v18  ;;  %v12903_v8 = vld [vmem:[%s16518_s2 + $0xca8] sm:$0xff]   ;;  %v618_v17 = vld [vmem:[#allocation2 + $0x180] sm:$0xff]  ;;  %v3402_v18 = vmul.f32 %v3395_v0, %v14532_v10 }
 0x1c7   : > { %11773 = vmatprep.subr.bf16.mxu1 %v12878_v12  ;;  %v12904_v6 = vld [vmem:[%s16518_s2 + $0xbe8] sm:$0xff]   ;;  %v619_v15 = vsel %vm13619_vm11, %v581_v7, %v618_v17  ;;  %v12922_v17 = vld [vmem:[%s16518_s2 + $0xd50] sm:$0xff]  }
 0x1c8   : > { %12337 = vmatpush3.bf16.msra.mxu0 %v12876_v39  ;;  %v15023_v28 = vadd.f32 %v11511_v23, %v11489_v19  ;;  %v12902_v39 = vld [vmem:[%s16518_s2 + $0xc28] sm:$0xff]   ;;  %v12907_v19 = vld [vmem:[%s16518_s2 + $0xcb0] sm:$0xff]   ;;  %620 = vst [vmem:[#allocation2 + $0x180] sm:$0xff] %v619_v15 }
 0x1c9   : > { %12338 = vmatprep.subr.bf16.mxu0 %v13375_v49 }
 0x1ca   : > { %11774 = vmatpush3.bf16.msra.mxu1 %v12880_v2 }
 0x1cb   : > { %11803 = vmatprep.subr.bf16.mxu1 %v12883_v25 }
 0x1cc   : > { %12339 = vmatpush3.bf16.msra.mxu0 %v12879_v59 }
 0x1cd   : > { %11781 = vmatprep.subr.bf16.mxu0 %v12882_v24  ;;  %5666 = vmatmul.mubr.bf16.vlgmr.msra.gmra.mrb[48].mxu1 %v5047_v37  ;;  %v733_v12 = vld [vmem:[#allocation2 + $0x190] sm:$0x80] }
 0x1ce   : > { %11804 = vmatpush3.bf16.msra.mxu1 %v12885_v3  ;;  %v734_v59 = vsel %vm13737_vm6, 0, %v733_v12  ;;  %v12910_v3 = vld [vmem:[%s16518_s2 + $0xc38] sm:$0xff]  }
 0x1cf   : > { %12341 = vmatmul.mubr.bf16.vlgmr.msra.gmra.mrb[48].mxu0 %v4239_v63  ;;  %11805 = vmatprep.subr.bf16.mxu1 %v12887_v32  ;;  %735 = vst [vmem:[#allocation2 + $0x190] sm:$0x80] %v734_v59  ;;  %v12924_v12 = vld [vmem:[%s16518_s2 + $0xcd8] sm:$0xff]  }
 0x1d0   : > { %11782 = vmatpush3.bf16.msra.mxu0 %v12884_v29  ;;  %5706 = vmatprep.mubr.bf16.mxu0 %v619_v15  ;;  %v12909_v29 = vld [vmem:[%s16518_s2 + $0xc70] sm:$0xff]  }
 0x1d1   : > { %11783 = vmatprep.subr.bf16.mxu0 %v12886_v4 }
 0x1d2   : > { %11806 = vmatpush3.bf16.msra.mxu1 %v12889_v11  ;;  %v12911_v11 = vld [vmem:[%s16518_s2 + $0xcb8] sm:$0xff]  }
 0x1d3   : > { %11807 = vmatprep.subr.bf16.mxu1 %v12891_v53 }
 0x1d4   : > { %11784 = vmatpush3.bf16.msra.mxu0 %v12888_v42 }
 0x1d5   : > { %11785 = vmatprep.subr.bf16.mxu0 %v12890_v43 }
 0x1d6   : > { %11808 = vmatpush3.bf16.msra.mxu1 %v12893_v13  ;;  %v12914_v13 = vld [vmem:[%s16518_s2 + $0xd00] sm:$0xff]   ;;  %v5052_v56 = vld [vmem:[#allocation2 + $0x190] sm:$0xff] }
 0x1d7   : > { %11809 = vmatprep.subr.bf16.mxu1 %v12895_v58  ;;  %5747 = vmatprep.mubr.bf16.mxu1 %v5052_v56 }
 0x1d8   : > { %11786 = vmatpush3.bf16.msra.mxu0 %v12892_v54 }
 0x1d9   : > { %11787 = vmatprep.subr.bf16.mxu0 %v12894_v47  ;;  %v12913_v47 = vld [vmem:[%s16518_s2 + $0xc78] sm:$0xff]  }
 0x1da   : > { %11810 = vmatpush3.bf16.msra.mxu1 %v12897_v61  ;;  %v12915_v61 = vld [vmem:[%s16518_s2 + $0xcc0] sm:$0xff]  }
 0x1db   : > { %11811 = vmatprep.subr.bf16.mxu1 %v12899_v1  ;;  %v12920_v1 = vld [vmem:[%s16518_s2 + $0xd10] sm:$0xff]  }
 0x1dc   : > { %11788 = vmatpush3.bf16.msra.mxu0 %v12896_v57  ;;  %v5049_v57 = vld [vmem:[#allocation2 + $0x178] sm:$0xff] }
 0x1dd   : > { %11789 = vmatprep.subr.bf16.mxu0 %v12898_v62 }
 0x1de   : > { %11812 = vmatpush3.bf16.msra.mxu1 %v12901_v52  ;;  %v846_v52 = vld [vmem:[#allocation2 + $0x1a0] sm:$0x7f] }
 0x1df   : > { %11813 = vmatprep.subr.bf16.mxu1 %v12903_v8  ;;  %v11550_v24 = vpop.f32.mrb[24].mxu1  ;;  %v12921_v8 = vld [vmem:[%s16518_s2 + $0xcd0] sm:$0xff]  }
 0x1e0   : > { %11790 = vmatpush3.bf16.msra.mxu0 %v12900_v5  ;;  %v11551_v25 = vpop.f32.mrb[25].mxu1  ;;  %v12919_v5 = vld [vmem:[%s16518_s2 + $0xd48] sm:$0xff]  }
 0x1e1   : > { %11791 = vmatprep.subr.bf16.mxu0 %v12902_v39  ;;  %v11552_v37 = vadd.f32 %v11551_v25, %v11550_v24  ;;  %v11553_v42 = vpop.f32.mrb[26].mxu1  ;;  %v3398_v39 = vmul.f32 1.442695, %v3396_v36  ;;  %v12928_v24 = vld [vmem:[%s16518_s2 + $0xd60] sm:$0xff]   ;;  %v12930_v25 = vld [vmem:[%s16518_s2 + $0xce8] sm:$0xff]  }
 0x1e2   : > { %v11528_v16 = vpop.f32.mrb[24].mxu0  ;;  %11814 = vmatpush3.bf16.msra.mxu1 %v12905_v20  ;;  %v11554_v43 = vpop.f32.mrb[27].mxu1  ;;  %v12926_v20 = vld [vmem:[%s16518_s2 + $0xd20] sm:$0xff]  }
 0x1e3   : > { %v11529_v14 = vpop.f32.mrb[25].mxu0  ;;  %11815 = vmatprep.subr.bf16.mxu1 %v12907_v19  ;;  %v11555_v54 = vadd.f32 %v11554_v43, %v11553_v42  ;;  %v12925_v19 = vld [vmem:[%s16518_s2 + $0xd58] sm:$0xff]   ;;  %13242 = vpow2.f32 %v3398_v39 }
 0x1e4   : > { %v11530_v23 = vadd.f32 %v11529_v14, %v11528_v16  ;;  %v11531_v2 = vpop.f32.mrb[26].mxu0  ;;  %11792 = vmatpush3.bf16.msra.mxu0 %v12904_v6  ;;  %v3403_v6 = vmul.f32 1.442695, %v3402_v18  ;;  %v15193_v16 = vstv %s4210_s28  ;;  %v12937_v18 = vld [vmem:[%s16518_s2 + $0xd78] sm:$0xff]   ;;  %s8288_s28 = sadd.s32 20, %s14431_s29 }
 0x1e5   : > { %v11532_v63 = vpop.f32.mrb[27].mxu0  ;;  %11793 = vmatprep.subr.bf16.mxu0 %v12906_v38  ;;  %v12923_v38 = vld [vmem:[%s16518_s2 + $0xd18] sm:$0xff]   ;;  %v4212_v14 = vmul.f32 %v15193_v16, %v14527_v21 }
 0x1e6   : > { %v3302_v4 = vadd.f32 %v11530_v23, %v15014_v22  ;;  %v11533_v32 = vadd.f32 %v11532_v63, %v11531_v2  ;;  %11816 = vmatpush3.bf16.msra.mxu1 %v12909_v29  ;;  %13244 = vpow2.f32 %v3403_v6  ;;  %v12929_v2 = vld [vmem:[%s16518_s2 + $0xd28] sm:$0xff]   ;;  %v12932_v29 = vld [vmem:[%s16518_s2 + $0xd30] sm:$0xff]   ;;  %v5053_v39 = vld [vmem:[#allocation2 + $0x198] sm:$0xff] }
 0x1e7   : > { %11817 = vmatprep.subr.bf16.mxu1 %v12911_v11  ;;  %v15218_v63 = vmul.f32 1.442695, %v4212_v14  ;;  %v12940_v6 = vld [vmem:[%s16518_s2 + $0xd80] sm:$0xff]   ;;  %v12948_v14 = vld [vmem:[%s16518_s2 + $0xd90] sm:$0xff]  }
 0x1e8   : > { %v3305_v53 = vadd.f32 %v11533_v32, %v15023_v28  ;;  %11794 = vmatpush3.bf16.msra.mxu0 %v12908_v9  ;;  %v15133_v22 = vadd.f32 %v11552_v37, %v3302_v4  ;;  %v803_v28 = vrot.slane %v14958_v33, 1  ;;  %v12916_v33 = vld [vmem:[%s16518_s2 + $0xd40] sm:$0xff]   ;;  %v3405_v4 = vstv %s15201_s22  ;;  %v12931_v32 = vld [vmem:[%s16518_s2 + $0xd68] sm:$0xff]   ;;  %s15856_s22 = sld [smem:[#allocation3 + %s5840_s23]] }
 0x1e9   : > { %11795 = vmatprep.subr.bf16.mxu0 %v12910_v3  ;;  %v12927_v9 = vld [vmem:[%s16518_s2 + $0xce0] sm:$0xff]  }
 0x1ea   : > { %v15142_v58 = vadd.f32 %v11555_v54, %v3305_v53  ;;  %11818 = vmatpush3.bf16.msra.mxu1 %v12913_v47  ;;  %v805_v62 = vor.u32 %v804_v60, %v803_v28  ;;  %v12933_v53 = vld [vmem:[%s16518_s2 + $0xcf0] sm:$0xff]  }
 0x1eb   : > { %12344 = vmatprep.subr.bf16.mxu1 %v13375_v49 }
 0x1ec   : > { %11796 = vmatpush3.bf16.msra.mxu0 %v12912_v48  ;;  %v847_v7 = vsel %vm13718_vm1, %v805_v62, %v846_v52  ;;  %v12936_v62 = vld [vmem:[%s16518_s2 + $0xcf8] sm:$0xff]   ;;  %v12938_v52 = vld [vmem:[%s16518_s2 + $0xdc0] sm:$0xff]  }
 0x1ed   : > { %11825 = vmatprep.subr.bf16.mxu0 %v12914_v13  ;;  %5748 = vmatmul.mubr.bf16.vlgmr.msra.gmra.mrb[52].mxu1 %v14950_v31  ;;  %v3397_v31 = vmul.f32 %v3395_v0, %v14549_v30  ;;  %848 = vst [vmem:[#allocation2 + $0x1a0] sm:$0x7f] %v847_v7  ;;  %v13243_v11 = vpop.eup %13242 }
 0x1ee   : > { %12345 = vmatpush3.bf16.msra.mxu1 %v12916_v33  ;;  %12360 = vmatprep.mubr.msk.bf16.mxu1 %vm13376_vm9, %v13375_v49  ;;  %s5842_s9 = ssub.f32 0.0, %s15856_s22  ;;  %s9104_s22 = sadd.s32 21, %s14431_s29 }
 0x1ef   : > { %5707 = vmatmul.mubr.bf16.vlgmr.msra.gmra.mrb[52].mxu0 %v5049_v57  ;;  %12346 = vmatprep.subr.bf16.mxu1 %v13375_v49  ;;  %v3400_v15 = vmul.f32 1.442695, %v3397_v31  ;;  %v12939_v31 = vld [vmem:[%s16518_s2 + $0xe40] sm:$0xff]   ;;  %s9105_s23 = sld [smem:[#allocation3 + %s9104_s22]] }
 0x1f0   : > { %11826 = vmatpush3.bf16.msra.mxu0 %v12915_v61  ;;  %v13245_v13 = vpop.eup %13244 }
 0x1f1   : > { %11827 = vmatprep.subr.bf16.mxu0 %v12917_v40  ;;  %13246 = vpow2.f32 %v3400_v15  ;;  %v12934_v40 = vld [vmem:[%s16518_s2 + $0xd70] sm:$0xff]  }
 0x1f2   : > { %12347 = vmatpush3.bf16.msra.mxu1 %v12919_v5  ;;  %13248 = vpow2.f32 %v15218_v63  ;;  %v12996_v63 = vld [vmem:[%s16518_s2 + $0xf70] sm:$0xff]  }
 0x1f3   : > { %12348 = vmatprep.subr.bf16.mxu1 %v13375_v49 }
 0x1f4   : > { %11828 = vmatpush3.bf16.msra.mxu0 %v12918_v46  ;;  %v879_v59 = vld [vmem:[#allocation2 + $0x1a0] sm:$0xc0] }
 0x1f5   : > { %11829 = vmatprep.subr.bf16.mxu0 %v12920_v1  ;;  %v880_v23 = vsel %vm13744_vm8, 0, %v879_v59  ;;  %v12947_v59 = vld [vmem:[%s16518_s2 + $0xe50] sm:$0xff]   ;;  %s9106_s8 = ssub.f32 0.0, %s9105_s23 }
 0x1f6   : > { %12349 = vmatpush3.bf16.msra.mxu1 %v12922_v17  ;;  %881 = vst [vmem:[#allocation2 + $0x1a0] sm:$0xc0] %v880_v23  ;;  %v12941_v17 = vld [vmem:[%s16518_s2 + $0xe00] sm:$0xff]   ;;  %v12949_v23 = vld [vmem:[%s16518_s2 + $0xe10] sm:$0xff]  }
 0x1f7   : > { %12350 = vmatprep.subr.bf16.mxu1 %v13375_v49 }
 0x1f8   : > { %11830 = vmatpush3.bf16.msra.mxu0 %v12921_v8 }
 0x1f9   : > { %11831 = vmatprep.subr.bf16.mxu0 %v12923_v38  ;;  %v5055_v38 = vld [vmem:[#allocation2 + $0x1a8] sm:$0xff] }
 0x1fa   : > { %12351 = vmatpush3.bf16.msra.mxu1 %v12925_v19  ;;  %v12946_v19 = vld [vmem:[%s16518_s2 + $0xdd0] sm:$0xff]  }
 0x1fb   : > { %12352 = vmatprep.subr.bf16.mxu1 %v13375_v49  ;;  %v13247_v60 = vpop.eup %13246 }
 0x1fc   : > { %11832 = vmatpush3.bf16.msra.mxu0 %v12924_v12  ;;  %v12943_v12 = vld [vmem:[%s16518_s2 + $0xe48] sm:$0xff]  }
 0x1fd   : > { %11833 = vmatprep.subr.bf16.mxu0 %v12926_v20  ;;  %v5054_v54 = vld [vmem:[#allocation2 + $0x1a0] sm:$0xff]  ;;  %v12944_v20 = vld [vmem:[%s16518_s2 + $0xd88] sm:$0xff]  }
 0x1fe   : > { %12353 = vmatpush3.bf16.msra.mxu1 %v12928_v24  ;;  %5788 = vmatprep.mubr.bf16.mxu0 %v5054_v54  ;;  %v362_v24 = vld [vmem:[#allocation2 + $0x1b8] sm:$0x3] }
 0x1ff   : > { %12354 = vmatprep.subr.bf16.mxu1 %v13375_v49  ;;  %v11581_v48 = vpop.f32.mrb[28].mxu1 }
 0x200   : > { %11834 = vmatpush3.bf16.msra.mxu0 %v12927_v9  ;;  %v11582_v57 = vpop.f32.mrb[29].mxu1  ;;  %v12950_v9 = vld [vmem:[%s16518_s2 + $0xdd8] sm:$0xff]  }
 0x201   : > { %11835 = vmatprep.subr.bf16.mxu0 %v12929_v2  ;;  %v15239_v61 = vadd.f32 %v11582_v57, %v11581_v48  ;;  %v11584_v0 = vpop.f32.mrb[30].mxu1  ;;  %v15300_v2 = vld [vmem:[%s13569_s30 + $0x30] sm:$0xff]   ;;  %v12954_v48 = vld [vmem:[%s16518_s2 + $0xde0] sm:$0xff]  }
 0x202   : > { %v3383_v3 = vpop.f32.mrb[28].mxu0  ;;  %12355 = vmatpush3.bf16.msra.mxu1 %v12931_v32  ;;  %v15311_v32 = vshll.u32 %v15300_v2, 16 }
 0x203   : > { %v3384_v37 = vadd.f32 %v3383_v3, %v15133_v22  ;;  %v12302_v42 = vpop.f32.mrb[29].mxu0  ;;  %v12935_v22 = vld [vmem:[%s16518_s2 + $0xd38] sm:$0xff]   ;;  %12356 = vmatprep.subr.bf16.mxu1 %v13375_v49  ;;  %v558_v3 = vld [vmem:[#allocation2 + $0x1c8] sm:$0x1] }
 0x204   : > { %v3386_v43 = vpop.f32.mrb[30].mxu0  ;;  %11836 = vmatpush3.bf16.msra.mxu0 %v12930_v25  ;;  %v12951_v25 = vld [vmem:[%s16518_s2 + $0xe58] sm:$0xff]   ;;  %v317_v42 = vrot.slane %v15300_v2, 6  ;;  %v428_v54 = vrot.slane %v15311_v32, 7 }
 0x205   : > { %v3406_v47 = vmul.f32 %v3405_v4, %v3384_v37  ;;  %v3387_v56 = vadd.f32 %v3386_v43, %v15142_v58  ;;  %v12303_v28 = vpop.f32.mrb[31].mxu0  ;;  %11837 = vmatprep.subr.bf16.mxu0 %v12932_v29  ;;  %v11585_v58 = vpop.f32.mrb[31].mxu1  ;;  %v363_v29 = vsel %vm13580_vm3, 0, %v362_v24  ;;  %v559_v37 = vsel %vm13600_vm7, 0, %v558_v3 }
 0x206   : > { %v15248_v46 = vadd.f32 %v11585_v58, %v11584_v0  ;;  %12357 = vmatpush3.bf16.msra.mxu1 %v12934_v40  ;;  %364 = vst [vmem:[#allocation2 + $0x1b8] sm:$0x3] %v363_v29  ;;  %560 = vst [vmem:[#allocation2 + $0x1c8] sm:$0x1] %v559_v37  ;;  %v513_v43 = vrot.slane %v15300_v2, 7  ;;  %v12955_v28 = vld [vmem:[%s16518_s2 + $0xe60] sm:$0xff]  }
 0x207   : > { %v3408_v33 = vmul.f32 %v13243_v11, %v3406_v47  ;;  %v3407_v36 = vmul.f32 %v3405_v4, %v3387_v56  ;;  %12358 = vmatprep.subr.bf16.mxu1 %v13375_v49  ;;  %v15308_v4 = vshrl.u32 %v15300_v2, 16  ;;  %v12952_v11 = vld [vmem:[%s16518_s2 + $0xd98] sm:$0xff]   ;;  %337 = vst [vmem:[#allocation2 + $0x1b0] sm:$0xfc] %v317_v42  ;;  %v12958_v0 = vld [vmem:[%s16518_s2 + $0xde8] sm:$0xff]  }
 0x208   : > { %11838 = vmatpush3.bf16.msra.mxu0 %v12933_v53  ;;  %533 = vst [vmem:[#allocation2 + $0x1c0] sm:$0xfe] %v513_v43  ;;  %v12953_v47 = vld [vmem:[%s16518_s2 + $0xe18] sm:$0xff]  }
 0x209   : > { %v3410_v1 = vmul.f32 %v13245_v13, %v3408_v33  ;;  %v3409_v5 = vmul.f32 %v13247_v60, %v3407_v36  ;;  %11839 = vmatprep.subr.bf16.mxu0 %v12935_v22  ;;  %v425_v53 = vrot.slane %v15308_v4, 6  ;;  %v12956_v22 = vld [vmem:[%s16518_s2 + $0xda0] sm:$0xff]   ;;  %v4218_v60 = vmul.f32 %v15193_v16, %v14532_v10 }
 0x20a   : > { %12359 = vmatpush3.bf16.msra.mxu1 %v12937_v18  ;;  %v754_v33 = vrot.slane %v15300_v2, 1  ;;  %v12957_v36 = vld [vmem:[%s16518_s2 + $0xe20] sm:$0xff]   ;;  %v900_v18 = vrot.slane %v15300_v2, 2 }
 0x20b   : > { %v15260_v7 = vadd.f32 %v3410_v1, %v14926_v26  ;;  %v3411_v8 = vmul.f32 %v13245_v13, %v3409_v5  ;;  %v12942_v26 = vld [vmem:[%s16518_s2 + $0xdc8] sm:$0xff]   ;;  %11878 = vmatprep.subr.bf16.mxu1 %v12939_v31  ;;  %v582_v13 = vrot.slane %v15308_v4, 7  ;;  %v429_v56 = vor.u32 %v428_v54, %v425_v53  ;;  %v12971_v54 = vld [vmem:[%s16518_s2 + $0xec0] sm:$0xff]  }
 0x20c   : > { %11840 = vmatpush3.bf16.msra.mxu0 %v12936_v62  ;;  %v12959_v1 = vld [vmem:[%s16518_s2 + $0xe68] sm:$0xff]   ;;  %774 = vst [vmem:[#allocation2 + $0x1e0] sm:$0x7f] %v754_v33  ;;  %v15359_v31 = vmul.f32 1.442695, %v4218_v60 }
 0x20d   : > { %v15270_v15 = vadd.f32 %v3411_v8, %v14934_v51  ;;  %11856 = vmatprep.subr.bf16.mxu0 %v12938_v52  ;;  %v12945_v51 = vld [vmem:[%s16518_s2 + $0xe08] sm:$0xff]   ;;  %12361 = vmatmul.mubr.bf16.vlgmr.msra.gmra.mrb[56].mxu1 %v5055_v38  ;;  %v583_v57 = vor.u32 %v582_v13, %v15311_v32  ;;  %v485_v40 = vld [vmem:[#allocation2 + $0x1b8] sm:$0xfe]  ;;  %920 = vst [vmem:[#allocation2 + $0x1f0] sm:$0x3f] %v900_v18  ;;  %v12962_v8 = vld [vmem:[%s16518_s2 + $0xdf0] sm:$0xff]  }
 0x20e   : > { %11879 = vmatpush3.bf16.msra.mxu1 %v12941_v17  ;;  %v486_v58 = vsel %vm13611_vm10, %v429_v56, %v485_v40  ;;  %v621_v62 = vld [vmem:[#allocation2 + $0x1c8] sm:$0xff]  ;;  %v12963_v38 = vld [vmem:[%s16518_s2 + $0xe70] sm:$0xff]   ;;  %v12972_v13 = vld [vmem:[%s16518_s2 + $0xf40] sm:$0xff]   ;;  %v665_v40 = vrot.slane %v15311_v32, 1  ;;  %13250 = vpow2.f32 %v15359_v31 }
 0x20f   : > { %5789 = vmatmul.mubr.bf16.vlgmr.msra.gmra.mrb[56].mxu0 %v5053_v39  ;;  %11880 = vmatprep.subr.bf16.mxu1 %v12943_v12  ;;  %487 = vst [vmem:[#allocation2 + $0x1b8] sm:$0xfe] %v486_v58  ;;  %v622_v5 = vsel %vm13619_vm11, %v583_v57, %v621_v62  ;;  %v12960_v52 = vld [vmem:[%s16518_s2 + $0xda8] sm:$0xff]   ;;  %v12974_v57 = vld [vmem:[%s16518_s2 + $0xf00] sm:$0xff]   ;;  %v12979_v58 = vld [vmem:[%s16518_s2 + $0xed0] sm:$0xff]   ;;  %v807_v62 = vrot.slane %v15311_v32, 2 }
 0x210   : > { %11857 = vmatpush3.bf16.msra.mxu0 %v12940_v6  ;;  %v12961_v39 = vld [vmem:[%s16518_s2 + $0xe28] sm:$0xff]   ;;  %623 = vst [vmem:[#allocation2 + $0x1c8] sm:$0xff] %v622_v5  ;;  %6522 = vmatprep.mubr.bf16.mxu1 %v622_v5  ;;  %v5865_v60 = vld [vmem:[#allocation2 + $0x1c0] sm:$0xff]  ;;  %v12980_v18 = vld [vmem:[%s16518_s2 + $0xf50] sm:$0xff]  }
 0x211   : > { %11858 = vmatprep.subr.bf16.mxu0 %v12942_v26  ;;  %v12964_v26 = vld [vmem:[%s16518_s2 + $0xdb0] sm:$0xff]   ;;  %v12975_v56 = vld [vmem:[%s16518_s2 + $0xec8] sm:$0xff]   ;;  %v12983_v32 = vld [vmem:[%s16518_s2 + $0xed8] sm:$0xff]  }
 0x212   : > { %11881 = vmatpush3.bf16.msra.mxu1 %v12945_v51  ;;  %v12978_v33 = vld [vmem:[%s16518_s2 + $0xf08] sm:$0xff]   ;;  %v12982_v5 = vld [vmem:[%s16518_s2 + $0xf10] sm:$0xff]  }
 0x213   : > { %11882 = vmatprep.subr.bf16.mxu1 %v12947_v59  ;;  %v12966_v59 = vld [vmem:[%s16518_s2 + $0xdf8] sm:$0xff]  }
 0x214   : > { %11859 = vmatpush3.bf16.msra.mxu0 %v12944_v20 }
 0x215   : > { %11860 = vmatprep.subr.bf16.mxu0 %v12946_v19  ;;  %v12965_v19 = vld [vmem:[%s16518_s2 + $0xe30] sm:$0xff]  }
 0x216   : > { %11883 = vmatpush3.bf16.msra.mxu1 %v12949_v23  ;;  %v12967_v23 = vld [vmem:[%s16518_s2 + $0xe78] sm:$0xff]  }
 0x217   : > { %11884 = vmatprep.subr.bf16.mxu1 %v12951_v25  ;;  %v5864_v37 = vld [vmem:[#allocation2 + $0x1b8] sm:$0xff] }
 0x218   : > { %11861 = vmatpush3.bf16.msra.mxu0 %v12948_v14  ;;  %6481 = vmatprep.mubr.bf16.mxu0 %v5864_v37 }
 0x219   : > { %11862 = vmatprep.subr.bf16.mxu0 %v12950_v9 }
 0x21a   : > { %11885 = vmatpush3.bf16.msra.mxu1 %v12953_v47 }
 0x21b   : > { %11886 = vmatprep.subr.bf16.mxu1 %v12955_v28  ;;  %v5863_v28 = vld [vmem:[#allocation2 + $0x1b0] sm:$0xff] }
 0x21c   : > { %11863 = vmatpush3.bf16.msra.mxu0 %v12952_v11  ;;  %v12968_v11 = vld [vmem:[%s16518_s2 + $0xdb8] sm:$0xff]  }
 0x21d   : > { %11864 = vmatprep.subr.bf16.mxu0 %v12954_v48 }
 0x21e   : > { %11887 = vmatpush3.bf16.msra.mxu1 %v12957_v36  ;;  %v806_v36 = vrot.slane %v15308_v4, 1 }
 0x21f   : > { %11888 = vmatprep.subr.bf16.mxu1 %v12959_v1  ;;  %v11625_v51 = vpop.f32.mrb[32].mxu1  ;;  %v12981_v1 = vld [vmem:[%s16518_s2 + $0xe90] sm:$0xff]  }
 0x220   : > { %11865 = vmatpush3.bf16.msra.mxu0 %v12956_v22  ;;  %v11626_v9 = vpop.f32.mrb[33].mxu1  ;;  %v12976_v22 = vld [vmem:[%s16518_s2 + $0xf48] sm:$0xff]  }
 0x221   : > { %11866 = vmatprep.subr.bf16.mxu0 %v12958_v0  ;;  %v11627_v29 = vadd.f32 %v11626_v9, %v11625_v51  ;;  %v11628_v3 = vpop.f32.mrb[34].mxu1  ;;  %v12977_v0 = vld [vmem:[%s16518_s2 + $0xe88] sm:$0xff]  }
 0x222   : > { %v11603_v6 = vpop.f32.mrb[32].mxu0  ;;  %11889 = vmatpush3.bf16.msra.mxu1 %v12961_v39  ;;  %v11629_v42 = vpop.f32.mrb[35].mxu1  ;;  %v666_v39 = vor.u32 %v665_v40, %v15308_v4  ;;  %v849_v4 = vld [vmem:[#allocation2 + $0x1e8] sm:$0x7f]  ;;  %v13000_v40 = vld [vmem:[%s16518_s2 + $0xf78] sm:$0xff]  }
 0x223   : > { %v11604_v17 = vpop.f32.mrb[33].mxu0  ;;  %11890 = vmatprep.subr.bf16.mxu1 %v12963_v38  ;;  %v11630_v53 = vadd.f32 %v11629_v42, %v11628_v3  ;;  %v12985_v38 = vld [vmem:[%s16518_s2 + $0xe98] sm:$0xff]   ;;  %v12991_v9 = vld [vmem:[%s16518_s2 + $0xee8] sm:$0xff]  }
 0x224   : > { %v11605_v12 = vadd.f32 %v11604_v17, %v11603_v6  ;;  %v11606_v20 = vpop.f32.mrb[34].mxu0  ;;  %11867 = vmatpush3.bf16.msra.mxu0 %v12960_v52  ;;  %v4213_v52 = vmul.f32 %v15193_v16, %v14549_v30  ;;  %v12984_v6 = vld [vmem:[%s16518_s2 + $0xf58] sm:$0xff]  }
 0x225   : > { %v11607_v14 = vpop.f32.mrb[35].mxu0  ;;  %11868 = vmatprep.subr.bf16.mxu0 %v12962_v8  ;;  %v808_v8 = vor.u32 %v807_v62, %v806_v36  ;;  %v12986_v16 = vld [vmem:[%s16518_s2 + $0xf18] sm:$0xff]  }
 0x226   : > { %v4077_v24 = vadd.f32 %v11605_v12, %v15239_v61  ;;  %v11608_v25 = vadd.f32 %v11607_v14, %v11606_v20  ;;  %v12969_v61 = vld [vmem:[%s16518_s2 + $0xe38] sm:$0xff]   ;;  %11891 = vmatpush3.bf16.msra.mxu1 %v12965_v19  ;;  %v4216_v17 = vmul.f32 1.442695, %v4213_v52  ;;  %v12987_v12 = vld [vmem:[%s16518_s2 + $0xee0] sm:$0xff]  }
 0x227   : > { %11892 = vmatprep.subr.bf16.mxu1 %v12967_v23  ;;  %v850_v51 = vsel %vm13718_vm1, %v808_v8, %v849_v4  ;;  %v12988_v19 = vld [vmem:[%s16518_s2 + $0xf60] sm:$0xff]   ;;  %v12992_v23 = vld [vmem:[%s16518_s2 + $0xf68] sm:$0xff]  }
 0x228   : > { %v4080_v43 = vadd.f32 %v11608_v25, %v15248_v46  ;;  %v15384_v48 = vadd.f32 %v11627_v29, %v4077_v24  ;;  %11869 = vmatpush3.bf16.msra.mxu0 %v12964_v26  ;;  %v12973_v46 = vld [vmem:[%s16518_s2 + $0xe80] sm:$0xff]   ;;  %v703_v26 = vld [vmem:[#allocation2 + $0x1d8] sm:$0xff]  ;;  %851 = vst [vmem:[#allocation2 + $0x1e8] sm:$0x7f] %v850_v51  ;;  %v12993_v24 = vld [vmem:[%s16518_s2 + $0xea8] sm:$0xff]   ;;  %13252 = vpow2.f32 %v4216_v17 }
 0x229   : > { %11870 = vmatprep.subr.bf16.mxu0 %v12966_v59  ;;  %v704_v20 = vsel %vm13705_vm15, %v666_v39, %v703_v26  ;;  %v12989_v59 = vld [vmem:[%s16518_s2 + $0xea0] sm:$0xff]   ;;  %v12994_v25 = vld [vmem:[%s16518_s2 + $0xf28] sm:$0xff]   ;;  %v12995_v29 = vld [vmem:[%s16518_s2 + $0xef0] sm:$0xff]  }
 0x22a   : > { %v15395_v47 = vadd.f32 %v11630_v53, %v4080_v43  ;;  %11893 = vmatpush3.bf16.msra.mxu1 %v12969_v61  ;;  %705 = vst [vmem:[#allocation2 + $0x1d8] sm:$0xff] %v704_v20  ;;  %v12990_v14 = vld [vmem:[%s16518_s2 + $0xf20] sm:$0xff]   ;;  %v12997_v53 = vld [vmem:[%s16518_s2 + $0xeb0] sm:$0xff]   ;;  %v13006_v51 = vld [vmem:[%s16518_s2 + $0x1008] sm:$0xff]  }
 0x22b   : > { %11922 = vmatprep.subr.bf16.mxu1 %v12972_v13  ;;  %v13004_v17 = vld [vmem:[%s16518_s2 + $0xf80] sm:$0xff]  }
 0x22c   : > { %11871 = vmatpush3.bf16.msra.mxu0 %v12968_v11  ;;  %v5869_v26 = vld [vmem:[#allocation2 + $0x1e0] sm:$0xff] }
 0x22d   : > { %11900 = vmatprep.subr.bf16.mxu0 %v12971_v54  ;;  %6523 = vmatmul.mubr.bf16.vlgmr.msra.gmra.mrb[60].mxu1 %v5865_v60  ;;  %v13005_v20 = vld [vmem:[%s16518_s2 + $0xfc0] sm:$0xff]  }
 0x22e   : > { %11923 = vmatpush3.bf16.msra.mxu1 %v12974_v57  ;;  %v12999_v57 = vld [vmem:[%s16518_s2 + $0xef8] sm:$0xff]  }
 0x22f   : > { %6482 = vmatmul.mubr.bf16.vlgmr.msra.gmra.mrb[60].mxu0 %v5863_v28  ;;  %11924 = vmatprep.subr.bf16.mxu1 %v12976_v22  ;;  %v882_v37 = vld [vmem:[#allocation2 + $0x1e8] sm:$0xc0]  ;;  %v12998_v28 = vld [vmem:[%s16518_s2 + $0xf30] sm:$0xff]  }
 0x230   : > { %11901 = vmatpush3.bf16.msra.mxu0 %v12973_v46  ;;  %v883_v31 = vsel %vm13744_vm8, 0, %v882_v37 }
 0x231   : > { %11902 = vmatprep.subr.bf16.mxu0 %v12975_v56  ;;  %v736_v3 = vld [vmem:[#allocation2 + $0x1d8] sm:$0x80]  ;;  %884 = vst [vmem:[#allocation2 + $0x1e8] sm:$0xc0] %v883_v31 }
 0x232   : > { %11925 = vmatpush3.bf16.msra.mxu1 %v12978_v33  ;;  %v737_v11 = vsel %vm13737_vm6, 0, %v736_v3  ;;  %v4221_v33 = vstv %s15471_s27  ;;  %s8286_s27 = sadd.s32 10, %s14431_s29 }
 0x233   : > { %11926 = vmatprep.subr.bf16.mxu1 %v12980_v18  ;;  %738 = vst [vmem:[#allocation2 + $0x1d8] sm:$0x80] %v737_v11  ;;  %v13013_v11 = vld [vmem:[%s16518_s2 + $0xf98] sm:$0xff]  }
 0x234   : > { %11903 = vmatpush3.bf16.msra.mxu0 %v12977_v0 }
 0x235   : > { %11904 = vmatprep.subr.bf16.mxu0 %v12979_v58  ;;  %v13001_v58 = vld [vmem:[%s16518_s2 + $0xeb8] sm:$0xff]  }
 0x236   : > { %11927 = vmatpush3.bf16.msra.mxu1 %v12982_v5 }
 0x237   : > { %11928 = vmatprep.subr.bf16.mxu1 %v12984_v6 }
 0x238   : > { %11905 = vmatpush3.bf16.msra.mxu0 %v12981_v1  ;;  %v13249_v1 = vpop.eup %13248  ;;  %v5870_v8 = vld [vmem:[#allocation2 + $0x1e8] sm:$0xff] }
 0x239   : > { %11906 = vmatprep.subr.bf16.mxu0 %v12983_v32  ;;  %v13251_v5 = vpop.eup %13250  ;;  %6604 = vmatprep.mubr.bf16.mxu1 %v5870_v8  ;;  %v13024_v8 = vld [vmem:[%s16518_s2 + $0x1038] sm:$0xff]  }
 0x23a   : > { %11929 = vmatpush3.bf16.msra.mxu1 %v12986_v16  ;;  %v5868_v39 = vld [vmem:[#allocation2 + $0x1d8] sm:$0xff]  ;;  %v13253_v6 = vpop.eup %13252 }
 0x23b   : > { %11930 = vmatprep.subr.bf16.mxu1 %v12988_v19  ;;  %6563 = vmatprep.mubr.bf16.mxu0 %v5868_v39  ;;  %v13023_v39 = vld [vmem:[%s16518_s2 + $0xff0] sm:$0xff]  }
 0x23c   : > { %11907 = vmatpush3.bf16.msra.mxu0 %v12985_v38 }
 0x23d   : > { %11908 = vmatprep.subr.bf16.mxu0 %v12987_v12 }
 0x23e   : > { %11931 = vmatpush3.bf16.msra.mxu1 %v12990_v14  ;;  %v13007_v14 = vld [vmem:[%s16518_s2 + $0xf88] sm:$0xff]  }
 0x23f   : > { %11932 = vmatprep.subr.bf16.mxu1 %v12992_v23  ;;  %v4199_v13 = vpop.f32.mrb[36].mxu1  ;;  %v13010_v23 = vld [vmem:[%s16518_s2 + $0xf90] sm:$0xff]  }
 0x240   : > { %11909 = vmatpush3.bf16.msra.mxu0 %v12989_v59  ;;  %v12322_v56 = vpop.f32.mrb[37].mxu1 }
 0x241   : > { %11910 = vmatprep.subr.bf16.mxu0 %v12991_v9  ;;  %v4202_v0 = vpop.f32.mrb[38].mxu1  ;;  %v13009_v9 = vld [vmem:[%s16518_s2 + $0x1010] sm:$0xff]  }
 0x242   : > { %v11647_v42 = vpop.f32.mrb[36].mxu0  ;;  %11933 = vmatpush3.bf16.msra.mxu1 %v12994_v25  ;;  %v12323_v36 = vpop.f32.mrb[39].mxu1  ;;  %v365_v25 = vld [vmem:[#allocation2 + $0x200] sm:$0x3] }
 0x243   : > { %v11648_v43 = vpop.f32.mrb[37].mxu0  ;;  %11934 = vmatprep.subr.bf16.mxu1 %v12996_v63 }
 0x244   : > { %v11649_v61 = vadd.f32 %v11648_v43, %v11647_v42  ;;  %v11650_v54 = vpop.f32.mrb[38].mxu0  ;;  %11911 = vmatpush3.bf16.msra.mxu0 %v12993_v24  ;;  %v15545_v24 = vld [vmem:[%s13569_s30 + $0x38] sm:$0xff]  }
 0x245   : > { %v11651_v46 = vpop.f32.mrb[39].mxu0  ;;  %11912 = vmatprep.subr.bf16.mxu0 %v12995_v29  ;;  %v366_v29 = vsel %vm13580_vm3, 0, %v365_v25  ;;  %v15554_v3 = vshrl.u32 %v15545_v24, 16  ;;  %v15557_v37 = vshll.u32 %v15545_v24, 16  ;;  %v13012_v42 = vld [vmem:[%s16518_s2 + $0x1018] sm:$0xff]   ;;  %v318_v63 = vrot.slane %v15545_v24, 6 }
 0x246   : > { %v11652_v22 = vadd.f32 %v11651_v46, %v11650_v54  ;;  %v4159_v60 = vadd.f32 %v11649_v61, %v15384_v48  ;;  %v13002_v48 = vld [vmem:[%s16518_s2 + $0xf38] sm:$0xff]   ;;  %11935 = vmatpush3.bf16.msra.mxu1 %v12998_v28  ;;  %367 = vst [vmem:[#allocation2 + $0x200] sm:$0x3] %v366_v29  ;;  %v13015_v54 = vld [vmem:[%s16518_s2 + $0x1020] sm:$0xff]   ;;  %v13032_v25 = vld [vmem:[%s16518_s2 + $0x1088] sm:$0xff]  }
 0x247   : > { %11936 = vmatprep.subr.bf16.mxu1 %v13000_v40  ;;  %v433_v31 = vrot.slane %v15554_v3, 6  ;;  %v436_v43 = vrot.slane %v15557_v37, 7  ;;  %338 = vst [vmem:[#allocation2 + $0x1f8] sm:$0xfc] %v318_v63  ;;  %v13016_v46 = vld [vmem:[%s16518_s2 + $0xfa0] sm:$0xff]   ;;  %v901_v40 = vrot.slane %v15545_v24, 2 }
 0x248   : > { %v4200_v62 = vadd.f32 %v4199_v13, %v4159_v60  ;;  %v4162_v18 = vadd.f32 %v11652_v22, %v15395_v47  ;;  %11913 = vmatpush3.bf16.msra.mxu0 %v12997_v53  ;;  %v13003_v47 = vld [vmem:[%s16518_s2 + $0x1000] sm:$0xff]   ;;  %v13014_v53 = vld [vmem:[%s16518_s2 + $0xfd8] sm:$0xff]   ;;  %v514_v13 = vrot.slane %v15545_v24, 7  ;;  %v13018_v22 = vld [vmem:[%s16518_s2 + $0x1028] sm:$0xff]   ;;  %v755_v60 = vrot.slane %v15545_v24, 1 }
 0x249   : > { %11914 = vmatprep.subr.bf16.mxu0 %v12999_v57  ;;  %v437_v61 = vor.u32 %v436_v43, %v433_v31  ;;  %v13017_v28 = vld [vmem:[%s16518_s2 + $0xfe0] sm:$0xff]   ;;  %921 = vst [vmem:[#allocation2 + $0x238] sm:$0x3f] %v901_v40  ;;  %v13035_v63 = vld [vmem:[%s16518_s2 + $0x10c8] sm:$0xff]   ;;  %v13036_v31 = vld [vmem:[%s16518_s2 + $0x1090] sm:$0xff]  }
 0x24a   : > { %v4222_v52 = vmul.f32 %v4221_v33, %v4200_v62  ;;  %v4203_v32 = vadd.f32 %v4202_v0, %v4162_v18  ;;  %11937 = vmatpush3.bf16.msra.mxu1 %v13002_v48  ;;  %534 = vst [vmem:[#allocation2 + $0x208] sm:$0xfe] %v514_v13  ;;  %v13019_v0 = vld [vmem:[%s16518_s2 + $0xfa8] sm:$0xff]   ;;  %775 = vst [vmem:[#allocation2 + $0x228] sm:$0x7f] %v755_v60  ;;  %v13022_v18 = vld [vmem:[%s16518_s2 + $0xfb0] sm:$0xff]  }
 0x24b   : > { %11953 = vmatprep.subr.bf16.mxu1 %v13003_v47  ;;  %v13037_v43 = vld [vmem:[%s16518_s2 + $0x1110] sm:$0xff]   ;;  %v13040_v13 = vld [vmem:[%s16518_s2 + $0x1098] sm:$0xff]  }
 0x24c   : > { %v4224_v38 = vmul.f32 %v13249_v1, %v4222_v52  ;;  %v4223_v16 = vmul.f32 %v4221_v33, %v4203_v32  ;;  %11915 = vmatpush3.bf16.msra.mxu0 %v13001_v58  ;;  %v13020_v33 = vld [vmem:[%s16518_s2 + $0xfe8] sm:$0xff]   ;;  %v13021_v58 = vld [vmem:[%s16518_s2 + $0x1030] sm:$0xff]   ;;  %v13043_v60 = vld [vmem:[%s16518_s2 + $0x10d8] sm:$0xff]  }
 0x24d   : > { %12364 = vmatprep.subr.bf16.mxu0 %v13375_v49  ;;  %6605 = vmatmul.mubr.bf16.vlgmr.msra.gmra.mrb[64].mxu1 %v5869_v26  ;;  %v488_v56 = vld [vmem:[#allocation2 + $0x200] sm:$0xfe]  ;;  %v13025_v26 = vld [vmem:[%s16518_s2 + $0xfb8] sm:$0xff]  }
 0x24e   : > { %v4226_v4 = vmul.f32 %v13251_v5, %v4224_v38  ;;  %v4225_v12 = vmul.f32 %v13253_v6, %v4223_v16  ;;  %11954 = vmatpush3.bf16.msra.mxu1 %v13005_v20  ;;  %v489_v57 = vsel %vm13611_vm10, %v437_v61, %v488_v56  ;;  %v13026_v20 = vld [vmem:[%s16518_s2 + $0xff8] sm:$0xff]   ;;  %v13039_v61 = vld [vmem:[%s16518_s2 + $0x10d0] sm:$0xff]  }
 0x24f   : > { %6564 = vmatmul.mubr.bf16.vlgmr.msra.gmra.mrb[64].mxu0 %v15300_v2  ;;  %11955 = vmatprep.subr.bf16.mxu1 %v13006_v51  ;;  %490 = vst [vmem:[#allocation2 + $0x200] sm:$0xfe] %v489_v57  ;;  %v13028_v51 = vld [vmem:[%s16518_s2 + $0x1080] sm:$0xff]   ;;  %v6679_v29 = vld [vmem:[#allocation2 + $0x1f8] sm:$0xff]  ;;  %v561_v56 = vld [vmem:[#allocation2 + $0x210] sm:$0x1] }
 0x250   : > { %v15524_v19 = vadd.f32 %v4226_v4, %v15260_v7  ;;  %v4227_v59 = vmul.f32 %v13251_v5, %v4225_v12  ;;  %12365 = vmatpush3.bf16.msra.mxu0 %v13004_v17  ;;  %12380 = vmatprep.mubr.msk.bf16.mxu0 %vm13376_vm9, %v13375_v49  ;;  %v13008_v7 = vld [vmem:[%s16518_s2 + $0xfc8] sm:$0xff]   ;;  %v562_v57 = vsel %vm13600_vm7, 0, %v561_v56 }
 0x251   : > { %12366 = vmatprep.subr.bf16.mxu0 %v13375_v49  ;;  %563 = vst [vmem:[#allocation2 + $0x210] sm:$0x1] %v562_v57  ;;  %v6681_v57 = vld [vmem:[#allocation2 + $0x208] sm:$0xff] }
 0x252   : > { %v15533_v2 = vadd.f32 %v4227_v59, %v15270_v15  ;;  %v13011_v15 = vld [vmem:[%s16518_s2 + $0xfd0] sm:$0xff]   ;;  %11956 = vmatpush3.bf16.msra.mxu1 %v13008_v7  ;;  %v13029_v7 = vld [vmem:[%s16518_s2 + $0x1100] sm:$0xff]  }
 0x253   : > { %11957 = vmatprep.subr.bf16.mxu1 %v13009_v9  ;;  %v13030_v9 = vld [vmem:[%s16518_s2 + $0x1040] sm:$0xff]  }
 0x254   : > { %12367 = vmatpush3.bf16.msra.mxu0 %v13007_v14  ;;  %v5871_v14 = vld [vmem:[#allocation2 + $0x1f0] sm:$0xff] }
 0x255   : > { %12368 = vmatprep.subr.bf16.mxu0 %v13375_v49 }
 0x256   : > { %11958 = vmatpush3.bf16.msra.mxu1 %v13011_v15  ;;  %v6680_v16 = vld [vmem:[#allocation2 + $0x200] sm:$0xff]  ;;  %v13033_v15 = vld [vmem:[%s16518_s2 + $0x1108] sm:$0xff]  }
 0x257   : > { %11959 = vmatprep.subr.bf16.mxu1 %v13012_v42  ;;  %7297 = vmatprep.mubr.bf16.mxu1 %v6680_v16  ;;  %v13034_v42 = vld [vmem:[%s16518_s2 + $0x1048] sm:$0xff]  }
 0x258   : > { %12369 = vmatpush3.bf16.msra.mxu0 %v13010_v23  ;;  %v13031_v23 = vld [vmem:[%s16518_s2 + $0x10c0] sm:$0xff]  }
 0x259   : > { %12370 = vmatprep.subr.bf16.mxu0 %v13375_v49 }
 0x25a   : > { %11960 = vmatpush3.bf16.msra.mxu1 %v13014_v53  ;;  %v13038_v53 = vld [vmem:[%s16518_s2 + $0x1050] sm:$0xff]  }
 0x25b   : > { %11961 = vmatprep.subr.bf16.mxu1 %v13015_v54 }
 0x25c   : > { %12371 = vmatpush3.bf16.msra.mxu0 %v13013_v11  ;;  %v667_v11 = vrot.slane %v15557_v37, 1 }
 0x25d   : > { %12372 = vmatprep.subr.bf16.mxu0 %v13375_v49 }
 0x25e   : > { %11962 = vmatpush3.bf16.msra.mxu1 %v13017_v28  ;;  %v668_v54 = vor.u32 %v667_v11, %v15554_v3  ;;  %v13042_v28 = vld [vmem:[%s16518_s2 + $0x1058] sm:$0xff]  }
 0x25f   : > { %11963 = vmatprep.subr.bf16.mxu1 %v13018_v22  ;;  %v11700_v1 = vpop.f32.mrb[40].mxu1  ;;  %v706_v22 = vld [vmem:[#allocation2 + $0x220] sm:$0xff]  ;;  %v13057_v11 = vld [vmem:[%s16518_s2 + $0x1138] sm:$0xff]  }
 0x260   : > { %12373 = vmatpush3.bf16.msra.mxu0 %v13016_v46  ;;  %v11701_v52 = vpop.f32.mrb[41].mxu1  ;;  %v13041_v46 = vld [vmem:[%s16518_s2 + $0x1118] sm:$0xff]   ;;  %v707_v40 = vsel %vm13705_vm15, %v668_v54, %v706_v22 }
 0x261   : > { %12374 = vmatprep.subr.bf16.mxu0 %v13375_v49  ;;  %v11702_v6 = vadd.f32 %v11701_v52, %v11700_v1  ;;  %v11703_v47 = vpop.f32.mrb[42].mxu1  ;;  %708 = vst [vmem:[#allocation2 + $0x220] sm:$0xff] %v707_v40  ;;  %v13048_v1 = vld [vmem:[%s16518_s2 + $0x10a8] sm:$0xff]   ;;  %v624_v52 = vld [vmem:[#allocation2 + $0x210] sm:$0xff] }
 0x262   : > { %v11678_v36 = vpop.f32.mrb[40].mxu0  ;;  %11964 = vmatpush3.bf16.msra.mxu1 %v13020_v33  ;;  %v11704_v17 = vpop.f32.mrb[43].mxu1  ;;  %v13044_v33 = vld [vmem:[%s16518_s2 + $0x10a0] sm:$0xff]  }
 0x263   : > { %v11679_v62 = vpop.f32.mrb[41].mxu0  ;;  %11965 = vmatprep.subr.bf16.mxu1 %v13021_v58  ;;  %v11705_v12 = vadd.f32 %v11704_v17, %v11703_v47  ;;  %v13046_v58 = vld [vmem:[%s16518_s2 + $0x1060] sm:$0xff]   ;;  %v13053_v17 = vld [vmem:[%s16518_s2 + $0x1130] sm:$0xff]  }
 0x264   : > { %v11680_v48 = vadd.f32 %v11679_v62, %v11678_v36  ;;  %v11681_v5 = vpop.f32.mrb[42].mxu0  ;;  %12375 = vmatpush3.bf16.msra.mxu0 %v13019_v0  ;;  %v584_v0 = vrot.slane %v15554_v3, 7  ;;  %v13045_v36 = vld [vmem:[%s16518_s2 + $0x1120] sm:$0xff]  }
 0x265   : > { %v11682_v32 = vpop.f32.mrb[43].mxu0  ;;  %12376 = vmatprep.subr.bf16.mxu0 %v13375_v49  ;;  %v13047_v62 = vld [vmem:[%s16518_s2 + $0x10e0] sm:$0xff]  }
 0x266   : > { %v11683_v38 = vadd.f32 %v11682_v32, %v11681_v5  ;;  %v15613_v4 = vadd.f32 %v11702_v6, %v11680_v48  ;;  %11966 = vmatpush3.bf16.msra.mxu1 %v13023_v39  ;;  %v13049_v48 = vld [vmem:[%s16518_s2 + $0x1128] sm:$0xff]  }
 0x267   : > { %11967 = vmatprep.subr.bf16.mxu1 %v13024_v8  ;;  %v13050_v5 = vld [vmem:[%s16518_s2 + $0x1068] sm:$0xff]   ;;  %v13052_v8 = vld [vmem:[%s16518_s2 + $0x10b0] sm:$0xff]  }
 0x268   : > { %12377 = vmatpush3.bf16.msra.mxu0 %v13022_v18  ;;  %v15622_v59 = vadd.f32 %v11705_v12, %v11683_v38  ;;  %v585_v18 = vor.u32 %v584_v0, %v15557_v37  ;;  %v739_v39 = vld [vmem:[#allocation2 + $0x220] sm:$0x80]  ;;  %v13051_v38 = vld [vmem:[%s16518_s2 + $0x10e8] sm:$0xff]  }
 0x269   : > { %12378 = vmatprep.subr.bf16.mxu0 %v13375_v49  ;;  %v740_v6 = vsel %vm13737_vm6, 0, %v739_v39  ;;  %v13062_v0 = vld [vmem:[%s16518_s2 + $0x11c0] sm:$0xff]   ;;  %v13068_v39 = vld [vmem:[%s16518_s2 + $0x11d0] sm:$0xff]  }
 0x26a   : > { %11968 = vmatpush3.bf16.msra.mxu1 %v13026_v20  ;;  %v625_v32 = vsel %vm13619_vm11, %v585_v18, %v624_v52  ;;  %741 = vst [vmem:[#allocation2 + $0x220] sm:$0x80] %v740_v6  ;;  %v852_v18 = vld [vmem:[#allocation2 + $0x230] sm:$0x7f]  ;;  %v13071_v6 = vld [vmem:[%s16518_s2 + $0x11d8] sm:$0xff]  }
 0x26b   : > { %11997 = vmatprep.subr.bf16.mxu1 %v13029_v7  ;;  %626 = vst [vmem:[#allocation2 + $0x210] sm:$0xff] %v625_v32  ;;  %v13067_v52 = vld [vmem:[%s16518_s2 + $0x1150] sm:$0xff]  }
 0x26c   : > { %12379 = vmatpush3.bf16.msra.mxu0 %v13025_v26 }
 0x26d   : > { %11975 = vmatprep.subr.bf16.mxu0 %v13028_v51  ;;  %7298 = vmatmul.mubr.bf16.vlgmr.msra.gmra.mrb[68].mxu1 %v6679_v29  ;;  %v13054_v51 = vld [vmem:[%s16518_s2 + $0x1070] sm:$0xff]  }
 0x26e   : > { %11998 = vmatpush3.bf16.msra.mxu1 %v13031_v23 }
 0x26f   : > { %12381 = vmatmul.mubr.bf16.vlgmr.msra.gmra.mrb[68].mxu0 %v5871_v14  ;;  %11999 = vmatprep.subr.bf16.mxu1 %v13033_v15  ;;  %v13056_v14 = vld [vmem:[%s16518_s2 + $0x10b8] sm:$0xff]  }
 0x270   : > { %11976 = vmatpush3.bf16.msra.mxu0 %v13030_v9  ;;  %7338 = vmatprep.mubr.bf16.mxu0 %v625_v32  ;;  %v13069_v32 = vld [vmem:[%s16518_s2 + $0x1198] sm:$0xff]  }
 0x271   : > { %11977 = vmatprep.subr.bf16.mxu0 %v13032_v25  ;;  %v6684_v54 = vld [vmem:[#allocation2 + $0x220] sm:$0xff] }
 0x272   : > { %12000 = vmatpush3.bf16.msra.mxu1 %v13035_v63  ;;  %7379 = vmatprep.mubr.bf16.mxu1 %v6684_v54 }
 0x273   : > { %12001 = vmatprep.subr.bf16.mxu1 %v13037_v43 }
 0x274   : > { %11978 = vmatpush3.bf16.msra.mxu0 %v13034_v42  ;;  %v13055_v42 = vld [vmem:[%s16518_s2 + $0x10f0] sm:$0xff]  }
 0x275   : > { %11979 = vmatprep.subr.bf16.mxu0 %v13036_v31 }
 0x276   : > { %12002 = vmatpush3.bf16.msra.mxu1 %v13039_v61  ;;  %v5027_v61 = vstv %s5026_s20 }
 0x277   : > { %12003 = vmatprep.subr.bf16.mxu1 %v13041_v46  ;;  %v809_v46 = vrot.slane %v15554_v3, 1  ;;  %v5028_v22 = vmul.f32 %v5027_v61, %v14527_v21  ;;  %v13063_v3 = vld [vmem:[%s16518_s2 + $0x1188] sm:$0xff]  }
 0x278   : > { %11980 = vmatpush3.bf16.msra.mxu0 %v13038_v53 }
 0x279   : > { %11981 = vmatprep.subr.bf16.mxu0 %v13040_v13  ;;  %v13060_v13 = vld [vmem:[%s16518_s2 + $0x1180] sm:$0xff]   ;;  %v5030_v40 = vmul.f32 1.442695, %v5028_v22 }
 0x27a   : > { %12004 = vmatpush3.bf16.msra.mxu1 %v13043_v60  ;;  %v13061_v60 = vld [vmem:[%s16518_s2 + $0x1140] sm:$0xff]  }
 0x27b   : > { %12005 = vmatprep.subr.bf16.mxu1 %v13045_v36  ;;  %v5029_v36 = vmul.f32 %v5027_v61, %v14549_v30  ;;  %13254 = vpow2.f32 %v5030_v40 }
 0x27c   : > { %11982 = vmatpush3.bf16.msra.mxu0 %v13042_v28  ;;  %v810_v28 = vrot.slane %v15557_v37, 2 }
 0x27d   : > { %11983 = vmatprep.subr.bf16.mxu0 %v13044_v33  ;;  %v5034_v33 = vmul.f32 %v5027_v61, %v14532_v10 }
 0x27e   : > { %12006 = vmatpush3.bf16.msra.mxu1 %v13047_v62  ;;  %v811_v37 = vor.u32 %v810_v28, %v809_v46  ;;  %v13066_v62 = vld [vmem:[%s16518_s2 + $0x1190] sm:$0xff]  }
 0x27f   : > { %12007 = vmatprep.subr.bf16.mxu1 %v13049_v48  ;;  %v13080_v28 = vld [vmem:[%s16518_s2 + $0x11f0] sm:$0xff]  }
 0x280   : > { %11984 = vmatpush3.bf16.msra.mxu0 %v13046_v58  ;;  %v11744_v20 = vpop.f32.mrb[44].mxu1  ;;  %v13064_v58 = vld [vmem:[%s16518_s2 + $0x1148] sm:$0xff]   ;;  %v853_v48 = vsel %vm13718_vm1, %v811_v37, %v852_v18 }
 0x281   : > { %11985 = vmatprep.subr.bf16.mxu0 %v13048_v1  ;;  %v11745_v9 = vpop.f32.mrb[45].mxu1  ;;  %v13065_v1 = vld [vmem:[%s16518_s2 + $0x11c8] sm:$0xff]   ;;  %854 = vst [vmem:[#allocation2 + $0x230] sm:$0x7f] %v853_v48  ;;  %v6687_v48 = vld [vmem:[#allocation2 + $0x238] sm:$0xff] }
 0x282   : > { %v11722_v47 = vpop.f32.mrb[44].mxu0  ;;  %12008 = vmatpush3.bf16.msra.mxu1 %v13051_v38  ;;  %v11746_v15 = vadd.f32 %v11745_v9, %v11744_v20  ;;  %v11747_v29 = vpop.f32.mrb[46].mxu1  ;;  %v13076_v20 = vld [vmem:[%s16518_s2 + $0x1168] sm:$0xff]  }
 0x283   : > { %v11723_v16 = vpop.f32.mrb[45].mxu0  ;;  %v11748_v63 = vpop.f32.mrb[47].mxu1  ;;  %12009 = vmatprep.subr.bf16.mxu1 %v13053_v17  ;;  %v13073_v17 = vld [vmem:[%s16518_s2 + $0x1160] sm:$0xff]   ;;  %v13077_v9 = vld [vmem:[%s16518_s2 + $0x11e8] sm:$0xff]  }
 0x284   : > { %v11724_v26 = vadd.f32 %v11723_v16, %v11722_v47  ;;  %v11725_v12 = vpop.f32.mrb[46].mxu0  ;;  %11986 = vmatpush3.bf16.msra.mxu0 %v13050_v5  ;;  %v11749_v43 = vadd.f32 %v11748_v63, %v11747_v29  ;;  %v5032_v5 = vmul.f32 1.442695, %v5029_v36  ;;  %v13072_v47 = vld [vmem:[%s16518_s2 + $0x11a0] sm:$0xff]   ;;  %v6685_v36 = vld [vmem:[#allocation2 + $0x228] sm:$0xff] }
 0x285   : > { %v11726_v7 = vpop.f32.mrb[47].mxu0  ;;  %11987 = vmatprep.subr.bf16.mxu0 %v13052_v8  ;;  %v13070_v8 = vld [vmem:[%s16518_s2 + $0x1158] sm:$0xff]   ;;  %v13255_v29 = vpop.eup %13254 }
 0x286   : > { %v4934_v23 = vadd.f32 %v11724_v26, %v15613_v4  ;;  %v11727_v25 = vadd.f32 %v11726_v7, %v11725_v12  ;;  %v13058_v4 = vld [vmem:[%s16518_s2 + $0x1078] sm:$0xff]   ;;  %12010 = vmatpush3.bf16.msra.mxu1 %v13055_v42  ;;  %v13075_v26 = vld [vmem:[%s16518_s2 + $0x11a8] sm:$0xff]   ;;  %v13074_v12 = vld [vmem:[%s16518_s2 + $0x11e0] sm:$0xff]   ;;  %v5037_v7 = vstv %s15794_s13  ;;  %s16065_s13 = sld [smem:[#allocation3 + %s5838_s11]]  ;;  %s9102_s11 = sadd.s32 11, %s14431_s29 }
 0x287   : > { %12011 = vmatprep.subr.bf16.mxu1 %v13057_v11  ;;  %v13079_v11 = vld [vmem:[%s16518_s2 + $0x1170] sm:$0xff]   ;;  %s9103_s5 = sld [smem:[#allocation3 + %s9102_s11]] }
 0x288   : > { %v4937_v31 = vadd.f32 %v11727_v25, %v15622_v59  ;;  %11988 = vmatpush3.bf16.msra.mxu0 %v13054_v51  ;;  %v15732_v53 = vadd.f32 %v11746_v15, %v4934_v23  ;;  %v13059_v59 = vld [vmem:[%s16518_s2 + $0x10f8] sm:$0xff]   ;;  %v885_v38 = vld [vmem:[#allocation2 + $0x230] sm:$0xc0] }
 0x289   : > { %11989 = vmatprep.subr.bf16.mxu0 %v13056_v14  ;;  %v886_v16 = vsel %vm13744_vm8, 0, %v885_v38  ;;  %v13078_v51 = vld [vmem:[%s16518_s2 + $0x11b0] sm:$0xff]   ;;  %v15889_v38 = vld [vmem:[%s13569_s30 + $0x40] sm:$0xff]  }
 0x28a   : > { %v15743_v56 = vadd.f32 %v11749_v43, %v4937_v31  ;;  %12012 = vmatpush3.bf16.msra.mxu1 %v13059_v59  ;;  %887 = vst [vmem:[#allocation2 + $0x230] sm:$0xc0] %v886_v16  ;;  %v13081_v31 = vld [vmem:[%s16518_s2 + $0x11b8] sm:$0xff]   ;;  %v368_v16 = vld [vmem:[#allocation2 + $0x248] sm:$0x3] }
 0x28b   : > { %12384 = vmatprep.subr.bf16.mxu1 %v13375_v49 }
 0x28c   : > { %11990 = vmatpush3.bf16.msra.mxu0 %v13058_v4 }
 0x28d   : > { %12019 = vmatprep.subr.bf16.mxu0 %v13060_v13  ;;  %7380 = vmatmul.mubr.bf16.vlgmr.msra.gmra.mrb[72].mxu1 %v15545_v24  ;;  %v5035_v24 = vmul.f32 1.442695, %v5034_v33  ;;  %v13084_v33 = vld [vmem:[%s16518_s2 + $0x1240] sm:$0xff]  }
 0x28e   : > { %12385 = vmatpush3.bf16.msra.mxu1 %v13062_v0  ;;  %12400 = vmatprep.mubr.msk.bf16.mxu1 %vm13376_vm9, %v13375_v49  ;;  %v13083_v0 = vld [vmem:[%s16518_s2 + $0x11f8] sm:$0xff]  }
 0x28f   : > { %7339 = vmatmul.mubr.bf16.vlgmr.msra.gmra.mrb[72].mxu0 %v6681_v57  ;;  %12386 = vmatprep.subr.bf16.mxu1 %v13375_v49  ;;  %13256 = vpow2.f32 %v5035_v24  ;;  %v13087_v24 = vld [vmem:[%s16518_s2 + $0x1280] sm:$0xff]  }
 0x290   : > { %12020 = vmatpush3.bf16.msra.mxu0 %v13061_v60  ;;  %13258 = vpow2.f32 %v5032_v5 }
 0x291   : > { %12021 = vmatprep.subr.bf16.mxu0 %v13063_v3  ;;  %v6686_v15 = vld [vmem:[#allocation2 + $0x230] sm:$0xff] }
 0x292   : > { %12387 = vmatpush3.bf16.msra.mxu1 %v13065_v1  ;;  %7420 = vmatprep.mubr.bf16.mxu0 %v6686_v15  ;;  %v13086_v1 = vld [vmem:[%s16518_s2 + $0x1200] sm:$0xff]  }
 0x293   : > { %12388 = vmatprep.subr.bf16.mxu1 %v13375_v49 }
 0x294   : > { %12022 = vmatpush3.bf16.msra.mxu0 %v13064_v58  ;;  %v13085_v58 = vld [vmem:[%s16518_s2 + $0x12c0] sm:$0xff]  }
 0x295   : > { %12023 = vmatprep.subr.bf16.mxu0 %v13066_v62 }
 0x296   : > { %12389 = vmatpush3.bf16.msra.mxu1 %v13068_v39  ;;  %v13092_v39 = vld [vmem:[%s16518_s2 + $0x1250] sm:$0xff]  }
 0x297   : > { %12390 = vmatprep.subr.bf16.mxu1 %v13375_v49 }
 0x298   : > { %12024 = vmatpush3.bf16.msra.mxu0 %v13067_v52  ;;  %v13089_v52 = vld [vmem:[%s16518_s2 + $0x12c8] sm:$0xff]  }
 0x299   : > { %12025 = vmatprep.subr.bf16.mxu0 %v13069_v32  ;;  %v13257_v43 = vpop.eup %13256  ;;  %v13090_v32 = vld [vmem:[%s16518_s2 + $0x1208] sm:$0xff]  }
 0x29a   : > { %12391 = vmatpush3.bf16.msra.mxu1 %v13071_v6  ;;  %v13259_v13 = vpop.eup %13258  ;;  %v13094_v6 = vld [vmem:[%s16518_s2 + $0x1210] sm:$0xff]  }
 0x29b   : > { %12392 = vmatprep.subr.bf16.mxu1 %v13375_v49 }
 0x29c   : > { %12026 = vmatpush3.bf16.msra.mxu0 %v13070_v8  ;;  %v13093_v8 = vld [vmem:[%s16518_s2 + $0x12d0] sm:$0xff]  }
 0x29d   : > { %12027 = vmatprep.subr.bf16.mxu0 %v13072_v47  ;;  %v13096_v47 = vld [vmem:[%s16518_s2 + $0x1258] sm:$0xff]  }
 0x29e   : > { %12393 = vmatpush3.bf16.msra.mxu1 %v13074_v12  ;;  %v15895_v12 = vshrl.u32 %v15889_v38, 16 }
 0x29f   : > { %12394 = vmatprep.subr.bf16.mxu1 %v13375_v49 }
 0x2a0   : > { %12028 = vmatpush3.bf16.msra.mxu0 %v13073_v17  ;;  %v11775_v63 = vpop.f32.mrb[48].mxu1  ;;  %v564_v17 = vld [vmem:[#allocation2 + $0x258] sm:$0x1]  ;;  %v441_v15 = vrot.slane %v15895_v12, 6 }
 0x2a1   : > { %12029 = vmatprep.subr.bf16.mxu0 %v13075_v26  ;;  %v11776_v54 = vpop.f32.mrb[49].mxu1  ;;  %v369_v26 = vsel %vm13580_vm3, 0, %v368_v16 }
 0x2a2   : > { %v5015_v14 = vpop.f32.mrb[48].mxu0  ;;  %12395 = vmatpush3.bf16.msra.mxu1 %v13077_v9  ;;  %v15828_v46 = vadd.f32 %v11776_v54, %v11775_v63  ;;  %v11778_v59 = vpop.f32.mrb[50].mxu1  ;;  %370 = vst [vmem:[#allocation2 + $0x248] sm:$0x3] %v369_v26  ;;  %v319_v9 = vrot.slane %v15889_v38, 6  ;;  %v13099_v63 = vld [vmem:[%s16518_s2 + $0x1298] sm:$0xff]  }
 0x2a3   : > { %v5016_v23 = vadd.f32 %v5015_v14, %v15732_v53  ;;  %v12342_v25 = vpop.f32.mrb[49].mxu0  ;;  %12396 = vmatprep.subr.bf16.mxu1 %v13375_v49  ;;  %v11779_v60 = vpop.f32.mrb[51].mxu1  ;;  %v13095_v14 = vld [vmem:[%s16518_s2 + $0x1290] sm:$0xff]  }
 0x2a4   : > { %v5018_v42 = vpop.f32.mrb[50].mxu0  ;;  %12030 = vmatpush3.bf16.msra.mxu0 %v13076_v20  ;;  %v15837_v3 = vadd.f32 %v11779_v60, %v11778_v59  ;;  %v15898_v20 = vshll.u32 %v15889_v38, 16  ;;  %v13098_v25 = vld [vmem:[%s16518_s2 + $0x1218] sm:$0xff]   ;;  %339 = vst [vmem:[#allocation2 + $0x240] sm:$0xfc] %v319_v9  ;;  %v756_v59 = vrot.slane %v15889_v38, 1 }
 0x2a5   : > { %v5038_v4 = vmul.f32 %v5037_v7, %v5016_v23  ;;  %v5019_v53 = vadd.f32 %v5018_v42, %v15743_v56  ;;  %v12343_v61 = vpop.f32.mrb[51].mxu0  ;;  %12031 = vmatprep.subr.bf16.mxu0 %v13078_v51  ;;  %v13082_v56 = vld [vmem:[%s16518_s2 + $0x1178] sm:$0xff]   ;;  %v565_v51 = vsel %vm13600_vm7, 0, %v564_v17  ;;  %v515_v23 = vrot.slane %v15889_v38, 7  ;;  %v13103_v60 = vld [vmem:[%s16518_s2 + $0x12a0] sm:$0xff]  }
 0x2a6   : > { %12397 = vmatpush3.bf16.msra.mxu1 %v13080_v28  ;;  %566 = vst [vmem:[#allocation2 + $0x258] sm:$0x1] %v565_v51  ;;  %v586_v42 = vrot.slane %v15895_v12, 7  ;;  %v13102_v61 = vld [vmem:[%s16518_s2 + $0x1220] sm:$0xff]   ;;  %776 = vst [vmem:[#allocation2 + $0x270] sm:$0x7f] %v756_v59 }
 0x2a7   : > { %v5040_v57 = vmul.f32 %v13255_v29, %v5038_v4  ;;  %v5039_v22 = vmul.f32 %v5037_v7, %v5019_v53  ;;  %12398 = vmatprep.subr.bf16.mxu1 %v13375_v49  ;;  %v13097_v7 = vld [vmem:[%s16518_s2 + $0x12d8] sm:$0xff]   ;;  %v444_v29 = vrot.slane %v15898_v20, 7  ;;  %535 = vst [vmem:[#allocation2 + $0x250] sm:$0xfe] %v515_v23  ;;  %v13124_v59 = vld [vmem:[%s16518_s2 + $0x1388] sm:$0xff]  }
 0x2a8   : > { %12032 = vmatpush3.bf16.msra.mxu0 %v13079_v11  ;;  %v15919_v11 = vstv %s5842_s9  ;;  %v587_v53 = vor.u32 %v586_v42, %v15898_v20  ;;  %v13114_v9 = vld [vmem:[%s16518_s2 + $0x1238] sm:$0xff]  }
 0x2a9   : > { %v5042_v37 = vmul.f32 %v13257_v43, %v5040_v57  ;;  %v5041_v40 = vmul.f32 %v13259_v13, %v5039_v22  ;;  %12033 = vmatprep.subr.bf16.mxu0 %v13081_v31  ;;  %v13100_v31 = vld [vmem:[%s16518_s2 + $0x1260] sm:$0xff]   ;;  %v445_v4 = vor.u32 %v444_v29, %v441_v15  ;;  %v5844_v54 = vmul.f32 %v15919_v11, %v14527_v21  ;;  %v13104_v13 = vld [vmem:[%s16518_s2 + $0x1268] sm:$0xff]  }
 0x2aa   : > { %12399 = vmatpush3.bf16.msra.mxu1 %v13083_v0  ;;  %v491_v28 = vld [vmem:[#allocation2 + $0x248] sm:$0xfe]  ;;  %v902_v22 = vrot.slane %v15889_v38, 2  ;;  %v13117_v29 = vld [vmem:[%s16518_s2 + $0x1340] sm:$0xff]  }
 0x2ab   : > { %v15850_v62 = vadd.f32 %v5042_v37, %v15524_v19  ;;  %v5043_v18 = vmul.f32 %v13257_v43, %v5041_v40  ;;  %v13088_v19 = vld [vmem:[%s16518_s2 + $0x1248] sm:$0xff]   ;;  %12072 = vmatprep.subr.bf16.mxu1 %v13085_v58  ;;  %v13101_v43 = vld [vmem:[%s16518_s2 + $0x12e0] sm:$0xff]   ;;  %v13108_v58 = vld [vmem:[%s16518_s2 + $0x1270] sm:$0xff]  }
 0x2ac   : > { %12034 = vmatpush3.bf16.msra.mxu0 %v13082_v56  ;;  %v492_v56 = vsel %vm13611_vm10, %v445_v4, %v491_v28  ;;  %v13105_v37 = vld [vmem:[%s16518_s2 + $0x12e8] sm:$0xff]   ;;  %922 = vst [vmem:[#allocation2 + $0x280] sm:$0x3f] %v902_v22  ;;  %v812_v28 = vrot.slane %v15895_v12, 1  ;;  %v813_v22 = vrot.slane %v15898_v20, 2 }
 0x2ad   : > { %v15862_v5 = vadd.f32 %v5043_v18, %v15533_v2  ;;  %12050 = vmatprep.subr.bf16.mxu0 %v13084_v33  ;;  %v13091_v2 = vld [vmem:[%s16518_s2 + $0x1288] sm:$0xff]   ;;  %12401 = vmatmul.mubr.bf16.vlgmr.msra.gmra.mrb[76].mxu1 %v6687_v48  ;;  %v627_v57 = vld [vmem:[#allocation2 + $0x258] sm:$0xff]  ;;  %493 = vst [vmem:[#allocation2 + $0x248] sm:$0xfe] %v492_v56  ;;  %v15951_v33 = vmul.f32 1.442695, %v5844_v54  ;;  %v5850_v56 = vmul.f32 %v15919_v11, %v14532_v10 }
 0x2ae   : > { %12073 = vmatpush3.bf16.msra.mxu1 %v13087_v24  ;;  %v628_v0 = vsel %vm13619_vm11, %v587_v53, %v627_v57  ;;  %v13106_v40 = vld [vmem:[%s16518_s2 + $0x1228] sm:$0xff]   ;;  %v13110_v24 = vld [vmem:[%s16518_s2 + $0x1230] sm:$0xff]  }
 0x2af   : > { %7421 = vmatmul.mubr.bf16.vlgmr.msra.gmra.mrb[76].mxu0 %v6685_v36  ;;  %12074 = vmatprep.subr.bf16.mxu1 %v13089_v52  ;;  %629 = vst [vmem:[#allocation2 + $0x258] sm:$0xff] %v628_v0  ;;  %v13107_v36 = vld [vmem:[%s16518_s2 + $0x12a8] sm:$0xff]   ;;  %v7497_v53 = vld [vmem:[#allocation2 + $0x250] sm:$0xff]  ;;  %13260 = vpow2.f32 %v15951_v33 }
 0x2b0   : > { %12051 = vmatpush3.bf16.msra.mxu0 %v13086_v1  ;;  %8154 = vmatprep.mubr.bf16.mxu1 %v628_v0  ;;  %v13109_v1 = vld [vmem:[%s16518_s2 + $0x12f0] sm:$0xff]   ;;  %v13121_v4 = vld [vmem:[%s16518_s2 + $0x1348] sm:$0xff]  }
 0x2b1   : > { %12052 = vmatprep.subr.bf16.mxu0 %v13088_v19  ;;  %v13123_v54 = vld [vmem:[%s16518_s2 + $0x13c8] sm:$0xff]   ;;  %v13125_v57 = vld [vmem:[%s16518_s2 + $0x1350] sm:$0xff]  }
 0x2b2   : > { %12075 = vmatpush3.bf16.msra.mxu1 %v13091_v2  ;;  %v13111_v2 = vld [vmem:[%s16518_s2 + $0x12b0] sm:$0xff]   ;;  %v13140_v33 = vld [vmem:[%s16518_s2 + $0x13a8] sm:$0xff]  }
 0x2b3   : > { %12076 = vmatprep.subr.bf16.mxu1 %v13093_v8  ;;  %v13127_v0 = vld [vmem:[%s16518_s2 + $0x13d0] sm:$0xff]  }
 0x2b4   : > { %12053 = vmatpush3.bf16.msra.mxu0 %v13090_v32 }
 0x2b5   : > { %12054 = vmatprep.subr.bf16.mxu0 %v13092_v39 }
 0x2b6   : > { %12077 = vmatpush3.bf16.msra.mxu1 %v13095_v14  ;;  %v7496_v14 = vld [vmem:[#allocation2 + $0x248] sm:$0xff] }
 0x2b7   : > { %12078 = vmatprep.subr.bf16.mxu1 %v13097_v7  ;;  %8113 = vmatprep.mubr.bf16.mxu0 %v7496_v14 }
 0x2b8   : > { %12055 = vmatpush3.bf16.msra.mxu0 %v13094_v6  ;;  %v13112_v6 = vld [vmem:[%s16518_s2 + $0x1278] sm:$0xff]  }
 0x2b9   : > { %12056 = vmatprep.subr.bf16.mxu0 %v13096_v47  ;;  %v13113_v47 = vld [vmem:[%s16518_s2 + $0x12f8] sm:$0xff]  }
 0x2ba   : > { %12079 = vmatpush3.bf16.msra.mxu1 %v13099_v63  ;;  %v13119_v63 = vld [vmem:[%s16518_s2 + $0x13c0] sm:$0xff]  }
 0x2bb   : > { %12080 = vmatprep.subr.bf16.mxu1 %v13101_v43  ;;  %v13120_v43 = vld [vmem:[%s16518_s2 + $0x1380] sm:$0xff]  }
 0x2bc   : > { %12057 = vmatpush3.bf16.msra.mxu0 %v13098_v25 }
 0x2bd   : > { %12058 = vmatprep.subr.bf16.mxu0 %v13100_v31  ;;  %v7495_v31 = vld [vmem:[#allocation2 + $0x240] sm:$0xff] }
 0x2be   : > { %12081 = vmatpush3.bf16.msra.mxu1 %v13103_v60  ;;  %v13126_v60 = vld [vmem:[%s16518_s2 + $0x1310] sm:$0xff]  }
 0x2bf   : > { %12082 = vmatprep.subr.bf16.mxu1 %v13105_v37 }
 0x2c0   : > { %12059 = vmatpush3.bf16.msra.mxu0 %v13102_v61  ;;  %v11819_v32 = vpop.f32.mrb[52].mxu1  ;;  %v13122_v61 = vld [vmem:[%s16518_s2 + $0x1308] sm:$0xff]  }
 0x2c1   : > { %12060 = vmatprep.subr.bf16.mxu0 %v13104_v13  ;;  %v11820_v8 = vpop.f32.mrb[53].mxu1  ;;  %v669_v13 = vrot.slane %v15898_v20, 1  ;;  %v13128_v20 = vld [vmem:[%s16518_s2 + $0x1390] sm:$0xff]  }
 0x2c2   : > { %v11797_v18 = vpop.f32.mrb[52].mxu0  ;;  %12083 = vmatpush3.bf16.msra.mxu1 %v13107_v36  ;;  %v11821_v26 = vadd.f32 %v11820_v8, %v11819_v32  ;;  %v11822_v51 = vpop.f32.mrb[54].mxu1  ;;  %v5845_v36 = vmul.f32 %v15919_v11, %v14549_v30  ;;  %v855_v11 = vld [vmem:[#allocation2 + $0x278] sm:$0x7f]  ;;  %v13135_v8 = vld [vmem:[%s16518_s2 + $0x13e0] sm:$0xff]  }
 0x2c3   : > { %v11798_v48 = vpop.f32.mrb[53].mxu0  ;;  %v11823_v7 = vpop.f32.mrb[55].mxu1  ;;  %12084 = vmatprep.subr.bf16.mxu1 %v13109_v1  ;;  %v670_v37 = vor.u32 %v669_v13, %v15895_v12  ;;  %v5851_v12 = vmul.f32 1.442695, %v5850_v56  ;;  %v709_v1 = vld [vmem:[#allocation2 + $0x268] sm:$0xff] }
 0x2c4   : > { %v11799_v19 = vadd.f32 %v11798_v48, %v11797_v18  ;;  %v11800_v52 = vpop.f32.mrb[54].mxu0  ;;  %12061 = vmatpush3.bf16.msra.mxu0 %v13106_v40  ;;  %v11824_v15 = vadd.f32 %v11823_v7, %v11822_v51  ;;  %v13129_v40 = vld [vmem:[%s16518_s2 + $0x1358] sm:$0xff]   ;;  %v5848_v32 = vmul.f32 1.442695, %v5845_v36  ;;  %v13141_v51 = vld [vmem:[%s16518_s2 + $0x1370] sm:$0xff]  }
 0x2c5   : > { %v11801_v39 = vpop.f32.mrb[55].mxu0  ;;  %12062 = vmatprep.subr.bf16.mxu0 %v13108_v58  ;;  %v814_v58 = vor.u32 %v813_v22, %v812_v28  ;;  %v13130_v18 = vld [vmem:[%s16518_s2 + $0x1318] sm:$0xff]   ;;  %13262 = vpow2.f32 %v5851_v12 }
 0x2c6   : > { %v5709_v16 = vadd.f32 %v11799_v19, %v15828_v46  ;;  %v11802_v17 = vadd.f32 %v11801_v39, %v11800_v52  ;;  %v13115_v46 = vld [vmem:[%s16518_s2 + $0x12b8] sm:$0xff]   ;;  %12085 = vmatpush3.bf16.msra.mxu1 %v13111_v2  ;;  %v13133_v52 = vld [vmem:[%s16518_s2 + $0x1360] sm:$0xff]   ;;  %13264 = vpow2.f32 %v5848_v32 }
 0x2c7   : > { %12086 = vmatprep.subr.bf16.mxu1 %v13113_v47  ;;  %v13131_v48 = vld [vmem:[%s16518_s2 + $0x13d8] sm:$0xff]   ;;  %v856_v2 = vsel %vm13718_vm1, %v814_v58, %v855_v11  ;;  %v13134_v39 = vld [vmem:[%s16518_s2 + $0x1320] sm:$0xff]   ;;  %v13137_v47 = vld [vmem:[%s16518_s2 + $0x1368] sm:$0xff]  }
 0x2c8   : > { %v5712_v23 = vadd.f32 %v11802_v17, %v15837_v3  ;;  %v15979_v25 = vadd.f32 %v11821_v26, %v5709_v16  ;;  %12063 = vmatpush3.bf16.msra.mxu0 %v13110_v24  ;;  %v13118_v3 = vld [vmem:[%s16518_s2 + $0x1300] sm:$0xff]   ;;  %v710_v24 = vsel %vm13705_vm15, %v670_v37, %v709_v1  ;;  %v13132_v19 = vld [vmem:[%s16518_s2 + $0x1398] sm:$0xff]   ;;  %857 = vst [vmem:[#allocation2 + $0x278] sm:$0x7f] %v856_v2  ;;  %v13138_v16 = vld [vmem:[%s16518_s2 + $0x1328] sm:$0xff]  }
 0x2c9   : > { %12064 = vmatprep.subr.bf16.mxu0 %v13112_v6  ;;  %711 = vst [vmem:[#allocation2 + $0x268] sm:$0xff] %v710_v24  ;;  %v13136_v6 = vld [vmem:[%s16518_s2 + $0x13a0] sm:$0xff]   ;;  %v13139_v17 = vld [vmem:[%s16518_s2 + $0x13e8] sm:$0xff]   ;;  %v13146_v28 = vld [vmem:[%s16518_s2 + $0x1338] sm:$0xff]  }
 0x2ca   : > { %v15987_v42 = vadd.f32 %v11824_v15, %v5712_v23  ;;  %12087 = vmatpush3.bf16.msra.mxu1 %v13115_v46  ;;  %v13142_v23 = vld [vmem:[%s16518_s2 + $0x1330] sm:$0xff]   ;;  %v13149_v24 = vld [vmem:[%s16518_s2 + $0x1400] sm:$0xff]   ;;  %v13153_v2 = vld [vmem:[%s16518_s2 + $0x1488] sm:$0xff]  }
 0x2cb   : > { %12116 = vmatprep.subr.bf16.mxu1 %v13119_v63  ;;  %v7501_v11 = vld [vmem:[#allocation2 + $0x270] sm:$0xff]  ;;  %v13151_v32 = vld [vmem:[%s16518_s2 + $0x1440] sm:$0xff]  }
 0x2cc   : > { %12065 = vmatpush3.bf16.msra.mxu0 %v13114_v9 }
 0x2cd   : > { %12094 = vmatprep.subr.bf16.mxu0 %v13117_v29  ;;  %8155 = vmatmul.mubr.bf16.vlgmr.msra.gmra.mrb[80].mxu1 %v7497_v53  ;;  %v13143_v29 = vld [vmem:[%s16518_s2 + $0x13f0] sm:$0xff]  }
 0x2ce   : > { %12117 = vmatpush3.bf16.msra.mxu1 %v13120_v43  ;;  %v13144_v53 = vld [vmem:[%s16518_s2 + $0x13b0] sm:$0xff]  }
 0x2cf   : > { %8114 = vmatmul.mubr.bf16.vlgmr.msra.gmra.mrb[80].mxu0 %v7495_v31  ;;  %12118 = vmatprep.subr.bf16.mxu1 %v13123_v54  ;;  %v888_v7 = vld [vmem:[#allocation2 + $0x278] sm:$0xc0] }
 0x2d0   : > { %12095 = vmatpush3.bf16.msra.mxu0 %v13118_v3  ;;  %v742_v26 = vld [vmem:[#allocation2 + $0x268] sm:$0x80]  ;;  %v889_v15 = vsel %vm13744_vm8, 0, %v888_v7  ;;  %v13159_v7 = vld [vmem:[%s16518_s2 + $0x1498] sm:$0xff]  }
 0x2d1   : > { %12096 = vmatprep.subr.bf16.mxu0 %v13121_v4  ;;  %v743_v14 = vsel %vm13737_vm6, 0, %v742_v26  ;;  %890 = vst [vmem:[#allocation2 + $0x278] sm:$0xc0] %v889_v15  ;;  %v371_v26 = vld [vmem:[#allocation2 + $0x290] sm:$0x3] }
 0x2d2   : > { %12119 = vmatpush3.bf16.msra.mxu1 %v13124_v59  ;;  %744 = vst [vmem:[#allocation2 + $0x268] sm:$0x80] %v743_v14  ;;  %v372_v14 = vsel %vm13580_vm3, 0, %v371_v26  ;;  %v13180_v26 = vld [vmem:[%s16518_s2 + $0x1588] sm:$0xff]  }
 0x2d3   : > { %12120 = vmatprep.subr.bf16.mxu1 %v13127_v0  ;;  %373 = vst [vmem:[#allocation2 + $0x290] sm:$0x3] %v372_v14 }
 0x2d4   : > { %12097 = vmatpush3.bf16.msra.mxu0 %v13122_v61  ;;  %v13145_v61 = vld [vmem:[%s16518_s2 + $0x1378] sm:$0xff]  }
 0x2d5   : > { %12098 = vmatprep.subr.bf16.mxu0 %v13125_v57  ;;  %v5853_v57 = vstv %s16065_s13  ;;  %s16390_s13 = sld [smem:[#allocation3 + %s6654_s10]] }
 0x2d6   : > { %12121 = vmatpush3.bf16.msra.mxu1 %v13128_v20  ;;  %v13261_v20 = vpop.eup %13260 }
 0x2d7   : > { %12122 = vmatprep.subr.bf16.mxu1 %v13131_v48 }
 0x2d8   : > { %12099 = vmatpush3.bf16.msra.mxu0 %v13126_v60  ;;  %v13147_v60 = vld [vmem:[%s16518_s2 + $0x13f8] sm:$0xff]  }
 0x2d9   : > { %12100 = vmatprep.subr.bf16.mxu0 %v13129_v40  ;;  %v7500_v37 = vld [vmem:[#allocation2 + $0x268] sm:$0xff]  ;;  %v13263_v40 = vpop.eup %13262 }
 0x2da   : > { %12123 = vmatpush3.bf16.msra.mxu1 %v13132_v19  ;;  %8195 = vmatprep.mubr.bf16.mxu0 %v7500_v37  ;;  %v13265_v12 = vpop.eup %13264 }
 0x2db   : > { %12124 = vmatprep.subr.bf16.mxu1 %v13135_v8 }
 0x2dc   : > { %12101 = vmatpush3.bf16.msra.mxu0 %v13130_v18  ;;  %v7502_v18 = vld [vmem:[#allocation2 + $0x278] sm:$0xff] }
 0x2dd   : > { %12102 = vmatprep.subr.bf16.mxu0 %v13133_v52  ;;  %8236 = vmatprep.mubr.bf16.mxu1 %v7502_v18 }
 0x2de   : > { %12125 = vmatpush3.bf16.msra.mxu1 %v13136_v6  ;;  %v13152_v6 = vld [vmem:[%s16518_s2 + $0x1408] sm:$0xff]  }
 0x2df   : > { %12126 = vmatprep.subr.bf16.mxu1 %v13139_v17  ;;  %v16145_v17 = vld [vmem:[%s13569_s30 + $0x48] sm:$0xff]   ;;  %s6656_s30 = sadd.s32 18, %s14431_s29 }
 0x2e0   : > { %12103 = vmatpush3.bf16.msra.mxu0 %v13134_v39  ;;  %v5831_v31 = vpop.f32.mrb[56].mxu1  ;;  %s16294_s20 = sld [smem:[#allocation3 + %s6656_s30]]  ;;  %s7472_s30 = sadd.s32 19, %s14431_s29 }
 0x2e1   : > { %12104 = vmatprep.subr.bf16.mxu0 %v13137_v47  ;;  %v12362_v4 = vpop.f32.mrb[57].mxu1  ;;  %v13155_v47 = vld [vmem:[%s16518_s2 + $0x1410] sm:$0xff]   ;;  %s7473_s7 = sld [smem:[#allocation3 + %s7472_s30]]  ;;  %s11273_s30 = sshll.u32 %s13426_s19, 8 }
 0x2e2   : > { %v11841_v9 = vpop.f32.mrb[56].mxu0  ;;  %12127 = vmatpush3.bf16.msra.mxu1 %v13140_v33  ;;  %v5834_v59 = vpop.f32.mrb[58].mxu1  ;;  %v16159_v33 = vshll.u32 %v16145_v17, 16  ;;  %v494_v4 = vld [vmem:[#allocation2 + $0x290] sm:$0xfe] }
 0x2e3   : > { %v11842_v46 = vpop.f32.mrb[57].mxu0  ;;  %v12363_v22 = vpop.f32.mrb[59].mxu1  ;;  %12128 = vmatprep.subr.bf16.mxu1 %v13143_v29  ;;  %v13162_v29 = vld [vmem:[%s16518_s2 + $0x14a0] sm:$0xff]  }
 0x2e4   : > { %v11843_v3 = vadd.f32 %v11842_v46, %v11841_v9  ;;  %v11844_v63 = vpop.f32.mrb[58].mxu0  ;;  %12105 = vmatpush3.bf16.msra.mxu0 %v13138_v16  ;;  %v13156_v16 = vld [vmem:[%s16518_s2 + $0x1490] sm:$0xff]   ;;  %v16156_v9 = vshrl.u32 %v16145_v17, 16  ;;  %v452_v46 = vrot.slane %v16159_v33, 7  ;;  %v671_v14 = vrot.slane %v16159_v33, 1 }
 0x2e5   : > { %v11845_v43 = vpop.f32.mrb[59].mxu0  ;;  %12106 = vmatprep.subr.bf16.mxu0 %v13141_v51  ;;  %v13158_v51 = vld [vmem:[%s16518_s2 + $0x1418] sm:$0xff]  }
 0x2e6   : > { %v11846_v54 = vadd.f32 %v11845_v43, %v11844_v63  ;;  %v5791_v13 = vadd.f32 %v11843_v3, %v15979_v25  ;;  %v13148_v25 = vld [vmem:[%s16518_s2 + $0x13b8] sm:$0xff]   ;;  %12129 = vmatpush3.bf16.msra.mxu1 %v13144_v53  ;;  %v449_v15 = vrot.slane %v16156_v9, 6  ;;  %v13161_v63 = vld [vmem:[%s16518_s2 + $0x1420] sm:$0xff]   ;;  %v13165_v53 = vld [vmem:[%s16518_s2 + $0x14a8] sm:$0xff]   ;;  %s6658_s6 = ssub.f32 0.0, %s16294_s20  ;;  %s8289_s20 = sld [smem:[#allocation3 + %s8288_s28]] }
 0x2e7   : > { %12130 = vmatprep.subr.bf16.mxu1 %v13147_v60  ;;  %v13163_v43 = vld [vmem:[%s16518_s2 + $0x1460] sm:$0xff]   ;;  %v13168_v60 = vld [vmem:[%s16518_s2 + $0x14b0] sm:$0xff]   ;;  %s7474_s10 = ssub.f32 0.0, %s7473_s7  ;;  %s16468_s28 = scalar_lea.hbm %s16520_s4, %s11273_s30 }
 0x2e8   : > { %v5832_v56 = vadd.f32 %v5831_v31, %v5791_v13  ;;  %v5794_v0 = vadd.f32 %v11846_v54, %v15987_v42  ;;  %12107 = vmatpush3.bf16.msra.mxu0 %v13142_v23  ;;  %v13150_v42 = vld [vmem:[%s16518_s2 + $0x1480] sm:$0xff]   ;;  %v320_v23 = vrot.slane %v16145_v17, 6  ;;  %v453_v3 = vor.u32 %v452_v46, %v449_v15  ;;  %v13164_v54 = vld [vmem:[%s16518_s2 + $0x1428] sm:$0xff]   ;;  %v13185_v15 = vld [vmem:[%s16518_s2 + $0x1550] sm:$0xff]  }
 0x2e9   : > { %12108 = vmatprep.subr.bf16.mxu0 %v13145_v61  ;;  %v516_v31 = vrot.slane %v16145_v17, 7  ;;  %v757_v13 = vrot.slane %v16145_v17, 1  ;;  %v567_v46 = vld [vmem:[#allocation2 + $0x2a0] sm:$0x1] }
 0x2ea   : > { %v5854_v36 = vmul.f32 %v5853_v57, %v5832_v56  ;;  %v5835_v58 = vadd.f32 %v5834_v59, %v5794_v0  ;;  %12131 = vmatpush3.bf16.msra.mxu1 %v13148_v25  ;;  %340 = vst [vmem:[#allocation2 + $0x288] sm:$0xfc] %v320_v23  ;;  %v495_v61 = vsel %vm13611_vm10, %v453_v3, %v494_v4  ;;  %v903_v59 = vrot.slane %v16145_v17, 2  ;;  %v13183_v23 = vld [vmem:[%s16518_s2 + $0x14d0] sm:$0xff]   ;;  %v13186_v3 = vld [vmem:[%s16518_s2 + $0x1518] sm:$0xff]  }
 0x2eb   : > { %12147 = vmatprep.subr.bf16.mxu1 %v13150_v42  ;;  %536 = vst [vmem:[#allocation2 + $0x298] sm:$0xfe] %v516_v31  ;;  %496 = vst [vmem:[#allocation2 + $0x290] sm:$0xfe] %v495_v61  ;;  %v13171_v42 = vld [vmem:[%s16518_s2 + $0x14b8] sm:$0xff]  }
 0x2ec   : > { %v5856_v1 = vmul.f32 %v13261_v20, %v5854_v36  ;;  %v5855_v48 = vmul.f32 %v5853_v57, %v5835_v58  ;;  %12109 = vmatpush3.bf16.msra.mxu0 %v13146_v28  ;;  %v13166_v28 = vld [vmem:[%s16518_s2 + $0x1468] sm:$0xff]   ;;  %777 = vst [vmem:[#allocation2 + $0x2b8] sm:$0x7f] %v757_v13  ;;  %923 = vst [vmem:[#allocation2 + $0x2c8] sm:$0x3f] %v903_v59  ;;  %v13187_v31 = vld [vmem:[%s16518_s2 + $0x14d8] sm:$0xff]  }
 0x2ed   : > { %12404 = vmatprep.subr.bf16.mxu0 %v13375_v49  ;;  %8237 = vmatmul.mubr.bf16.vlgmr.msra.gmra.mrb[84].mxu1 %v7501_v11  ;;  %v13188_v4 = vld [vmem:[%s16518_s2 + $0x1598] sm:$0xff]   ;;  %v13191_v13 = vld [vmem:[%s16518_s2 + $0x14e0] sm:$0xff]   ;;  %s8290_s9 = ssub.f32 0.0, %s8289_s20 }
 0x2ee   : > { %v5858_v19 = vmul.f32 %v13263_v40, %v5856_v1  ;;  %v5857_v52 = vmul.f32 %v13265_v12, %v5855_v48  ;;  %12148 = vmatpush3.bf16.msra.mxu1 %v13151_v32  ;;  %v13170_v12 = vld [vmem:[%s16518_s2 + $0x1438] sm:$0xff]  }
 0x2ef   : > { %8196 = vmatmul.mubr.bf16.vlgmr.msra.gmra.mrb[84].mxu0 %v15889_v38  ;;  %12149 = vmatprep.subr.bf16.mxu1 %v13153_v2  ;;  %v7503_v2 = vld [vmem:[#allocation2 + $0x280] sm:$0xff] }
 0x2f0   : > { %v16120_v39 = vadd.f32 %v5858_v19, %v15850_v62  ;;  %v5859_v8 = vmul.f32 %v13263_v40, %v5857_v52  ;;  %12405 = vmatpush3.bf16.msra.mxu0 %v13149_v24  ;;  %12420 = vmatprep.mubr.msk.bf16.mxu0 %vm13376_vm9, %v13375_v49  ;;  %v13154_v62 = vld [vmem:[%s16518_s2 + $0x1448] sm:$0xff]   ;;  %v13169_v40 = vld [vmem:[%s16518_s2 + $0x1470] sm:$0xff]   ;;  %v13172_v19 = vld [vmem:[%s16518_s2 + $0x1478] sm:$0xff]  }
 0x2f1   : > { %12406 = vmatprep.subr.bf16.mxu0 %v13375_v49  ;;  %v13173_v52 = vld [vmem:[%s16518_s2 + $0x1500] sm:$0xff]  }
 0x2f2   : > { %v16129_v38 = vadd.f32 %v5859_v8, %v15862_v5  ;;  %v13157_v5 = vld [vmem:[%s16518_s2 + $0x1450] sm:$0xff]   ;;  %12150 = vmatpush3.bf16.msra.mxu1 %v13154_v62  ;;  %v13174_v8 = vld [vmem:[%s16518_s2 + $0x14c0] sm:$0xff]  }
 0x2f3   : > { %12151 = vmatprep.subr.bf16.mxu1 %v13156_v16  ;;  %v8312_v48 = vld [vmem:[#allocation2 + $0x290] sm:$0xff]  ;;  %v13177_v62 = vld [vmem:[%s16518_s2 + $0x1540] sm:$0xff]   ;;  %v8311_v16 = vld [vmem:[#allocation2 + $0x288] sm:$0xff] }
 0x2f4   : > { %12407 = vmatpush3.bf16.msra.mxu0 %v13152_v6  ;;  %8929 = vmatprep.mubr.bf16.mxu1 %v8312_v48  ;;  %v13176_v6 = vld [vmem:[%s16518_s2 + $0x1580] sm:$0xff]  }
 0x2f5   : > { %12408 = vmatprep.subr.bf16.mxu0 %v13375_v49 }
 0x2f6   : > { %12152 = vmatpush3.bf16.msra.mxu1 %v13157_v5  ;;  %v13179_v5 = vld [vmem:[%s16518_s2 + $0x14c8] sm:$0xff]  }
 0x2f7   : > { %12153 = vmatprep.subr.bf16.mxu1 %v13159_v7  ;;  %v13182_v7 = vld [vmem:[%s16518_s2 + $0x1510] sm:$0xff]  }
 0x2f8   : > { %12409 = vmatpush3.bf16.msra.mxu0 %v13155_v47  ;;  %v13178_v47 = vld [vmem:[%s16518_s2 + $0x1508] sm:$0xff]  }
 0x2f9   : > { %12410 = vmatprep.subr.bf16.mxu0 %v13375_v49 }
 0x2fa   : > { %12154 = vmatpush3.bf16.msra.mxu1 %v13160_v35  ;;  %v13184_v35 = vld [vmem:[%s16518_s2 + $0x1590] sm:$0xff]  }
 0x2fb   : > { %12155 = vmatprep.subr.bf16.mxu1 %v13162_v29  ;;  %v672_v29 = vor.u32 %v671_v14, %v16156_v9 }
 0x2fc   : > { %12411 = vmatpush3.bf16.msra.mxu0 %v13158_v51  ;;  %v13181_v51 = vld [vmem:[%s16518_s2 + $0x1548] sm:$0xff]  }
 0x2fd   : > { %12412 = vmatprep.subr.bf16.mxu0 %v13375_v49 }
 0x2fe   : > { %12156 = vmatpush3.bf16.msra.mxu1 %v13163_v43  ;;  %v588_v43 = vrot.slane %v16156_v9, 7 }
 0x2ff   : > { %12157 = vmatprep.subr.bf16.mxu1 %v13165_v53  ;;  %v712_v53 = vld [vmem:[#allocation2 + $0x2b0] sm:$0xff] }
 0x300   : > { %12413 = vmatpush3.bf16.msra.mxu0 %v13161_v63  ;;  %v11894_v56 = vpop.f32.mrb[60].mxu1  ;;  %v568_v63 = vsel %vm13600_vm7, 0, %v567_v46  ;;  %v713_v61 = vsel %vm13705_vm15, %v672_v29, %v712_v53  ;;  %v589_v59 = vor.u32 %v588_v43, %v16159_v33  ;;  %v13208_v46 = vld [vmem:[%s16518_s2 + $0x1640] sm:$0xff]   ;;  %v6659_v29 = vstv %s6658_s6  ;;  %v13212_v43 = vld [vmem:[%s16518_s2 + $0x1610] sm:$0xff]   ;;  %s217_s6 = sand.u32 1, %s13363_s16  }
 0x301   : > { %12414 = vmatprep.subr.bf16.mxu0 %v13375_v49  ;;  %v11895_v20 = vpop.f32.mrb[61].mxu1  ;;  %569 = vst [vmem:[#allocation2 + $0x2a0] sm:$0x1] %v568_v63  ;;  %714 = vst [vmem:[#allocation2 + $0x2b0] sm:$0xff] %v713_v61  ;;  %v13210_v63 = vld [vmem:[%s16518_s2 + $0x15c8] sm:$0xff]   ;;  %v6660_v53 = vmul.f32 %v6659_v29, %v14527_v21  ;;  %v6666_v34 = vmul.f32 %v6659_v29, %v14532_v10  ;;  %v13215_v61 = vld [vmem:[%s16518_s2 + $0x1618] sm:$0xff]  }
 0x302   : > { %v11872_v57 = vpop.f32.mrb[60].mxu0  ;;  %v11896_v36 = vadd.f32 %v11895_v20, %v11894_v56  ;;  %v11897_v58 = vpop.f32.mrb[62].mxu1  ;;  %12158 = vmatpush3.bf16.msra.mxu1 %v13166_v28  ;;  %v13192_v28 = vld [vmem:[%s16518_s2 + $0x15a0] sm:$0xff]   ;;  %v13196_v56 = vld [vmem:[%s16518_s2 + $0x15a8] sm:$0xff]   ;;  %v13198_v20 = vld [vmem:[%s16518_s2 + $0x1530] sm:$0xff]   ;;  %s9234_s29 = sshll.u32 %s217_s6, 4 }
 0x303   : > { %v11873_v22 = vpop.f32.mrb[61].mxu0  ;;  %v11898_v1 = vpop.f32.mrb[63].mxu1  ;;  %12159 = vmatprep.subr.bf16.mxu1 %v13168_v60  ;;  %s219_s7 = scalar_lea.vmem [#allocation6], %s9234_s29  ;;  %s16475_s19 = scalar_lea.sflag [#allocation4], %s217_s6 }
 0x304   : > { %v11874_v0 = vadd.f32 %v11873_v22, %v11872_v57  ;;  %v11875_v37 = vpop.f32.mrb[62].mxu0  ;;  %12415 = vmatpush3.bf16.msra.mxu0 %v13164_v54  ;;  %v11899_v11 = vadd.f32 %v11898_v1, %v11897_v58  ;;  %v13190_v54 = vld [vmem:[%s16518_s2 + $0x1520] sm:$0xff]   ;;  %v13194_v57 = vld [vmem:[%s16518_s2 + $0x1528] sm:$0xff]  }
 0x305   : > { %v11876_v25 = vpop.f32.mrb[63].mxu0  ;;  %12416 = vmatprep.subr.bf16.mxu0 %v13375_v49  ;;  %v13195_v22 = vld [vmem:[%s16518_s2 + $0x14e8] sm:$0xff]  }
 0x306   : > { %v11877_v18 = vadd.f32 %v11876_v25, %v11875_v37  ;;  %v16209_v24 = vadd.f32 %v11896_v36, %v11874_v0  ;;  %12160 = vmatpush3.bf16.msra.mxu1 %v13169_v40  ;;  %v815_v0 = vrot.slane %v16156_v9, 1  ;;  %v13197_v40 = vld [vmem:[%s16518_s2 + $0x1568] sm:$0xff]   ;;  %v13200_v9 = vld [vmem:[%s16518_s2 + $0x15b0] sm:$0xff]  }
 0x307   : > { %12161 = vmatprep.subr.bf16.mxu1 %v13171_v42  ;;  %v13202_v42 = vld [vmem:[%s16518_s2 + $0x1538] sm:$0xff]  }
 0x308   : > { %12417 = vmatpush3.bf16.msra.mxu0 %v13167_v50  ;;  %v16218_v32 = vadd.f32 %v11899_v11, %v11877_v18  ;;  %v630_v50 = vld [vmem:[#allocation2 + $0x2a0] sm:$0xff]  ;;  %v745_v37 = vld [vmem:[#allocation2 + $0x2b0] sm:$0x80] }
 0x309   : > { %12418 = vmatprep.subr.bf16.mxu0 %v13375_v49  ;;  %v631_v60 = vsel %vm13619_vm11, %v589_v59, %v630_v50  ;;  %v746_v55 = vsel %vm13737_vm6, 0, %v745_v37  ;;  %v6667_v59 = vmul.f32 1.442695, %v6666_v34  ;;  %v13218_v50 = vld [vmem:[%s16518_s2 + $0x1620] sm:$0xff]   ;;  %v13222_v37 = vld [vmem:[%s16518_s2 + $0x15e8] sm:$0xff]  }
 0x30a   : > { %12162 = vmatpush3.bf16.msra.mxu1 %v13172_v19  ;;  %632 = vst [vmem:[#allocation2 + $0x2a0] sm:$0xff] %v631_v60  ;;  %747 = vst [vmem:[#allocation2 + $0x2b0] sm:$0x80] %v746_v55 }
 0x30b   : > { %12191 = vmatprep.subr.bf16.mxu1 %v13176_v6 }
 0x30c   : > { %12419 = vmatpush3.bf16.msra.mxu0 %v13170_v12 }
 0x30d   : > { %12169 = vmatprep.subr.bf16.mxu0 %v13173_v52  ;;  %8930 = vmatmul.mubr.bf16.vlgmr.msra.gmra.mrb[88].mxu1 %v8311_v16 }
 0x30e   : > { %12192 = vmatpush3.bf16.msra.mxu1 %v13177_v62  ;;  %v13204_v62 = vld [vmem:[%s16518_s2 + $0x15b8] sm:$0xff]  }
 0x30f   : > { %12421 = vmatmul.mubr.bf16.vlgmr.msra.gmra.mrb[88].mxu0 %v7503_v2  ;;  %12193 = vmatprep.subr.bf16.mxu1 %v13180_v26  ;;  %v816_v26 = vrot.slane %v16159_v33, 2  ;;  %v13207_v33 = vld [vmem:[%s16518_s2 + $0x15c0] sm:$0xff]  }
 0x310   : > { %12170 = vmatpush3.bf16.msra.mxu0 %v13174_v8  ;;  %8970 = vmatprep.mubr.bf16.mxu0 %v631_v60  ;;  %v13201_v8 = vld [vmem:[%s16518_s2 + $0x1570] sm:$0xff]   ;;  %v13217_v60 = vld [vmem:[%s16518_s2 + $0x1658] sm:$0xff]  }
 0x311   : > { %12171 = vmatprep.subr.bf16.mxu0 %v13178_v47  ;;  %v8316_v14 = vld [vmem:[#allocation2 + $0x2b0] sm:$0xff] }
 0x312   : > { %12194 = vmatpush3.bf16.msra.mxu1 %v13181_v51  ;;  %v13206_v51 = vld [vmem:[%s16518_s2 + $0x1600] sm:$0xff]   ;;  %9011 = vmatprep.mubr.bf16.mxu1 %v8316_v14 }
 0x313   : > { %12195 = vmatprep.subr.bf16.mxu1 %v13184_v35  ;;  %v817_v35 = vor.u32 %v816_v26, %v815_v0  ;;  %v13220_v0 = vld [vmem:[%s16518_s2 + $0x1660] sm:$0xff]  }
 0x314   : > { %12172 = vmatpush3.bf16.msra.mxu0 %v13179_v5 }
 0x315   : > { %12173 = vmatprep.subr.bf16.mxu0 %v13182_v7 }
 0x316   : > { %12196 = vmatpush3.bf16.msra.mxu1 %v13185_v15  ;;  %v13209_v15 = vld [vmem:[%s16518_s2 + $0x1608] sm:$0xff]  }
 0x317   : > { %12197 = vmatprep.subr.bf16.mxu1 %v13188_v4  ;;  %v13211_v4 = vld [vmem:[%s16518_s2 + $0x1648] sm:$0xff]  }
 0x318   : > { %12174 = vmatpush3.bf16.msra.mxu0 %v13183_v23  ;;  %v8313_v23 = vld [vmem:[#allocation2 + $0x298] sm:$0xff] }
 0x319   : > { %12175 = vmatprep.subr.bf16.mxu0 %v13186_v3  ;;  %v858_v3 = vld [vmem:[#allocation2 + $0x2c0] sm:$0x7f] }
 0x31a   : > { %12198 = vmatpush3.bf16.msra.mxu1 %v13189_v45  ;;  %v6661_v45 = vmul.f32 %v6659_v29, %v14549_v30 }
 0x31b   : > { %12199 = vmatprep.subr.bf16.mxu1 %v13192_v28  ;;  %v13216_v28 = vld [vmem:[%s16518_s2 + $0x15d8] sm:$0xff]  }
 0x31c   : > { %12176 = vmatpush3.bf16.msra.mxu0 %v13187_v31  ;;  %v859_v31 = vsel %vm13718_vm1, %v817_v35, %v858_v3  ;;  %v8317_v35 = vld [vmem:[#allocation2 + $0x2b8] sm:$0xff] }
 0x31d   : > { %12177 = vmatprep.subr.bf16.mxu0 %v13190_v54  ;;  %860 = vst [vmem:[#allocation2 + $0x2c0] sm:$0x7f] %v859_v31  ;;  %v13214_v54 = vld [vmem:[%s16518_s2 + $0x1650] sm:$0xff]  }
 0x31e   : > { %12200 = vmatpush3.bf16.msra.mxu1 %v13193_v27  ;;  %v6664_v27 = vmul.f32 1.442695, %v6661_v45 }
 0x31f   : > { %12201 = vmatprep.subr.bf16.mxu1 %v13196_v56  ;;  %v13219_v56 = vld [vmem:[%s16518_s2 + $0x15e0] sm:$0xff]  }
 0x320   : > { %12178 = vmatpush3.bf16.msra.mxu0 %v13191_v13  ;;  %v11938_v12 = vpop.f32.mrb[64].mxu1  ;;  %v6662_v13 = vmul.f32 1.442695, %v6660_v53 }
 0x321   : > { %12179 = vmatprep.subr.bf16.mxu0 %v13194_v57  ;;  %v11939_v48 = vpop.f32.mrb[65].mxu1 }
 0x322   : > { %v11916_v25 = vpop.f32.mrb[64].mxu0  ;;  %v11940_v52 = vadd.f32 %v11939_v48, %v11938_v12  ;;  %v11941_v2 = vpop.f32.mrb[66].mxu1  ;;  %12202 = vmatpush3.bf16.msra.mxu1 %v13197_v40  ;;  %13266 = vpow2.f32 %v6662_v13  ;;  %v6669_v40 = vstv %s16390_s13  ;;  %s8287_s13 = sld [smem:[#allocation3 + %s8286_s27]] }
 0x323   : > { %v11917_v36 = vpop.f32.mrb[65].mxu0  ;;  %v11942_v6 = vpop.f32.mrb[67].mxu1  ;;  %12203 = vmatprep.subr.bf16.mxu1 %v13200_v9  ;;  %13268 = vpow2.f32 %v6667_v59  ;;  %v7475_v59 = vstv %s7474_s10  ;;  %s9142_s10 = sshll.u32 %s219_s7, 4  ;;  %s16470_s10 = int_to_ptr.vmem [resolvable:$true] %s9142_s10 }
 0x324   : > { %v11918_v58 = vadd.f32 %v11917_v36, %v11916_v25  ;;  %v11919_v18 = vpop.f32.mrb[66].mxu0  ;;  %12180 = vmatpush3.bf16.msra.mxu0 %v13195_v22  ;;  %v11943_v16 = vadd.f32 %v11942_v6, %v11941_v2  ;;  %v891_v57 = vld [vmem:[#allocation2 + $0x2c0] sm:$0xc0]  ;;  %13270 = vpow2.f32 %v6664_v27  ;;  %v13223_v36 = vld [vmem:[%s16518_s2 + $0x1668] sm:$0xff]   ;;  %v13227_v2 = vld [vmem:[%s16518_s2 + $0x1638] sm:$0xff]   ;;  %v7482_v27 = vmul.f32 %v7475_v59, %v14532_v10  ;;  %s13305_s20 = scalar_lea.vmem %s16470_s10, 256 }
 0x325   : > { %v11920_v1 = vpop.f32.mrb[67].mxu0  ;;  %12181 = vmatprep.subr.bf16.mxu0 %v13198_v20  ;;  %v892_v22 = vsel %vm13744_vm8, 0, %v891_v57  ;;  %v13224_v20 = vld [vmem:[%s16518_s2 + $0x1630] sm:$0xff]   ;;  %v7477_v57 = vmul.f32 %v7475_v59, %v14549_v30  ;;  %p13306_p10 = scmp.ne.s32.totalorder %s16470_s10, %s13305_s20 }
 0x326   : > { %v6566_v11 = vadd.f32 %v11918_v58, %v16209_v24  ;;  %v11921_v19 = vadd.f32 %v11920_v1, %v11919_v18  ;;  %v13203_v24 = vld [vmem:[%s16518_s2 + $0x14f8] sm:$0xff]   ;;  %12204 = vmatpush3.bf16.msra.mxu1 %v13201_v8  ;;  %893 = vst [vmem:[#allocation2 + $0x2c0] sm:$0xc0] %v892_v22  ;;  %v7483_v22 = vmul.f32 1.442695, %v7482_v27  ;;  %v8291_v27 = vstv %s8290_s9  ;;  %s13377_s9 = smov [#allocation6]  }
 0x327   : > { %12205 = vmatprep.subr.bf16.mxu1 %v13204_v62  ;;  %p13307_p11 = pnand %p13306_p10, %p13443_p5  ;;  %s13309_s27 = sshll.u32 %s13377_s9, 4  ;;  %s13310_s27 = int_to_ptr.vmem [resolvable:$false] %s13309_s27 }
 0x328   : > { %v6569_v47 = vadd.f32 %v11921_v19, %v16218_v32  ;;  %12182 = vmatpush3.bf16.msra.mxu0 %v13199_v41  ;;  %v16328_v5 = vadd.f32 %v11940_v52, %v6566_v11  ;;  %v13205_v32 = vld [vmem:[%s16518_s2 + $0x1578] sm:$0xff]   ;;  %p13312_p13 = scmp.lt.s32.totalorder %s16470_s10, %s13310_s27 }
 0x329   : > { %12183 = vmatprep.subr.bf16.mxu0 %v13202_v42  ;;  %v13225_v42 = vld [vmem:[%s16518_s2 + $0x15f0] sm:$0xff]   ;;  %p13308_p12 = pneg %p13307_p11 }
 0x32a   : > { %v16337_v7 = vadd.f32 %v11943_v16, %v6569_v47  ;;  %12206 = vmatpush3.bf16.msra.mxu1 %v13205_v32  ;;  %v13226_v47 = vld [vmem:[%s16518_s2 + $0x1670] sm:$0xff]  }
 0x32b   : > { %12424 = vmatprep.subr.bf16.mxu1 %v13375_v49 }
 0x32c   : > { %12184 = vmatpush3.bf16.msra.mxu0 %v13203_v24  ;;  %v13267_v18 = vpop.eup %13266 }
 0x32d   : > { %12213 = vmatprep.subr.bf16.mxu0 %v13206_v51  ;;  %9012 = vmatmul.mubr.bf16.vlgmr.msra.gmra.mrb[92].mxu1 %v16145_v17  ;;  %v13213_v17 = vld [vmem:[%s16518_s2 + $0x15d0] sm:$0xff]   ;;  %v8318_v55 = vld [vmem:[#allocation2 + $0x2c0] sm:$0xff]  ;;  %v13269_v1 = vpop.eup %13268  ;;  %v13228_v51 = vld [vmem:[%s16518_s2 + $0x15f8] sm:$0xff]  }
 0x32e   : > { %12425 = vmatpush3.bf16.msra.mxu1 %v13208_v46  ;;  %12440 = vmatprep.mubr.msk.bf16.mxu1 %vm13376_vm9, %v13375_v49  ;;  %v13271_v8 = vpop.eup %13270  ;;  %v8319_v46 = vld [vmem:[#allocation2 + $0x2c8] sm:$0xff] }
 0x32f   : > { %8971 = vmatmul.mubr.bf16.vlgmr.msra.gmra.mrb[92].mxu0 %v8313_v23  ;;  %12426 = vmatprep.subr.bf16.mxu1 %v13375_v49 }
 0x330   : > { %12214 = vmatpush3.bf16.msra.mxu0 %v13207_v33  ;;  %9052 = vmatprep.mubr.bf16.mxu0 %v8318_v55 }
 0x331   : > { %12215 = vmatprep.subr.bf16.mxu0 %v13209_v15 }
 0x332   : > { %12427 = vmatpush3.bf16.msra.mxu1 %v13211_v4 }
 0x333   : > { %12428 = vmatprep.subr.bf16.mxu1 %v13375_v49 }
 0x334   : > { %12216 = vmatpush3.bf16.msra.mxu0 %v13210_v63 }
 0x335   : > { %12217 = vmatprep.subr.bf16.mxu0 %v13212_v43 }
 0x336   : > { %12429 = vmatpush3.bf16.msra.mxu1 %v13214_v54 }
 0x337   : > { %12430 = vmatprep.subr.bf16.mxu1 %v13375_v49 }
 0x338   : > { %12218 = vmatpush3.bf16.msra.mxu0 %v13213_v17 }
 0x339   : > { %12219 = vmatprep.subr.bf16.mxu0 %v13215_v61 }
 0x33a   : > { %12431 = vmatpush3.bf16.msra.mxu1 %v13217_v60  ;;  %v7480_v60 = vmul.f32 1.442695, %v7477_v57  ;;  %v8292_v57 = vmul.f32 %v8291_v27, %v14527_v21 }
 0x33b   : > { %12432 = vmatprep.subr.bf16.mxu1 %v13375_v49 }
 0x33c   : > { %12220 = vmatpush3.bf16.msra.mxu0 %v13216_v28  ;;  %v7476_v28 = vmul.f32 %v7475_v59, %v14527_v21 }
 0x33d   : > { %12221 = vmatprep.subr.bf16.mxu0 %v13218_v50 }
 0x33e   : > { %12433 = vmatpush3.bf16.msra.mxu1 %v13220_v0  ;;  %v7478_v50 = vmul.f32 1.442695, %v7476_v28 }
 0x33f   : > { %12434 = vmatprep.subr.bf16.mxu1 %v13375_v49 }
 0x340   : > { %12222 = vmatpush3.bf16.msra.mxu0 %v13219_v56  ;;  %v11969_v41 = vpop.f32.mrb[68].mxu1  ;;  %13272 = vpow2.f32 %v7478_v50  ;;  %v8298_v50 = vmul.f32 %v8291_v27, %v14532_v10 }
 0x341   : > { %12223 = vmatprep.subr.bf16.mxu0 %v13221_v44  ;;  %v11970_v52 = vpop.f32.mrb[69].mxu1  ;;  %13274 = vpow2.f32 %v7483_v22  ;;  %v8293_v22 = vmul.f32 %v8291_v27, %v14549_v30  ;;  %v9117_v27 = vstv %s9103_s5 }
 0x342   : > { %v6647_v25 = vpop.f32.mrb[68].mxu0  ;;  %v11971_v6 = vadd.f32 %v11970_v52, %v11969_v41  ;;  %12435 = vmatpush3.bf16.msra.mxu1 %v13223_v36  ;;  %v11972_v62 = vpop.f32.mrb[70].mxu1  ;;  %13276 = vpow2.f32 %v7480_v60  ;;  %v8294_v60 = vmul.f32 1.442695, %v8292_v57 }
 0x343   : > { %v6648_v9 = vadd.f32 %v6647_v25, %v16328_v5  ;;  %v12382_v58 = vpop.f32.mrb[69].mxu0  ;;  %v11973_v5 = vpop.f32.mrb[71].mxu1  ;;  %12436 = vmatprep.subr.bf16.mxu1 %v13375_v49 }
 0x344   : > { %v6650_v12 = vpop.f32.mrb[70].mxu0  ;;  %12224 = vmatpush3.bf16.msra.mxu0 %v13222_v37  ;;  %v11974_v26 = vadd.f32 %v11973_v5, %v11972_v62  ;;  %v7485_v58 = vstv %s7471_s12  ;;  %13278 = vpow2.f32 %v8294_v60 }
 0x345   : > { %v6670_v48 = vmul.f32 %v6669_v40, %v6648_v9  ;;  %v6651_v11 = vadd.f32 %v6650_v12, %v16337_v7  ;;  %v12383_v19 = vpop.f32.mrb[71].mxu0  ;;  %12225 = vmatprep.subr.bf16.mxu0 %v13224_v20  ;;  %v13229_v7 = vld [vmem:[%s16518_s2 + $0x1678] sm:$0xff]  }
 0x346   : > { %12437 = vmatpush3.bf16.msra.mxu1 %v13226_v47 }
 0x347   : > { %v6672_v16 = vmul.f32 %v13267_v18, %v6670_v48  ;;  %v6671_v24 = vmul.f32 %v6669_v40, %v6651_v11  ;;  %12438 = vmatprep.subr.bf16.mxu1 %v13375_v49 }
 0x348   : > { %12226 = vmatpush3.bf16.msra.mxu0 %v13225_v42 }
 0x349   : > { %v6674_v14 = vmul.f32 %v13269_v1, %v6672_v16  ;;  %v6673_v32 = vmul.f32 %v13271_v8, %v6671_v24  ;;  %12227 = vmatprep.subr.bf16.mxu0 %v13227_v2 }
 0x34a   : > { %12439 = vmatpush3.bf16.msra.mxu1 %v13229_v7  ;;  %v13273_v42 = vpop.eup %13272 }
 0x34b   : > { %v16433_v23 = vadd.f32 %v6674_v14, %v16120_v39  ;;  %v6675_v33 = vmul.f32 %v13269_v1, %v6673_v32  ;;  %v13275_v1 = vpop.eup %13274 }
 0x34c   : > { %12228 = vmatpush3.bf16.msra.mxu0 %v13228_v51  ;;  %v13277_v19 = vpop.eup %13276 }
 0x34d   : > { %v6677_v15 = vadd.f32 %v6675_v33, %v16129_v38  ;;  %12441 = vmatmul.mubr.bf16.vlgmr.msra.gmra.mrb[96].mxu1 %v8319_v46 }
 0x34f   : > { %9053 = vmatmul.mubr.bf16.vlgmr.msra.gmra.mrb[96].mxu0 %v8317_v35 }
 0x360   : > { %v12013_v43 = vpop.f32.mrb[72].mxu1 }
 0x361   : > { %v12014_v39 = vpop.f32.mrb[73].mxu1 }
 0x362   : > { %v11991_v29 = vpop.f32.mrb[72].mxu0  ;;  %v12015_v49 = vadd.f32 %v12014_v39, %v12013_v43  ;;  %v12016_v17 = vpop.f32.mrb[74].mxu1 }
 0x363   : > { %v11992_v3 = vpop.f32.mrb[73].mxu0  ;;  %v12017_v45 = vpop.f32.mrb[75].mxu1 }
 0x364   : > { %v11993_v63 = vadd.f32 %v11992_v3, %v11991_v29  ;;  %v11994_v31 = vpop.f32.mrb[74].mxu0  ;;  %v12018_v54 = vadd.f32 %v12017_v45, %v12016_v17 }
 0x365   : > { %v11995_v4 = vpop.f32.mrb[75].mxu0 }
 0x366   : > { %v7341_v53 = vadd.f32 %v11993_v63, %v11971_v6  ;;  %v11996_v34 = vadd.f32 %v11995_v4, %v11994_v31 }
 0x368   : > { %v7344_v61 = vadd.f32 %v11996_v34, %v11974_v26  ;;  %v7382_v38 = vadd.f32 %v12015_v49, %v7341_v53 }
 0x36a   : > { %v7385_v13 = vadd.f32 %v12018_v54, %v7344_v61 }
 0x380   : > { %v7463_v20 = vpop.f32.mrb[76].mxu1 }
 0x381   : > { %v12402_v25 = vpop.f32.mrb[77].mxu1 }
 0x382   : > { %v12035_v56 = vpop.f32.mrb[76].mxu0  ;;  %v7466_v9 = vpop.f32.mrb[78].mxu1 }
 0x383   : > { %v12036_v44 = vpop.f32.mrb[77].mxu0  ;;  %v12403_v18 = vpop.f32.mrb[79].mxu1 }
 0x384   : > { %v12037_v0 = vadd.f32 %v12036_v44, %v12035_v56  ;;  %v12038_v37 = vpop.f32.mrb[78].mxu0  ;;  %v8299_v56 = vmul.f32 1.442695, %v8298_v50  ;;  %v8296_v44 = vmul.f32 1.442695, %v8293_v22  ;;  %v13279_v25 = vpop.eup %13278 }
 0x385   : > { %v12039_v55 = vpop.f32.mrb[79].mxu0 }
 0x386   : > { %v12040_v40 = vadd.f32 %v12039_v55, %v12038_v37  ;;  %v7423_v36 = vadd.f32 %v12037_v0, %v7382_v38  ;;  %13280 = vpow2.f32 %v8299_v56  ;;  %v8301_v37 = vstv %s8287_s13  ;;  %s13311_s13 = scalar_lea.vmem %s13310_s27, 512 }
 0x387   : > { %13282 = vpow2.f32 %v8296_v44  ;;  %p13313_p0 = scmp.lt.s32.totalorder %s13311_s13, %s13305_s20 }
 0x388   : > { %v7464_v12 = vadd.f32 %v7463_v20, %v7423_v36  ;;  %v7426_v41 = vadd.f32 %v12040_v40, %v7385_v13 }
 0x389   : > { %p13314_p1 = por %p13313_p0, %p13312_p13 }
 0x38a   : > { %v7486_v48 = vmul.f32 %v7485_v58, %v7464_v12  ;;  %v7467_v11 = vadd.f32 %v7466_v9, %v7426_v41 }
 0x38b   : > { %p13315_p2 = pnand %p13314_p1, %p13308_p12 }
 0x38c   : > { %v7488_v52 = vmul.f32 %v13273_v42, %v7486_v48  ;;  %v7487_v2 = vmul.f32 %v7485_v58, %v7467_v11 }
 0x38e   : > { %v7490_v8 = vmul.f32 %v13275_v1, %v7488_v52  ;;  %v7489_v6 = vmul.f32 %v13277_v19, %v7487_v2 }
 0x390   : > { %v16443_v62 = vadd.f32 %v7490_v8, %v16433_v23  ;;  %v7491_v47 = vmul.f32 %v13275_v1, %v7489_v6  ;;  %v13281_v9 = vpop.eup %13280 }
 0x391   : > { %v13283_v42 = vpop.eup %13282 }
 0x392   : > { %v16445_v16 = vadd.f32 %v7491_v47, %v6677_v15 }
 0x3a0   : > { %v12088_v26 = vpop.f32.mrb[80].mxu1 }
 0x3a1   : > { %v12089_v32 = vpop.f32.mrb[81].mxu1 }
 0x3a2   : > { %v12066_v24 = vpop.f32.mrb[80].mxu0  ;;  %v12090_v33 = vadd.f32 %v12089_v32, %v12088_v26  ;;  %v12091_v35 = vpop.f32.mrb[82].mxu1 }
 0x3a3   : > { %v12067_v5 = vpop.f32.mrb[81].mxu0  ;;  %v12092_v29 = vpop.f32.mrb[83].mxu1 }
 0x3a4   : > { %v12068_v51 = vadd.f32 %v12067_v5, %v12066_v24  ;;  %v12069_v14 = vpop.f32.mrb[82].mxu0  ;;  %v12093_v63 = vadd.f32 %v12092_v29, %v12091_v35 }
 0x3a5   : > { %v12070_v7 = vpop.f32.mrb[83].mxu0 }
 0x3a6   : > { %v12071_v46 = vadd.f32 %v12070_v7, %v12069_v14  ;;  %v8157_v3 = vadd.f32 %v12090_v33, %v12068_v51 }
 0x3a8   : > { %v8160_v31 = vadd.f32 %v12093_v63, %v12071_v46 }
 0x3c0   : > { %v12132_v39 = vpop.f32.mrb[84].mxu1 }
 0x3c1   : > { %v12133_v34 = vpop.f32.mrb[85].mxu1 }
 0x3c2   : > { %v12110_v23 = vpop.f32.mrb[84].mxu0  ;;  %v12134_v45 = vadd.f32 %v12133_v34, %v12132_v39  ;;  %v12135_v61 = vpop.f32.mrb[86].mxu1 }
 0x3c3   : > { %v12111_v43 = vpop.f32.mrb[85].mxu0  ;;  %v12136_v38 = vpop.f32.mrb[87].mxu1 }
 0x3c4   : > { %v12112_v15 = vadd.f32 %v12111_v43, %v12110_v23  ;;  %v12113_v4 = vpop.f32.mrb[86].mxu0  ;;  %v12137_v13 = vadd.f32 %v12136_v38, %v12135_v61 }
 0x3c5   : > { %v12114_v53 = vpop.f32.mrb[87].mxu0 }
 0x3c6   : > { %v8198_v49 = vadd.f32 %v12112_v15, %v8157_v3  ;;  %v12115_v17 = vadd.f32 %v12114_v53, %v12113_v4  ;;  %v9107_v15 = vstv %s9106_s8 }
 0x3c7   : > { %v9108_v4 = vmul.f32 %v9107_v15, %v14527_v21  ;;  %v9114_v39 = vmul.f32 %v9107_v15, %v14532_v10  ;;  %v9109_v53 = vmul.f32 %v9107_v15, %v14549_v30 }
 0x3c8   : > { %v8201_v54 = vadd.f32 %v12115_v17, %v8160_v31  ;;  %v8239_v59 = vadd.f32 %v12134_v45, %v8198_v49 }
 0x3c9   : > { %v9110_v34 = vmul.f32 1.442695, %v9108_v4  ;;  %v9115_v49 = vmul.f32 1.442695, %v9114_v39  ;;  %v9112_v17 = vmul.f32 1.442695, %v9109_v53 }
 0x3ca   : > { %v8242_v28 = vadd.f32 %v12137_v13, %v8201_v54 }
 0x3cb   : > { %13284 = vpow2.f32 %v9110_v34 }
 0x3cc   : > { %13286 = vpow2.f32 %v9115_v49 }
 0x3cd   : > { %13288 = vpow2.f32 %v9112_v17 }
 0x3d5   : > { %v13285_v60 = vpop.eup %13284 }
 0x3d6   : > { %v13287_v56 = vpop.eup %13286 }
 0x3e0   : > { %v12163_v36 = vpop.f32.mrb[88].mxu1 }
 0x3e1   : > { %v12164_v41 = vpop.f32.mrb[89].mxu1 }
 0x3e2   : > { %v8279_v0 = vpop.f32.mrb[88].mxu0  ;;  %v12165_v1 = vadd.f32 %v12164_v41, %v12163_v36  ;;  %v12166_v48 = vpop.f32.mrb[90].mxu1 }
 0x3e3   : > { %v8280_v20 = vadd.f32 %v8279_v0, %v8239_v59  ;;  %v12422_v55 = vpop.f32.mrb[89].mxu0  ;;  %v12167_v52 = vpop.f32.mrb[91].mxu1 }
 0x3e4   : > { %v8282_v40 = vpop.f32.mrb[90].mxu0  ;;  %v12168_v2 = vadd.f32 %v12167_v52, %v12166_v48 }
 0x3e5   : > { %v8302_v58 = vmul.f32 %v8301_v37, %v8280_v20  ;;  %v8283_v18 = vadd.f32 %v8282_v40, %v8242_v28  ;;  %v12423_v12 = vpop.f32.mrb[91].mxu0 }
 0x3e7   : > { %v8304_v11 = vmul.f32 %v13279_v25, %v8302_v58  ;;  %v8303_v19 = vmul.f32 %v8301_v37, %v8283_v18  ;;  %v13289_v37 = vpop.eup %13288 }
 0x3e9   : > { %v8306_v8 = vmul.f32 %v13281_v9, %v8304_v11  ;;  %v8305_v6 = vmul.f32 %v13283_v42, %v8303_v19 }
 0x3eb   : > { %v8308_v47 = vadd.f32 %v8306_v8, %v16443_v62  ;;  %v8307_v24 = vmul.f32 %v13281_v9, %v8305_v6 }
 0x3ed   : > { %v16454_v5 = vadd.f32 %v8307_v24, %v16445_v16 }
 0x400   : > { %v12207_v7 = vpop.f32.mrb[92].mxu1 }
 0x401   : > { %v12208_v35 = vpop.f32.mrb[93].mxu1 }
 0x402   : > { %v12185_v26 = vpop.f32.mrb[92].mxu0  ;;  %v12209_v3 = vadd.f32 %v12208_v35, %v12207_v7  ;;  %v12210_v63 = vpop.f32.mrb[94].mxu1 }
 0x403   : > { %v12186_v51 = vpop.f32.mrb[93].mxu0  ;;  %v12211_v31 = vpop.f32.mrb[95].mxu1 }
 0x404   : > { %v12187_v14 = vadd.f32 %v12186_v51, %v12185_v26  ;;  %v12188_v32 = vpop.f32.mrb[94].mxu0  ;;  %v12212_v43 = vadd.f32 %v12211_v31, %v12210_v63 }
 0x405   : > { %v12189_v33 = vpop.f32.mrb[95].mxu0 }
 0x406   : > { %v8973_v46 = vadd.f32 %v12187_v14, %v12165_v1  ;;  %v12190_v29 = vadd.f32 %v12189_v33, %v12188_v32 }
 0x408   : > { %v8976_v23 = vadd.f32 %v12190_v29, %v12168_v2  ;;  %v9014_v62 = vadd.f32 %v12209_v3, %v8973_v46 }
 0x40a   : > { %v9017_v16 = vadd.f32 %v12212_v43, %v8976_v23 }
 0x420   : > { %v9095_v13 = vpop.f32.mrb[96].mxu1 }
 0x421   : > { %v12442_v59 = vpop.f32.mrb[97].mxu1 }
 0x422   : > { %v12229_v45 = vpop.f32.mrb[96].mxu0  ;;  %v9098_v30 = vpop.f32.mrb[98].mxu1 }
 0x423   : > { %v12230_v61 = vpop.f32.mrb[97].mxu0  ;;  %v12443_v57 = vpop.f32.mrb[99].mxu1 }
 0x424   : > { %v12231_v38 = vadd.f32 %v12230_v61, %v12229_v45  ;;  %v12232_v54 = vpop.f32.mrb[98].mxu0 }
 0x425   : > { %v12233_v21 = vpop.f32.mrb[99].mxu0 }
 0x426   : > { %v9055_v10 = vadd.f32 %v12231_v38, %v9014_v62  ;;  %v12234_v28 = vadd.f32 %v12233_v21, %v12232_v54 }
 0x428   : > { %v9096_v50 = vadd.f32 %v9095_v13, %v9055_v10  ;;  %v9058_v22 = vadd.f32 %v12234_v28, %v9017_v16 }
 0x42a   : > { %v9118_v44 = vmul.f32 %v9117_v27, %v9096_v50  ;;  %v9099_v0 = vadd.f32 %v9098_v30, %v9058_v22 }
 0x42c   : > { %v9120_v20 = vmul.f32 %v13285_v60, %v9118_v44  ;;  %v9119_v55 = vmul.f32 %v9117_v27, %v9099_v0 }
 0x42e   : > { %v9122_v25 = vmul.f32 %v13287_v56, %v9120_v20  ;;  %v9121_v40 = vmul.f32 %v13289_v37, %v9119_v55 }
 0x430   : > { %v9124_v36 = vadd.f32 %v9122_v25, %v8308_v47  ;;  %v9123_v9 = vmul.f32 %v13287_v56, %v9121_v40 }
 0x432   : > { %9126 = vst [vmem:[%s219_s7] sm:$0xff] %v9124_v36  ;;  %v9125_v58 = vadd.f32 %v9123_v9, %v16454_v5 }
 0x434   : > { %9127 = vst [vmem:[%s219_s7 + $0x8] sm:$0xff] %v9125_v58 }
 0x435   : > { %13318 = shalt.err (!%p13315_p2)
}
 0x436   : > { %s13319_s22 = scalar_lea.hbm %s16468_s28, 256  ;;  %s13323_s11 = scalar_lea.hbm %s16520_s4, 512 }
 0x437   : > { %p13320_p3 = scmp.ne.s32.totalorder %s16468_s28, %s13319_s22  ;;  %p13324_p8 = scmp.lt.u32.totalorder %s16468_s28, %s16520_s4 }
 0x438   : > { %p13325_p9 = scmp.lt.u32.totalorder %s13323_s11, %s13319_s22  ;;  %p13327_p11 = scmp.lt.u32.totalorder %s13319_s22, %s16468_s28 }
 0x439   : > { %p13321_p4 = pnand %p13320_p3, %p13443_p5 }
 0x43a   : > { %p13326_p10 = por %p13325_p9, %p13324_p8 }
 0x43b   : > { %p13322_p7 = pneg %p13321_p4 }
 0x43c   : > { %p13328_p12 = por %p13327_p11, %p13326_p10 }
 0x43e   : > { %p13329_p13 = pnand %p13328_p12, %p13322_p7 }
 0x440   : > { %13332 = shalt.err (!%p13329_p13)
}
 0x441   : > { %s13378_s29 = smov 128   ;;  %s13379_s30 = smov 8  }
 0x442   : > { %12449 = dma.vmem_to_hbm [thread:$0]  (%p13443_p5), %s16470_s10, 256, %s16468_s28, %s16475_s19, %s13378_s29, %s13378_s29, %s13379_s30  }
 0x443 PF: > { %p12461_p0 = scmp.ge.s32.totalorder %s13371_s18, 2  ;;  %s9157_s7 = sand.u32 1, %s13359_s15  }
 0x444   : > { %s9158_s14 = scalar_lea.sflag [#allocation4], %s9157_s7 }
 0x445   : > { %p12456_p1 = pnand %p12461_p0, %p13447_p6 }
 0x447   : > { %13354 = dma.done.wait (!%p12456_p1), %s9158_s14, 256  }
 0x448   : > { %13356 = vsyncadd (!%p12456_p1), %s9158_s14, 4294967040  ;;  %p15_p2 = scmp.ge.s32.totalorder %s13430_s21, 4   ;;  %s16540_s15 = smov %s13363_s16 }
 0x449   : > { %s16541_s16 = smov %s13367_s17  ;;  %s16542_s17 = smov %s13441_s24 }
 0x44a   : > { %s16543_s18 = smov %s13430_s21  ;;  %17 = sbr.rel (!%p15_p2) target bundleno = 4 (0x4), region = 97 }
 0x451   :  { %9163 = vsyncpa [#allocation4], 1 }
 0x452   :  { %9165 = vsyncpa [#allocation4 + $0x1], 1 }
 0x453   :  { %9166 = vsyncpa [#allocation5], 1 }
 0x454   :  { %9168 = vsyncpa [#allocation5 + $0x1], 1 }

</bundles_post_ra>
